<compile_context>
chip_gen: v7x
topology: tpu7x:2x2x1
jax: 0.10.0
libtpu: 0.0.40
codegen_flags: <defaults>
</compile_context>

<pallas_src>
import jax
import jax.numpy as jnp
from jax.experimental import pallas as pl
from jax.experimental.pallas import tpu as pltpu


def fusion_autoencoder_kernel(
    x1_ref, x2_ref,
    w1a_ref, b1a_ref,        # encoder1 layer 1: Linear(D1, 512)
    w2a_ref, b2a_ref,        # encoder2 layer 1: Linear(D2, 512)
    we2_ref, be2_ref,        # fused encoder layer 2: [w1b; w2b] (1024, L), b1b + b2b
    wd1_ref, bd1_ref,        # decoder layer 1: Linear(L, 512)
    wd2_ref, bd2_ref,        # decoder layer 2: Linear(512, D1 + D2)
    out_ref,
):
    f32 = jnp.float32
    wdt = w1a_ref.dtype      # matmul-operand dtype (bf16 by default, f32 optional)

    x1 = x1_ref[...].astype(wdt)
    x2 = x2_ref[...].astype(wdt)

    # encoder first layers: Linear -> ReLU (bias add and ReLU stay in f32)
    h1 = jnp.dot(x1, w1a_ref[...], preferred_element_type=f32) + b1a_ref[...]
    h1 = jnp.maximum(h1, 0.0)
    h2 = jnp.dot(x2, w2a_ref[...], preferred_element_type=f32) + b2a_ref[...]
    h2 = jnp.maximum(h2, 0.0)

    # fused encoder second layers + latent average:
    #   z = 0.5 * ((h1 @ w1b + b1b) + (h2 @ w2b + b2b))
    #     = 0.5 * ([h1 | h2] @ [w1b ; w2b] + (b1b + b2b))
    h_cat = jnp.concatenate([h1, h2], axis=-1).astype(wdt)
    z = 0.5 * (jnp.dot(h_cat, we2_ref[...], preferred_element_type=f32) + be2_ref[...])

    # decoder: Linear -> ReLU -> Linear
    hd = jnp.dot(z.astype(wdt), wd1_ref[...], preferred_element_type=f32) + bd1_ref[...]
    hd = jnp.maximum(hd, 0.0)
    out = jnp.dot(hd.astype(wdt), wd2_ref[...], preferred_element_type=f32) + bd2_ref[...]

    out_ref[...] = out.astype(out_ref.dtype)


def _const_spec(shape, single_buffer):
    """BlockSpec for a grid-invariant (weight/bias) operand."""
    index_map = lambda i: (0,) * len(shape)
    if single_buffer:
        # index_map is constant across grid steps -> double-buffering is pure waste.
        return pl.BlockSpec(shape, index_map, pipeline_mode=pl.Buffered(1))
    return pl.BlockSpec(shape, index_map)


def _build_and_call(x1p, x2p, weights, biases, tile_b, out_dim, single_buffer):
    Bp, D1 = x1p.shape
    _, D2 = x2p.shape
    w1a, w2a, we2, wd1, wd2 = weights
    b1a, b2a, be2, bd1, bd2 = biases
    L = we2.shape[1]

    grid = (Bp // tile_b,)

    in_specs = [
        pl.BlockSpec((tile_b, D1), lambda i: (i, 0)),   # x1 tile
        pl.BlockSpec((tile_b, D2), lambda i: (i, 0)),   # x2 tile
        _const_spec(w1a.shape, single_buffer), _const_spec(b1a.shape, single_buffer),
        _const_spec(w2a.shape, single_buffer), _const_spec(b2a.shape, single_buffer),
        _const_spec(we2.shape, single_buffer), _const_spec(be2.shape, single_buffer),
        _const_spec(wd1.shape, single_buffer), _const_spec(bd1.shape, single_buffer),
        _const_spec(wd2.shape, single_buffer), _const_spec(bd2.shape, single_buffer),
    ]
    out_spec = pl.BlockSpec((tile_b, out_dim), lambda i: (i, 0))

    # Advisory cost estimate so XLA schedules surrounding ops sensibly.
    flops = 2 * Bp * (D1 * 512 + D2 * 512 + 1024 * L + L * 512 + 512 * out_dim)
    bytes_accessed = int(
        x1p.size * x1p.dtype.itemsize + x2p.size * x2p.dtype.itemsize
        + sum(w.size * w.dtype.itemsize for w in weights)
        + sum(b.size * b.dtype.itemsize for b in biases)
        + Bp * out_dim * 4
    )
    cost = pl.CostEstimate(flops=int(flops), transcendentals=0,
                           bytes_accessed=bytes_accessed)

    # Explicit VMEM budget: weights (worst-case double-buffered) + I/O tiles
    # (double-buffered) + live f32 intermediates, with 2x headroom, clamped to
    # [32 MiB, 64 MiB] so it is valid on v5e/v6e (128 MiB) and v7x (64 MiB).
    weight_bytes = (sum(w.size * w.dtype.itemsize for w in weights)
                    + sum(b.size * b.dtype.itemsize for b in biases))
    io_tile_bytes = tile_b * (D1 + D2 + out_dim) * 4
    interm_bytes = tile_b * (512 + 512 + 1024 + L + 512) * 4
    needed = 2 * weight_bytes + 2 * io_tile_bytes + interm_bytes
    vmem_limit = int(min(64 * 2**20, max(32 * 2**20, 2 * needed)))

    fn = pl.pallas_call(
        fusion_autoencoder_kernel,
        out_shape=jax.ShapeDtypeStruct((Bp, out_dim), jnp.float32),
        grid_spec=pl.GridSpec(grid=grid, in_specs=in_specs, out_specs=out_spec),
        compiler_params=pltpu.CompilerParams(
            dimension_semantics=("parallel",),   # batch tiles shard across v7x TCs
            vmem_limit_bytes=vmem_limit,
        ),
        cost_estimate=cost,
    )
    return fn(x1p, x2p, w1a, b1a, w2a, b2a, we2, be2, wd1, bd1, wd2, bd2)


def fusion_autoencoder_forward(x1, x2, params, *, tile_b=128,
                               weights_dtype=jnp.bfloat16):
    """Fused FusionAutoencoder forward pass.

    tile_b: batch tile presented to the MXU. 128 fills the v5e MXU; use 256 on
            v6e/v7x (and keep padded batch >= 2*tile_b on v7x so both
            TensorCores get work).
    weights_dtype: matmul-operand dtype. bf16 halves weight VMEM/DMA and uses
            the full-rate MXU path on v6e/v7x; accumulation stays f32.
    """
    B, D1 = x1.shape
    B2, D2 = x2.shape
    assert B == B2, "batch mismatch between omics views"
    out_dim = params["wd2"].shape[1]
    assert out_dim == D1 + D2

    wdt = jnp.dtype(weights_dtype)
    f32 = jnp.float32

    # Host-side weight prep: fuse encoder second layers, cast matmul operands.
    we2 = jnp.concatenate([params["w1b"], params["w2b"]], axis=0).astype(wdt)
    be2 = (params["b1b"] + params["b2b"]).astype(f32)
    weights = (
        params["w1a"].astype(wdt), params["w2a"].astype(wdt), we2,
        params["wd1"].astype(wdt), params["wd2"].astype(wdt),
    )
    biases = (
        params["b1a"].astype(f32), params["b2a"].astype(f32), be2,
        params["bd1"].astype(f32), params["bd2"].astype(f32),
    )

    # Pad the batch to a tile multiple so every matmul presents a full M=tile_b.
    Bp = ((B + tile_b - 1) // tile_b) * tile_b
    x1p = x1.astype(f32)
    x2p = x2.astype(f32)
    if Bp != B:
        x1p = jnp.pad(x1p, ((0, Bp - B), (0, 0)))
        x2p = jnp.pad(x2p, ((0, Bp - B), (0, 0)))

    try:
        out = _build_and_call(x1p, x2p, weights, biases, tile_b, out_dim,
                              single_buffer=True)
    except Exception:
        # Fallback for JAX versions where pipeline_mode=pl.Buffered(1) is not
        # accepted on BlockSpec; identical semantics, just default 2-deep buffers.
        out = _build_and_call(x1p, x2p, weights, biases, tile_b, out_dim,
                              single_buffer=False)
    return out[:B]


def init_params(key, input_dim1, input_dim2, latent_dim=128, hidden=512):
    """Deterministic init mimicking PyTorch Linear default U[-1/sqrt(fan_in), ...].

    Weights stored as (in_features, out_features)."""
    def linear(key, fan_in, fan_out):
        kw, kb = jax.random.split(key)
        bound = 1.0 / jnp.sqrt(fan_in)
        w = jax.random.uniform(kw, (fan_in, fan_out), jnp.float32, -bound, bound)
        b = jax.random.uniform(kb, (1, fan_out), jnp.float32, -bound, bound)
        return w, b

    keys = jax.random.split(key, 6)
    w1a, b1a = linear(keys[0], input_dim1, hidden)
    w1b, b1b = linear(keys[1], hidden, latent_dim)
    w2a, b2a = linear(keys[2], input_dim2, hidden)
    w2b, b2b = linear(keys[3], hidden, latent_dim)
    wd1, bd1 = linear(keys[4], latent_dim, hidden)
    wd2, bd2 = linear(keys[5], hidden, input_dim1 + input_dim2)
    return dict(w1a=w1a, b1a=b1a, w1b=w1b, b1b=b1b,
                w2a=w2a, b2a=b2a, w2b=w2b, b2b=b2b,
                wd1=wd1, bd1=bd1, wd2=wd2, bd2=bd2)


def reference_forward(x1, x2, p):
    """Pure-JAX f32 reference matching the PyTorch forward semantics."""
    h1 = jnp.maximum(x1 @ p["w1a"] + p["b1a"], 0.0)
    z1 = h1 @ p["w1b"] + p["b1b"]
    h2 = jnp.maximum(x2 @ p["w2a"] + p["b2a"], 0.0)
    z2 = h2 @ p["w2b"] + p["b2b"]
    z = (z1 + z2) / 2
    hd = jnp.maximum(z @ p["wd1"] + p["bd1"], 0.0)
    return hd @ p["wd2"] + p["bd2"]


if __name__ == "__main__":
    # Small shapes consistent with the module's forward: two omics views.
    B, D1, D2, LATENT = 8, 256, 128, 128

    key = jax.random.PRNGKey(0)
    kx1, kx2, kp = jax.random.split(key, 3)
    x1 = jax.random.normal(kx1, (B, D1), jnp.float32)   # omics[0]
    x2 = jax.random.normal(kx2, (B, D2), jnp.float32)   # omics[1]
    params = init_params(kp, D1, D2, latent_dim=LATENT)

    ref = reference_forward(x1, x2, params)

    # Exact-precision path: f32 matmul operands must match the reference tightly.
    out_f32 = fusion_autoencoder_forward(x1, x2, params, tile_b=128,
                                         weights_dtype=jnp.float32)
    out_f32 = jax.block_until_ready(out_f32)
    assert out_f32.shape == (B, D1 + D2)
    assert jnp.allclose(out_f32, ref, atol=1e-4, rtol=1e-4), "f32 path mismatch vs reference"

    # Fast path (default): bf16 matmul operands with f32 accumulation.
    out = fusion_autoencoder_forward(x1, x2, params, tile_b=128)
    out = jax.block_until_ready(out)
    assert out.shape == (B, D1 + D2)
    assert jnp.allclose(out, ref, atol=2e-2, rtol=2e-2), "bf16 path mismatch vs f32 reference"

    print("KERNEL_OK")
</pallas_src>

<mosaic_0001>
module attributes {stable_mosaic.version = 11 : i64} {
  func.func @fusion_autoencoder_kernel(%arg0: i32, %arg1: memref<128x256xf32, #tpu.memory_space<vmem>>, %arg2: memref<128x128xf32, #tpu.memory_space<vmem>>, %arg3: memref<256x512xf32, #tpu.memory_space<vmem>>, %arg4: memref<1x512xf32, #tpu.memory_space<vmem>>, %arg5: memref<128x512xf32, #tpu.memory_space<vmem>>, %arg6: memref<1x512xf32, #tpu.memory_space<vmem>>, %arg7: memref<1024x128xf32, #tpu.memory_space<vmem>>, %arg8: memref<1x128xf32, #tpu.memory_space<vmem>>, %arg9: memref<128x512xf32, #tpu.memory_space<vmem>>, %arg10: memref<1x512xf32, #tpu.memory_space<vmem>>, %arg11: memref<512x384xf32, #tpu.memory_space<vmem>>, %arg12: memref<1x384xf32, #tpu.memory_space<vmem>>, %arg13: memref<128x384xf32, #tpu.memory_space<vmem>>) attributes {dimension_semantics = [#tpu.dimension_semantics<parallel>], iteration_bounds = array<i64: 1>, scalar_prefetch = 0 : i64, scratch_operands = 0 : i64, tpu.core_type = #tpu.core_type<tc>, window_params = [{transform_indices = @transform_0, window_bounds = array<i64: 128, 256>}, {transform_indices = @transform_1, window_bounds = array<i64: 128, 128>}, {pipeline_mode = #tpu.pipeline_mode<synchronous>, transform_indices = @transform_2, window_bounds = array<i64: 256, 512>}, {pipeline_mode = #tpu.pipeline_mode<synchronous>, transform_indices = @transform_3, window_bounds = array<i64: 1, 512>}, {pipeline_mode = #tpu.pipeline_mode<synchronous>, transform_indices = @transform_4, window_bounds = array<i64: 128, 512>}, {pipeline_mode = #tpu.pipeline_mode<synchronous>, transform_indices = @transform_5, window_bounds = array<i64: 1, 512>}, {pipeline_mode = #tpu.pipeline_mode<synchronous>, transform_indices = @transform_6, window_bounds = array<i64: 1024, 128>}, {pipeline_mode = #tpu.pipeline_mode<synchronous>, transform_indices = @transform_7, window_bounds = array<i64: 1, 128>}, {pipeline_mode = #tpu.pipeline_mode<synchronous>, transform_indices = @transform_8, window_bounds = array<i64: 128, 512>}, {pipeline_mode = #tpu.pipeline_mode<synchronous>, transform_indices = @transform_9, window_bounds = array<i64: 1, 512>}, {pipeline_mode = #tpu.pipeline_mode<synchronous>, transform_indices = @transform_10, window_bounds = array<i64: 512, 384>}, {pipeline_mode = #tpu.pipeline_mode<synchronous>, transform_indices = @transform_11, window_bounds = array<i64: 1, 384>}, {transform_indices = @transform_12, window_bounds = array<i64: 128, 384>}]} {
    %c0 = arith.constant 0 : index
    %c0_0 = arith.constant 0 : index
    %0 = vector.load %arg1[%c0, %c0_0] : memref<128x256xf32, #tpu.memory_space<vmem>>, vector<128x256xf32>
    %c0_1 = arith.constant 0 : index
    %c0_2 = arith.constant 0 : index
    %1 = vector.load %arg2[%c0_1, %c0_2] : memref<128x128xf32, #tpu.memory_space<vmem>>, vector<128x128xf32>
    %c0_3 = arith.constant 0 : index
    %c0_4 = arith.constant 0 : index
    %2 = vector.load %arg3[%c0_3, %c0_4] : memref<256x512xf32, #tpu.memory_space<vmem>>, vector<256x512xf32>
    %cst = arith.constant dense<0.000000e+00> : vector<128x512xf32>
    %3 = tpu.matmul %0, %2, %cst {dimension_numbers = #tpu.dot_dimension_numbers<[1], [0], [0], [1], [0, 0, 1, 1], [], []>} : vector<128x256xf32>, vector<256x512xf32>, vector<128x512xf32> -> vector<128x512xf32>
    %c0_5 = arith.constant 0 : index
    %c0_6 = arith.constant 0 : index
    %4 = vector.load %arg4[%c0_5, %c0_6] : memref<1x512xf32, #tpu.memory_space<vmem>>, vector<1x512xf32>
    %5 = vector.broadcast %4 : vector<1x512xf32> to vector<128x512xf32>
    %6 = arith.addf %3, %5 : vector<128x512xf32>
    %cst_7 = arith.constant 0.000000e+00 : f32
    %7 = vector.broadcast %cst_7 : f32 to vector<128x512xf32>
    %8 = arith.maximumf %6, %7 : vector<128x512xf32>
    %c0_8 = arith.constant 0 : index
    %c0_9 = arith.constant 0 : index
    %9 = vector.load %arg5[%c0_8, %c0_9] : memref<128x512xf32, #tpu.memory_space<vmem>>, vector<128x512xf32>
    %cst_10 = arith.constant dense<0.000000e+00> : vector<128x512xf32>
    %10 = tpu.matmul %1, %9, %cst_10 {dimension_numbers = #tpu.dot_dimension_numbers<[1], [0], [0], [1], [0, 0, 1, 1], [], []>} : vector<128x128xf32>, vector<128x512xf32>, vector<128x512xf32> -> vector<128x512xf32>
    %c0_11 = arith.constant 0 : index
    %c0_12 = arith.constant 0 : index
    %11 = vector.load %arg6[%c0_11, %c0_12] : memref<1x512xf32, #tpu.memory_space<vmem>>, vector<1x512xf32>
    %12 = vector.broadcast %11 : vector<1x512xf32> to vector<128x512xf32>
    %13 = arith.addf %10, %12 : vector<128x512xf32>
    %cst_13 = arith.constant 0.000000e+00 : f32
    %14 = vector.broadcast %cst_13 : f32 to vector<128x512xf32>
    %15 = arith.maximumf %13, %14 : vector<128x512xf32>
    %16 = tpu.concatenate %8, %15 in 1 : vector<128x512xf32>, vector<128x512xf32> -> vector<128x1024xf32>
    %c0_14 = arith.constant 0 : index
    %c0_15 = arith.constant 0 : index
    %17 = vector.load %arg7[%c0_14, %c0_15] : memref<1024x128xf32, #tpu.memory_space<vmem>>, vector<1024x128xf32>
    %cst_16 = arith.constant dense<0.000000e+00> : vector<128x128xf32>
    %18 = tpu.matmul %16, %17, %cst_16 {dimension_numbers = #tpu.dot_dimension_numbers<[1], [0], [0], [1], [0, 0, 1, 1], [], []>} : vector<128x1024xf32>, vector<1024x128xf32>, vector<128x128xf32> -> vector<128x128xf32>
    %c0_17 = arith.constant 0 : index
    %c0_18 = arith.constant 0 : index
    %19 = vector.load %arg8[%c0_17, %c0_18] : memref<1x128xf32, #tpu.memory_space<vmem>>, vector<1x128xf32>
    %20 = vector.broadcast %19 : vector<1x128xf32> to vector<128x128xf32>
    %21 = arith.addf %18, %20 : vector<128x128xf32>
    %cst_19 = arith.constant 5.000000e-01 : f32
    %22 = vector.broadcast %cst_19 : f32 to vector<128x128xf32>
    %23 = arith.mulf %22, %21 : vector<128x128xf32>
    %c0_20 = arith.constant 0 : index
    %c0_21 = arith.constant 0 : index
    %24 = vector.load %arg9[%c0_20, %c0_21] : memref<128x512xf32, #tpu.memory_space<vmem>>, vector<128x512xf32>
    %cst_22 = arith.constant dense<0.000000e+00> : vector<128x512xf32>
    %25 = tpu.matmul %23, %24, %cst_22 {dimension_numbers = #tpu.dot_dimension_numbers<[1], [0], [0], [1], [0, 0, 1, 1], [], []>} : vector<128x128xf32>, vector<128x512xf32>, vector<128x512xf32> -> vector<128x512xf32>
    %c0_23 = arith.constant 0 : index
    %c0_24 = arith.constant 0 : index
    %26 = vector.load %arg10[%c0_23, %c0_24] : memref<1x512xf32, #tpu.memory_space<vmem>>, vector<1x512xf32>
    %27 = vector.broadcast %26 : vector<1x512xf32> to vector<128x512xf32>
    %28 = arith.addf %25, %27 : vector<128x512xf32>
    %cst_25 = arith.constant 0.000000e+00 : f32
    %29 = vector.broadcast %cst_25 : f32 to vector<128x512xf32>
    %30 = arith.maximumf %28, %29 : vector<128x512xf32>
    %c0_26 = arith.constant 0 : index
    %c0_27 = arith.constant 0 : index
    %31 = vector.load %arg11[%c0_26, %c0_27] : memref<512x384xf32, #tpu.memory_space<vmem>>, vector<512x384xf32>
    %cst_28 = arith.constant dense<0.000000e+00> : vector<128x384xf32>
    %32 = tpu.matmul %30, %31, %cst_28 {dimension_numbers = #tpu.dot_dimension_numbers<[1], [0], [0], [1], [0, 0, 1, 1], [], []>} : vector<128x512xf32>, vector<512x384xf32>, vector<128x384xf32> -> vector<128x384xf32>
    %c0_29 = arith.constant 0 : index
    %c0_30 = arith.constant 0 : index
    %33 = vector.load %arg12[%c0_29, %c0_30] : memref<1x384xf32, #tpu.memory_space<vmem>>, vector<1x384xf32>
    %34 = vector.broadcast %33 : vector<1x384xf32> to vector<128x384xf32>
    %35 = arith.addf %32, %34 : vector<128x384xf32>
    %c0_31 = arith.constant 0 : index
    %c0_32 = arith.constant 0 : index
    %36 = vector.load %arg13[%c0_31, %c0_32] : memref<128x384xf32, #tpu.memory_space<vmem>>, vector<128x384xf32>
    tpu.vector_store %arg13[%c0_31, %c0_32], %35 {strides = array<i32>} : memref<128x384xf32, #tpu.memory_space<vmem>>, vector<128x384xf32>,
    return
  }
  func.func @transform_0(%arg0: i32) -> (i32, i32) {
    %c0_i32 = arith.constant 0 : i32
    %c0_i32_0 = arith.constant 0 : i32
    return %arg0, %c0_i32 : i32, i32
  }
  func.func @transform_1(%arg0: i32) -> (i32, i32) {
    %c0_i32 = arith.constant 0 : i32
    %c0_i32_0 = arith.constant 0 : i32
    return %arg0, %c0_i32 : i32, i32
  }
  func.func @transform_2(%arg0: i32) -> (i32, i32) {
    %c0_i32 = arith.constant 0 : i32
    %c0_i32_0 = arith.constant 0 : i32
    %c0_i32_1 = arith.constant 0 : i32
    return %c0_i32, %c0_i32_0 : i32, i32
  }
  func.func @transform_3(%arg0: i32) -> (i32, i32) {
    %c0_i32 = arith.constant 0 : i32
    %c0_i32_0 = arith.constant 0 : i32
    %c0_i32_1 = arith.constant 0 : i32
    return %c0_i32, %c0_i32_0 : i32, i32
  }
  func.func @transform_4(%arg0: i32) -> (i32, i32) {
    %c0_i32 = arith.constant 0 : i32
    %c0_i32_0 = arith.constant 0 : i32
    %c0_i32_1 = arith.constant 0 : i32
    return %c0_i32, %c0_i32_0 : i32, i32
  }
  func.func @transform_5(%arg0: i32) -> (i32, i32) {
    %c0_i32 = arith.constant 0 : i32
    %c0_i32_0 = arith.constant 0 : i32
    %c0_i32_1 = arith.constant 0 : i32
    return %c0_i32, %c0_i32_0 : i32, i32
  }
  func.func @transform_6(%arg0: i32) -> (i32, i32) {
    %c0_i32 = arith.constant 0 : i32
    %c0_i32_0 = arith.constant 0 : i32
    %c0_i32_1 = arith.constant 0 : i32
    return %c0_i32, %c0_i32_0 : i32, i32
  }
  func.func @transform_7(%arg0: i32) -> (i32, i32) {
    %c0_i32 = arith.constant 0 : i32
    %c0_i32_0 = arith.constant 0 : i32
    %c0_i32_1 = arith.constant 0 : i32
    return %c0_i32, %c0_i32_0 : i32, i32
  }
  func.func @transform_8(%arg0: i32) -> (i32, i32) {
    %c0_i32 = arith.constant 0 : i32
    %c0_i32_0 = arith.constant 0 : i32
    %c0_i32_1 = arith.constant 0 : i32
    return %c0_i32, %c0_i32_0 : i32, i32
  }
  func.func @transform_9(%arg0: i32) -> (i32, i32) {
    %c0_i32 = arith.constant 0 : i32
    %c0_i32_0 = arith.constant 0 : i32
    %c0_i32_1 = arith.constant 0 : i32
    return %c0_i32, %c0_i32_0 : i32, i32
  }
  func.func @transform_10(%arg0: i32) -> (i32, i32) {
    %c0_i32 = arith.constant 0 : i32
    %c0_i32_0 = arith.constant 0 : i32
    %c0_i32_1 = arith.constant 0 : i32
    return %c0_i32, %c0_i32_0 : i32, i32
  }
  func.func @transform_11(%arg0: i32) -> (i32, i32) {
    %c0_i32 = arith.constant 0 : i32
    %c0_i32_0 = arith.constant 0 : i32
    %c0_i32_1 = arith.constant 0 : i32
    return %c0_i32, %c0_i32_0 : i32, i32
  }
  func.func @transform_12(%arg0: i32) -> (i32, i32) {
    %c0_i32 = arith.constant 0 : i32
    %c0_i32_0 = arith.constant 0 : i32
    return %arg0, %c0_i32 : i32, i32
  }
}

module attributes {stable_mosaic.version = 11 : i64} {
  func.func @fusion_autoencoder_kernel(%arg0: i32, %arg1: memref<128x256xf32, #tpu.memory_space<vmem>>, %arg2: memref<128x128xf32, #tpu.memory_space<vmem>>, %arg3: memref<256x512xf32, #tpu.memory_space<vmem>>, %arg4: memref<1x512xf32, #tpu.memory_space<vmem>>, %arg5: memref<128x512xf32, #tpu.memory_space<vmem>>, %arg6: memref<1x512xf32, #tpu.memory_space<vmem>>, %arg7: memref<1024x128xf32, #tpu.memory_space<vmem>>, %arg8: memref<1x128xf32, #tpu.memory_space<vmem>>, %arg9: memref<128x512xf32, #tpu.memory_space<vmem>>, %arg10: memref<1x512xf32, #tpu.memory_space<vmem>>, %arg11: memref<512x384xf32, #tpu.memory_space<vmem>>, %arg12: memref<1x384xf32, #tpu.memory_space<vmem>>, %arg13: memref<128x384xf32, #tpu.memory_space<vmem>>) attributes {dimension_semantics = [#tpu.dimension_semantics<parallel>], iteration_bounds = array<i64: 1>, scalar_prefetch = 0 : i64, scratch_operands = 0 : i64, tpu.core_type = #tpu.core_type<tc>, window_params = [{transform_indices = @transform_0, window_bounds = array<i64: 128, 256>}, {transform_indices = @transform_1, window_bounds = array<i64: 128, 128>}, {pipeline_mode = #tpu.pipeline_mode<synchronous>, transform_indices = @transform_2, window_bounds = array<i64: 256, 512>}, {pipeline_mode = #tpu.pipeline_mode<synchronous>, transform_indices = @transform_3, window_bounds = array<i64: 1, 512>}, {pipeline_mode = #tpu.pipeline_mode<synchronous>, transform_indices = @transform_4, window_bounds = array<i64: 128, 512>}, {pipeline_mode = #tpu.pipeline_mode<synchronous>, transform_indices = @transform_5, window_bounds = array<i64: 1, 512>}, {pipeline_mode = #tpu.pipeline_mode<synchronous>, transform_indices = @transform_6, window_bounds = array<i64: 1024, 128>}, {pipeline_mode = #tpu.pipeline_mode<synchronous>, transform_indices = @transform_7, window_bounds = array<i64: 1, 128>}, {pipeline_mode = #tpu.pipeline_mode<synchronous>, transform_indices = @transform_8, window_bounds = array<i64: 128, 512>}, {pipeline_mode = #tpu.pipeline_mode<synchronous>, transform_indices = @transform_9, window_bounds = array<i64: 1, 512>}, {pipeline_mode = #tpu.pipeline_mode<synchronous>, transform_indices = @transform_10, window_bounds = array<i64: 512, 384>}, {pipeline_mode = #tpu.pipeline_mode<synchronous>, transform_indices = @transform_11, window_bounds = array<i64: 1, 384>}, {transform_indices = @transform_12, window_bounds = array<i64: 128, 384>}]} {
    %c0 = arith.constant 0 : index
    %c0_0 = arith.constant 0 : index
    %0 = vector.load %arg1[%c0, %c0_0] : memref<128x256xf32, #tpu.memory_space<vmem>>, vector<128x256xf32>
    %c0_1 = arith.constant 0 : index
    %c0_2 = arith.constant 0 : index
    %1 = vector.load %arg2[%c0_1, %c0_2] : memref<128x128xf32, #tpu.memory_space<vmem>>, vector<128x128xf32>
    %c0_3 = arith.constant 0 : index
    %c0_4 = arith.constant 0 : index
    %2 = vector.load %arg3[%c0_3, %c0_4] : memref<256x512xf32, #tpu.memory_space<vmem>>, vector<256x512xf32>
    %cst = arith.constant dense<0.000000e+00> : vector<128x512xf32>
    %3 = tpu.matmul %0, %2, %cst {dimension_numbers = #tpu.dot_dimension_numbers<[1], [0], [0], [1], [0, 0, 1, 1], [], []>} : vector<128x256xf32>, vector<256x512xf32>, vector<128x512xf32> -> vector<128x512xf32>
    %c0_5 = arith.constant 0 : index
    %c0_6 = arith.constant 0 : index
    %4 = vector.load %arg4[%c0_5, %c0_6] : memref<1x512xf32, #tpu.memory_space<vmem>>, vector<1x512xf32>
    %5 = vector.broadcast %4 : vector<1x512xf32> to vector<128x512xf32>
    %6 = arith.addf %3, %5 : vector<128x512xf32>
    %cst_7 = arith.constant 0.000000e+00 : f32
    %7 = vector.broadcast %cst_7 : f32 to vector<128x512xf32>
    %8 = arith.maximumf %6, %7 : vector<128x512xf32>
    %c0_8 = arith.constant 0 : index
    %c0_9 = arith.constant 0 : index
    %9 = vector.load %arg5[%c0_8, %c0_9] : memref<128x512xf32, #tpu.memory_space<vmem>>, vector<128x512xf32>
    %cst_10 = arith.constant dense<0.000000e+00> : vector<128x512xf32>
    %10 = tpu.matmul %1, %9, %cst_10 {dimension_numbers = #tpu.dot_dimension_numbers<[1], [0], [0], [1], [0, 0, 1, 1], [], []>} : vector<128x128xf32>, vector<128x512xf32>, vector<128x512xf32> -> vector<128x512xf32>
    %c0_11 = arith.constant 0 : index
    %c0_12 = arith.constant 0 : index
    %11 = vector.load %arg6[%c0_11, %c0_12] : memref<1x512xf32, #tpu.memory_space<vmem>>, vector<1x512xf32>
    %12 = vector.broadcast %11 : vector<1x512xf32> to vector<128x512xf32>
    %13 = arith.addf %10, %12 : vector<128x512xf32>
    %cst_13 = arith.constant 0.000000e+00 : f32
    %14 = vector.broadcast %cst_13 : f32 to vector<128x512xf32>
    %15 = arith.maximumf %13, %14 : vector<128x512xf32>
    %16 = tpu.concatenate %8, %15 in 1 : vector<128x512xf32>, vector<128x512xf32> -> vector<128x1024xf32>
    %c0_14 = arith.constant 0 : index
    %c0_15 = arith.constant 0 : index
    %17 = vector.load %arg7[%c0_14, %c0_15] : memref<1024x128xf32, #tpu.memory_space<vmem>>, vector<1024x128xf32>
    %cst_16 = arith.constant dense<0.000000e+00> : vector<128x128xf32>
    %18 = tpu.matmul %16, %17, %cst_16 {dimension_numbers = #tpu.dot_dimension_numbers<[1], [0], [0], [1], [0, 0, 1, 1], [], []>} : vector<128x1024xf32>, vector<1024x128xf32>, vector<128x128xf32> -> vector<128x128xf32>
    %c0_17 = arith.constant 0 : index
    %c0_18 = arith.constant 0 : index
    %19 = vector.load %arg8[%c0_17, %c0_18] : memref<1x128xf32, #tpu.memory_space<vmem>>, vector<1x128xf32>
    %20 = vector.broadcast %19 : vector<1x128xf32> to vector<128x128xf32>
    %21 = arith.addf %18, %20 : vector<128x128xf32>
    %cst_19 = arith.constant 5.000000e-01 : f32
    %22 = vector.broadcast %cst_19 : f32 to vector<128x128xf32>
    %23 = arith.mulf %22, %21 : vector<128x128xf32>
    %c0_20 = arith.constant 0 : index
    %c0_21 = arith.constant 0 : index
    %24 = vector.load %arg9[%c0_20, %c0_21] : memref<128x512xf32, #tpu.memory_space<vmem>>, vector<128x512xf32>
    %cst_22 = arith.constant dense<0.000000e+00> : vector<128x512xf32>
    %25 = tpu.matmul %23, %24, %cst_22 {dimension_numbers = #tpu.dot_dimension_numbers<[1], [0], [0], [1], [0, 0, 1, 1], [], []>} : vector<128x128xf32>, vector<128x512xf32>, vector<128x512xf32> -> vector<128x512xf32>
    %c0_23 = arith.constant 0 : index
    %c0_24 = arith.constant 0 : index
    %26 = vector.load %arg10[%c0_23, %c0_24] : memref<1x512xf32, #tpu.memory_space<vmem>>, vector<1x512xf32>
    %27 = vector.broadcast %26 : vector<1x512xf32> to vector<128x512xf32>
    %28 = arith.addf %25, %27 : vector<128x512xf32>
    %cst_25 = arith.constant 0.000000e+00 : f32
    %29 = vector.broadcast %cst_25 : f32 to vector<128x512xf32>
    %30 = arith.maximumf %28, %29 : vector<128x512xf32>
    %c0_26 = arith.constant 0 : index
    %c0_27 = arith.constant 0 : index
    %31 = vector.load %arg11[%c0_26, %c0_27] : memref<512x384xf32, #tpu.memory_space<vmem>>, vector<512x384xf32>
    %cst_28 = arith.constant dense<0.000000e+00> : vector<128x384xf32>
    %32 = tpu.matmul %30, %31, %cst_28 {dimension_numbers = #tpu.dot_dimension_numbers<[1], [0], [0], [1], [0, 0, 1, 1], [], []>} : vector<128x512xf32>, vector<512x384xf32>, vector<128x384xf32> -> vector<128x384xf32>
    %c0_29 = arith.constant 0 : index
    %c0_30 = arith.constant 0 : index
    %33 = vector.load %arg12[%c0_29, %c0_30] : memref<1x384xf32, #tpu.memory_space<vmem>>, vector<1x384xf32>
    %34 = vector.broadcast %33 : vector<1x384xf32> to vector<128x384xf32>
    %35 = arith.addf %32, %34 : vector<128x384xf32>
    %c0_31 = arith.constant 0 : index
    %c0_32 = arith.constant 0 : index
    %36 = vector.load %arg13[%c0_31, %c0_32] : memref<128x384xf32, #tpu.memory_space<vmem>>, vector<128x384xf32>
    tpu.vector_store %arg13[%c0_31, %c0_32], %35 {strides = array<i32>} : memref<128x384xf32, #tpu.memory_space<vmem>>, vector<128x384xf32>,
    return
  }
  func.func @transform_0(%arg0: i32) -> (i32, i32) {
    %c0_i32 = arith.constant 0 : i32
    %c0_i32_0 = arith.constant 0 : i32
    return %arg0, %c0_i32 : i32, i32
  }
  func.func @transform_1(%arg0: i32) -> (i32, i32) {
    %c0_i32 = arith.constant 0 : i32
    %c0_i32_0 = arith.constant 0 : i32
    return %arg0, %c0_i32 : i32, i32
  }
  func.func @transform_2(%arg0: i32) -> (i32, i32) {
    %c0_i32 = arith.constant 0 : i32
    %c0_i32_0 = arith.constant 0 : i32
    %c0_i32_1 = arith.constant 0 : i32
    return %c0_i32, %c0_i32_0 : i32, i32
  }
  func.func @transform_3(%arg0: i32) -> (i32, i32) {
    %c0_i32 = arith.constant 0 : i32
    %c0_i32_0 = arith.constant 0 : i32
    %c0_i32_1 = arith.constant 0 : i32
    return %c0_i32, %c0_i32_0 : i32, i32
  }
  func.func @transform_4(%arg0: i32) -> (i32, i32) {
    %c0_i32 = arith.constant 0 : i32
    %c0_i32_0 = arith.constant 0 : i32
    %c0_i32_1 = arith.constant 0 : i32
    return %c0_i32, %c0_i32_0 : i32, i32
  }
  func.func @transform_5(%arg0: i32) -> (i32, i32) {
    %c0_i32 = arith.constant 0 : i32
    %c0_i32_0 = arith.constant 0 : i32
    %c0_i32_1 = arith.constant 0 : i32
    return %c0_i32, %c0_i32_0 : i32, i32
  }
  func.func @transform_6(%arg0: i32) -> (i32, i32) {
    %c0_i32 = arith.constant 0 : i32
    %c0_i32_0 = arith.constant 0 : i32
    %c0_i32_1 = arith.constant 0 : i32
    return %c0_i32, %c0_i32_0 : i32, i32
  }
  func.func @transform_7(%arg0: i32) -> (i32, i32) {
    %c0_i32 = arith.constant 0 : i32
    %c0_i32_0 = arith.constant 0 : i32
    %c0_i32_1 = arith.constant 0 : i32
    return %c0_i32, %c0_i32_0 : i32, i32
  }
  func.func @transform_8(%arg0: i32) -> (i32, i32) {
    %c0_i32 = arith.constant 0 : i32
    %c0_i32_0 = arith.constant 0 : i32
    %c0_i32_1 = arith.constant 0 : i32
    return %c0_i32, %c0_i32_0 : i32, i32
  }
  func.func @transform_9(%arg0: i32) -> (i32, i32) {
    %c0_i32 = arith.constant 0 : i32
    %c0_i32_0 = arith.constant 0 : i32
    %c0_i32_1 = arith.constant 0 : i32
    return %c0_i32, %c0_i32_0 : i32, i32
  }
  func.func @transform_10(%arg0: i32) -> (i32, i32) {
    %c0_i32 = arith.constant 0 : i32
    %c0_i32_0 = arith.constant 0 : i32
    %c0_i32_1 = arith.constant 0 : i32
    return %c0_i32, %c0_i32_0 : i32, i32
  }
  func.func @transform_11(%arg0: i32) -> (i32, i32) {
    %c0_i32 = arith.constant 0 : i32
    %c0_i32_0 = arith.constant 0 : i32
    %c0_i32_1 = arith.constant 0 : i32
    return %c0_i32, %c0_i32_0 : i32, i32
  }
  func.func @transform_12(%arg0: i32) -> (i32, i32) {
    %c0_i32 = arith.constant 0 : i32
    %c0_i32_0 = arith.constant 0 : i32
    return %arg0, %c0_i32 : i32, i32
  }
}

</mosaic_0001>

<bundles_post_ra>
// kernel: tpu_custom_call.1
= control target key start
LH: loop header
LB: loop body
LE: loop exit
PB: predicated region body
PF: predicated region fallthrough
CT: control target
= control target key end

     0   :  { %17 = vsyncpa [#allocation3], 0  ;;  %s5400_s0 = inlined_call_operand.hbm [shape: f32[128,256], index: 0, kind: input, shape index: {}]   ;;  %s5401_s1 = inlined_call_operand.hbm [shape: f32[128,128], index: 1, kind: input, shape index: {}]   ;;  %s5402_s2 = inlined_call_operand.hbm [shape: f32[256,512], index: 2, kind: input, shape index: {}]   ;;  %s5403_s3 = inlined_call_operand.vmem [shape: f32[1,512], index: 3, kind: input, shape index: {}]   ;;  %s5404_s4 = inlined_call_operand.hbm [shape: f32[128,512], index: 4, kind: input, shape index: {}]   ;;  %s5405_s5 = inlined_call_operand.vmem [shape: f32[1,512], index: 5, kind: input, shape index: {}]   ;;  %s5406_s6 = inlined_call_operand.hbm [shape: f32[1024,128], index: 6, kind: input, shape index: {}]   ;;  %s5407_s7 = inlined_call_operand.vmem [shape: f32[1,128], index: 7, kind: input, shape index: {}]   ;;  %s5408_s8 = inlined_call_operand.hbm [shape: f32[128,512], index: 8, kind: input, shape index: {}]   ;;  %s5409_s9 = inlined_call_operand.vmem [shape: f32[1,512], index: 9, kind: input, shape index: {}]   ;;  %s5410_s10 = inlined_call_operand.hbm [shape: f32[512,384], index: 10, kind: input, shape index: {}]   ;;  %s5411_s11 = inlined_call_operand.vmem [shape: f32[1,384], index: 11, kind: input, shape index: {}]   ;;  %s5412_s12 = inlined_call_operand.hbm [shape: f32[128,384], index: 12, kind: output, shape index: {}]  }
   0x1   :  { %18 = vsyncpa [#allocation6], 0 }
   0x2   :  { %19 = vsyncpa [#allocation9], 0 }
   0x3   :  { %20 = vsyncpa [#allocation12], 0 }
   0x4   :  { %21 = vsyncpa [#allocation4], 0  ;;  %s4609_s21 = smov [#allocation5]   ;;  %s4423_s25 = scalar_lea.hbm %s5401_s1, 2048 }
   0x5   :  { %s39_s22 = sshll.u32 %s4609_s21, 4  ;;  %p4424_p0 = scmp.ne.s32.totalorder %s5401_s1, %s4423_s25  ;;  %s40_s22 = int_to_ptr.vmem [resolvable:$true] %s39_s22 }
   0x6   :  { %p4427_p1 = scmp.lt.u32.totalorder %s4423_s25, %s5401_s1 }
   0x8   :  { %p4429_p2 = pnand %p4427_p1, %p4424_p0 }
   0xa   :  { %4432 = shalt.err (!%p4429_p2)
}
   0xb   :  { %s4433_s30 = scalar_lea.vmem %s40_s22, 2048  ;;  %p4438_p4 = scmp.lt.s32.totalorder %s40_s22, %s40_s22 }
   0xc   :  { %p4434_p3 = scmp.ne.s32.totalorder %s40_s22, %s4433_s30  ;;  %p4439_p5 = scmp.lt.s32.totalorder %s4433_s30, %s4433_s30 }
   0xe   :  { %p4440_p6 = por %p4439_p5, %p4438_p4 }
  0x10   :  { %p4441_p7 = pnand %p4440_p6, %p4434_p3 }
  0x12   :  { %4444 = shalt.err (!%p4441_p7)
}
  0x13   :  { %s4610_s13 = smov 128   ;;  %s4611_s14 = smov 8  }
  0x14   :  { %45 = dma.hbm_to_vmem [thread:$0]  %s5401_s1, 2048, %s40_s22, [#allocation6], %s4610_s13, %s4610_s13, %s4611_s14  }
  0x15   :  { %s4612_s17 = smov [#allocation8]   ;;  %s4613_s19 = smov [#allocation11]  }
  0x16   :  { %s65_s18 = sshll.u32 %s4612_s17, 4  ;;  %s93_s20 = sshll.u32 %s4613_s19, 4  ;;  %s66_s18 = int_to_ptr.vmem [resolvable:$true] %s65_s18  ;;  %s94_s20 = int_to_ptr.vmem [resolvable:$true] %s93_s20 }
  0x17   :  { %s4445_s24 = scalar_lea.hbm %s5404_s4, 8192 }
  0x18   :  { %p4446_p8 = scmp.ne.s32.totalorder %s5404_s4, %s4445_s24  ;;  %p4449_p9 = scmp.lt.u32.totalorder %s4445_s24, %s5404_s4 }
  0x1a   :  { %p4451_p10 = pnand %p4449_p9, %p4446_p8 }
  0x1c   :  { %4454 = shalt.err (!%p4451_p10)
}
  0x1d   :  { %s4455_s1 = scalar_lea.vmem %s66_s18, 8192  ;;  %p4460_p12 = scmp.lt.s32.totalorder %s66_s18, %s66_s18 }
  0x1e   :  { %p4456_p11 = scmp.ne.s32.totalorder %s66_s18, %s4455_s1  ;;  %p4461_p13 = scmp.lt.s32.totalorder %s4455_s1, %s4455_s1 }
  0x20   :  { %p4462_p0 = por %p4461_p13, %p4460_p12 }
  0x22   :  { %p4463_p1 = pnand %p4462_p0, %p4456_p11 }
  0x24   :  { %4466 = shalt.err (!%p4463_p1)
}
  0x25   :  { %s4614_s22 = smov 512   ;;  %s4615_s29 = smov 32  }
  0x26   :  { %71 = dma.hbm_to_vmem [thread:$0]  %s5404_s4, 8192, %s66_s18, [#allocation9], %s4614_s22, %s4614_s22, %s4615_s29  }
  0x27   :  { %s4467_s19 = scalar_lea.hbm %s5408_s8, 8192 }
  0x28   :  { %p4468_p2 = scmp.ne.s32.totalorder %s5408_s8, %s4467_s19  ;;  %p4471_p3 = scmp.lt.u32.totalorder %s4467_s19, %s5408_s8 }
  0x2a   :  { %p4473_p4 = pnand %p4471_p3, %p4468_p2 }
  0x2c   :  { %4476 = shalt.err (!%p4473_p4)
}
  0x2d   :  { %s4477_s26 = scalar_lea.vmem %s94_s20, 8192  ;;  %p4482_p6 = scmp.lt.s32.totalorder %s94_s20, %s94_s20 }
  0x2e   :  { %p4478_p5 = scmp.ne.s32.totalorder %s94_s20, %s4477_s26  ;;  %p4483_p7 = scmp.lt.s32.totalorder %s4477_s26, %s4477_s26 }
  0x30   :  { %p4484_p8 = por %p4483_p7, %p4482_p6 }
  0x32   :  { %p4485_p9 = pnand %p4484_p8, %p4478_p5 }
  0x34   :  { %4488 = shalt.err (!%p4485_p9)
}
  0x35   :  { %99 = dma.hbm_to_vmem [thread:$0]  %s5408_s8, 8192, %s94_s20, [#allocation12], %s4614_s22, %s4614_s22, %s4615_s29  }
  0x36   :  { %s4616_s27 = smov [#allocation2]   ;;  %s4489_s15 = scalar_lea.hbm %s5400_s0, 4096 }
  0x37   :  { %s27_s28 = sshll.u32 %s4616_s27, 4  ;;  %p4490_p10 = scmp.ne.s32.totalorder %s5400_s0, %s4489_s15  ;;  %s28_s28 = int_to_ptr.vmem [resolvable:$true] %s27_s28 }
  0x38   :  { %p4493_p11 = scmp.lt.u32.totalorder %s4489_s15, %s5400_s0 }
  0x3a   :  { %p4495_p12 = pnand %p4493_p11, %p4490_p10 }
  0x3c   :  { %4498 = shalt.err (!%p4495_p12)
}
  0x3d   :  { %s4499_s23 = scalar_lea.vmem %s28_s28, 4096  ;;  %p4504_p0 = scmp.lt.s32.totalorder %s28_s28, %s28_s28 }
  0x3e   :  { %p4500_p13 = scmp.ne.s32.totalorder %s28_s28, %s4499_s23  ;;  %p4505_p1 = scmp.lt.s32.totalorder %s4499_s23, %s4499_s23 }
  0x40   :  { %p4506_p2 = por %p4505_p1, %p4504_p0 }
  0x42   :  { %p4507_p3 = pnand %p4506_p2, %p4500_p13 }
  0x44   :  { %4510 = shalt.err (!%p4507_p3)
}
  0x45   :  { %s4617_s8 = smov 256   ;;  %s4618_s20 = smov 16  }
  0x46   :  { %33 = dma.hbm_to_vmem [thread:$0]  %s5400_s0, 4096, %s28_s28, [#allocation3], %s4617_s8, %s4617_s8, %s4618_s20  }
  0x47   :  { %s4619_s26 = smov [#allocation7]   ;;  %s4620_s18 = smov [#allocation10]  }
  0x48   :  { %s51_s4 = sshll.u32 %s4619_s26, 4  ;;  %s79_s27 = sshll.u32 %s4620_s18, 4  ;;  %s52_s4 = int_to_ptr.vmem [resolvable:$true] %s51_s4  ;;  %s4748_s27 = int_to_ptr.vmem [resolvable:$true] %s79_s27 }
  0x49   :  { %s4511_s15 = scalar_lea.hbm %s5402_s2, 16384 }
  0x4a   :  { %p4512_p4 = scmp.ne.s32.totalorder %s5402_s2, %s4511_s15  ;;  %p4515_p5 = scmp.lt.u32.totalorder %s4511_s15, %s5402_s2 }
  0x4c   :  { %p4517_p6 = pnand %p4515_p5, %p4512_p4 }
  0x4e   :  { %4520 = shalt.err (!%p4517_p6)
}
  0x4f   :  { %s4521_s0 = scalar_lea.vmem %s52_s4, 16384  ;;  %p4526_p8 = scmp.lt.s32.totalorder %s52_s4, %s52_s4 }
  0x50   :  { %p4522_p7 = scmp.ne.s32.totalorder %s52_s4, %s4521_s0  ;;  %p4527_p9 = scmp.lt.s32.totalorder %s4521_s0, %s4521_s0 }
  0x52   :  { %p4528_p10 = por %p4527_p9, %p4526_p8 }
  0x54   :  { %p4529_p11 = pnand %p4528_p10, %p4522_p7 }
  0x56   :  { %4532 = shalt.err (!%p4529_p11)
}
  0x57   :  { %57 = dma.hbm_to_vmem [thread:$0]  %s5402_s2, 16384, %s52_s4, [#allocation6], %s4614_s22, %s4614_s22, %s4615_s29  }
  0x58   :  { %s4533_s24 = scalar_lea.hbm %s5406_s6, 16384 }
  0x59   :  { %p4534_p12 = scmp.ne.s32.totalorder %s5406_s6, %s4533_s24  ;;  %p4537_p13 = scmp.lt.u32.totalorder %s4533_s24, %s5406_s6 }
  0x5b   :  { %p4539_p0 = pnand %p4537_p13, %p4534_p12 }
  0x5d   :  { %4542 = shalt.err (!%p4539_p0)
}
  0x5e   :  { %s4543_s30 = scalar_lea.vmem %s4748_s27, 16384  ;;  %p4548_p2 = scmp.lt.s32.totalorder %s4748_s27, %s4748_s27 }
  0x5f   :  { %p4544_p1 = scmp.ne.s32.totalorder %s4748_s27, %s4543_s30  ;;  %p4549_p3 = scmp.lt.s32.totalorder %s4543_s30, %s4543_s30 }
  0x61   :  { %p4550_p4 = por %p4549_p3, %p4548_p2 }
  0x63   :  { %p4551_p5 = pnand %p4550_p4, %p4544_p1 }
  0x65   :  { %4554 = shalt.err (!%p4551_p5)
}
  0x66   :  { %85 = dma.hbm_to_vmem [thread:$0]  %s5406_s6, 16384, %s4748_s27, [#allocation9], %s4610_s13, %s4610_s13, %s4611_s14  }
  0x67   :  { %s4621_s29 = smov [#allocation13]   ;;  %s4555_s17 = scalar_lea.hbm %s5410_s10, 24576 }
  0x68   :  { %s107_s4 = sshll.u32 %s4621_s29, 4  ;;  %p4556_p6 = scmp.ne.s32.totalorder %s5410_s10, %s4555_s17  ;;  %s108_s4 = int_to_ptr.vmem [resolvable:$true] %s107_s4 }
  0x69   :  { %p4559_p7 = scmp.lt.u32.totalorder %s4555_s17, %s5410_s10 }
  0x6b   :  { %p4561_p8 = pnand %p4559_p7, %p4556_p6 }
  0x6d   :  { %4564 = shalt.err (!%p4561_p8)
}
  0x6e   :  { %s4565_s23 = scalar_lea.vmem %s108_s4, 24576  ;;  %p4570_p10 = scmp.lt.s32.totalorder %s108_s4, %s108_s4 }
  0x6f   :  { %p4566_p9 = scmp.ne.s32.totalorder %s108_s4, %s4565_s23  ;;  %p4571_p11 = scmp.lt.s32.totalorder %s4565_s23, %s4565_s23 }
  0x71   :  { %p4572_p12 = por %p4571_p11, %p4570_p10 }
  0x73   :  { %p4573_p13 = pnand %p4572_p12, %p4566_p9 }
  0x75   :  { %4576 = shalt.err (!%p4573_p13)
}
  0x76   :  { %s4622_s6 = smov 384   ;;  %s4623_s13 = smov 24  }
  0x77   :  { %113 = dma.hbm_to_vmem [thread:$0]  %s5410_s10, 24576, %s108_s4, [#allocation12], %s4622_s6, %s4622_s6, %s4623_s13  }
  0x78   :  { %4599 = dma.done.wait [#allocation3], 4096  }
  0x79   :  { %4600 = vsyncadd [#allocation3], 4294963200 }
  0x7a   :  { %4601 = dma.done.wait [#allocation6], 18432  }
  0x7b   :  { %4602 = vsyncadd [#allocation6], 4294948864 }
  0x7c   :  { %4603 = dma.done.wait [#allocation9], 24576  }
  0x7d   :  { %4604 = vsyncadd [#allocation9], 4294942720 }
  0x7e   :  { %4605 = dma.done.wait [#allocation12], 32768  }
  0x7f   :  { %4606 = vsyncadd [#allocation12], 4294934528  ;;  %v186_v0 = vld [vmem:[#allocation7 + $0x8] sm:$0xff]  ;;  %v188_v2 = vld [vmem:[#allocation7 + $0x18] sm:$0xff] }
  0x80   :  { %v190_v1 = vld [vmem:[#allocation7 + $0x28] sm:$0xff]  ;;  %v192_v4 = vld [vmem:[#allocation7 + $0x38] sm:$0xff]  ;;  %v185_v5 = vld [vmem:[#allocation7] sm:$0xff] }
  0x81   :  { %v3766_v3 = vpack.c.bf16 %v190_v1, %v186_v0  ;;  %v189_v6 = vld [vmem:[#allocation7 + $0x20] sm:$0xff]  ;;  %v3830_v7 = vpack.c.bf16 %v192_v4, %v188_v2  ;;  %v187_v9 = vld [vmem:[#allocation7 + $0x10] sm:$0xff]  ;;  %v194_v11 = vld [vmem:[#allocation7 + $0x48] sm:$0xff] }
  0x82   :  { %v3768_v8 = vpack.c.bf16 %v189_v6, %v185_v5  ;;  %v191_v10 = vld [vmem:[#allocation7 + $0x30] sm:$0xff]  ;;  %v198_v13 = vld [vmem:[#allocation7 + $0x68] sm:$0xff]  ;;  %v196_v14 = vld [vmem:[#allocation7 + $0x58] sm:$0xff] }
  0x83   :  { %3767 = vmatprep.subr.bf16.mxu0 %v3766_v3  ;;  %v3832_v12 = vpack.c.bf16 %v191_v10, %v187_v9  ;;  %v200_v15 = vld [vmem:[#allocation7 + $0x78] sm:$0xff]  ;;  %3831 = vmatprep.subr.bf16.mxu1 %v3830_v7  ;;  %v3770_v16 = vpack.c.bf16 %v198_v13, %v194_v11  ;;  %v193_v18 = vld [vmem:[#allocation7 + $0x40] sm:$0xff]  ;;  %v195_v20 = vld [vmem:[#allocation7 + $0x50] sm:$0xff] }
  0x84   :  { %3769 = vmatpush1.bf16.msra.mxu0 %v3768_v8  ;;  %v3834_v17 = vpack.c.bf16 %v200_v15, %v196_v14  ;;  %v197_v19 = vld [vmem:[#allocation7 + $0x60] sm:$0xff]  ;;  %v199_v22 = vld [vmem:[#allocation7 + $0x70] sm:$0xff]  ;;  %v202_v23 = vld [vmem:[#allocation7 + $0x88] sm:$0xff] }
  0x85   :  { %3833 = vmatpush1.bf16.msra.mxu1 %v3832_v12  ;;  %v3772_v21 = vpack.c.bf16 %v197_v19, %v193_v18  ;;  %v206_v24 = vld [vmem:[#allocation7 + $0xa8] sm:$0xff]  ;;  %3771 = vmatprep.subr.bf16.mxu0 %v3770_v16  ;;  %v3836_v25 = vpack.c.bf16 %v199_v22, %v195_v20  ;;  %v204_v27 = vld [vmem:[#allocation7 + $0x98] sm:$0xff]  ;;  %v201_v29 = vld [vmem:[#allocation7 + $0x80] sm:$0xff] }
  0x86   :  { %3835 = vmatprep.subr.bf16.mxu1 %v3834_v17  ;;  %v3774_v26 = vpack.c.bf16 %v206_v24, %v202_v23  ;;  %v208_v28 = vld [vmem:[#allocation7 + $0xb8] sm:$0xff]  ;;  %v205_v31 = vld [vmem:[#allocation7 + $0xa0] sm:$0xff]  ;;  %v203_v32 = vld [vmem:[#allocation7 + $0x90] sm:$0xff] }
  0x87   :  { %v3838_v30 = vpack.c.bf16 %v208_v28, %v204_v27  ;;  %v207_v33 = vld [vmem:[#allocation7 + $0xb0] sm:$0xff]  ;;  %v3776_v34 = vpack.c.bf16 %v205_v31, %v201_v29  ;;  %v210_v35 = vld [vmem:[#allocation7 + $0xc8] sm:$0xff]  ;;  %v212_v37 = vld [vmem:[#allocation7 + $0xd8] sm:$0xff] }
  0x88   :  { %3773 = vmatpush1.bf16.msra.mxu0 %v3772_v21  ;;  %v214_v36 = vld [vmem:[#allocation7 + $0xe8] sm:$0xff]  ;;  %v3840_v38 = vpack.c.bf16 %v207_v33, %v203_v32  ;;  %v216_v40 = vld [vmem:[#allocation7 + $0xf8] sm:$0xff]  ;;  %v209_v41 = vld [vmem:[#allocation7 + $0xc0] sm:$0xff] }
  0x89   :  { %3837 = vmatpush1.bf16.msra.mxu1 %v3836_v25  ;;  %3775 = vmatprep.subr.bf16.mxu0 %v3774_v26  ;;  %v3778_v39 = vpack.c.bf16 %v214_v36, %v210_v35  ;;  %v213_v42 = vld [vmem:[#allocation7 + $0xe0] sm:$0xff]  ;;  %v3842_v43 = vpack.c.bf16 %v216_v40, %v212_v37  ;;  %v211_v44 = vld [vmem:[#allocation7 + $0xd0] sm:$0xff]  ;;  %v218_v46 = vld [vmem:[#allocation7 + $0x108] sm:$0xff] }
  0x8a   :  { %3839 = vmatprep.subr.bf16.mxu1 %v3838_v30  ;;  %v215_v45 = vld [vmem:[#allocation7 + $0xf0] sm:$0xff]  ;;  %v222_v47 = vld [vmem:[#allocation7 + $0x128] sm:$0xff]  ;;  %v220_v48 = vld [vmem:[#allocation7 + $0x118] sm:$0xff]  ;;  %v3780_v50 = vpack.c.bf16 %v213_v42, %v209_v41 }
  0x8b   :  { %v224_v49 = vld [vmem:[#allocation7 + $0x138] sm:$0xff]  ;;  %v3844_v51 = vpack.c.bf16 %v215_v45, %v211_v44  ;;  %v3782_v52 = vpack.c.bf16 %v222_v47, %v218_v46  ;;  %v217_v53 = vld [vmem:[#allocation7 + $0x100] sm:$0xff]  ;;  %v219_v55 = vld [vmem:[#allocation7 + $0x110] sm:$0xff] }
  0x8c   :  { %3777 = vmatpush1.bf16.msra.mxu0 %v3776_v34  ;;  %v221_v54 = vld [vmem:[#allocation7 + $0x120] sm:$0xff]  ;;  %v3846_v56 = vpack.c.bf16 %v224_v49, %v220_v48  ;;  %v223_v57 = vld [vmem:[#allocation7 + $0x130] sm:$0xff]  ;;  %v226_v58 = vld [vmem:[#allocation7 + $0x148] sm:$0xff] }
  0x8d   :  { %3841 = vmatpush1.bf16.msra.mxu1 %v3840_v38  ;;  %3779 = vmatprep.subr.bf16.mxu0 %v3778_v39  ;;  %v230_v59 = vld [vmem:[#allocation7 + $0x168] sm:$0xff]  ;;  %v228_v60 = vld [vmem:[#allocation7 + $0x158] sm:$0xff]  ;;  %v3784_v62 = vpack.c.bf16 %v221_v54, %v217_v53  ;;  %v3848_v63 = vpack.c.bf16 %v223_v57, %v219_v55  ;;  %v225_v1 = vld [vmem:[#allocation7 + $0x140] sm:$0xff] }
  0x8e   :  { %3843 = vmatprep.subr.bf16.mxu1 %v3842_v43  ;;  %v232_v61 = vld [vmem:[#allocation7 + $0x178] sm:$0xff]  ;;  %v3786_v0 = vpack.c.bf16 %v230_v59, %v226_v58  ;;  %v229_v2 = vld [vmem:[#allocation7 + $0x160] sm:$0xff]  ;;  %v227_v3 = vld [vmem:[#allocation7 + $0x150] sm:$0xff] }
  0x8f   :  { %v3850_v4 = vpack.c.bf16 %v232_v61, %v228_v60  ;;  %v231_v5 = vld [vmem:[#allocation7 + $0x170] sm:$0xff]  ;;  %v234_v6 = vld [vmem:[#allocation7 + $0x188] sm:$0xff]  ;;  %v236_v8 = vld [vmem:[#allocation7 + $0x198] sm:$0xff]  ;;  %v3788_v10 = vpack.c.bf16 %v229_v2, %v225_v1 }
  0x90   :  { %3781 = vmatpush1.bf16.msra.mxu0 %v3780_v50  ;;  %v238_v7 = vld [vmem:[#allocation7 + $0x1a8] sm:$0xff]  ;;  %v240_v9 = vld [vmem:[#allocation7 + $0x1b8] sm:$0xff]  ;;  %v3852_v11 = vpack.c.bf16 %v231_v5, %v227_v3  ;;  %v233_v13 = vld [vmem:[#allocation7 + $0x180] sm:$0xff] }
  0x91   :  { %3845 = vmatpush1.bf16.msra.mxu1 %v3844_v51  ;;  %3783 = vmatprep.subr.bf16.mxu0 %v3782_v52  ;;  %v3790_v12 = vpack.c.bf16 %v238_v7, %v234_v6  ;;  %v237_v14 = vld [vmem:[#allocation7 + $0x1a0] sm:$0xff]  ;;  %v235_v15 = vld [vmem:[#allocation7 + $0x190] sm:$0xff]  ;;  %v3854_v16 = vpack.c.bf16 %v240_v9, %v236_v8  ;;  %v242_v18 = vld [vmem:[#allocation7 + $0x1c8] sm:$0xff] }
  0x92   :  { %3847 = vmatprep.subr.bf16.mxu1 %v3846_v56  ;;  %v239_v17 = vld [vmem:[#allocation7 + $0x1b0] sm:$0xff]  ;;  %v246_v19 = vld [vmem:[#allocation7 + $0x1e8] sm:$0xff]  ;;  %v244_v20 = vld [vmem:[#allocation7 + $0x1d8] sm:$0xff]  ;;  %v3792_v22 = vpack.c.bf16 %v237_v14, %v233_v13 }
  0x93   :  { %v248_v21 = vld [vmem:[#allocation7 + $0x1f8] sm:$0xff]  ;;  %v3856_v23 = vpack.c.bf16 %v239_v17, %v235_v15  ;;  %v3794_v24 = vpack.c.bf16 %v246_v19, %v242_v18  ;;  %v241_v25 = vld [vmem:[#allocation7 + $0x1c0] sm:$0xff]  ;;  %v243_v27 = vld [vmem:[#allocation7 + $0x1d0] sm:$0xff] }
  0x94   :  { %3785 = vmatpush1.bf16.msra.mxu0 %v3784_v62  ;;  %v245_v26 = vld [vmem:[#allocation7 + $0x1e0] sm:$0xff]  ;;  %v3858_v28 = vpack.c.bf16 %v248_v21, %v244_v20  ;;  %v247_v29 = vld [vmem:[#allocation7 + $0x1f0] sm:$0xff]  ;;  %v250_v30 = vld [vmem:[#allocation7 + $0x208] sm:$0xff] }
  0x95   :  { %3849 = vmatpush1.bf16.msra.mxu1 %v3848_v63  ;;  %3787 = vmatprep.subr.bf16.mxu0 %v3786_v0  ;;  %v254_v31 = vld [vmem:[#allocation7 + $0x228] sm:$0xff]  ;;  %v252_v32 = vld [vmem:[#allocation7 + $0x218] sm:$0xff]  ;;  %v3796_v34 = vpack.c.bf16 %v245_v26, %v241_v25  ;;  %v3860_v35 = vpack.c.bf16 %v247_v29, %v243_v27  ;;  %v249_v37 = vld [vmem:[#allocation7 + $0x200] sm:$0xff] }
  0x96   :  { %3851 = vmatprep.subr.bf16.mxu1 %v3850_v4  ;;  %v256_v33 = vld [vmem:[#allocation7 + $0x238] sm:$0xff]  ;;  %v3798_v36 = vpack.c.bf16 %v254_v31, %v250_v30  ;;  %v253_v38 = vld [vmem:[#allocation7 + $0x220] sm:$0xff]  ;;  %v251_v39 = vld [vmem:[#allocation7 + $0x210] sm:$0xff] }
  0x97   :  { %v3862_v40 = vpack.c.bf16 %v256_v33, %v252_v32  ;;  %v255_v41 = vld [vmem:[#allocation7 + $0x230] sm:$0xff]  ;;  %v258_v42 = vld [vmem:[#allocation7 + $0x248] sm:$0xff]  ;;  %v260_v44 = vld [vmem:[#allocation7 + $0x258] sm:$0xff]  ;;  %v3800_v46 = vpack.c.bf16 %v253_v38, %v249_v37 }
  0x98   :  { %3789 = vmatpush1.bf16.msra.mxu0 %v3788_v10  ;;  %v262_v43 = vld [vmem:[#allocation7 + $0x268] sm:$0xff]  ;;  %v264_v45 = vld [vmem:[#allocation7 + $0x278] sm:$0xff]  ;;  %v3864_v47 = vpack.c.bf16 %v255_v41, %v251_v39  ;;  %v257_v49 = vld [vmem:[#allocation7 + $0x240] sm:$0xff] }
  0x99   :  { %3853 = vmatpush1.bf16.msra.mxu1 %v3852_v11  ;;  %3791 = vmatprep.subr.bf16.mxu0 %v3790_v12  ;;  %v3802_v48 = vpack.c.bf16 %v262_v43, %v258_v42  ;;  %v261_v50 = vld [vmem:[#allocation7 + $0x260] sm:$0xff]  ;;  %v259_v51 = vld [vmem:[#allocation7 + $0x250] sm:$0xff]  ;;  %v3866_v52 = vpack.c.bf16 %v264_v45, %v260_v44  ;;  %v266_v54 = vld [vmem:[#allocation7 + $0x288] sm:$0xff] }
  0x9a   :  { %3855 = vmatprep.subr.bf16.mxu1 %v3854_v16  ;;  %v263_v53 = vld [vmem:[#allocation7 + $0x270] sm:$0xff]  ;;  %v270_v55 = vld [vmem:[#allocation7 + $0x2a8] sm:$0xff]  ;;  %v268_v56 = vld [vmem:[#allocation7 + $0x298] sm:$0xff]  ;;  %v3804_v58 = vpack.c.bf16 %v261_v50, %v257_v49 }
  0x9b   :  { %v272_v57 = vld [vmem:[#allocation7 + $0x2b8] sm:$0xff]  ;;  %v3868_v59 = vpack.c.bf16 %v263_v53, %v259_v51  ;;  %v3806_v60 = vpack.c.bf16 %v270_v55, %v266_v54  ;;  %v265_v61 = vld [vmem:[#allocation7 + $0x280] sm:$0xff]  ;;  %v267_v63 = vld [vmem:[#allocation7 + $0x290] sm:$0xff] }
  0x9c   :  { %3793 = vmatpush1.bf16.msra.mxu0 %v3792_v22  ;;  %v269_v62 = vld [vmem:[#allocation7 + $0x2a0] sm:$0xff]  ;;  %v3870_v0 = vpack.c.bf16 %v272_v57, %v268_v56  ;;  %v271_v1 = vld [vmem:[#allocation7 + $0x2b0] sm:$0xff]  ;;  %v274_v2 = vld [vmem:[#allocation7 + $0x2c8] sm:$0xff] }
  0x9d   :  { %3857 = vmatpush1.bf16.msra.mxu1 %v3856_v23  ;;  %3795 = vmatprep.subr.bf16.mxu0 %v3794_v24  ;;  %v278_v3 = vld [vmem:[#allocation7 + $0x2e8] sm:$0xff]  ;;  %v276_v4 = vld [vmem:[#allocation7 + $0x2d8] sm:$0xff]  ;;  %v3808_v6 = vpack.c.bf16 %v269_v62, %v265_v61  ;;  %v273_v7 = vld [vmem:[#allocation7 + $0x2c0] sm:$0xff]  ;;  %v3872_v8 = vpack.c.bf16 %v271_v1, %v267_v63 }
  0x9e   :  { %3859 = vmatprep.subr.bf16.mxu1 %v3858_v28  ;;  %v280_v5 = vld [vmem:[#allocation7 + $0x2f8] sm:$0xff]  ;;  %v3810_v9 = vpack.c.bf16 %v278_v3, %v274_v2  ;;  %v277_v10 = vld [vmem:[#allocation7 + $0x2e0] sm:$0xff]  ;;  %v275_v11 = vld [vmem:[#allocation7 + $0x2d0] sm:$0xff] }
  0x9f   :  { %v279_v12 = vld [vmem:[#allocation7 + $0x2f0] sm:$0xff]  ;;  %v3874_v13 = vpack.c.bf16 %v280_v5, %v276_v4  ;;  %v282_v14 = vld [vmem:[#allocation7 + $0x308] sm:$0xff]  ;;  %v284_v17 = vld [vmem:[#allocation7 + $0x318] sm:$0xff]  ;;  %v3812_v19 = vpack.c.bf16 %v277_v10, %v273_v7 }
  0xa0   :  { %3797 = vmatpush1.bf16.msra.mxu0 %v3796_v34  ;;  %v286_v15 = vld [vmem:[#allocation7 + $0x328] sm:$0xff]  ;;  %v288_v18 = vld [vmem:[#allocation7 + $0x338] sm:$0xff]  ;;  %v3876_v20 = vpack.c.bf16 %v279_v12, %v275_v11  ;;  %v281_v22 = vld [vmem:[#allocation7 + $0x300] sm:$0xff] }
  0xa1   :  { %3861 = vmatpush1.bf16.msra.mxu1 %v3860_v35  ;;  %3799 = vmatprep.subr.bf16.mxu0 %v3798_v36  ;;  %v138_v16 = vld [vmem:[#allocation2 + $0x8] sm:$0xff]  ;;  %v3814_v21 = vpack.c.bf16 %v286_v15, %v282_v14  ;;  %v285_v23 = vld [vmem:[#allocation7 + $0x320] sm:$0xff]  ;;  %v283_v24 = vld [vmem:[#allocation7 + $0x310] sm:$0xff]  ;;  %v3878_v25 = vpack.c.bf16 %v288_v18, %v284_v17 }
  0xa2   :  { %3863 = vmatprep.subr.bf16.mxu1 %v3862_v40  ;;  %399 = vmatprep.mubr.f32.mxu0 %v138_v16  ;;  %v287_v26 = vld [vmem:[#allocation7 + $0x330] sm:$0xff]  ;;  %v290_v27 = vld [vmem:[#allocation7 + $0x348] sm:$0xff]  ;;  %v292_v29 = vld [vmem:[#allocation7 + $0x358] sm:$0xff]  ;;  %v3816_v31 = vpack.c.bf16 %v285_v23, %v281_v22 }
  0xa3   :  { %560 = vmatprep.mubr.f32.mxu1 %v138_v16  ;;  %v294_v28 = vld [vmem:[#allocation7 + $0x368] sm:$0xff]  ;;  %v296_v30 = vld [vmem:[#allocation7 + $0x378] sm:$0xff]  ;;  %v3880_v32 = vpack.c.bf16 %v287_v26, %v283_v24  ;;  %v289_v34 = vld [vmem:[#allocation7 + $0x340] sm:$0xff] }
  0xa4   :  { %3801 = vmatpush1.bf16.msra.mxu0 %v3800_v46  ;;  %v3818_v33 = vpack.c.bf16 %v294_v28, %v290_v27  ;;  %v293_v35 = vld [vmem:[#allocation7 + $0x360] sm:$0xff]  ;;  %v291_v36 = vld [vmem:[#allocation7 + $0x350] sm:$0xff]  ;;  %v3882_v37 = vpack.c.bf16 %v296_v30, %v292_v29  ;;  %v298_v39 = vld [vmem:[#allocation7 + $0x388] sm:$0xff] }
  0xa5   :  { %3865 = vmatpush1.bf16.msra.mxu1 %v3864_v47  ;;  %3803 = vmatprep.subr.bf16.mxu0 %v3802_v48  ;;  %v295_v38 = vld [vmem:[#allocation7 + $0x370] sm:$0xff]  ;;  %v302_v40 = vld [vmem:[#allocation7 + $0x3a8] sm:$0xff]  ;;  %v300_v41 = vld [vmem:[#allocation7 + $0x398] sm:$0xff]  ;;  %v3820_v43 = vpack.c.bf16 %v293_v35, %v289_v34 }
  0xa6   :  { %3867 = vmatprep.subr.bf16.mxu1 %v3866_v52  ;;  %v304_v42 = vld [vmem:[#allocation7 + $0x3b8] sm:$0xff]  ;;  %v3884_v44 = vpack.c.bf16 %v295_v38, %v291_v36  ;;  %v3822_v45 = vpack.c.bf16 %v302_v40, %v298_v39  ;;  %v297_v46 = vld [vmem:[#allocation7 + $0x380] sm:$0xff]  ;;  %v299_v48 = vld [vmem:[#allocation7 + $0x390] sm:$0xff] }
  0xa7   :  { %v301_v47 = vld [vmem:[#allocation7 + $0x3a0] sm:$0xff]  ;;  %v3886_v49 = vpack.c.bf16 %v304_v42, %v300_v41  ;;  %v303_v50 = vld [vmem:[#allocation7 + $0x3b0] sm:$0xff]  ;;  %v306_v51 = vld [vmem:[#allocation7 + $0x3c8] sm:$0xff] }
  0xa8   :  { %3805 = vmatpush1.bf16.msra.mxu0 %v3804_v58  ;;  %v310_v52 = vld [vmem:[#allocation7 + $0x3e8] sm:$0xff]  ;;  %v308_v53 = vld [vmem:[#allocation7 + $0x3d8] sm:$0xff]  ;;  %v3824_v55 = vpack.c.bf16 %v301_v47, %v297_v46  ;;  %v3888_v56 = vpack.c.bf16 %v303_v50, %v299_v48  ;;  %v305_v58 = vld [vmem:[#allocation7 + $0x3c0] sm:$0xff] }
  0xa9   :  { %3869 = vmatpush1.bf16.msra.mxu1 %v3868_v59  ;;  %3807 = vmatprep.subr.bf16.mxu0 %v3806_v60  ;;  %v312_v54 = vld [vmem:[#allocation7 + $0x3f8] sm:$0xff]  ;;  %v3826_v57 = vpack.c.bf16 %v310_v52, %v306_v51  ;;  %v309_v59 = vld [vmem:[#allocation7 + $0x3e0] sm:$0xff]  ;;  %v307_v60 = vld [vmem:[#allocation7 + $0x3d0] sm:$0xff] }
  0xaa   :  { %3871 = vmatprep.subr.bf16.mxu1 %v3870_v0  ;;  %v3890_v61 = vpack.c.bf16 %v312_v54, %v308_v53  ;;  %v311_v62 = vld [vmem:[#allocation7 + $0x3f0] sm:$0xff]  ;;  %v722_v63 = vld [vmem:[#allocation8 + $0x8] sm:$0xff]  ;;  %v724_v1 = vld [vmem:[#allocation8 + $0x18] sm:$0xff]  ;;  %v3828_v3 = vpack.c.bf16 %v309_v59, %v305_v58 }
  0xab   :  { %v726_v0 = vld [vmem:[#allocation8 + $0x28] sm:$0xff]  ;;  %v728_v2 = vld [vmem:[#allocation8 + $0x38] sm:$0xff]  ;;  %v3892_v4 = vpack.c.bf16 %v311_v62, %v307_v60  ;;  %v725_v7 = vld [vmem:[#allocation8 + $0x20] sm:$0xff] }
  0xac   :  { %3809 = vmatpush1.bf16.msra.mxu0 %v3808_v6  ;;  %v3894_v5 = vpack.c.bf16 %v726_v0, %v722_v63  ;;  %v721_v6 = vld [vmem:[#allocation8] sm:$0xff]  ;;  %v727_v10 = vld [vmem:[#allocation8 + $0x30] sm:$0xff]  ;;  %v730_v11 = vld [vmem:[#allocation8 + $0x48] sm:$0xff] }
  0xad   :  { %3873 = vmatpush1.bf16.msra.mxu1 %v3872_v8  ;;  %3811 = vmatprep.subr.bf16.mxu0 %v3810_v9  ;;  %v3926_v8 = vpack.c.bf16 %v728_v2, %v724_v1  ;;  %v723_v9 = vld [vmem:[#allocation8 + $0x10] sm:$0xff]  ;;  %v734_v12 = vld [vmem:[#allocation8 + $0x68] sm:$0xff]  ;;  %v3896_v14 = vpack.c.bf16 %v725_v7, %v721_v6  ;;  %v732_v15 = vld [vmem:[#allocation8 + $0x58] sm:$0xff] }
  0xae   :  { %3875 = vmatprep.subr.bf16.mxu1 %v3874_v13  ;;  %v137_v13 = vld [vmem:[#allocation2] sm:$0xff]  ;;  %v736_v16 = vld [vmem:[#allocation8 + $0x78] sm:$0xff]  ;;  %v3928_v18 = vpack.c.bf16 %v727_v10, %v723_v9  ;;  %v731_v22 = vld [vmem:[#allocation8 + $0x50] sm:$0xff] }
  0xaf   :  { %v140_v17 = vld [vmem:[#allocation2 + $0x18] sm:$0xff]  ;;  %v3930_v23 = vpack.c.bf16 %v736_v16, %v732_v15  ;;  %v735_v24 = vld [vmem:[#allocation8 + $0x70] sm:$0xff]  ;;  %v742_v26 = vld [vmem:[#allocation8 + $0xa8] sm:$0xff] }
  0xb0   :  { %3813 = vmatpush1.bf16.msra.mxu0 %v3812_v19  ;;  %v3898_v19 = vpack.c.bf16 %v734_v12, %v730_v11  ;;  %v139_v27 = vld [vmem:[#allocation2 + $0x10] sm:$0xff]  ;;  %v740_v28 = vld [vmem:[#allocation8 + $0x98] sm:$0xff]  ;;  %v142_v30 = vld [vmem:[#allocation2 + $0x28] sm:$0xff] }
  0xb1   :  { %3877 = vmatpush1.bf16.msra.mxu1 %v3876_v20  ;;  %3815 = vmatprep.subr.bf16.mxu0 %v3814_v21  ;;  %v729_v20 = vld [vmem:[#allocation8 + $0x40] sm:$0xff]  ;;  %v744_v29 = vld [vmem:[#allocation8 + $0xb8] sm:$0xff]  ;;  %v739_v36 = vld [vmem:[#allocation8 + $0x90] sm:$0xff] }
  0xb2   :  { %3879 = vmatprep.subr.bf16.mxu1 %v3878_v25  ;;  %v733_v21 = vld [vmem:[#allocation8 + $0x60] sm:$0xff]  ;;  %v738_v25 = vld [vmem:[#allocation8 + $0x88] sm:$0xff]  ;;  %v743_v38 = vld [vmem:[#allocation8 + $0xb0] sm:$0xff] }
  0xb3   :  { %v737_v34 = vld [vmem:[#allocation8 + $0x80] sm:$0xff]  ;;  %v746_v39 = vld [vmem:[#allocation8 + $0xc8] sm:$0xff]  ;;  %v748_v42 = vld [vmem:[#allocation8 + $0xd8] sm:$0xff]  ;;  %v3936_v46 = vpack.c.bf16 %v743_v38, %v739_v36 }
  0xb4   :  { %3817 = vmatpush1.bf16.msra.mxu0 %v3816_v31  ;;  %v3900_v31 = vpack.c.bf16 %v733_v21, %v729_v20  ;;  %v741_v35 = vld [vmem:[#allocation8 + $0xa0] sm:$0xff]  ;;  %v750_v40 = vld [vmem:[#allocation8 + $0xe8] sm:$0xff]  ;;  %v747_v50 = vld [vmem:[#allocation8 + $0xd0] sm:$0xff] }
  0xb5   :  { %3881 = vmatpush1.bf16.msra.mxu1 %v3880_v32  ;;  %3819 = vmatprep.subr.bf16.mxu0 %v3818_v33  ;;  %v3932_v32 = vpack.c.bf16 %v735_v24, %v731_v22  ;;  %v3902_v33 = vpack.c.bf16 %v742_v26, %v738_v25  ;;  %v141_v41 = vld [vmem:[#allocation2 + $0x20] sm:$0xff]  ;;  %v3906_v47 = vpack.c.bf16 %v750_v40, %v746_v39  ;;  %v751_v52 = vld [vmem:[#allocation8 + $0xf0] sm:$0xff]  ;;  %v754_v53 = vld [vmem:[#allocation8 + $0x108] sm:$0xff] }
  0xb6   :  { %3883 = vmatprep.subr.bf16.mxu1 %v3882_v37  ;;  %v3934_v37 = vpack.c.bf16 %v744_v29, %v740_v28  ;;  %v745_v48 = vld [vmem:[#allocation8 + $0xc0] sm:$0xff]  ;;  %v758_v54 = vld [vmem:[#allocation8 + $0x128] sm:$0xff]  ;;  %v3940_v60 = vpack.c.bf16 %v751_v52, %v747_v50  ;;  %v755_v0 = vld [vmem:[#allocation8 + $0x110] sm:$0xff] }
  0xb7   :  { %v146_v58 = vld [vmem:[#allocation2 + $0x48] sm:$0xff]  ;;  %v753_v62 = vld [vmem:[#allocation8 + $0x100] sm:$0xff]  ;;  %v759_v2 = vld [vmem:[#allocation8 + $0x130] sm:$0xff] }
  0xb8   :  { %3821 = vmatpush1.bf16.msra.mxu0 %v3820_v43  ;;  %v752_v43 = vld [vmem:[#allocation8 + $0xf8] sm:$0xff]  ;;  %v757_v63 = vld [vmem:[#allocation8 + $0x120] sm:$0xff]  ;;  %v3944_v10 = vpack.c.bf16 %v759_v2, %v755_v0  ;;  %v767_v16 = vld [vmem:[#allocation8 + $0x170] sm:$0xff] }
  0xb9   :  { %3885 = vmatpush1.bf16.msra.mxu1 %v3884_v44  ;;  %3823 = vmatprep.subr.bf16.mxu0 %v3822_v45  ;;  %v144_v44 = vld [vmem:[#allocation2 + $0x38] sm:$0xff]  ;;  %v3904_v45 = vpack.c.bf16 %v741_v35, %v737_v34  ;;  %v3938_v51 = vpack.c.bf16 %v752_v43, %v748_v42  ;;  %v3912_v9 = vpack.c.bf16 %v757_v63, %v753_v62  ;;  %v761_v12 = vld [vmem:[#allocation8 + $0x140] sm:$0xff]  ;;  %v150_v22 = vld [vmem:[#allocation2 + $0x68] sm:$0xff] }
  0xba   :  { %3887 = vmatprep.subr.bf16.mxu1 %v3886_v49  ;;  %v749_v49 = vld [vmem:[#allocation8 + $0xe0] sm:$0xff]  ;;  %v764_v6 = vld [vmem:[#allocation8 + $0x158] sm:$0xff]  ;;  %v771_v28 = vld [vmem:[#allocation8 + $0x190] sm:$0xff] }
  0xbb   :  { %v3908_v59 = vpack.c.bf16 %v749_v49, %v745_v48  ;;  %v768_v7 = vld [vmem:[#allocation8 + $0x178] sm:$0xff]  ;;  %v769_v26 = vld [vmem:[#allocation8 + $0x180] sm:$0xff]  ;;  %v779_v42 = vld [vmem:[#allocation8 + $0x1d0] sm:$0xff] }
  0xbc   :  { %3825 = vmatpush1.bf16.msra.mxu0 %v3824_v55  ;;  %v143_v55 = vld [vmem:[#allocation2 + $0x30] sm:$0xff]  ;;  %v3946_v15 = vpack.c.bf16 %v768_v7, %v764_v6  ;;  %v772_v20 = vld [vmem:[#allocation8 + $0x198] sm:$0xff]  ;;  %v777_v40 = vld [vmem:[#allocation8 + $0x1c0] sm:$0xff] }
  0xbd   :  { %3889 = vmatpush1.bf16.msra.mxu1 %v3888_v56  ;;  %3827 = vmatprep.subr.bf16.mxu0 %v3826_v57  ;;  %v756_v56 = vld [vmem:[#allocation8 + $0x118] sm:$0xff]  ;;  %v1241_v48 = vld [vmem:[#allocation10 + $0x180] sm:$0xff]  ;;  %v1242_v49 = vld [vmem:[#allocation10 + $0x188] sm:$0xff] }
  0xbe   :  { %3891 = vmatprep.subr.bf16.mxu1 %v3890_v61  ;;  %v760_v57 = vld [vmem:[#allocation8 + $0x138] sm:$0xff]  ;;  %v3910_v61 = vpack.c.bf16 %v758_v54, %v754_v53  ;;  %v154_v50 = vld [vmem:[#allocation2 + $0x88] sm:$0xff]  ;;  %v3990_v54 = vpack.c.bf16 %v1242_v49, %v1241_v48  ;;  %v161_v63 = vld [vmem:[#allocation2 + $0xc0] sm:$0xff] }
  0xbf   :  { %v3942_v1 = vpack.c.bf16 %v760_v57, %v756_v56  ;;  %v776_v21 = vld [vmem:[#allocation8 + $0x1b8] sm:$0xff]  ;;  %v155_v57 = vld [vmem:[#allocation2 + $0x90] sm:$0xff]  ;;  %v162_v62 = vld [vmem:[#allocation2 + $0xc8] sm:$0xff] }
  0xc0   :  { %3829 = vmatpush1.bf16.msra.mxu0 %v3828_v3  ;;  %v762_v3 = vld [vmem:[#allocation8 + $0x148] sm:$0xff]  ;;  %v3950_v29 = vpack.c.bf16 %v776_v21, %v772_v20  ;;  %v780_v34 = vld [vmem:[#allocation8 + $0x1d8] sm:$0xff]  ;;  %v1193_v6 = vld [vmem:[#allocation10] sm:$0xff] }
  0xc1   :  { %3893 = vmatpush1.bf16.msra.mxu1 %v3892_v4  ;;  %3895 = vmatprep.subr.bf16.mxu0 %v3894_v5  ;;  %v766_v4 = vld [vmem:[#allocation8 + $0x168] sm:$0xff]  ;;  %v145_v5 = vld [vmem:[#allocation2 + $0x40] sm:$0xff]  ;;  %v784_v35 = vld [vmem:[#allocation8 + $0x1f8] sm:$0xff] }
  0xc2   :  { %3927 = vmatprep.subr.bf16.mxu1 %v3926_v8  ;;  %v148_v8 = vld [vmem:[#allocation2 + $0x58] sm:$0xff]  ;;  %v3914_v11 = vpack.c.bf16 %v766_v4, %v762_v3  ;;  %v3954_v43 = vpack.c.bf16 %v784_v35, %v780_v34  ;;  %v166_v2 = vld [vmem:[#allocation2 + $0xe8] sm:$0xff]  ;;  %v165_v3 = vld [vmem:[#allocation2 + $0xe0] sm:$0xff] }
  0xc3   :  { %400 = vmatmul.mubr.f32.vlgmr.msra.gmra.mrb[0].mxu0 %v137_v13  ;;  %v152_v36 = vld [vmem:[#allocation2 + $0x78] sm:$0xff]  ;;  %v1194_v7 = vld [vmem:[#allocation10 + $0x8] sm:$0xff]  ;;  %v1227_v21 = vld [vmem:[#allocation10 + $0x110] sm:$0xff] }
  0xc4   :  { %561 = vmatmul.mubr.f32.vlgmr.msra.gmra.mrb[0].mxu1 %v137_v13  ;;  %3897 = vmatpush1.bf16.msra.mxu0 %v3896_v14  ;;  %v765_v13 = vld [vmem:[#allocation8 + $0x160] sm:$0xff]  ;;  %v763_v14 = vld [vmem:[#allocation8 + $0x150] sm:$0xff]  ;;  %v156_v56 = vld [vmem:[#allocation2 + $0x98] sm:$0xff] }
  0xc5   :  { %405 = vmatprep.mubr.f32.mxu0 %v140_v17  ;;  %566 = vmatprep.mubr.f32.mxu1 %v140_v17  ;;  %v770_v17 = vld [vmem:[#allocation8 + $0x188] sm:$0xff]  ;;  %v3948_v24 = vpack.c.bf16 %v767_v16, %v763_v14  ;;  %v164_v0 = vld [vmem:[#allocation2 + $0xd8] sm:$0xff]  ;;  %v1243_v14 = vld [vmem:[#allocation10 + $0x190] sm:$0xff]  ;;  %v3960_v16 = vpack.c.bf16 %v1194_v7, %v1193_v6 }
  0xc6   :  { %3929 = vmatpush1.bf16.msra.mxu1 %v3928_v18  ;;  %3899 = vmatprep.subr.bf16.mxu0 %v3898_v19  ;;  %v774_v18 = vld [vmem:[#allocation8 + $0x1a8] sm:$0xff]  ;;  %v147_v19 = vld [vmem:[#allocation2 + $0x50] sm:$0xff]  ;;  %v168_v4 = vld [vmem:[#allocation2 + $0xf8] sm:$0xff] }
  0xc7   :  { %406 = vmatmul.mubr.f32.gmra.mrb[2].mxu0 %v139_v27  ;;  %3931 = vmatprep.subr.bf16.mxu1 %v3930_v23  ;;  %v3916_v23 = vpack.c.bf16 %v765_v13, %v761_v12  ;;  %v3918_v25 = vpack.c.bf16 %v774_v18, %v770_v17  ;;  %v4624_v12 = vmov 0.0   ;;  %v169_v13 = vld [vmem:[#allocation5] sm:$0xff]  ;;  %v1196_v20 = vld [vmem:[#allocation10 + $0x18] sm:$0xff]  ;;  %v1203_v7 = vld [vmem:[#allocation10 + $0x50] sm:$0xff] }
  0xc8   :  { %567 = vmatmul.mubr.f32.gmra.mrb[2].mxu1 %v139_v27  ;;  %411 = vmatprep.mubr.f32.mxu0 %v142_v30  ;;  %v773_v27 = vld [vmem:[#allocation8 + $0x1a0] sm:$0xff]  ;;  %v1232_v49 = vld [vmem:[#allocation10 + $0x138] sm:$0xff] }
  0xc9   :  { %572 = vmatprep.mubr.f32.mxu1 %v142_v30  ;;  %3901 = vmatpush1.bf16.msra.mxu0 %v3900_v31  ;;  %v775_v30 = vld [vmem:[#allocation8 + $0x1b0] sm:$0xff]  ;;  %v778_v31 = vld [vmem:[#allocation8 + $0x1c8] sm:$0xff]  ;;  %v1229_v34 = vld [vmem:[#allocation10 + $0x120] sm:$0xff] }
  0xca   :  { %3933 = vmatpush1.bf16.msra.mxu1 %v3932_v32  ;;  %3903 = vmatprep.subr.bf16.mxu0 %v3902_v33  ;;  %v782_v32 = vld [vmem:[#allocation8 + $0x1e8] sm:$0xff]  ;;  %v149_v33 = vld [vmem:[#allocation2 + $0x60] sm:$0xff]  ;;  %v3952_v38 = vpack.c.bf16 %v775_v30, %v771_v28 }
  0xcb   :  { %412 = vmatmul.mubr.f32.gmra.mrb[4].mxu0 %v141_v41  ;;  %3935 = vmatprep.subr.bf16.mxu1 %v3934_v37  ;;  %v3920_v37 = vpack.c.bf16 %v773_v27, %v769_v26  ;;  %v3922_v39 = vpack.c.bf16 %v782_v32, %v778_v31  ;;  %v170_v26 = vld [vmem:[#allocation5 + $0x8] sm:$0xff]  ;;  %v1245_v27 = vld [vmem:[#allocation10 + $0x1a0] sm:$0xff] }
  0xcc   :  { %573 = vmatmul.mubr.f32.gmra.mrb[4].mxu1 %v141_v41  ;;  %417 = vmatprep.mubr.f32.mxu0 %v144_v44  ;;  %v781_v41 = vld [vmem:[#allocation8 + $0x1e0] sm:$0xff]  ;;  %v1246_v28 = vld [vmem:[#allocation10 + $0x1a8] sm:$0xff] }
  0xcd   :  { %578 = vmatprep.mubr.f32.mxu1 %v144_v44  ;;  %3905 = vmatpush1.bf16.msra.mxu0 %v3904_v45  ;;  %v783_v44 = vld [vmem:[#allocation8 + $0x1f0] sm:$0xff]  ;;  %v1209_v45 = vld [vmem:[#allocation10 + $0x80] sm:$0xff]  ;;  %v3998_v35 = vpack.c.bf16 %v1246_v28, %v1245_v27  ;;  %v1224_v27 = vld [vmem:[#allocation10 + $0xf8] sm:$0xff] }
  0xce   :  { %3937 = vmatpush1.bf16.msra.mxu1 %v3936_v46  ;;  %3907 = vmatprep.subr.bf16.mxu0 %v3906_v47  ;;  %v1210_v46 = vld [vmem:[#allocation10 + $0x88] sm:$0xff]  ;;  %v151_v47 = vld [vmem:[#allocation2 + $0x70] sm:$0xff]  ;;  %v3956_v52 = vpack.c.bf16 %v783_v44, %v779_v42  ;;  %v1197_v32 = vld [vmem:[#allocation10 + $0x20] sm:$0xff] }
  0xcf   :  { %418 = vmatmul.mubr.f32.gmra.mrb[6].mxu0 %v143_v55  ;;  %3939 = vmatprep.subr.bf16.mxu1 %v3938_v51  ;;  %v3924_v51 = vpack.c.bf16 %v781_v41, %v777_v40  ;;  %v3958_v53 = vpack.c.bf16 %v1210_v46, %v1209_v45  ;;  %v1247_v40 = vld [vmem:[#allocation10 + $0x1b0] sm:$0xff]  ;;  %v1248_v41 = vld [vmem:[#allocation10 + $0x1b8] sm:$0xff] }
  0xd0   :  { %579 = vmatmul.mubr.f32.gmra.mrb[6].mxu1 %v143_v55  ;;  %423 = vmatprep.mubr.f32.mxu0 %v146_v58  ;;  %v153_v55 = vld [vmem:[#allocation2 + $0x80] sm:$0xff]  ;;  %v1199_v45 = vld [vmem:[#allocation10 + $0x30] sm:$0xff]  ;;  %v1200_v46 = vld [vmem:[#allocation10 + $0x38] sm:$0xff]  ;;  %v4002_v48 = vpack.c.bf16 %v1248_v41, %v1247_v40 }
  0xd1   :  { %584 = vmatprep.mubr.f32.mxu1 %v146_v58  ;;  %3909 = vmatpush1.bf16.msra.mxu0 %v3908_v59  ;;  %v158_v58 = vld [vmem:[#allocation2 + $0xa8] sm:$0xff]  ;;  %v157_v59 = vld [vmem:[#allocation2 + $0xa0] sm:$0xff]  ;;  %v175_v28 = vld [vmem:[#allocation5 + $0x30] sm:$0xff] }
  0xd2   :  { %3941 = vmatpush1.bf16.msra.mxu1 %v3940_v60  ;;  %3911 = vmatprep.subr.bf16.mxu0 %v3910_v61  ;;  %v160_v60 = vld [vmem:[#allocation2 + $0xb8] sm:$0xff]  ;;  %v159_v61 = vld [vmem:[#allocation2 + $0xb0] sm:$0xff] }
  0xd3   :  { %424 = vmatmul.mubr.f32.gmra.mrb[8].mxu0 %v145_v5  ;;  %3943 = vmatprep.subr.bf16.mxu1 %v3942_v1  ;;  %v163_v1 = vld [vmem:[#allocation2 + $0xd0] sm:$0xff] }
  0xd4   :  { %585 = vmatmul.mubr.f32.gmra.mrb[8].mxu1 %v145_v5  ;;  %429 = vmatprep.mubr.f32.mxu0 %v148_v8  ;;  %v167_v5 = vld [vmem:[#allocation2 + $0xf0] sm:$0xff] }
  0xd5   :  { %590 = vmatprep.mubr.f32.mxu1 %v148_v8  ;;  %3913 = vmatpush1.bf16.msra.mxu0 %v3912_v9  ;;  %v1225_v8 = vld [vmem:[#allocation10 + $0x100] sm:$0xff]  ;;  %v1226_v9 = vld [vmem:[#allocation10 + $0x108] sm:$0xff] }
  0xd6   :  { %3945 = vmatpush1.bf16.msra.mxu1 %v3944_v10  ;;  %3915 = vmatprep.subr.bf16.mxu0 %v3914_v11  ;;  %v1211_v10 = vld [vmem:[#allocation10 + $0x90] sm:$0xff]  ;;  %v1212_v11 = vld [vmem:[#allocation10 + $0x98] sm:$0xff]  ;;  %v3992_v17 = vpack.c.bf16 %v1226_v9, %v1225_v8 }
  0xd7   :  { %430 = vmatmul.mubr.f32.gmra.mrb[10].mxu0 %v147_v19  ;;  %3947 = vmatprep.subr.bf16.mxu1 %v3946_v15  ;;  %v1244_v15 = vld [vmem:[#allocation10 + $0x198] sm:$0xff]  ;;  %v3962_v18 = vpack.c.bf16 %v1212_v11, %v1211_v10  ;;  %v1235_v9 = vld [vmem:[#allocation10 + $0x150] sm:$0xff] }
  0xd8   :  { %591 = vmatmul.mubr.f32.gmra.mrb[10].mxu1 %v147_v19  ;;  %435 = vmatprep.mubr.f32.mxu0 %v150_v22  ;;  %v1195_v19 = vld [vmem:[#allocation10 + $0x10] sm:$0xff]  ;;  %v1204_v8 = vld [vmem:[#allocation10 + $0x58] sm:$0xff] }
  0xd9   :  { %596 = vmatprep.mubr.f32.mxu1 %v150_v22  ;;  %3917 = vmatpush1.bf16.msra.mxu0 %v3916_v23  ;;  %v3994_v22 = vpack.c.bf16 %v1244_v15, %v1243_v14  ;;  %v1228_v23 = vld [vmem:[#allocation10 + $0x118] sm:$0xff]  ;;  %v1222_v14 = vld [vmem:[#allocation10 + $0xe8] sm:$0xff] }
  0xda   :  { %3949 = vmatpush1.bf16.msra.mxu1 %v3948_v24  ;;  %3919 = vmatprep.subr.bf16.mxu0 %v3918_v25  ;;  %v1213_v24 = vld [vmem:[#allocation10 + $0xa0] sm:$0xff]  ;;  %v1214_v25 = vld [vmem:[#allocation10 + $0xa8] sm:$0xff]  ;;  %v3996_v30 = vpack.c.bf16 %v1228_v23, %v1227_v21  ;;  %v1236_v11 = vld [vmem:[#allocation10 + $0x158] sm:$0xff] }
  0xdb   :  { %436 = vmatmul.mubr.f32.gmra.mrb[12].mxu0 %v149_v33  ;;  %3951 = vmatprep.subr.bf16.mxu1 %v3950_v29  ;;  %v3964_v29 = vpack.c.bf16 %v1196_v20, %v1195_v19  ;;  %v3966_v31 = vpack.c.bf16 %v1214_v25, %v1213_v24  ;;  %v174_v15 = vld [vmem:[#allocation5 + $0x28] sm:$0xff]  ;;  %v4012_v19 = vpack.c.bf16 %v1236_v11, %v1235_v9  ;;  %v1205_v21 = vld [vmem:[#allocation10 + $0x60] sm:$0xff] }
  0xdc   :  { %597 = vmatmul.mubr.f32.gmra.mrb[12].mxu1 %v149_v33  ;;  %441 = vmatprep.mubr.f32.mxu0 %v152_v36  ;;  %v1198_v33 = vld [vmem:[#allocation10 + $0x28] sm:$0xff]  ;;  %v1237_v23 = vld [vmem:[#allocation10 + $0x160] sm:$0xff] }
  0xdd   :  { %602 = vmatprep.mubr.f32.mxu1 %v152_v36  ;;  %3921 = vmatpush1.bf16.msra.mxu0 %v3920_v37  ;;  %v1230_v36 = vld [vmem:[#allocation10 + $0x128] sm:$0xff]  ;;  %v1215_v37 = vld [vmem:[#allocation10 + $0xb0] sm:$0xff]  ;;  %v3968_v42 = vpack.c.bf16 %v1198_v33, %v1197_v32  ;;  %v1289_v9 = vld [vmem:[#allocation10 + $0x300] sm:$0xff] }
  0xde   :  { %3953 = vmatpush1.bf16.msra.mxu1 %v3952_v38  ;;  %3923 = vmatprep.subr.bf16.mxu0 %v3922_v39  ;;  %v1216_v38 = vld [vmem:[#allocation10 + $0xb8] sm:$0xff]  ;;  %v171_v39 = vld [vmem:[#allocation5 + $0x10] sm:$0xff]  ;;  %v1238_v25 = vld [vmem:[#allocation10 + $0x168] sm:$0xff] }
  0xdf   :  { %442 = vmatmul.mubr.f32.gmra.mrb[14].mxu0 %v151_v47  ;;  %3955 = vmatprep.subr.bf16.mxu1 %v3954_v43  ;;  %v4000_v43 = vpack.c.bf16 %v1230_v36, %v1229_v34  ;;  %v3970_v44 = vpack.c.bf16 %v1216_v38, %v1215_v37  ;;  %v4016_v32 = vpack.c.bf16 %v1238_v25, %v1237_v23  ;;  %v1207_v34 = vld [vmem:[#allocation10 + $0x70] sm:$0xff]  ;;  %v1240_v38 = vld [vmem:[#allocation10 + $0x178] sm:$0xff] }
  0xe0   :  { %603 = vmatmul.mubr.f32.gmra.mrb[14].mxu1 %v151_v47  ;;  %447 = vmatprep.mubr.f32.mxu0 %v154_v50  ;;  %v1231_v47 = vld [vmem:[#allocation10 + $0x130] sm:$0xff] }
  0xe1   :  { %608 = vmatprep.mubr.f32.mxu1 %v154_v50  ;;  %3925 = vmatpush1.bf16.msra.mxu0 %v3924_v51  ;;  %v1217_v50 = vld [vmem:[#allocation10 + $0xc0] sm:$0xff]  ;;  %v1218_v51 = vld [vmem:[#allocation10 + $0xc8] sm:$0xff]  ;;  %v1239_v37 = vld [vmem:[#allocation10 + $0x170] sm:$0xff] }
  0xe2   :  { %3957 = vmatpush1.bf16.msra.mxu1 %v3956_v52  ;;  %3959 = vmatprep.subr.bf16.mxu0 %v3958_v53  ;;  %v172_v52 = vld [vmem:[#allocation5 + $0x18] sm:$0xff]  ;;  %v1249_v53 = vld [vmem:[#allocation10 + $0x1c0] sm:$0xff]  ;;  %v4020_v41 = vpack.c.bf16 %v1240_v38, %v1239_v37  ;;  %v1259_v25 = vld [vmem:[#allocation10 + $0x210] sm:$0xff] }
  0xe3   :  { %448 = vmatmul.mubr.f32.gmra.mrb[16].mxu0 %v153_v55  ;;  %3991 = vmatprep.subr.bf16.mxu1 %v3990_v54  ;;  %v1250_v54 = vld [vmem:[#allocation10 + $0x1c8] sm:$0xff] }
  0xe4   :  { %609 = vmatmul.mubr.f32.gmra.mrb[16].mxu1 %v153_v55  ;;  %453 = vmatprep.mubr.f32.mxu0 %v156_v56  ;;  %v3972_v55 = vpack.c.bf16 %v1200_v46, %v1199_v45  ;;  %v1305_v46 = vld [vmem:[#allocation10 + $0x380] sm:$0xff] }
  0xe5   :  { %614 = vmatprep.mubr.f32.mxu1 %v156_v56  ;;  %v4004_v56 = vpack.c.bf16 %v1232_v49, %v1231_v47  ;;  %v1306_v47 = vld [vmem:[#allocation10 + $0x388] sm:$0xff] }
  0xe6   :  { %v4054_v49 = vpack.c.bf16 %v1306_v47, %v1305_v46 }
  0xe7   :  { %454 = vmatmul.mubr.f32.gmra.mrb[18].mxu0 %v155_v57 }
  0xe8   :  { %615 = vmatmul.mubr.f32.gmra.mrb[18].mxu1 %v155_v57  ;;  %459 = vmatprep.mubr.f32.mxu0 %v158_v58  ;;  %v3974_v57 = vpack.c.bf16 %v1218_v51, %v1217_v50  ;;  %v179_v50 = vld [vmem:[#allocation5 + $0x50] sm:$0xff]  ;;  %v180_v51 = vld [vmem:[#allocation5 + $0x58] sm:$0xff] }
  0xe9   :  { %620 = vmatprep.mubr.f32.mxu1 %v158_v58  ;;  %v1201_v58 = vld [vmem:[#allocation10 + $0x40] sm:$0xff] }
  0xeb   :  { %460 = vmatmul.mubr.f32.gmra.mrb[20].mxu0 %v157_v59 }
  0xec   :  { %621 = vmatmul.mubr.f32.gmra.mrb[20].mxu1 %v157_v59  ;;  %465 = vmatprep.mubr.f32.mxu0 %v160_v60  ;;  %v1202_v59 = vld [vmem:[#allocation10 + $0x48] sm:$0xff] }
  0xed   :  { %626 = vmatprep.mubr.f32.mxu1 %v160_v60  ;;  %v1233_v60 = vld [vmem:[#allocation10 + $0x140] sm:$0xff] }
  0xef   :  { %466 = vmatmul.mubr.f32.gmra.mrb[22].mxu0 %v159_v61 }
  0xf0   :  { %627 = vmatmul.mubr.f32.gmra.mrb[22].mxu1 %v159_v61  ;;  %471 = vmatprep.mubr.f32.mxu0 %v162_v62  ;;  %v4006_v61 = vpack.c.bf16 %v1250_v54, %v1249_v53  ;;  %v182_v53 = vld [vmem:[#allocation5 + $0x68] sm:$0xff]  ;;  %v183_v54 = vld [vmem:[#allocation5 + $0x70] sm:$0xff] }
  0xf1   :  { %632 = vmatprep.mubr.f32.mxu1 %v162_v62  ;;  %v1234_v62 = vld [vmem:[#allocation10 + $0x148] sm:$0xff] }
  0xf3   :  { %472 = vmatmul.mubr.f32.gmra.mrb[24].mxu0 %v161_v63 }
  0xf4   :  { %633 = vmatmul.mubr.f32.gmra.mrb[24].mxu1 %v161_v63  ;;  %477 = vmatprep.mubr.f32.mxu0 %v164_v0  ;;  %v1219_v63 = vld [vmem:[#allocation10 + $0xd0] sm:$0xff] }
  0xf5   :  { %638 = vmatprep.mubr.f32.mxu1 %v164_v0  ;;  %v1220_v0 = vld [vmem:[#allocation10 + $0xd8] sm:$0xff] }
  0xf6   :  { %v3978_v6 = vpack.c.bf16 %v1220_v0, %v1219_v63 }
  0xf7   :  { %478 = vmatmul.mubr.f32.gmra.mrb[26].mxu0 %v163_v1 }
  0xf8   :  { %639 = vmatmul.mubr.f32.gmra.mrb[26].mxu1 %v163_v1  ;;  %483 = vmatprep.mubr.f32.mxu0 %v166_v2  ;;  %v173_v1 = vld [vmem:[#allocation5 + $0x20] sm:$0xff] }
  0xf9   :  { %644 = vmatprep.mubr.f32.mxu1 %v166_v2  ;;  %v1251_v2 = vld [vmem:[#allocation10 + $0x1d0] sm:$0xff] }
  0xfb   :  { %484 = vmatmul.mubr.f32.gmra.mrb[28].mxu0 %v165_v3 }
  0xfc   :  { %645 = vmatmul.mubr.f32.gmra.mrb[28].mxu1 %v165_v3  ;;  %489 = vmatprep.mubr.f32.mxu0 %v168_v4  ;;  %v1252_v3 = vld [vmem:[#allocation10 + $0x1d8] sm:$0xff] }
  0xfd   :  { %650 = vmatprep.mubr.f32.mxu1 %v168_v4  ;;  %v3976_v4 = vpack.c.bf16 %v1202_v59, %v1201_v58  ;;  %v4010_v10 = vpack.c.bf16 %v1252_v3, %v1251_v2  ;;  %v313_v59 = vld [vmem:[%s5403_s3] sm:$0xf] }
  0xff   :  { %490 = vmatmul.mubr.f32.gmra.mrb[30].mxu0 %v167_v5 }
 0x100   :  { %651 = vmatmul.mubr.f32.gmra.mrb[30].mxu1 %v167_v5  ;;  %871 = vmatprep.mubr.f32.mxu0 %v4624_v12  ;;  %v4008_v5 = vpack.c.bf16 %v1234_v62, %v1233_v60 }
 0x101   :  { %1032 = vmatprep.mubr.f32.mxu1 %v4624_v12 }
 0x103   :  { %872 = vmatmul.mubr.f32.vlgmr.msra.gmra.mrb[32].mxu0 %v169_v13 }
 0x104   :  { %1033 = vmatmul.mubr.f32.vlgmr.msra.gmra.mrb[32].mxu1 %v169_v13  ;;  %877 = vmatprep.mubr.f32.mxu0 %v4624_v12  ;;  %v1221_v13 = vld [vmem:[#allocation10 + $0xe0] sm:$0xff] }
 0x105   :  { %1038 = vmatprep.mubr.f32.mxu1 %v4624_v12  ;;  %3961 = vmatpush3.bf16.msra.mxu0 %v3960_v16  ;;  %v1253_v16 = vld [vmem:[#allocation10 + $0x1e0] sm:$0xff]  ;;  %v3982_v20 = vpack.c.bf16 %v1222_v14, %v1221_v13 }
 0x106   :  { %3993 = vmatpush3.bf16.msra.mxu1 %v3992_v17  ;;  %3963 = vmatprep.subr.bf16.mxu0 %v3962_v18  ;;  %v1254_v17 = vld [vmem:[#allocation10 + $0x1e8] sm:$0xff]  ;;  %v3980_v18 = vpack.c.bf16 %v1204_v8, %v1203_v7 }
 0x107   :  { %878 = vmatmul.mubr.f32.gmra.mrb[34].mxu0 %v170_v26  ;;  %3995 = vmatprep.subr.bf16.mxu1 %v3994_v22  ;;  %v1206_v22 = vld [vmem:[#allocation10 + $0x68] sm:$0xff]  ;;  %v4014_v24 = vpack.c.bf16 %v1254_v17, %v1253_v16  ;;  %v1276_v16 = vld [vmem:[#allocation10 + $0x298] sm:$0xff] }
 0x108   :  { %1039 = vmatmul.mubr.f32.gmra.mrb[34].mxu1 %v170_v26  ;;  %883 = vmatprep.mubr.f32.mxu0 %v4624_v12  ;;  %v1223_v26 = vld [vmem:[#allocation10 + $0xf0] sm:$0xff]  ;;  %v1258_v8 = vld [vmem:[#allocation10 + $0x208] sm:$0xff] }
 0x109   :  { %1044 = vmatprep.mubr.f32.mxu1 %v4624_v12  ;;  %3965 = vmatpush3.bf16.msra.mxu0 %v3964_v29  ;;  %v1255_v29 = vld [vmem:[#allocation10 + $0x1f0] sm:$0xff]  ;;  %v3986_v33 = vpack.c.bf16 %v1224_v27, %v1223_v26  ;;  %v1260_v26 = vld [vmem:[#allocation10 + $0x218] sm:$0xff] }
 0x10a   :  { %3997 = vmatpush3.bf16.msra.mxu1 %v3996_v30  ;;  %3967 = vmatprep.subr.bf16.mxu0 %v3966_v31  ;;  %v1256_v30 = vld [vmem:[#allocation10 + $0x1f8] sm:$0xff]  ;;  %v3984_v31 = vpack.c.bf16 %v1206_v22, %v1205_v21  ;;  %v4028_v47 = vpack.c.bf16 %v1260_v26, %v1259_v25  ;;  %v1295_v26 = vld [vmem:[#allocation10 + $0x330] sm:$0xff] }
 0x10b   :  { %884 = vmatmul.mubr.f32.gmra.mrb[36].mxu0 %v171_v39  ;;  %3999 = vmatprep.subr.bf16.mxu1 %v3998_v35  ;;  %v1208_v35 = vld [vmem:[#allocation10 + $0x78] sm:$0xff]  ;;  %v4018_v36 = vpack.c.bf16 %v1256_v30, %v1255_v29 }
 0x10c   :  { %1045 = vmatmul.mubr.f32.gmra.mrb[36].mxu1 %v171_v39  ;;  %889 = vmatprep.mubr.f32.mxu0 %v4624_v12  ;;  %v176_v39 = vld [vmem:[#allocation5 + $0x38] sm:$0xff]  ;;  %v3988_v40 = vpack.c.bf16 %v1208_v35, %v1207_v34 }
 0x10d   :  { %1050 = vmatprep.mubr.f32.mxu1 %v4624_v12  ;;  %3969 = vmatpush3.bf16.msra.mxu0 %v3968_v42  ;;  %v1273_v42 = vld [vmem:[#allocation10 + $0x280] sm:$0xff]  ;;  %v1292_v34 = vld [vmem:[#allocation10 + $0x318] sm:$0xff] }
 0x10e   :  { %4001 = vmatpush3.bf16.msra.mxu1 %v4000_v43  ;;  %3971 = vmatprep.subr.bf16.mxu0 %v3970_v44  ;;  %v1274_v43 = vld [vmem:[#allocation10 + $0x288] sm:$0xff]  ;;  %v177_v44 = vld [vmem:[#allocation5 + $0x40] sm:$0xff] }
 0x10f   :  { %890 = vmatmul.mubr.f32.gmra.mrb[38].mxu0 %v172_v52  ;;  %4003 = vmatprep.subr.bf16.mxu1 %v4002_v48  ;;  %v4022_v45 = vpack.c.bf16 %v1274_v43, %v1273_v42  ;;  %v178_v48 = vld [vmem:[#allocation5 + $0x48] sm:$0xff]  ;;  %v1309_v42 = vld [vmem:[#allocation10 + $0x3a0] sm:$0xff] }
 0x110   :  { %1051 = vmatmul.mubr.f32.gmra.mrb[38].mxu1 %v172_v52  ;;  %895 = vmatprep.mubr.f32.mxu0 %v4624_v12  ;;  %v181_v52 = vld [vmem:[#allocation5 + $0x60] sm:$0xff]  ;;  %v1310_v43 = vld [vmem:[#allocation10 + $0x3a8] sm:$0xff] }
 0x111   :  { %1056 = vmatprep.mubr.f32.mxu1 %v4624_v12  ;;  %3973 = vmatpush3.bf16.msra.mxu0 %v3972_v55  ;;  %v184_v55 = vld [vmem:[#allocation5 + $0x78] sm:$0xff] }
 0x112   :  { %4005 = vmatpush3.bf16.msra.mxu1 %v4004_v56  ;;  %3975 = vmatprep.subr.bf16.mxu0 %v3974_v57  ;;  %v315_v56 = vlaneseq }
 0x113   :  { %896 = vmatmul.mubr.f32.gmra.mrb[40].mxu0 %v173_v1  ;;  %4007 = vmatprep.subr.bf16.mxu1 %v4006_v61 }
 0x114   :  { %1057 = vmatmul.mubr.f32.gmra.mrb[40].mxu1 %v173_v1  ;;  %901 = vmatprep.mubr.f32.mxu0 %v4624_v12  ;;  %v316_v57 = vshrl.u32 %v315_v56, 7 }
 0x115   :  { %1062 = vmatprep.mubr.f32.mxu1 %v4624_v12  ;;  %3977 = vmatpush3.bf16.msra.mxu0 %v3976_v4  ;;  %v1257_v4 = vld [vmem:[#allocation10 + $0x200] sm:$0xff] }
 0x116   :  { %4009 = vmatpush3.bf16.msra.mxu1 %v4008_v5  ;;  %3979 = vmatprep.subr.bf16.mxu0 %v3978_v6  ;;  %v4832_v58 = vsub.s32 0, %v316_v57  ;;  %v4837_v60 = vsub.s32 2, %v316_v57  ;;  %v4839_v61 = vsub.s32 1, %v316_v57  ;;  %v4841_v62 = vsub.s32 3, %v316_v57  ;;  %v1293_v57 = vld [vmem:[#allocation10 + $0x320] sm:$0xff] }
 0x117   :  { %902 = vmatmul.mubr.f32.gmra.mrb[42].mxu0 %v174_v15  ;;  %4011 = vmatprep.subr.bf16.mxu1 %v4010_v10  ;;  %v1290_v10 = vld [vmem:[#allocation10 + $0x308] sm:$0xff]  ;;  %v4024_v23 = vpack.c.bf16 %v1258_v8, %v1257_v4  ;;  %v1280_v8 = vld [vmem:[#allocation10 + $0x2b8] sm:$0xff] }
 0x118   :  { %1063 = vmatmul.mubr.f32.gmra.mrb[42].mxu1 %v174_v15  ;;  %907 = vmatprep.mubr.f32.mxu0 %v4624_v12  ;;  %v4844_v63 = vrot.slane %v313_v59, %v4832_v58  ;;  %v4847_v0 = vrot.slane %v313_v59, %v4837_v60  ;;  %v4850_v1 = vrot.slane %v313_v59, %v4839_v61  ;;  %v1275_v15 = vld [vmem:[#allocation10 + $0x290] sm:$0xff] }
 0x119   :  { %1068 = vmatprep.mubr.f32.mxu1 %v4624_v12  ;;  %3981 = vmatpush3.bf16.msra.mxu0 %v3980_v18  ;;  %v4853_v2 = vrot.slane %v313_v59, %v4841_v62  ;;  %v1307_v18 = vld [vmem:[#allocation10 + $0x390] sm:$0xff]  ;;  %v1294_v59 = vld [vmem:[#allocation10 + $0x328] sm:$0xff] }
 0x11a   :  { %4013 = vmatpush3.bf16.msra.mxu1 %v4012_v19  ;;  %3983 = vmatprep.subr.bf16.mxu0 %v3982_v20  ;;  %v1308_v19 = vld [vmem:[#allocation10 + $0x398] sm:$0xff] }
 0x11b   :  { %908 = vmatmul.mubr.f32.gmra.mrb[44].mxu0 %v175_v28  ;;  %4015 = vmatprep.subr.bf16.mxu1 %v4014_v24  ;;  %v4056_v24 = vpack.c.bf16 %v1290_v10, %v1289_v9  ;;  %v4058_v38 = vpack.c.bf16 %v1308_v19, %v1307_v18  ;;  %v1311_v10 = vld [vmem:[#allocation10 + $0x3b0] sm:$0xff]  ;;  %v1264_v19 = vld [vmem:[#allocation10 + $0x238] sm:$0xff] }
 0x11c   :  { %1069 = vmatmul.mubr.f32.gmra.mrb[44].mxu1 %v175_v28  ;;  %913 = vmatprep.mubr.f32.mxu0 %v4624_v12  ;;  %v1263_v18 = vld [vmem:[#allocation10 + $0x230] sm:$0xff] }
 0x11d   :  { %1074 = vmatprep.mubr.f32.mxu1 %v4624_v12  ;;  %3985 = vmatpush3.bf16.msra.mxu0 %v3984_v31 }
 0x11e   :  { %4017 = vmatpush3.bf16.msra.mxu1 %v4016_v32  ;;  %3987 = vmatprep.subr.bf16.mxu0 %v3986_v33  ;;  %v4026_v32 = vpack.c.bf16 %v1276_v16, %v1275_v15  ;;  %v1291_v33 = vld [vmem:[#allocation10 + $0x310] sm:$0xff] }
 0x11f   :  { %914 = vmatmul.mubr.f32.gmra.mrb[46].mxu0 %v176_v39  ;;  %4019 = vmatprep.subr.bf16.mxu1 %v4018_v36 }
 0x120   :  { %1075 = vmatmul.mubr.f32.gmra.mrb[46].mxu1 %v176_v39  ;;  %919 = vmatprep.mubr.f32.mxu0 %v4624_v12  ;;  %v1277_v39 = vld [vmem:[#allocation10 + $0x2a0] sm:$0xff] }
 0x121   :  { %1080 = vmatprep.mubr.f32.mxu1 %v4624_v12  ;;  %3989 = vmatpush3.bf16.msra.mxu0 %v3988_v40  ;;  %v1278_v40 = vld [vmem:[#allocation10 + $0x2a8] sm:$0xff] }
 0x122   :  { %4021 = vmatpush3.bf16.msra.mxu1 %v4020_v41  ;;  %4023 = vmatprep.subr.bf16.mxu0 %v4022_v45  ;;  %v4030_v56 = vpack.c.bf16 %v1278_v40, %v1277_v39  ;;  %v4036_v40 = vpack.c.bf16 %v1264_v19, %v1263_v18  ;;  %v1299_v19 = vld [vmem:[#allocation10 + $0x350] sm:$0xff] }
 0x123   :  { %920 = vmatmul.mubr.f32.gmra.mrb[48].mxu0 %v177_v44  ;;  %4055 = vmatprep.subr.bf16.mxu1 %v4054_v49  ;;  %v1261_v49 = vld [vmem:[#allocation10 + $0x220] sm:$0xff] }
 0x124   :  { %1081 = vmatmul.mubr.f32.gmra.mrb[48].mxu1 %v177_v44  ;;  %925 = vmatprep.mubr.f32.mxu0 %v4624_v12 }
 0x125   :  { %1086 = vmatprep.mubr.f32.mxu1 %v4624_v12 }
 0x127   :  { %926 = vmatmul.mubr.f32.gmra.mrb[50].mxu0 %v178_v48 }
 0x128   :  { %1087 = vmatmul.mubr.f32.gmra.mrb[50].mxu1 %v178_v48  ;;  %931 = vmatprep.mubr.f32.mxu0 %v4624_v12  ;;  %v4060_v48 = vpack.c.bf16 %v1292_v34, %v1291_v33  ;;  %v1282_v33 = vld [vmem:[#allocation10 + $0x2c8] sm:$0xff] }
 0x129   :  { %1092 = vmatprep.mubr.f32.mxu1 %v4624_v12 }
 0x12b   :  { %932 = vmatmul.mubr.f32.gmra.mrb[52].mxu0 %v179_v50 }
 0x12c   :  { %1093 = vmatmul.mubr.f32.gmra.mrb[52].mxu1 %v179_v50  ;;  %937 = vmatprep.mubr.f32.mxu0 %v4624_v12  ;;  %v1262_v50 = vld [vmem:[#allocation10 + $0x228] sm:$0xff] }
 0x12d   :  { %1098 = vmatprep.mubr.f32.mxu1 %v4624_v12  ;;  %v4032_v16 = vpack.c.bf16 %v1262_v50, %v1261_v49  ;;  %v1297_v50 = vld [vmem:[#allocation10 + $0x340] sm:$0xff] }
 0x12f   :  { %938 = vmatmul.mubr.f32.gmra.mrb[54].mxu0 %v180_v51 }
 0x130   :  { %1099 = vmatmul.mubr.f32.gmra.mrb[54].mxu1 %v180_v51  ;;  %943 = vmatprep.mubr.f32.mxu0 %v4624_v12 }
 0x131   :  { %1104 = vmatprep.mubr.f32.mxu1 %v4624_v12 }
 0x133   :  { %944 = vmatmul.mubr.f32.gmra.mrb[56].mxu0 %v181_v52 }
 0x134   :  { %1105 = vmatmul.mubr.f32.gmra.mrb[56].mxu1 %v181_v52  ;;  %949 = vmatprep.mubr.f32.mxu0 %v4624_v12 }
 0x135   :  { %1110 = vmatprep.mubr.f32.mxu1 %v4624_v12 }
 0x137   :  { %950 = vmatmul.mubr.f32.gmra.mrb[58].mxu0 %v182_v53 }
 0x138   :  { %1111 = vmatmul.mubr.f32.gmra.mrb[58].mxu1 %v182_v53  ;;  %955 = vmatprep.mubr.f32.mxu0 %v4624_v12 }
 0x139   :  { %1116 = vmatprep.mubr.f32.mxu1 %v4624_v12 }
 0x13b   :  { %956 = vmatmul.mubr.f32.gmra.mrb[60].mxu0 %v183_v54 }
 0x13c   :  { %1117 = vmatmul.mubr.f32.gmra.mrb[60].mxu1 %v183_v54  ;;  %961 = vmatprep.mubr.f32.mxu0 %v4624_v12 }
 0x13d   :  { %1122 = vmatprep.mubr.f32.mxu1 %v4624_v12 }
 0x13f   :  { %962 = vmatmul.mubr.f32.gmra.mrb[62].mxu0 %v184_v55 }
 0x140   :  { %1123 = vmatmul.mubr.f32.gmra.mrb[62].mxu1 %v184_v55 }
 0x196   :  { %v401_v3 = vpop.f32.mrb[0].mxu0 }
 0x197   :  { %v402_v5 = vadd.f32 %v401_v3, %v4844_v63  ;;  %v562_v6 = vpop.f32.mrb[0].mxu1  ;;  %v403_v7 = vpop.f32.mrb[1].mxu0 }
 0x198   :  { %v563_v11 = vadd.f32 %v562_v6, %v4847_v0  ;;  %v404_v13 = vadd.f32 %v403_v7, %v4850_v1  ;;  %v564_v14 = vpop.f32.mrb[1].mxu1  ;;  %v4062_v6 = vpack.c.bf16 %v1310_v43, %v1309_v42  ;;  %v1279_v7 = vld [vmem:[#allocation10 + $0x2b0] sm:$0xff]  ;;  %v1265_v42 = vld [vmem:[#allocation10 + $0x240] sm:$0xff]  ;;  %v1266_v43 = vld [vmem:[#allocation10 + $0x248] sm:$0xff] }
 0x199   :  { %v565_v17 = vadd.f32 %v564_v14, %v4853_v2  ;;  %v657_v27 = vmax.f32 %v402_v5, 0.0  ;;  %v4034_v25 = vpack.c.bf16 %v1280_v8, %v1279_v7  ;;  %v4040_v8 = vpack.c.bf16 %v1266_v43, %v1265_v42  ;;  %v1301_v43 = vld [vmem:[#allocation10 + $0x360] sm:$0xff] }
 0x19a   :  { %v659_v20 = vmax.f32 %v563_v11, 0.0  ;;  %v658_v21 = vmax.f32 %v404_v13, 0.0  ;;  %v407_v22 = vpop.f32.mrb[2].mxu0  ;;  %v1312_v11 = vld [vmem:[#allocation10 + $0x3b8] sm:$0xff] }
 0x19b   :  { %v660_v28 = vmax.f32 %v565_v17, 0.0  ;;  %v408_v29 = vadd.f32 %v407_v22, %v4844_v63  ;;  %v568_v30 = vpop.f32.mrb[2].mxu1  ;;  %v409_v31 = vpop.f32.mrb[3].mxu0  ;;  %v4064_v17 = vpack.c.bf16 %v1294_v59, %v1293_v57  ;;  %v1284_v57 = vld [vmem:[#allocation10 + $0x2d8] sm:$0xff] }
 0x19c   :  { %v569_v35 = vadd.f32 %v568_v30, %v4847_v0  ;;  %v410_v36 = vadd.f32 %v409_v31, %v4850_v1  ;;  %v570_v37 = vpop.f32.mrb[3].mxu1  ;;  %1392 = vmatprep.mubr.f32.mxu0 %v658_v21  ;;  %v4066_v31 = vpack.c.bf16 %v1312_v11, %v1311_v10  ;;  %v1267_v10 = vld [vmem:[#allocation10 + $0x250] sm:$0xff]  ;;  %v1268_v11 = vld [vmem:[#allocation10 + $0x258] sm:$0xff] }
 0x19d   :  { %v571_v41 = vadd.f32 %v570_v37, %v4853_v2  ;;  %1537 = vmatprep.mubr.f32.mxu1 %v660_v28  ;;  %1393 = vmatmul.mubr.f32.vlgmr.msra.gmra.mrb[64].mxu0 %v657_v27  ;;  %v661_v51 = vmax.f32 %v408_v29, 0.0  ;;  %v1296_v27 = vld [vmem:[#allocation10 + $0x338] sm:$0xff] }
 0x19e   :  { %v663_v44 = vmax.f32 %v569_v35, 0.0  ;;  %v662_v45 = vmax.f32 %v410_v36, 0.0  ;;  %1538 = vmatmul.mubr.f32.vlgmr.msra.gmra.mrb[64].mxu1 %v659_v20  ;;  %v413_v46 = vpop.f32.mrb[4].mxu0  ;;  %4025 = vmatpush3.bf16.msra.mxu0 %v4024_v23  ;;  %v1313_v35 = vld [vmem:[#allocation10 + $0x3c0] sm:$0xff]  ;;  %v1314_v36 = vld [vmem:[#allocation10 + $0x3c8] sm:$0xff] }
 0x19f   :  { %v664_v52 = vmax.f32 %v571_v41, 0.0  ;;  %v414_v53 = vadd.f32 %v413_v46, %v4844_v63  ;;  %v574_v54 = vpop.f32.mrb[4].mxu1  ;;  %v415_v55 = vpop.f32.mrb[5].mxu0  ;;  %4057 = vmatpush3.bf16.msra.mxu1 %v4056_v24  ;;  %4027 = vmatprep.subr.bf16.mxu0 %v4026_v32  ;;  %v1281_v32 = vld [vmem:[#allocation10 + $0x2c0] sm:$0xff]  ;;  %v4068_v41 = vpack.c.bf16 %v1296_v27, %v1295_v26  ;;  %v1286_v26 = vld [vmem:[#allocation10 + $0x2e8] sm:$0xff] }
 0x1a0   :  { %v575_v3 = vadd.f32 %v574_v54, %v4847_v0  ;;  %v416_v4 = vadd.f32 %v415_v55, %v4850_v1  ;;  %v576_v5 = vpop.f32.mrb[5].mxu1  ;;  %1397 = vmatprep.mubr.f32.mxu0 %v662_v45  ;;  %4059 = vmatprep.subr.bf16.mxu1 %v4058_v38  ;;  %v4038_v49 = vpack.c.bf16 %v1282_v33, %v1281_v32 }
 0x1a1   :  { %v577_v9 = vadd.f32 %v576_v5, %v4853_v2  ;;  %1542 = vmatprep.mubr.f32.mxu1 %v664_v52  ;;  %1398 = vmatmul.mubr.f32.gmra.mrb[66].mxu0 %v661_v51  ;;  %v665_v20 = vmax.f32 %v414_v53, 0.0  ;;  %v1298_v51 = vld [vmem:[#allocation10 + $0x348] sm:$0xff]  ;;  %v4070_v55 = vpack.c.bf16 %v1314_v36, %v1313_v35  ;;  %v4044_v33 = vpack.c.bf16 %v1268_v11, %v1267_v10  ;;  %v1269_v35 = vld [vmem:[#allocation10 + $0x260] sm:$0xff]  ;;  %v1272_v10 = vld [vmem:[#allocation10 + $0x278] sm:$0xff] }
 0x1a2   :  { %v667_v13 = vmax.f32 %v575_v3, 0.0  ;;  %v666_v14 = vmax.f32 %v416_v4, 0.0  ;;  %1543 = vmatmul.mubr.f32.gmra.mrb[66].mxu1 %v663_v44  ;;  %v419_v15 = vpop.f32.mrb[6].mxu0  ;;  %4029 = vmatpush3.bf16.msra.mxu0 %v4028_v47  ;;  %v1315_v3 = vld [vmem:[#allocation10 + $0x3d0] sm:$0xff]  ;;  %v1316_v4 = vld [vmem:[#allocation10 + $0x3d8] sm:$0xff]  ;;  %v1270_v36 = vld [vmem:[#allocation10 + $0x268] sm:$0xff] }
 0x1a3   :  { %v668_v21 = vmax.f32 %v577_v9, 0.0  ;;  %v420_v22 = vadd.f32 %v419_v15, %v4844_v63  ;;  %v580_v23 = vpop.f32.mrb[6].mxu1  ;;  %v421_v24 = vpop.f32.mrb[7].mxu0  ;;  %4061 = vmatpush3.bf16.msra.mxu1 %v4060_v48  ;;  %4031 = vmatprep.subr.bf16.mxu0 %v4030_v56  ;;  %v1283_v56 = vld [vmem:[#allocation10 + $0x2d0] sm:$0xff]  ;;  %v4072_v9 = vpack.c.bf16 %v1298_v51, %v1297_v50  ;;  %v1288_v50 = vld [vmem:[#allocation10 + $0x2f8] sm:$0xff] }
 0x1a4   :  { %v581_v28 = vadd.f32 %v580_v23, %v4847_v0  ;;  %v422_v29 = vadd.f32 %v421_v24, %v4850_v1  ;;  %v582_v30 = vpop.f32.mrb[7].mxu1  ;;  %1402 = vmatprep.mubr.f32.mxu0 %v666_v14  ;;  %4063 = vmatprep.subr.bf16.mxu1 %v4062_v6  ;;  %v4042_v18 = vpack.c.bf16 %v1284_v57, %v1283_v56 }
 0x1a5   :  { %v583_v34 = vadd.f32 %v582_v30, %v4853_v2  ;;  %1547 = vmatprep.mubr.f32.mxu1 %v668_v21  ;;  %1403 = vmatmul.mubr.f32.gmra.mrb[68].mxu0 %v665_v20  ;;  %v669_v44 = vmax.f32 %v420_v22, 0.0  ;;  %v1300_v20 = vld [vmem:[#allocation10 + $0x358] sm:$0xff]  ;;  %v4074_v24 = vpack.c.bf16 %v1316_v4, %v1315_v3  ;;  %v4048_v57 = vpack.c.bf16 %v1270_v36, %v1269_v35 }
 0x1a6   :  { %v671_v37 = vmax.f32 %v581_v28, 0.0  ;;  %v670_v38 = vmax.f32 %v422_v29, 0.0  ;;  %1548 = vmatmul.mubr.f32.gmra.mrb[68].mxu1 %v667_v13  ;;  %v425_v39 = vpop.f32.mrb[8].mxu0  ;;  %4033 = vmatpush3.bf16.msra.mxu0 %v4032_v16  ;;  %v1317_v28 = vld [vmem:[#allocation10 + $0x3e0] sm:$0xff]  ;;  %v1318_v29 = vld [vmem:[#allocation10 + $0x3e8] sm:$0xff] }
 0x1a7   :  { %v672_v45 = vmax.f32 %v583_v34, 0.0  ;;  %v426_v46 = vadd.f32 %v425_v39, %v4844_v63  ;;  %v586_v47 = vpop.f32.mrb[8].mxu1  ;;  %v427_v48 = vpop.f32.mrb[9].mxu0  ;;  %4065 = vmatpush3.bf16.msra.mxu1 %v4064_v17  ;;  %4035 = vmatprep.subr.bf16.mxu0 %v4034_v25  ;;  %v1285_v25 = vld [vmem:[#allocation10 + $0x2e0] sm:$0xff]  ;;  %v4076_v34 = vpack.c.bf16 %v1300_v20, %v1299_v19 }
 0x1a8   :  { %v587_v52 = vadd.f32 %v586_v47, %v4847_v0  ;;  %v428_v53 = vadd.f32 %v427_v48, %v4850_v1  ;;  %v588_v54 = vpop.f32.mrb[9].mxu1  ;;  %1407 = vmatprep.mubr.f32.mxu0 %v670_v38  ;;  %4067 = vmatprep.subr.bf16.mxu1 %v4066_v31  ;;  %v4046_v42 = vpack.c.bf16 %v1286_v26, %v1285_v25 }
 0x1a9   :  { %v589_v59 = vadd.f32 %v588_v54, %v4853_v2  ;;  %1552 = vmatprep.mubr.f32.mxu1 %v672_v45  ;;  %1408 = vmatmul.mubr.f32.gmra.mrb[70].mxu0 %v669_v44  ;;  %v673_v13 = vmax.f32 %v426_v46, 0.0  ;;  %v1302_v44 = vld [vmem:[#allocation10 + $0x368] sm:$0xff]  ;;  %v4078_v48 = vpack.c.bf16 %v1318_v29, %v1317_v28 }
 0x1aa   :  { %v675_v5 = vmax.f32 %v587_v52, 0.0  ;;  %v674_v6 = vmax.f32 %v428_v53, 0.0  ;;  %1553 = vmatmul.mubr.f32.gmra.mrb[70].mxu1 %v671_v37  ;;  %v431_v7 = vpop.f32.mrb[10].mxu0  ;;  %4037 = vmatpush3.bf16.msra.mxu0 %v4036_v40  ;;  %v1319_v52 = vld [vmem:[#allocation10 + $0x3f0] sm:$0xff]  ;;  %v1320_v53 = vld [vmem:[#allocation10 + $0x3f8] sm:$0xff] }
 0x1ab   :  { %v676_v14 = vmax.f32 %v589_v59, 0.0  ;;  %v432_v15 = vadd.f32 %v431_v7, %v4844_v63  ;;  %v592_v16 = vpop.f32.mrb[10].mxu1  ;;  %v433_v17 = vpop.f32.mrb[11].mxu0  ;;  %4069 = vmatpush3.bf16.msra.mxu1 %v4068_v41  ;;  %4039 = vmatprep.subr.bf16.mxu0 %v4038_v49  ;;  %v1287_v49 = vld [vmem:[#allocation10 + $0x2f0] sm:$0xff]  ;;  %v4080_v59 = vpack.c.bf16 %v1302_v44, %v1301_v43 }
 0x1ac   :  { %v593_v21 = vadd.f32 %v592_v16, %v4847_v0  ;;  %v434_v22 = vadd.f32 %v433_v17, %v4850_v1  ;;  %v594_v23 = vpop.f32.mrb[11].mxu1  ;;  %1412 = vmatprep.mubr.f32.mxu0 %v674_v6  ;;  %4071 = vmatprep.subr.bf16.mxu1 %v4070_v55  ;;  %v1303_v16 = vld [vmem:[#allocation10 + $0x370] sm:$0xff]  ;;  %v1304_v17 = vld [vmem:[#allocation10 + $0x378] sm:$0xff] }
 0x1ad   :  { %v595_v27 = vadd.f32 %v594_v23, %v4853_v2  ;;  %1557 = vmatprep.mubr.f32.mxu1 %v676_v14  ;;  %1413 = vmatmul.mubr.f32.gmra.mrb[72].mxu0 %v673_v13  ;;  %v677_v37 = vmax.f32 %v432_v15, 0.0  ;;  %v4082_v15 = vpack.c.bf16 %v1320_v53, %v1319_v52  ;;  %v4084_v28 = vpack.c.bf16 %v1304_v17, %v1303_v16 }
 0x1ae   :  { %v679_v30 = vmax.f32 %v593_v21, 0.0  ;;  %v678_v31 = vmax.f32 %v434_v22, 0.0  ;;  %1558 = vmatmul.mubr.f32.gmra.mrb[72].mxu1 %v675_v5  ;;  %v437_v32 = vpop.f32.mrb[12].mxu0  ;;  %4041 = vmatpush3.bf16.msra.mxu0 %v4040_v8  ;;  %v4050_v8 = vpack.c.bf16 %v1288_v50, %v1287_v49 }
 0x1af   :  { %v680_v38 = vmax.f32 %v595_v27, 0.0  ;;  %v438_v39 = vadd.f32 %v437_v32, %v4844_v63  ;;  %v598_v40 = vpop.f32.mrb[12].mxu1  ;;  %v439_v41 = vpop.f32.mrb[13].mxu0  ;;  %4073 = vmatpush3.bf16.msra.mxu1 %v4072_v9  ;;  %4043 = vmatprep.subr.bf16.mxu0 %v4042_v18  ;;  %v1271_v9 = vld [vmem:[#allocation10 + $0x270] sm:$0xff] }
 0x1b0   :  { %v599_v45 = vadd.f32 %v598_v40, %v4847_v0  ;;  %v440_v46 = vadd.f32 %v439_v41, %v4850_v1  ;;  %v600_v47 = vpop.f32.mrb[13].mxu1  ;;  %1417 = vmatprep.mubr.f32.mxu0 %v678_v31  ;;  %4075 = vmatprep.subr.bf16.mxu1 %v4074_v24  ;;  %v4052_v22 = vpack.c.bf16 %v1272_v10, %v1271_v9 }
 0x1b1   :  { %v601_v51 = vadd.f32 %v600_v47, %v4853_v2  ;;  %1562 = vmatprep.mubr.f32.mxu1 %v680_v38  ;;  %1418 = vmatmul.mubr.f32.gmra.mrb[74].mxu0 %v677_v37  ;;  %v681_v3 = vmax.f32 %v438_v39, 0.0 }
 0x1b2   :  { %v683_v54 = vmax.f32 %v599_v45, 0.0  ;;  %v682_v55 = vmax.f32 %v440_v46, 0.0  ;;  %1563 = vmatmul.mubr.f32.gmra.mrb[74].mxu1 %v679_v30  ;;  %v443_v56 = vpop.f32.mrb[14].mxu0  ;;  %4045 = vmatpush3.bf16.msra.mxu0 %v4044_v33 }
 0x1b3   :  { %v684_v4 = vmax.f32 %v601_v51, 0.0  ;;  %v444_v5 = vadd.f32 %v443_v56, %v4844_v63  ;;  %v604_v6 = vpop.f32.mrb[14].mxu1  ;;  %v445_v7 = vpop.f32.mrb[15].mxu0  ;;  %4077 = vmatpush3.bf16.msra.mxu1 %v4076_v34  ;;  %4047 = vmatprep.subr.bf16.mxu0 %v4046_v42 }
 0x1b4   :  { %v605_v11 = vadd.f32 %v604_v6, %v4847_v0  ;;  %v446_v13 = vadd.f32 %v445_v7, %v4850_v1  ;;  %v606_v14 = vpop.f32.mrb[15].mxu1  ;;  %1422 = vmatprep.mubr.f32.mxu0 %v682_v55  ;;  %4079 = vmatprep.subr.bf16.mxu1 %v4078_v48 }
 0x1b5   :  { %v607_v18 = vadd.f32 %v606_v14, %v4853_v2  ;;  %1567 = vmatprep.mubr.f32.mxu1 %v684_v4  ;;  %1423 = vmatmul.mubr.f32.gmra.mrb[76].mxu0 %v681_v3  ;;  %v685_v23 = vmax.f32 %v444_v5, 0.0 }
 0x1b6   :  { %v687_v19 = vmax.f32 %v605_v11, 0.0  ;;  %v686_v20 = vmax.f32 %v446_v13, 0.0  ;;  %1568 = vmatmul.mubr.f32.gmra.mrb[76].mxu1 %v683_v54  ;;  %v449_v21 = vpop.f32.mrb[16].mxu0  ;;  %4049 = vmatpush3.bf16.msra.mxu0 %v4048_v57 }
 0x1b7   :  { %v688_v24 = vmax.f32 %v607_v18, 0.0  ;;  %v450_v25 = vadd.f32 %v449_v21, %v4844_v63  ;;  %v610_v26 = vpop.f32.mrb[16].mxu1  ;;  %v451_v27 = vpop.f32.mrb[17].mxu0  ;;  %4081 = vmatpush3.bf16.msra.mxu1 %v4080_v59  ;;  %4051 = vmatprep.subr.bf16.mxu0 %v4050_v8 }
 0x1b8   :  { %v611_v29 = vadd.f32 %v610_v26, %v4847_v0  ;;  %v452_v30 = vadd.f32 %v451_v27, %v4850_v1  ;;  %v612_v31 = vpop.f32.mrb[17].mxu1  ;;  %1427 = vmatprep.mubr.f32.mxu0 %v686_v20  ;;  %4083 = vmatprep.subr.bf16.mxu1 %v4082_v15 }
 0x1b9   :  { %v613_v32 = vadd.f32 %v612_v31, %v4853_v2  ;;  %1572 = vmatprep.mubr.f32.mxu1 %v688_v24  ;;  %1428 = vmatmul.mubr.f32.gmra.mrb[78].mxu0 %v685_v23  ;;  %v689_v36 = vmax.f32 %v450_v25, 0.0 }
 0x1ba   :  { %v691_v33 = vmax.f32 %v611_v29, 0.0  ;;  %v690_v34 = vmax.f32 %v452_v30, 0.0  ;;  %1573 = vmatmul.mubr.f32.gmra.mrb[78].mxu1 %v687_v19  ;;  %v455_v35 = vpop.f32.mrb[18].mxu0  ;;  %4053 = vmatpush3.bf16.msra.mxu0 %v4052_v22 }
 0x1bb   :  { %v692_v37 = vmax.f32 %v613_v32, 0.0  ;;  %v456_v38 = vadd.f32 %v455_v35, %v4844_v63  ;;  %v616_v39 = vpop.f32.mrb[18].mxu1  ;;  %v457_v40 = vpop.f32.mrb[19].mxu0  ;;  %4085 = vmatpush3.bf16.msra.mxu1 %v4084_v28 }
 0x1bc   :  { %v617_v41 = vadd.f32 %v616_v39, %v4847_v0  ;;  %v458_v42 = vadd.f32 %v457_v40, %v4850_v1  ;;  %v618_v43 = vpop.f32.mrb[19].mxu1  ;;  %1432 = vmatprep.mubr.f32.mxu0 %v690_v34 }
 0x1bd   :  { %v619_v44 = vadd.f32 %v618_v43, %v4853_v2  ;;  %1577 = vmatprep.mubr.f32.mxu1 %v692_v37  ;;  %1433 = vmatmul.mubr.f32.gmra.mrb[80].mxu0 %v689_v36  ;;  %v693_v48 = vmax.f32 %v456_v38, 0.0 }
 0x1be   :  { %v695_v45 = vmax.f32 %v617_v41, 0.0  ;;  %v694_v46 = vmax.f32 %v458_v42, 0.0  ;;  %1578 = vmatmul.mubr.f32.gmra.mrb[80].mxu1 %v691_v33  ;;  %v461_v47 = vpop.f32.mrb[20].mxu0 }
 0x1bf   :  { %v696_v49 = vmax.f32 %v619_v44, 0.0  ;;  %v462_v50 = vadd.f32 %v461_v47, %v4844_v63  ;;  %v622_v51 = vpop.f32.mrb[20].mxu1  ;;  %v463_v52 = vpop.f32.mrb[21].mxu0 }
 0x1c0   :  { %v623_v53 = vadd.f32 %v622_v51, %v4847_v0  ;;  %v464_v54 = vadd.f32 %v463_v52, %v4850_v1  ;;  %v624_v55 = vpop.f32.mrb[21].mxu1  ;;  %1437 = vmatprep.mubr.f32.mxu0 %v694_v46 }
 0x1c1   :  { %v625_v56 = vadd.f32 %v624_v55, %v4853_v2  ;;  %1582 = vmatprep.mubr.f32.mxu1 %v696_v49  ;;  %1438 = vmatmul.mubr.f32.gmra.mrb[82].mxu0 %v693_v48  ;;  %v697_v4 = vmax.f32 %v462_v50, 0.0  ;;  %v785_v49 = vld [vmem:[%s5405_s5] sm:$0xf] }
 0x1c2   :  { %v699_v57 = vmax.f32 %v623_v53, 0.0  ;;  %v698_v59 = vmax.f32 %v464_v54, 0.0  ;;  %1583 = vmatmul.mubr.f32.gmra.mrb[82].mxu1 %v695_v45  ;;  %v467_v3 = vpop.f32.mrb[22].mxu0 }
 0x1c3   :  { %v700_v5 = vmax.f32 %v625_v56, 0.0  ;;  %v468_v6 = vadd.f32 %v467_v3, %v4844_v63  ;;  %v628_v7 = vpop.f32.mrb[22].mxu1  ;;  %v469_v8 = vpop.f32.mrb[23].mxu0  ;;  %v4920_v3 = vrot.slane %v785_v49, %v4832_v58 }
 0x1c4   :  { %v629_v9 = vadd.f32 %v628_v7, %v4847_v0  ;;  %v470_v10 = vadd.f32 %v469_v8, %v4850_v1  ;;  %v630_v11 = vpop.f32.mrb[23].mxu1  ;;  %1442 = vmatprep.mubr.f32.mxu0 %v698_v59  ;;  %v4925_v7 = vrot.slane %v785_v49, %v4837_v60  ;;  %v4928_v8 = vrot.slane %v785_v49, %v4839_v61 }
 0x1c5   :  { %v631_v13 = vadd.f32 %v630_v11, %v4853_v2  ;;  %1587 = vmatprep.mubr.f32.mxu1 %v700_v5  ;;  %1443 = vmatmul.mubr.f32.gmra.mrb[84].mxu0 %v697_v4  ;;  %v701_v17 = vmax.f32 %v468_v6, 0.0 }
 0x1c6   :  { %v703_v14 = vmax.f32 %v629_v9, 0.0  ;;  %v702_v15 = vmax.f32 %v470_v10, 0.0  ;;  %1588 = vmatmul.mubr.f32.gmra.mrb[84].mxu1 %v699_v57  ;;  %v473_v16 = vpop.f32.mrb[24].mxu0 }
 0x1c7   :  { %v704_v18 = vmax.f32 %v631_v13, 0.0  ;;  %v474_v19 = vadd.f32 %v473_v16, %v4844_v63  ;;  %v634_v20 = vpop.f32.mrb[24].mxu1  ;;  %v475_v21 = vpop.f32.mrb[25].mxu0 }
 0x1c8   :  { %v635_v22 = vadd.f32 %v634_v20, %v4847_v0  ;;  %v476_v23 = vadd.f32 %v475_v21, %v4850_v1  ;;  %v636_v24 = vpop.f32.mrb[25].mxu1  ;;  %1447 = vmatprep.mubr.f32.mxu0 %v702_v15 }
 0x1c9   :  { %v637_v25 = vadd.f32 %v636_v24, %v4853_v2  ;;  %1592 = vmatprep.mubr.f32.mxu1 %v704_v18  ;;  %1448 = vmatmul.mubr.f32.gmra.mrb[86].mxu0 %v701_v17  ;;  %v705_v29 = vmax.f32 %v474_v19, 0.0 }
 0x1ca   :  { %v707_v26 = vmax.f32 %v635_v22, 0.0  ;;  %v706_v27 = vmax.f32 %v476_v23, 0.0  ;;  %1593 = vmatmul.mubr.f32.gmra.mrb[86].mxu1 %v703_v14  ;;  %v479_v28 = vpop.f32.mrb[26].mxu0 }
 0x1cb   :  { %v708_v30 = vmax.f32 %v637_v25, 0.0  ;;  %v480_v31 = vadd.f32 %v479_v28, %v4844_v63  ;;  %v640_v32 = vpop.f32.mrb[26].mxu1  ;;  %v481_v33 = vpop.f32.mrb[27].mxu0 }
 0x1cc   :  { %v641_v34 = vadd.f32 %v640_v32, %v4847_v0  ;;  %v482_v35 = vadd.f32 %v481_v33, %v4850_v1  ;;  %v642_v36 = vpop.f32.mrb[27].mxu1  ;;  %1452 = vmatprep.mubr.f32.mxu0 %v706_v27 }
 0x1cd   :  { %v643_v37 = vadd.f32 %v642_v36, %v4853_v2  ;;  %1597 = vmatprep.mubr.f32.mxu1 %v708_v30  ;;  %1453 = vmatmul.mubr.f32.gmra.mrb[88].mxu0 %v705_v29  ;;  %v709_v41 = vmax.f32 %v480_v31, 0.0 }
 0x1ce   :  { %v711_v38 = vmax.f32 %v641_v34, 0.0  ;;  %v710_v39 = vmax.f32 %v482_v35, 0.0  ;;  %1598 = vmatmul.mubr.f32.gmra.mrb[88].mxu1 %v707_v26  ;;  %v485_v40 = vpop.f32.mrb[28].mxu0 }
 0x1cf   :  { %v712_v42 = vmax.f32 %v643_v37, 0.0  ;;  %v486_v43 = vadd.f32 %v485_v40, %v4844_v63  ;;  %v646_v44 = vpop.f32.mrb[28].mxu1  ;;  %v487_v45 = vpop.f32.mrb[29].mxu0 }
 0x1d0   :  { %v647_v46 = vadd.f32 %v646_v44, %v4847_v0  ;;  %v488_v47 = vadd.f32 %v487_v45, %v4850_v1  ;;  %v648_v48 = vpop.f32.mrb[29].mxu1  ;;  %1457 = vmatprep.mubr.f32.mxu0 %v710_v39 }
 0x1d1   :  { %v649_v50 = vadd.f32 %v648_v48, %v4853_v2  ;;  %1602 = vmatprep.mubr.f32.mxu1 %v712_v42  ;;  %1458 = vmatmul.mubr.f32.gmra.mrb[90].mxu0 %v709_v41  ;;  %v713_v54 = vmax.f32 %v486_v43, 0.0 }
 0x1d2   :  { %v715_v51 = vmax.f32 %v647_v46, 0.0  ;;  %v714_v52 = vmax.f32 %v488_v47, 0.0  ;;  %1603 = vmatmul.mubr.f32.gmra.mrb[90].mxu1 %v711_v38  ;;  %v491_v53 = vpop.f32.mrb[30].mxu0 }
 0x1d3   :  { %v716_v55 = vmax.f32 %v649_v50, 0.0  ;;  %v492_v56 = vadd.f32 %v491_v53, %v4844_v63  ;;  %v652_v57 = vpop.f32.mrb[30].mxu1  ;;  %v493_v59 = vpop.f32.mrb[31].mxu0  ;;  %v4932_v63 = vrot.slane %v785_v49, %v4841_v62 }
 0x1d4   :  { %v653_v4 = vadd.f32 %v652_v57, %v4847_v0  ;;  %v494_v5 = vadd.f32 %v493_v59, %v4850_v1  ;;  %v654_v6 = vpop.f32.mrb[31].mxu1  ;;  %1462 = vmatprep.mubr.f32.mxu0 %v714_v52 }
 0x1d5   :  { %v655_v9 = vadd.f32 %v654_v6, %v4853_v2  ;;  %1607 = vmatprep.mubr.f32.mxu1 %v716_v55  ;;  %1463 = vmatmul.mubr.f32.gmra.mrb[92].mxu0 %v713_v54  ;;  %v717_v1 = vmax.f32 %v492_v56, 0.0 }
 0x1d6   :  { %v719_v10 = vmax.f32 %v653_v4, 0.0  ;;  %v718_v11 = vmax.f32 %v494_v5, 0.0  ;;  %1608 = vmatmul.mubr.f32.gmra.mrb[92].mxu1 %v715_v51  ;;  %v873_v0 = vpop.f32.mrb[32].mxu0 }
 0x1d7   :  { %v720_v13 = vmax.f32 %v655_v9, 0.0  ;;  %v874_v14 = vadd.f32 %v873_v0, %v4920_v3  ;;  %v1034_v15 = vpop.f32.mrb[32].mxu1  ;;  %v875_v16 = vpop.f32.mrb[33].mxu0 }
 0x1d8   :  { %v1035_v17 = vadd.f32 %v1034_v15, %v4925_v7  ;;  %v876_v18 = vadd.f32 %v875_v16, %v4928_v8  ;;  %v1036_v2 = vpop.f32.mrb[33].mxu1  ;;  %1467 = vmatprep.mubr.f32.mxu0 %v718_v11 }
 0x1d9   :  { %v1037_v19 = vadd.f32 %v1036_v2, %v4932_v63  ;;  %1612 = vmatprep.mubr.f32.mxu1 %v720_v13  ;;  %1468 = vmatmul.mubr.f32.gmra.mrb[94].mxu0 %v717_v1  ;;  %v1129_v23 = vmax.f32 %v874_v14, 0.0 }
 0x1da   :  { %v1131_v20 = vmax.f32 %v1035_v17, 0.0  ;;  %v1130_v21 = vmax.f32 %v876_v18, 0.0  ;;  %1613 = vmatmul.mubr.f32.gmra.mrb[94].mxu1 %v719_v10  ;;  %v879_v22 = vpop.f32.mrb[34].mxu0 }
 0x1db   :  { %v1132_v24 = vmax.f32 %v1037_v19, 0.0  ;;  %v880_v25 = vadd.f32 %v879_v22, %v4920_v3  ;;  %v1040_v26 = vpop.f32.mrb[34].mxu1  ;;  %v881_v27 = vpop.f32.mrb[35].mxu0 }
 0x1dc   :  { %v1041_v28 = vadd.f32 %v1040_v26, %v4925_v7  ;;  %v882_v29 = vadd.f32 %v881_v27, %v4928_v8  ;;  %v1042_v30 = vpop.f32.mrb[35].mxu1  ;;  %1682 = vmatprep.mubr.f32.mxu0 %v1130_v21 }
 0x1dd   :  { %v1043_v31 = vadd.f32 %v1042_v30, %v4932_v63  ;;  %1827 = vmatprep.mubr.f32.mxu1 %v1132_v24  ;;  %1683 = vmatmul.mubr.f32.vlgmr.msra.gmra.mrb[96].mxu0 %v1129_v23  ;;  %v1133_v35 = vmax.f32 %v880_v25, 0.0 }
 0x1de   :  { %v1135_v32 = vmax.f32 %v1041_v28, 0.0  ;;  %v1134_v33 = vmax.f32 %v882_v29, 0.0  ;;  %1828 = vmatmul.mubr.f32.vlgmr.msra.gmra.mrb[96].mxu1 %v1131_v20  ;;  %v885_v34 = vpop.f32.mrb[36].mxu0 }
 0x1df   :  { %v1136_v36 = vmax.f32 %v1043_v31, 0.0  ;;  %v886_v37 = vadd.f32 %v885_v34, %v4920_v3  ;;  %v1046_v38 = vpop.f32.mrb[36].mxu1  ;;  %v887_v39 = vpop.f32.mrb[37].mxu0 }
 0x1e0   :  { %v1047_v40 = vadd.f32 %v1046_v38, %v4925_v7  ;;  %v888_v41 = vadd.f32 %v887_v39, %v4928_v8  ;;  %v1048_v42 = vpop.f32.mrb[37].mxu1  ;;  %1687 = vmatprep.mubr.f32.mxu0 %v1134_v33 }
 0x1e1   :  { %v1049_v43 = vadd.f32 %v1048_v42, %v4932_v63  ;;  %1832 = vmatprep.mubr.f32.mxu1 %v1136_v36  ;;  %1688 = vmatmul.mubr.f32.gmra.mrb[98].mxu0 %v1133_v35  ;;  %v1137_v47 = vmax.f32 %v886_v37, 0.0 }
 0x1e2   :  { %v1139_v44 = vmax.f32 %v1047_v40, 0.0  ;;  %v1138_v45 = vmax.f32 %v888_v41, 0.0  ;;  %1833 = vmatmul.mubr.f32.gmra.mrb[98].mxu1 %v1135_v32  ;;  %v891_v46 = vpop.f32.mrb[38].mxu0 }
 0x1e3   :  { %v1140_v48 = vmax.f32 %v1049_v43, 0.0  ;;  %v892_v49 = vadd.f32 %v891_v46, %v4920_v3  ;;  %v1052_v50 = vpop.f32.mrb[38].mxu1  ;;  %v893_v51 = vpop.f32.mrb[39].mxu0 }
 0x1e4   :  { %v1053_v52 = vadd.f32 %v1052_v50, %v4925_v7  ;;  %v894_v53 = vadd.f32 %v893_v51, %v4928_v8  ;;  %v1054_v54 = vpop.f32.mrb[39].mxu1  ;;  %1692 = vmatprep.mubr.f32.mxu0 %v1138_v45 }
 0x1e5   :  { %v1055_v55 = vadd.f32 %v1054_v54, %v4932_v63  ;;  %1837 = vmatprep.mubr.f32.mxu1 %v1140_v48  ;;  %1693 = vmatmul.mubr.f32.gmra.mrb[100].mxu0 %v1137_v47  ;;  %v1141_v4 = vmax.f32 %v892_v49, 0.0 }
 0x1e6   :  { %v1143_v56 = vmax.f32 %v1053_v52, 0.0  ;;  %v1142_v57 = vmax.f32 %v894_v53, 0.0  ;;  %1838 = vmatmul.mubr.f32.gmra.mrb[100].mxu1 %v1139_v44  ;;  %v897_v59 = vpop.f32.mrb[40].mxu0 }
 0x1e7   :  { %v1144_v5 = vmax.f32 %v1055_v55, 0.0  ;;  %v898_v6 = vadd.f32 %v897_v59, %v4920_v3  ;;  %v1058_v9 = vpop.f32.mrb[40].mxu1  ;;  %v899_v10 = vpop.f32.mrb[41].mxu0 }
 0x1e8   :  { %v1059_v11 = vadd.f32 %v1058_v9, %v4925_v7  ;;  %v900_v0 = vadd.f32 %v899_v10, %v4928_v8  ;;  %v1060_v1 = vpop.f32.mrb[41].mxu1  ;;  %1697 = vmatprep.mubr.f32.mxu0 %v1142_v57 }
 0x1e9   :  { %v1061_v13 = vadd.f32 %v1060_v1, %v4932_v63  ;;  %1842 = vmatprep.mubr.f32.mxu1 %v1144_v5  ;;  %1698 = vmatmul.mubr.f32.gmra.mrb[102].mxu0 %v1141_v4  ;;  %v1145_v17 = vmax.f32 %v898_v6, 0.0 }
 0x1ea   :  { %v1147_v14 = vmax.f32 %v1059_v11, 0.0  ;;  %v1146_v15 = vmax.f32 %v900_v0, 0.0  ;;  %1843 = vmatmul.mubr.f32.gmra.mrb[102].mxu1 %v1143_v56  ;;  %v903_v16 = vpop.f32.mrb[42].mxu0 }
 0x1eb   :  { %v1148_v18 = vmax.f32 %v1061_v13, 0.0  ;;  %v904_v2 = vadd.f32 %v903_v16, %v4920_v3  ;;  %v1064_v19 = vpop.f32.mrb[42].mxu1  ;;  %v905_v20 = vpop.f32.mrb[43].mxu0 }
 0x1ec   :  { %v1065_v21 = vadd.f32 %v1064_v19, %v4925_v7  ;;  %v906_v22 = vadd.f32 %v905_v20, %v4928_v8  ;;  %v1066_v23 = vpop.f32.mrb[43].mxu1  ;;  %1702 = vmatprep.mubr.f32.mxu0 %v1146_v15 }
 0x1ed   :  { %v1067_v24 = vadd.f32 %v1066_v23, %v4932_v63  ;;  %1847 = vmatprep.mubr.f32.mxu1 %v1148_v18  ;;  %1703 = vmatmul.mubr.f32.gmra.mrb[104].mxu0 %v1145_v17  ;;  %v1149_v28 = vmax.f32 %v904_v2, 0.0  ;;  %v1924_v23 = vld [vmem:[#allocation11] sm:$0xff] }
 0x1ee   :  { %v1151_v25 = vmax.f32 %v1065_v21, 0.0  ;;  %v1150_v26 = vmax.f32 %v906_v22, 0.0  ;;  %1848 = vmatmul.mubr.f32.gmra.mrb[104].mxu1 %v1147_v14  ;;  %v909_v27 = vpop.f32.mrb[44].mxu0  ;;  %v1925_v21 = vld [vmem:[#allocation11 + $0x8] sm:$0xff] }
 0x1ef   :  { %v1152_v29 = vmax.f32 %v1067_v24, 0.0  ;;  %v910_v30 = vadd.f32 %v909_v27, %v4920_v3  ;;  %v1070_v31 = vpop.f32.mrb[44].mxu1  ;;  %v911_v32 = vpop.f32.mrb[45].mxu0  ;;  %v1929_v22 = vld [vmem:[#allocation11 + $0x28] sm:$0xff] }
 0x1f0   :  { %v1071_v33 = vadd.f32 %v1070_v31, %v4925_v7  ;;  %v912_v34 = vadd.f32 %v911_v32, %v4928_v8  ;;  %v1072_v35 = vpop.f32.mrb[45].mxu1  ;;  %1707 = vmatprep.mubr.f32.mxu0 %v1150_v26 }
 0x1f1   :  { %v1073_v36 = vadd.f32 %v1072_v35, %v4932_v63  ;;  %1852 = vmatprep.mubr.f32.mxu1 %v1152_v29  ;;  %1708 = vmatmul.mubr.f32.gmra.mrb[106].mxu0 %v1149_v28  ;;  %v1153_v40 = vmax.f32 %v910_v30, 0.0  ;;  %v4086_v29 = vpack.c.bf16 %v1929_v22, %v1925_v21  ;;  %v1928_v30 = vld [vmem:[#allocation11 + $0x20] sm:$0xff] }
 0x1f2   :  { %v1155_v37 = vmax.f32 %v1071_v33, 0.0  ;;  %v1154_v38 = vmax.f32 %v912_v34, 0.0  ;;  %1853 = vmatmul.mubr.f32.gmra.mrb[106].mxu1 %v1151_v25  ;;  %v915_v39 = vpop.f32.mrb[46].mxu0  ;;  %v4088_v34 = vpack.c.bf16 %v1928_v30, %v1924_v23 }
 0x1f3   :  { %v1156_v41 = vmax.f32 %v1073_v36, 0.0  ;;  %v916_v42 = vadd.f32 %v915_v39, %v4920_v3  ;;  %v1076_v43 = vpop.f32.mrb[46].mxu1  ;;  %v917_v44 = vpop.f32.mrb[47].mxu0  ;;  %4087 = vmatprep.subr.bf16.mxu0 %v4086_v29 }
 0x1f4   :  { %v1077_v45 = vadd.f32 %v1076_v43, %v4925_v7  ;;  %v918_v46 = vadd.f32 %v917_v44, %v4928_v8  ;;  %v1078_v47 = vpop.f32.mrb[47].mxu1  ;;  %1712 = vmatprep.mubr.f32.mxu0 %v1154_v38  ;;  %4089 = vmatpush1.bf16.msra.mxu0 %v4088_v34 }
 0x1f5   :  { %v1079_v48 = vadd.f32 %v1078_v47, %v4932_v63  ;;  %1857 = vmatprep.mubr.f32.mxu1 %v1156_v41  ;;  %1713 = vmatmul.mubr.f32.gmra.mrb[108].mxu0 %v1153_v40  ;;  %v1157_v52 = vmax.f32 %v916_v42, 0.0 }
 0x1f6   :  { %v1159_v49 = vmax.f32 %v1077_v45, 0.0  ;;  %v1158_v50 = vmax.f32 %v918_v46, 0.0  ;;  %1858 = vmatmul.mubr.f32.gmra.mrb[108].mxu1 %v1155_v37  ;;  %v921_v51 = vpop.f32.mrb[48].mxu0 }
 0x1f7   :  { %v1160_v53 = vmax.f32 %v1079_v48, 0.0  ;;  %v922_v54 = vadd.f32 %v921_v51, %v4920_v3  ;;  %v1082_v55 = vpop.f32.mrb[48].mxu1  ;;  %v923_v56 = vpop.f32.mrb[49].mxu0  ;;  %v1933_v51 = vld [vmem:[#allocation11 + $0x48] sm:$0xff] }
 0x1f8   :  { %v1083_v57 = vadd.f32 %v1082_v55, %v4925_v7  ;;  %v924_v59 = vadd.f32 %v923_v56, %v4928_v8  ;;  %v1084_v4 = vpop.f32.mrb[49].mxu1  ;;  %1717 = vmatprep.mubr.f32.mxu0 %v1158_v50 }
 0x1f9   :  { %v1085_v5 = vadd.f32 %v1084_v4, %v4932_v63  ;;  %1862 = vmatprep.mubr.f32.mxu1 %v1160_v53  ;;  %1718 = vmatmul.mubr.f32.gmra.mrb[110].mxu0 %v1157_v52  ;;  %v1161_v11 = vmax.f32 %v922_v54, 0.0  ;;  %v1937_v52 = vld [vmem:[#allocation11 + $0x68] sm:$0xff]  ;;  %v1932_v53 = vld [vmem:[#allocation11 + $0x40] sm:$0xff] }
 0x1fa   :  { %v1163_v6 = vmax.f32 %v1083_v57, 0.0  ;;  %v1162_v9 = vmax.f32 %v924_v59, 0.0  ;;  %1863 = vmatmul.mubr.f32.gmra.mrb[110].mxu1 %v1159_v49  ;;  %v927_v10 = vpop.f32.mrb[50].mxu0  ;;  %v4090_v4 = vpack.c.bf16 %v1937_v52, %v1933_v51 }
 0x1fb   :  { %v1164_v0 = vmax.f32 %v1085_v5, 0.0  ;;  %v928_v1 = vadd.f32 %v927_v10, %v4920_v3  ;;  %v1088_v13 = vpop.f32.mrb[50].mxu1  ;;  %v929_v14 = vpop.f32.mrb[51].mxu0  ;;  %v1936_v5 = vld [vmem:[#allocation11 + $0x60] sm:$0xff] }
 0x1fc   :  { %v1089_v15 = vadd.f32 %v1088_v13, %v4925_v7  ;;  %v930_v16 = vadd.f32 %v929_v14, %v4928_v8  ;;  %v1090_v17 = vpop.f32.mrb[51].mxu1  ;;  %1722 = vmatprep.mubr.f32.mxu0 %v1162_v9  ;;  %4091 = vmatprep.subr.bf16.mxu0 %v4090_v4 }
 0x1fd   :  { %v1091_v18 = vadd.f32 %v1090_v17, %v4932_v63  ;;  %1867 = vmatprep.mubr.f32.mxu1 %v1164_v0  ;;  %1723 = vmatmul.mubr.f32.gmra.mrb[112].mxu0 %v1161_v11  ;;  %v1165_v24 = vmax.f32 %v928_v1, 0.0  ;;  %v4092_v11 = vpack.c.bf16 %v1936_v5, %v1932_v53  ;;  %v1952_v5 = vld [vmem:[#allocation11 + $0xe0] sm:$0xff] }
 0x1fe   :  { %v1167_v2 = vmax.f32 %v1089_v15, 0.0  ;;  %v1166_v19 = vmax.f32 %v930_v16, 0.0  ;;  %1868 = vmatmul.mubr.f32.gmra.mrb[112].mxu1 %v1163_v6  ;;  %v933_v20 = vpop.f32.mrb[52].mxu0 }
 0x1ff   :  { %v1168_v25 = vmax.f32 %v1091_v18, 0.0  ;;  %v934_v26 = vadd.f32 %v933_v20, %v4920_v3  ;;  %v1094_v27 = vpop.f32.mrb[52].mxu1  ;;  %v935_v28 = vpop.f32.mrb[53].mxu0  ;;  %4093 = vmatpush1.bf16.msra.mxu0 %v4092_v11 }
 0x200   :  { %v1095_v31 = vadd.f32 %v1094_v27, %v4925_v7  ;;  %v936_v32 = vadd.f32 %v935_v28, %v4928_v8  ;;  %v1096_v33 = vpop.f32.mrb[53].mxu1  ;;  %1727 = vmatprep.mubr.f32.mxu0 %v1166_v19  ;;  %v1945_v27 = vld [vmem:[#allocation11 + $0xa8] sm:$0xff]  ;;  %v1940_v28 = vld [vmem:[#allocation11 + $0x80] sm:$0xff] }
 0x201   :  { %v1097_v35 = vadd.f32 %v1096_v33, %v4932_v63  ;;  %1872 = vmatprep.mubr.f32.mxu1 %v1168_v25  ;;  %1728 = vmatmul.mubr.f32.gmra.mrb[114].mxu0 %v1165_v24  ;;  %v1169_v39 = vmax.f32 %v934_v26, 0.0  ;;  %v1941_v26 = vld [vmem:[#allocation11 + $0x88] sm:$0xff] }
 0x202   :  { %v1171_v36 = vmax.f32 %v1095_v31, 0.0  ;;  %v1170_v37 = vmax.f32 %v936_v32, 0.0  ;;  %1873 = vmatmul.mubr.f32.gmra.mrb[114].mxu1 %v1167_v2  ;;  %v939_v38 = vpop.f32.mrb[54].mxu0  ;;  %v4094_v34 = vpack.c.bf16 %v1945_v27, %v1941_v26  ;;  %v1946_v26 = vld [vmem:[#allocation11 + $0xb0] sm:$0xff] }
 0x203   :  { %v1172_v40 = vmax.f32 %v1097_v35, 0.0  ;;  %v940_v41 = vadd.f32 %v939_v38, %v4920_v3  ;;  %v1100_v42 = vpop.f32.mrb[54].mxu1  ;;  %v941_v43 = vpop.f32.mrb[55].mxu0  ;;  %v1944_v35 = vld [vmem:[#allocation11 + $0xa0] sm:$0xff] }
 0x204   :  { %v1101_v44 = vadd.f32 %v1100_v42, %v4925_v7  ;;  %v942_v45 = vadd.f32 %v941_v43, %v4928_v8  ;;  %v1102_v46 = vpop.f32.mrb[55].mxu1  ;;  %1732 = vmatprep.mubr.f32.mxu0 %v1170_v37  ;;  %4095 = vmatprep.subr.bf16.mxu0 %v4094_v34  ;;  %v1969_v34 = vld [vmem:[#allocation11 + $0x168] sm:$0xff] }
 0x205   :  { %v1103_v47 = vadd.f32 %v1102_v46, %v4932_v63  ;;  %1877 = vmatprep.mubr.f32.mxu1 %v1172_v40  ;;  %1733 = vmatmul.mubr.f32.gmra.mrb[116].mxu0 %v1169_v39  ;;  %v1173_v54 = vmax.f32 %v940_v41, 0.0  ;;  %v4096_v39 = vpack.c.bf16 %v1944_v35, %v1940_v28  ;;  %v1951_v28 = vld [vmem:[#allocation11 + $0xd8] sm:$0xff]  ;;  %v1964_v35 = vld [vmem:[#allocation11 + $0x140] sm:$0xff] }
 0x206   :  { %v1175_v48 = vmax.f32 %v1101_v44, 0.0  ;;  %v1174_v49 = vmax.f32 %v942_v45, 0.0  ;;  %1878 = vmatmul.mubr.f32.gmra.mrb[116].mxu1 %v1171_v36  ;;  %v945_v50 = vpop.f32.mrb[56].mxu0 }
 0x207   :  { %v1176_v55 = vmax.f32 %v1103_v47, 0.0  ;;  %v946_v56 = vadd.f32 %v945_v50, %v4920_v3  ;;  %v1106_v57 = vpop.f32.mrb[56].mxu1  ;;  %v947_v59 = vpop.f32.mrb[57].mxu0  ;;  %4097 = vmatpush1.bf16.msra.mxu0 %v4096_v39 }
 0x208   :  { %v1107_v6 = vadd.f32 %v1106_v57, %v4925_v7  ;;  %v948_v9 = vadd.f32 %v947_v59, %v4928_v8  ;;  %v1108_v10 = vpop.f32.mrb[57].mxu1  ;;  %1737 = vmatprep.mubr.f32.mxu0 %v1174_v49  ;;  %v1948_v57 = vld [vmem:[#allocation11 + $0xc0] sm:$0xff] }
 0x209   :  { %v1109_v0 = vadd.f32 %v1108_v10, %v4932_v63  ;;  %1882 = vmatprep.mubr.f32.mxu1 %v1176_v55  ;;  %1738 = vmatmul.mubr.f32.gmra.mrb[118].mxu0 %v1173_v54  ;;  %v1177_v15 = vmax.f32 %v946_v56, 0.0  ;;  %v1949_v55 = vld [vmem:[#allocation11 + $0xc8] sm:$0xff]  ;;  %v1930_v10 = vld [vmem:[#allocation11 + $0x30] sm:$0xff] }
 0x20a   :  { %v1179_v1 = vmax.f32 %v1107_v6, 0.0  ;;  %v1178_v13 = vmax.f32 %v948_v9, 0.0  ;;  %1883 = vmatmul.mubr.f32.gmra.mrb[118].mxu1 %v1175_v48  ;;  %v951_v14 = vpop.f32.mrb[58].mxu0  ;;  %v1953_v56 = vld [vmem:[#allocation11 + $0xe8] sm:$0xff]  ;;  %v1927_v6 = vld [vmem:[#allocation11 + $0x18] sm:$0xff] }
 0x20b   :  { %v1180_v16 = vmax.f32 %v1109_v0, 0.0  ;;  %v952_v17 = vadd.f32 %v951_v14, %v4920_v3  ;;  %v1112_v18 = vpop.f32.mrb[58].mxu1  ;;  %v953_v2 = vpop.f32.mrb[59].mxu0  ;;  %v4098_v4 = vpack.c.bf16 %v1953_v56, %v1949_v55  ;;  %v1935_v0 = vld [vmem:[#allocation11 + $0x58] sm:$0xff]  ;;  %v1934_v14 = vld [vmem:[#allocation11 + $0x50] sm:$0xff]  ;;  %v1976_v56 = vld [vmem:[#allocation11 + $0x1a0] sm:$0xff] }
 0x20c   :  { %v1113_v19 = vadd.f32 %v1112_v18, %v4925_v7  ;;  %v954_v20 = vadd.f32 %v953_v2, %v4928_v8  ;;  %v1114_v21 = vpop.f32.mrb[59].mxu1  ;;  %1742 = vmatprep.mubr.f32.mxu0 %v1178_v13  ;;  %v1956_v18 = vld [vmem:[#allocation11 + $0x100] sm:$0xff] }
 0x20d   :  { %v1115_v22 = vadd.f32 %v1114_v21, %v4932_v63  ;;  %1887 = vmatprep.mubr.f32.mxu1 %v1180_v16  ;;  %1743 = vmatmul.mubr.f32.gmra.mrb[120].mxu0 %v1177_v15  ;;  %v1181_v29 = vmax.f32 %v952_v17, 0.0  ;;  %v1938_v15 = vld [vmem:[#allocation11 + $0x70] sm:$0xff]  ;;  %v1957_v16 = vld [vmem:[#allocation11 + $0x108] sm:$0xff] }
 0x20e   :  { %v1183_v23 = vmax.f32 %v1113_v19, 0.0  ;;  %v1182_v24 = vmax.f32 %v954_v20, 0.0  ;;  %1888 = vmatmul.mubr.f32.gmra.mrb[120].mxu1 %v1179_v1  ;;  %v957_v25 = vpop.f32.mrb[60].mxu0  ;;  %4099 = vmatprep.subr.bf16.mxu0 %v4098_v4  ;;  %v1939_v1 = vld [vmem:[#allocation11 + $0x78] sm:$0xff]  ;;  %v1961_v17 = vld [vmem:[#allocation11 + $0x128] sm:$0xff]  ;;  %v4124_v2 = vpack.c.bf16 %v1938_v15, %v1934_v14  ;;  %v1960_v20 = vld [vmem:[#allocation11 + $0x120] sm:$0xff] }
 0x20f   :  { %v1184_v30 = vmax.f32 %v1115_v22, 0.0  ;;  %v958_v31 = vadd.f32 %v957_v25, %v4920_v3  ;;  %v1118_v32 = vpop.f32.mrb[60].mxu1  ;;  %v959_v33 = vpop.f32.mrb[61].mxu0  ;;  %v4122_v13 = vpack.c.bf16 %v1939_v1, %v1935_v0  ;;  %v4102_v19 = vpack.c.bf16 %v1961_v17, %v1957_v16  ;;  %v1943_v22 = vld [vmem:[#allocation11 + $0x98] sm:$0xff]  ;;  %v1942_v25 = vld [vmem:[#allocation11 + $0x90] sm:$0xff]  ;;  %v1984_v0 = vld [vmem:[#allocation11 + $0x1e0] sm:$0xff] }
 0x210   :  { %v1119_v36 = vadd.f32 %v1118_v32, %v4925_v7  ;;  %v960_v37 = vadd.f32 %v959_v33, %v4928_v8  ;;  %v1120_v38 = vpop.f32.mrb[61].mxu1  ;;  %1747 = vmatprep.mubr.f32.mxu0 %v1182_v24  ;;  %v4104_v21 = vpack.c.bf16 %v1960_v20, %v1956_v18  ;;  %v4128_v27 = vpack.c.bf16 %v1946_v26, %v1942_v25  ;;  %v1954_v32 = vld [vmem:[#allocation11 + $0xf0] sm:$0xff]  ;;  %v1965_v33 = vld [vmem:[#allocation11 + $0x148] sm:$0xff]  ;;  %v1987_v1 = vld [vmem:[#allocation11 + $0x1f8] sm:$0xff] }
 0x211   :  { %v1121_v40 = vadd.f32 %v1120_v38, %v4932_v63  ;;  %1892 = vmatprep.mubr.f32.mxu1 %v1184_v30  ;;  %1748 = vmatmul.mubr.f32.gmra.mrb[122].mxu0 %v1181_v29  ;;  %v1185_v44 = vmax.f32 %v958_v31, 0.0  ;;  %v1955_v29 = vld [vmem:[#allocation11 + $0xf8] sm:$0xff]  ;;  %v1950_v31 = vld [vmem:[#allocation11 + $0xd0] sm:$0xff]  ;;  %v1968_v38 = vld [vmem:[#allocation11 + $0x160] sm:$0xff] }
 0x212   :  { %v1187_v41 = vmax.f32 %v1119_v36, 0.0  ;;  %v1186_v42 = vmax.f32 %v960_v37, 0.0  ;;  %1893 = vmatmul.mubr.f32.gmra.mrb[122].mxu1 %v1183_v23  ;;  %v963_v43 = vpop.f32.mrb[62].mxu0  ;;  %v1947_v23 = vld [vmem:[#allocation11 + $0xb8] sm:$0xff]  ;;  %v4130_v30 = vpack.c.bf16 %v1955_v29, %v1951_v28  ;;  %v4132_v36 = vpack.c.bf16 %v1954_v32, %v1950_v31  ;;  %v1982_v15 = vld [vmem:[#allocation11 + $0x1d0] sm:$0xff]  ;;  %v2397_v31 = vld [vmem:[#allocation13 + $0x8] sm:$0xff] }
 0x213   :  { %v1188_v45 = vmax.f32 %v1121_v40, 0.0  ;;  %v964_v46 = vadd.f32 %v963_v43, %v4920_v3  ;;  %v1124_v47 = vpop.f32.mrb[62].mxu1  ;;  %v965_v48 = vpop.f32.mrb[63].mxu0  ;;  %v4126_v24 = vpack.c.bf16 %v1947_v23, %v1943_v22  ;;  %v4106_v37 = vpack.c.bf16 %v1969_v34, %v1965_v33  ;;  %v1959_v40 = vld [vmem:[#allocation11 + $0x118] sm:$0xff]  ;;  %v1958_v43 = vld [vmem:[#allocation11 + $0x110] sm:$0xff]  ;;  %v2400_v32 = vld [vmem:[#allocation13 + $0x20] sm:$0xff] }
 0x214   :  { %v1125_v49 = vadd.f32 %v1124_v47, %v4925_v7  ;;  %v966_v50 = vadd.f32 %v965_v48, %v4928_v8  ;;  %v1126_v51 = vpop.f32.mrb[63].mxu1  ;;  %1752 = vmatprep.mubr.f32.mxu0 %v1186_v42  ;;  %v4100_v7 = vpack.c.bf16 %v1952_v5, %v1948_v57  ;;  %v1931_v8 = vld [vmem:[#allocation11 + $0x38] sm:$0xff]  ;;  %v4108_v39 = vpack.c.bf16 %v1968_v38, %v1964_v35  ;;  %v1974_v5 = vld [vmem:[#allocation11 + $0x190] sm:$0xff] }
 0x215   :  { %v1127_v52 = vadd.f32 %v1126_v51, %v4932_v63  ;;  %1897 = vmatprep.mubr.f32.mxu1 %v1188_v45  ;;  %1753 = vmatmul.mubr.f32.gmra.mrb[124].mxu0 %v1185_v44  ;;  %v1189_v3 = vmax.f32 %v964_v46, 0.0  ;;  %v4118_v9 = vpack.c.bf16 %v1931_v8, %v1927_v6  ;;  %v1926_v63 = vld [vmem:[#allocation11 + $0x10] sm:$0xff]  ;;  %v1967_v46 = vld [vmem:[#allocation11 + $0x158] sm:$0xff]  ;;  %v1973_v51 = vld [vmem:[#allocation11 + $0x188] sm:$0xff]  ;;  %v4150_v35 = vpack.c.bf16 %v2400_v32, %v2397_v31 }
 0x216   :  { %v1191_v53 = vmax.f32 %v1125_v49, 0.0  ;;  %v1190_v54 = vmax.f32 %v966_v50, 0.0  ;;  %1898 = vmatmul.mubr.f32.gmra.mrb[124].mxu1 %v1187_v41  ;;  %v4120_v11 = vpack.c.bf16 %v1930_v10, %v1926_v63  ;;  %4101 = vmatpush1.bf16.msra.mxu0 %v4100_v7  ;;  %v1963_v41 = vld [vmem:[#allocation11 + $0x138] sm:$0xff]  ;;  %v1962_v44 = vld [vmem:[#allocation11 + $0x130] sm:$0xff]  ;;  %v1981_v8 = vld [vmem:[#allocation11 + $0x1c8] sm:$0xff] }
 0x217   :  { %v1192_v59 = vmax.f32 %v1127_v52, 0.0  ;;  %4119 = vmatprep.subr.bf16.mxu1 %v4118_v9  ;;  %4103 = vmatprep.subr.bf16.mxu0 %v4102_v19  ;;  %v4134_v42 = vpack.c.bf16 %v1963_v41, %v1959_v40  ;;  %v4136_v45 = vpack.c.bf16 %v1962_v44, %v1958_v43  ;;  %v1971_v47 = vld [vmem:[#allocation11 + $0x178] sm:$0xff]  ;;  %v1966_v49 = vld [vmem:[#allocation11 + $0x150] sm:$0xff]  ;;  %v1977_v52 = vld [vmem:[#allocation11 + $0x1a8] sm:$0xff] }
 0x218   :  { %1757 = vmatprep.mubr.f32.mxu0 %v1190_v54  ;;  %4121 = vmatpush1.bf16.msra.mxu1 %v4120_v11  ;;  %v4138_v48 = vpack.c.bf16 %v1971_v47, %v1967_v46  ;;  %v1970_v50 = vld [vmem:[#allocation11 + $0x170] sm:$0xff]  ;;  %v4110_v55 = vpack.c.bf16 %v1977_v52, %v1973_v51  ;;  %v1985_v9 = vld [vmem:[#allocation11 + $0x1e8] sm:$0xff]  ;;  %v1983_v63 = vld [vmem:[#allocation11 + $0x1d8] sm:$0xff] }
 0x219   :  { %1902 = vmatprep.mubr.f32.mxu1 %v1192_v59  ;;  %1758 = vmatmul.mubr.f32.gmra.mrb[126].mxu0 %v1189_v3  ;;  %v4140_v54 = vpack.c.bf16 %v1970_v50, %v1966_v49  ;;  %v1975_v3 = vld [vmem:[#allocation11 + $0x198] sm:$0xff]  ;;  %v1978_v7 = vld [vmem:[#allocation11 + $0x1b0] sm:$0xff]  ;;  %v4114_v10 = vpack.c.bf16 %v1985_v9, %v1981_v8  ;;  %v1980_v11 = vld [vmem:[#allocation11 + $0x1c0] sm:$0xff]  ;;  %v4146_v14 = vpack.c.bf16 %v1987_v1, %v1983_v63 }
 0x21a   :  { %1903 = vmatmul.mubr.f32.gmra.mrb[126].mxu1 %v1191_v53  ;;  %2074 = vmatprep.mubr.f32.mxu0 %v4624_v12  ;;  %v1972_v53 = vld [vmem:[#allocation11 + $0x180] sm:$0xff]  ;;  %v1979_v59 = vld [vmem:[#allocation11 + $0x1b8] sm:$0xff]  ;;  %v4144_v6 = vpack.c.bf16 %v1978_v7, %v1974_v5  ;;  %v1986_v16 = vld [vmem:[#allocation11 + $0x1f0] sm:$0xff] }
 0x21b   :  { %2235 = vmatprep.mubr.f32.mxu1 %v4624_v12  ;;  %4123 = vmatprep.subr.bf16.mxu1 %v4122_v13  ;;  %v4112_v57 = vpack.c.bf16 %v1976_v56, %v1972_v53  ;;  %v4142_v4 = vpack.c.bf16 %v1979_v59, %v1975_v3  ;;  %v4116_v13 = vpack.c.bf16 %v1984_v0, %v1980_v11  ;;  %v5003_v19 = vld [vmem:[%s5407_s7] ss:$0 sm:$0xff]  ;;  %v2446_v33 = vld [vmem:[#allocation13 + $0x190] sm:$0xff] }
 0x21c   :  { %4125 = vmatpush1.bf16.msra.mxu1 %v4124_v2  ;;  %4105 = vmatpush1.bf16.msra.mxu0 %v4104_v21  ;;  %v4148_v17 = vpack.c.bf16 %v1986_v16, %v1982_v15 }
 0x21d   :  { %4127 = vmatprep.subr.bf16.mxu1 %v4126_v24  ;;  %4107 = vmatprep.subr.bf16.mxu0 %v4106_v37 }
 0x220   :  { %4129 = vmatpush1.bf16.msra.mxu1 %v4128_v27  ;;  %4109 = vmatpush1.bf16.msra.mxu0 %v4108_v39 }
 0x221   :  { %4131 = vmatprep.subr.bf16.mxu1 %v4130_v30  ;;  %4111 = vmatprep.subr.bf16.mxu0 %v4110_v55 }
 0x224   :  { %4133 = vmatpush1.bf16.msra.mxu1 %v4132_v36  ;;  %4113 = vmatpush1.bf16.msra.mxu0 %v4112_v57  ;;  %v2449_v36 = vld [vmem:[#allocation13 + $0x1a8] sm:$0xff] }
 0x225   :  { %4135 = vmatprep.subr.bf16.mxu1 %v4134_v42  ;;  %4115 = vmatprep.subr.bf16.mxu0 %v4114_v10  ;;  %v4278_v39 = vpack.c.bf16 %v2449_v36, %v2446_v33 }
 0x228   :  { %4137 = vmatpush1.bf16.msra.mxu1 %v4136_v45  ;;  %4117 = vmatpush1.bf16.msra.mxu0 %v4116_v13 }
 0x229   :  { %4139 = vmatprep.subr.bf16.mxu1 %v4138_v48  ;;  %4151 = vmatprep.subr.bf16.mxu0 %v4150_v35 }
 0x22c   :  { %4141 = vmatpush1.bf16.msra.mxu1 %v4140_v54 }
 0x22d   :  { %4143 = vmatprep.subr.bf16.mxu1 %v4142_v4 }
 0x230   :  { %4145 = vmatpush1.bf16.msra.mxu1 %v4144_v6 }
 0x231   :  { %4147 = vmatprep.subr.bf16.mxu1 %v4146_v14 }
 0x234   :  { %4149 = vmatpush1.bf16.msra.mxu1 %v4148_v17 }
 0x235   :  { %4279 = vmatprep.subr.bf16.mxu1 %v4278_v39 }
 0x270   :  { %v3318_v18 = vpop.f32.mrb[64].mxu0 }
 0x271   :  { %v3398_v2 = vpop.f32.mrb[64].mxu1  ;;  %v3319_v20 = vpop.f32.mrb[65].mxu0 }
 0x272   :  { %v3320_v21 = vadd.f32 %v3319_v20, %v3318_v18  ;;  %v3399_v22 = vpop.f32.mrb[65].mxu1 }
 0x273   :  { %v3400_v23 = vadd.f32 %v3399_v22, %v3398_v2 }
 0x274   :  { %v1395_v24 = vadd.f32 %v3320_v21, %v5003_v19  ;;  %v3321_v25 = vpop.f32.mrb[66].mxu0 }
 0x275   :  { %v3401_v26 = vpop.f32.mrb[66].mxu1  ;;  %v3322_v27 = vpop.f32.mrb[67].mxu0 }
 0x276   :  { %v5006_v28 = vadd.f32 %v3400_v23, %v1395_v24  ;;  %v3323_v29 = vadd.f32 %v3322_v27, %v3321_v25  ;;  %v3402_v30 = vpop.f32.mrb[67].mxu1 }
 0x277   :  { %v3403_v34 = vadd.f32 %v3402_v30, %v3401_v26 }
 0x278   :  { %v1400_v37 = vadd.f32 %v3323_v29, %v5003_v19  ;;  %v3324_v38 = vpop.f32.mrb[68].mxu0 }
 0x279   :  { %v3404_v40 = vpop.f32.mrb[68].mxu1  ;;  %v3325_v41 = vpop.f32.mrb[69].mxu0 }
 0x27a   :  { %v5009_v42 = vadd.f32 %v3403_v34, %v1400_v37  ;;  %v3326_v43 = vadd.f32 %v3325_v41, %v3324_v38  ;;  %v3405_v44 = vpop.f32.mrb[69].mxu1 }
 0x27b   :  { %v3406_v45 = vadd.f32 %v3405_v44, %v3404_v40 }
 0x27c   :  { %v1405_v46 = vadd.f32 %v3326_v43, %v5003_v19  ;;  %v3327_v47 = vpop.f32.mrb[70].mxu0 }
 0x27d   :  { %v3407_v48 = vpop.f32.mrb[70].mxu1  ;;  %v3328_v49 = vpop.f32.mrb[71].mxu0 }
 0x27e   :  { %v5012_v50 = vadd.f32 %v3406_v45, %v1405_v46  ;;  %v3329_v51 = vadd.f32 %v3328_v49, %v3327_v47  ;;  %v3408_v52 = vpop.f32.mrb[71].mxu1 }
 0x27f   :  { %v3409_v53 = vadd.f32 %v3408_v52, %v3407_v48 }
 0x280   :  { %v1410_v54 = vadd.f32 %v3329_v51, %v5003_v19  ;;  %v3330_v55 = vpop.f32.mrb[72].mxu0 }
 0x281   :  { %v3410_v56 = vpop.f32.mrb[72].mxu1  ;;  %v3331_v57 = vpop.f32.mrb[73].mxu0 }
 0x282   :  { %v5015_v3 = vadd.f32 %v3409_v53, %v1410_v54  ;;  %v3332_v59 = vadd.f32 %v3331_v57, %v3330_v55  ;;  %v3411_v4 = vpop.f32.mrb[73].mxu1 }
 0x283   :  { %v3412_v5 = vadd.f32 %v3411_v4, %v3410_v56 }
 0x284   :  { %v1415_v7 = vadd.f32 %v3332_v59, %v5003_v19  ;;  %v3333_v6 = vpop.f32.mrb[74].mxu0 }
 0x285   :  { %v3413_v8 = vpop.f32.mrb[74].mxu1  ;;  %v3334_v9 = vpop.f32.mrb[75].mxu0 }
 0x286   :  { %v5018_v63 = vadd.f32 %v3412_v5, %v1415_v7  ;;  %v3335_v10 = vadd.f32 %v3334_v9, %v3333_v6  ;;  %v3414_v11 = vpop.f32.mrb[75].mxu1 }
 0x287   :  { %v3415_v0 = vadd.f32 %v3414_v11, %v3413_v8 }
 0x288   :  { %v1420_v1 = vadd.f32 %v3335_v10, %v5003_v19  ;;  %v3336_v13 = vpop.f32.mrb[76].mxu0 }
 0x289   :  { %v3416_v14 = vpop.f32.mrb[76].mxu1  ;;  %v3337_v15 = vpop.f32.mrb[77].mxu0 }
 0x28a   :  { %v5021_v16 = vadd.f32 %v3415_v0, %v1420_v1  ;;  %v3338_v17 = vadd.f32 %v3337_v15, %v3336_v13  ;;  %v3417_v18 = vpop.f32.mrb[77].mxu1 }
 0x28b   :  { %v3418_v2 = vadd.f32 %v3417_v18, %v3416_v14 }
 0x28c   :  { %v1425_v20 = vadd.f32 %v3338_v17, %v5003_v19  ;;  %v3339_v21 = vpop.f32.mrb[78].mxu0 }
 0x28d   :  { %v3419_v22 = vpop.f32.mrb[78].mxu1  ;;  %v3340_v23 = vpop.f32.mrb[79].mxu0 }
 0x28e   :  { %v5024_v24 = vadd.f32 %v3418_v2, %v1425_v20  ;;  %v3341_v25 = vadd.f32 %v3340_v23, %v3339_v21  ;;  %v3420_v26 = vpop.f32.mrb[79].mxu1 }
 0x28f   :  { %v3421_v27 = vadd.f32 %v3420_v26, %v3419_v22 }
 0x290   :  { %v1430_v29 = vadd.f32 %v3341_v25, %v5003_v19  ;;  %v3342_v30 = vpop.f32.mrb[80].mxu0 }
 0x291   :  { %v3422_v31 = vpop.f32.mrb[80].mxu1  ;;  %v3343_v32 = vpop.f32.mrb[81].mxu0 }
 0x292   :  { %v5027_v33 = vadd.f32 %v3421_v27, %v1430_v29  ;;  %v3344_v34 = vadd.f32 %v3343_v32, %v3342_v30  ;;  %v3423_v35 = vpop.f32.mrb[81].mxu1 }
 0x293   :  { %v3424_v36 = vadd.f32 %v3423_v35, %v3422_v31 }
 0x294   :  { %v1435_v37 = vadd.f32 %v3344_v34, %v5003_v19  ;;  %v3345_v38 = vpop.f32.mrb[82].mxu0 }
 0x295   :  { %v3425_v39 = vpop.f32.mrb[82].mxu1  ;;  %v3346_v40 = vpop.f32.mrb[83].mxu0 }
 0x296   :  { %v5030_v41 = vadd.f32 %v3424_v36, %v1435_v37  ;;  %v3347_v43 = vadd.f32 %v3346_v40, %v3345_v38  ;;  %v3426_v44 = vpop.f32.mrb[83].mxu1 }
 0x297   :  { %v3427_v45 = vadd.f32 %v3426_v44, %v3425_v39 }
 0x298   :  { %v1440_v46 = vadd.f32 %v3347_v43, %v5003_v19  ;;  %v3348_v47 = vpop.f32.mrb[84].mxu0 }
 0x299   :  { %v3428_v48 = vpop.f32.mrb[84].mxu1  ;;  %v3349_v49 = vpop.f32.mrb[85].mxu0 }
 0x29a   :  { %v5033_v51 = vadd.f32 %v3427_v45, %v1440_v46  ;;  %v3350_v52 = vadd.f32 %v3349_v49, %v3348_v47  ;;  %v3429_v53 = vpop.f32.mrb[85].mxu1 }
 0x29b   :  { %v3430_v54 = vadd.f32 %v3429_v53, %v3428_v48 }
 0x29c   :  { %v1445_v55 = vadd.f32 %v3350_v52, %v5003_v19  ;;  %v3351_v56 = vpop.f32.mrb[86].mxu0 }
 0x29d   :  { %v3431_v57 = vpop.f32.mrb[86].mxu1  ;;  %v3352_v59 = vpop.f32.mrb[87].mxu0 }
 0x29e   :  { %v5036_v4 = vadd.f32 %v3430_v54, %v1445_v55  ;;  %v3353_v5 = vadd.f32 %v3352_v59, %v3351_v56  ;;  %v3432_v7 = vpop.f32.mrb[87].mxu1  ;;  %v2399_v59 = vld [vmem:[#allocation13 + $0x18] sm:$0xff] }
 0x29f   :  { %v3433_v6 = vadd.f32 %v3432_v7, %v3431_v57  ;;  %v2396_v57 = vld [vmem:[#allocation13] sm:$0xff] }
 0x2a0   :  { %v1450_v8 = vadd.f32 %v3353_v5, %v5003_v19  ;;  %v3354_v9 = vpop.f32.mrb[88].mxu0 }
 0x2a1   :  { %v3434_v10 = vpop.f32.mrb[88].mxu1  ;;  %v3355_v11 = vpop.f32.mrb[89].mxu0 }
 0x2a2   :  { %v5039_v0 = vadd.f32 %v3433_v6, %v1450_v8  ;;  %v3356_v1 = vadd.f32 %v3355_v11, %v3354_v9  ;;  %v3435_v13 = vpop.f32.mrb[89].mxu1  ;;  %v2398_v6 = vld [vmem:[#allocation13 + $0x10] sm:$0xff]  ;;  %v2401_v8 = vld [vmem:[#allocation13 + $0x28] sm:$0xff]  ;;  %v2403_v9 = vld [vmem:[#allocation13 + $0x38] sm:$0xff] }
 0x2a3   :  { %v3436_v14 = vadd.f32 %v3435_v13, %v3434_v10  ;;  %v2452_v13 = vld [vmem:[#allocation13 + $0x1c0] sm:$0xff] }
 0x2a4   :  { %v1455_v15 = vadd.f32 %v3356_v1, %v5003_v19  ;;  %v3357_v17 = vpop.f32.mrb[90].mxu0  ;;  %v2406_v1 = vld [vmem:[#allocation13 + $0x50] sm:$0xff] }
 0x2a5   :  { %v3437_v18 = vpop.f32.mrb[90].mxu1  ;;  %v3358_v2 = vpop.f32.mrb[91].mxu0 }
 0x2a6   :  { %v5042_v20 = vadd.f32 %v3436_v14, %v1455_v15  ;;  %v3359_v21 = vadd.f32 %v3358_v2, %v3357_v17  ;;  %v3438_v22 = vpop.f32.mrb[91].mxu1  ;;  %v2455_v14 = vld [vmem:[#allocation13 + $0x1d8] sm:$0xff] }
 0x2a7   :  { %v3439_v23 = vadd.f32 %v3438_v22, %v3437_v18  ;;  %v2402_v22 = vld [vmem:[#allocation13 + $0x30] sm:$0xff] }
 0x2a8   :  { %v1460_v25 = vadd.f32 %v3359_v21, %v5003_v19  ;;  %v3360_v26 = vpop.f32.mrb[92].mxu0  ;;  %v4280_v21 = vpack.c.bf16 %v2401_v8, %v2398_v6 }
 0x2a9   :  { %v3440_v27 = vpop.f32.mrb[92].mxu1  ;;  %v3361_v29 = vpop.f32.mrb[93].mxu0 }
 0x2aa   :  { %v5045_v30 = vadd.f32 %v3439_v23, %v1460_v25  ;;  %v3362_v31 = vadd.f32 %v3361_v29, %v3360_v26  ;;  %v3441_v32 = vpop.f32.mrb[93].mxu1  ;;  %v2405_v23 = vld [vmem:[#allocation13 + $0x48] sm:$0xff] }
 0x2ab   :  { %v3442_v34 = vadd.f32 %v3441_v32, %v3440_v27  ;;  %v4154_v27 = vpack.c.bf16 %v2406_v1, %v2403_v9  ;;  %v2409_v29 = vld [vmem:[#allocation13 + $0x68] sm:$0xff]  ;;  %v2404_v32 = vld [vmem:[#allocation13 + $0x40] sm:$0xff] }
 0x2ac   :  { %v1465_v35 = vadd.f32 %v3362_v31, %v5003_v19  ;;  %v3363_v36 = vpop.f32.mrb[94].mxu0  ;;  %v4282_v31 = vpack.c.bf16 %v2455_v14, %v2452_v13 }
 0x2ad   :  { %v3443_v37 = vpop.f32.mrb[94].mxu1  ;;  %v3364_v38 = vpop.f32.mrb[95].mxu0 }
 0x2ae   :  { %v5048_v39 = vadd.f32 %v3442_v34, %v1465_v35  ;;  %v3365_v40 = vadd.f32 %v3364_v38, %v3363_v36  ;;  %v3444_v43 = vpop.f32.mrb[95].mxu1  ;;  %v2407_v34 = vld [vmem:[#allocation13 + $0x58] sm:$0xff]  ;;  %v2412_v38 = vld [vmem:[#allocation13 + $0x80] sm:$0xff] }
 0x2af   :  { %v3445_v44 = vadd.f32 %v3444_v43, %v3443_v37 }
 0x2b0   :  { %v1470_v45 = vadd.f32 %v3365_v40, %v5003_v19  ;;  %v3478_v46 = vpop.f32.mrb[96].mxu0  ;;  %v2458_v40 = vld [vmem:[#allocation13 + $0x1f0] sm:$0xff] }
 0x2b1   :  { %v3558_v47 = vpop.f32.mrb[96].mxu1  ;;  %v3479_v48 = vpop.f32.mrb[97].mxu0 }
 0x2b2   :  { %v5051_v49 = vadd.f32 %v3445_v44, %v1470_v45  ;;  %v3480_v52 = vadd.f32 %v3479_v48, %v3478_v46  ;;  %v3559_v53 = vpop.f32.mrb[97].mxu1  ;;  %v2408_v48 = vld [vmem:[#allocation13 + $0x60] sm:$0xff] }
 0x2b3   :  { %v3560_v54 = vadd.f32 %v3559_v53, %v3558_v47  ;;  %v4156_v47 = vpack.c.bf16 %v2405_v23, %v2402_v22  ;;  %v4284_v53 = vpack.c.bf16 %v2407_v34, %v2404_v32  ;;  %v2421_v23 = vld [vmem:[#allocation13 + $0xc8] sm:$0xff]  ;;  %v2470_v34 = vld [vmem:[#allocation13 + $0x250] sm:$0xff] }
 0x2b4   :  { %v1685_v55 = vadd.f32 %v3480_v52, %v5006_v28  ;;  %v3481_v56 = vpop.f32.mrb[98].mxu0  ;;  %v4152_v28 = vpack.c.bf16 %v2399_v59, %v2396_v57  ;;  %v2411_v52 = vld [vmem:[#allocation13 + $0x78] sm:$0xff] }
 0x2b5   :  { %v3561_v5 = vpop.f32.mrb[98].mxu1  ;;  %v3482_v7 = vpop.f32.mrb[99].mxu0  ;;  %v2415_v57 = vld [vmem:[#allocation13 + $0x98] sm:$0xff] }
 0x2b6   :  { %v1830_v10 = vadd.f32 %v3560_v54, %v1685_v55  ;;  %v3483_v19 = vadd.f32 %v3482_v7, %v3481_v56  ;;  %v3562_v11 = vpop.f32.mrb[99].mxu1  ;;  %v4158_v56 = vpack.c.bf16 %v2412_v38, %v2409_v29  ;;  %v2413_v7 = vld [vmem:[#allocation13 + $0x88] sm:$0xff] }
 0x2b7   :  { %v3563_v15 = vadd.f32 %v3562_v11, %v3561_v5  ;;  %v2410_v5 = vld [vmem:[#allocation13 + $0x70] sm:$0xff] }
 0x2b8   :  { %v1908_v17 = vmul.f32 0.5, %v1830_v10  ;;  %v1690_v18 = vadd.f32 %v3483_v19, %v5009_v42  ;;  %v3484_v2 = vpop.f32.mrb[100].mxu0  ;;  %v2461_v42 = vld [vmem:[#allocation13 + $0x208] sm:$0xff]  ;;  %v2464_v10 = vld [vmem:[#allocation13 + $0x220] sm:$0xff]  ;;  %v2467_v19 = vld [vmem:[#allocation13 + $0x238] sm:$0xff] }
 0x2b9   :  { %v3564_v25 = vpop.f32.mrb[100].mxu1  ;;  %v3485_v26 = vpop.f32.mrb[101].mxu0  ;;  %v4286_v59 = vpack.c.bf16 %v2461_v42, %v2458_v40 }
 0x2ba   :  { %v1835_v35 = vadd.f32 %v3563_v15, %v1690_v18  ;;  %v3486_v36 = vadd.f32 %v3485_v26, %v3484_v2  ;;  %v3565_v37 = vpop.f32.mrb[101].mxu1  ;;  %2075 = vmatmul.mubr.f32.vlgmr.msra.gmra.mrb[128].mxu0 %v1908_v17  ;;  %2236 = vmatmul.mubr.f32.vlgmr.msra.gmra.mrb[128].mxu1 %v1908_v17  ;;  %v4160_v15 = vpack.c.bf16 %v2411_v52, %v2408_v48  ;;  %v2414_v17 = vld [vmem:[#allocation13 + $0x90] sm:$0xff]  ;;  %v2417_v18 = vld [vmem:[#allocation13 + $0xa8] sm:$0xff]  ;;  %v2416_v26 = vld [vmem:[#allocation13 + $0xa0] sm:$0xff] }
 0x2bb   :  { %v3566_v43 = vadd.f32 %v3565_v37, %v3564_v25  ;;  %2080 = vmatprep.mubr.f32.mxu0 %v4624_v12  ;;  %2241 = vmatprep.mubr.f32.mxu1 %v4624_v12  ;;  %v4288_v2 = vpack.c.bf16 %v2413_v7, %v2410_v5  ;;  %v4290_v25 = vpack.c.bf16 %v2467_v19, %v2464_v10  ;;  %v2427_v52 = vld [vmem:[#allocation13 + $0xf8] sm:$0xff]  ;;  %v2476_v5 = vld [vmem:[#allocation13 + $0x280] sm:$0xff]  ;;  %v2426_v19 = vld [vmem:[#allocation13 + $0xf0] sm:$0xff] }
 0x2bc   :  { %v1909_v44 = vmul.f32 0.5, %v1835_v35  ;;  %v1695_v45 = vadd.f32 %v3486_v36, %v5012_v50  ;;  %v3487_v46 = vpop.f32.mrb[102].mxu0  ;;  %4153 = vmatpush1.bf16.msra.mxu0 %v4152_v28  ;;  %4281 = vmatpush3.bf16.msra.mxu1 %v4280_v21  ;;  %v2418_v50 = vld [vmem:[#allocation13 + $0xb0] sm:$0xff]  ;;  %v2473_v35 = vld [vmem:[#allocation13 + $0x268] sm:$0xff]  ;;  %v4164_v42 = vpack.c.bf16 %v2417_v18, %v2414_v17  ;;  %v2479_v7 = vld [vmem:[#allocation13 + $0x298] sm:$0xff] }
 0x2bd   :  { %v3567_v54 = vpop.f32.mrb[102].mxu1  ;;  %v3488_v55 = vpop.f32.mrb[103].mxu0  ;;  %4155 = vmatprep.subr.bf16.mxu0 %v4154_v27  ;;  %4283 = vmatprep.subr.bf16.mxu1 %v4282_v31  ;;  %v4162_v22 = vpack.c.bf16 %v2418_v50, %v2415_v57  ;;  %v2419_v27 = vld [vmem:[#allocation13 + $0xb8] sm:$0xff]  ;;  %v2433_v17 = vld [vmem:[#allocation13 + $0x128] sm:$0xff]  ;;  %v4298_v18 = vpack.c.bf16 %v2479_v7, %v2476_v5 }
 0x2be   :  { %v1840_v6 = vadd.f32 %v3566_v43, %v1695_v45  ;;  %v3489_v8 = vadd.f32 %v3488_v55, %v3487_v46  ;;  %v3568_v9 = vpop.f32.mrb[103].mxu1  ;;  %2081 = vmatmul.mubr.f32.gmra.mrb[130].mxu0 %v1909_v44  ;;  %2242 = vmatmul.mubr.f32.gmra.mrb[130].mxu1 %v1909_v44  ;;  %v2420_v43 = vld [vmem:[#allocation13 + $0xc0] sm:$0xff]  ;;  %v2423_v44 = vld [vmem:[#allocation13 + $0xd8] sm:$0xff]  ;;  %v4292_v45 = vpack.c.bf16 %v2419_v27, %v2416_v26  ;;  %v2425_v55 = vld [vmem:[#allocation13 + $0xe8] sm:$0xff] }
 0x2bf   :  { %v3569_v11 = vadd.f32 %v3568_v9, %v3567_v54  ;;  %2086 = vmatprep.mubr.f32.mxu0 %v4624_v12  ;;  %2247 = vmatprep.mubr.f32.mxu1 %v4624_v12  ;;  %v2422_v54 = vld [vmem:[#allocation13 + $0xd0] sm:$0xff]  ;;  %v4168_v10 = vpack.c.bf16 %v2423_v44, %v2420_v43  ;;  %v2485_v26 = vld [vmem:[#allocation13 + $0x2c8] sm:$0xff] }
 0x2c0   :  { %v1910_v1 = vmul.f32 0.5, %v1840_v6  ;;  %v1700_v13 = vadd.f32 %v3489_v8, %v5015_v3  ;;  %v3490_v14 = vpop.f32.mrb[104].mxu0  ;;  %4157 = vmatpush1.bf16.msra.mxu0 %v4156_v47  ;;  %4285 = vmatpush3.bf16.msra.mxu1 %v4284_v53  ;;  %v2424_v3 = vld [vmem:[#allocation13 + $0xe0] sm:$0xff]  ;;  %v4294_v53 = vpack.c.bf16 %v2473_v35, %v2470_v34  ;;  %v2435_v35 = vld [vmem:[#allocation13 + $0x138] sm:$0xff]  ;;  %v2434_v44 = vld [vmem:[#allocation13 + $0x130] sm:$0xff] }
 0x2c1   :  { %v3570_v28 = vpop.f32.mrb[104].mxu1  ;;  %v3491_v21 = vpop.f32.mrb[105].mxu0  ;;  %4159 = vmatprep.subr.bf16.mxu0 %v4158_v56  ;;  %4287 = vmatprep.subr.bf16.mxu1 %v4286_v59  ;;  %v4166_v48 = vpack.c.bf16 %v2424_v3, %v2421_v23  ;;  %v2432_v34 = vld [vmem:[#allocation13 + $0x120] sm:$0xff] }
 0x2c2   :  { %v1845_v29 = vadd.f32 %v3569_v11, %v1700_v13  ;;  %v3492_v31 = vadd.f32 %v3491_v21, %v3490_v14  ;;  %v3571_v32 = vpop.f32.mrb[105].mxu1  ;;  %2087 = vmatmul.mubr.f32.gmra.mrb[132].mxu0 %v1910_v1  ;;  %2248 = vmatmul.mubr.f32.gmra.mrb[132].mxu1 %v1910_v1  ;;  %v2429_v11 = vld [vmem:[#allocation13 + $0x108] sm:$0xff]  ;;  %v4296_v1 = vpack.c.bf16 %v2425_v55, %v2422_v54 }
 0x2c3   :  { %v3572_v36 = vadd.f32 %v3571_v32, %v3570_v28  ;;  %2092 = vmatprep.mubr.f32.mxu0 %v4624_v12  ;;  %2253 = vmatprep.mubr.f32.mxu1 %v4624_v12  ;;  %v2431_v28 = vld [vmem:[#allocation13 + $0x118] sm:$0xff]  ;;  %v4172_v3 = vpack.c.bf16 %v2429_v11, %v2426_v19 }
 0x2c4   :  { %v1911_v37 = vmul.f32 0.5, %v1845_v29  ;;  %v1705_v38 = vadd.f32 %v3492_v31, %v5018_v63  ;;  %v3493_v40 = vpop.f32.mrb[106].mxu0  ;;  %4161 = vmatpush1.bf16.msra.mxu0 %v4160_v15  ;;  %4289 = vmatpush3.bf16.msra.mxu1 %v4288_v2  ;;  %v2430_v63 = vld [vmem:[#allocation13 + $0x110] sm:$0xff]  ;;  %v2428_v2 = vld [vmem:[#allocation13 + $0x100] sm:$0xff] }
 0x2c5   :  { %v3573_v46 = vpop.f32.mrb[106].mxu1  ;;  %v3494_v47 = vpop.f32.mrb[107].mxu0  ;;  %4163 = vmatprep.subr.bf16.mxu0 %v4162_v22  ;;  %4291 = vmatprep.subr.bf16.mxu1 %v4290_v25  ;;  %v4170_v15 = vpack.c.bf16 %v2430_v63, %v2427_v52  ;;  %v2482_v25 = vld [vmem:[#allocation13 + $0x2b0] sm:$0xff]  ;;  %v2488_v52 = vld [vmem:[#allocation13 + $0x2e0] sm:$0xff] }
 0x2c6   :  { %v1850_v56 = vadd.f32 %v3572_v36, %v1705_v38  ;;  %v3495_v57 = vadd.f32 %v3494_v47, %v3493_v40  ;;  %v3574_v59 = vpop.f32.mrb[107].mxu1  ;;  %2093 = vmatmul.mubr.f32.gmra.mrb[134].mxu0 %v1911_v37  ;;  %2254 = vmatmul.mubr.f32.gmra.mrb[134].mxu1 %v1911_v37  ;;  %v4300_v36 = vpack.c.bf16 %v2431_v28, %v2428_v2 }
 0x2c7   :  { %v3575_v6 = vadd.f32 %v3574_v59, %v3573_v46  ;;  %2098 = vmatprep.mubr.f32.mxu0 %v4624_v12  ;;  %2259 = vmatprep.mubr.f32.mxu1 %v4624_v12  ;;  %v4302_v43 = vpack.c.bf16 %v2485_v26, %v2482_v25  ;;  %v4176_v59 = vpack.c.bf16 %v2435_v35, %v2432_v34 }
 0x2c8   :  { %v1912_v8 = vmul.f32 0.5, %v1850_v56  ;;  %v1710_v9 = vadd.f32 %v3495_v57, %v5021_v16  ;;  %v3496_v50 = vpop.f32.mrb[108].mxu0  ;;  %4165 = vmatpush1.bf16.msra.mxu0 %v4164_v42  ;;  %4293 = vmatpush3.bf16.msra.mxu1 %v4292_v45  ;;  %v2436_v16 = vld [vmem:[#allocation13 + $0x140] sm:$0xff]  ;;  %v2439_v42 = vld [vmem:[#allocation13 + $0x158] sm:$0xff]  ;;  %v2437_v45 = vld [vmem:[#allocation13 + $0x148] sm:$0xff] }
 0x2c9   :  { %v3576_v13 = vpop.f32.mrb[108].mxu1  ;;  %v3497_v14 = vpop.f32.mrb[109].mxu0  ;;  %4167 = vmatprep.subr.bf16.mxu0 %v4166_v48  ;;  %4295 = vmatprep.subr.bf16.mxu1 %v4294_v53  ;;  %v4174_v40 = vpack.c.bf16 %v2436_v16, %v2433_v17  ;;  %v2491_v53 = vld [vmem:[#allocation13 + $0x2f8] sm:$0xff]  ;;  %v4304_v63 = vpack.c.bf16 %v2437_v45, %v2434_v44  ;;  %v2457_v45 = vld [vmem:[#allocation13 + $0x1e8] sm:$0xff] }
 0x2ca   :  { %v1855_v21 = vadd.f32 %v3575_v6, %v1710_v9  ;;  %v3498_v22 = vadd.f32 %v3497_v14, %v3496_v50  ;;  %v3577_v23 = vpop.f32.mrb[109].mxu1  ;;  %2099 = vmatmul.mubr.f32.gmra.mrb[136].mxu0 %v1912_v8  ;;  %2260 = vmatmul.mubr.f32.gmra.mrb[136].mxu1 %v1912_v8  ;;  %v2438_v8 = vld [vmem:[#allocation13 + $0x150] sm:$0xff]  ;;  %v2441_v9 = vld [vmem:[#allocation13 + $0x168] sm:$0xff]  ;;  %v4306_v50 = vpack.c.bf16 %v2491_v53, %v2488_v52 }
 0x2cb   :  { %v3578_v27 = vadd.f32 %v3577_v23, %v3576_v13  ;;  %2104 = vmatprep.mubr.f32.mxu0 %v4624_v12  ;;  %2265 = vmatprep.mubr.f32.mxu1 %v4624_v12  ;;  %v2447_v23 = vld [vmem:[#allocation13 + $0x198] sm:$0xff] }
 0x2cc   :  { %v1913_v29 = vmul.f32 0.5, %v1855_v21  ;;  %v1715_v31 = vadd.f32 %v3498_v22, %v5024_v24  ;;  %v3499_v32 = vpop.f32.mrb[110].mxu0  ;;  %4169 = vmatpush1.bf16.msra.mxu0 %v4168_v10  ;;  %4297 = vmatpush3.bf16.msra.mxu1 %v4296_v1  ;;  %v2442_v24 = vld [vmem:[#allocation13 + $0x170] sm:$0xff]  ;;  %v2445_v1 = vld [vmem:[#allocation13 + $0x188] sm:$0xff]  ;;  %v2444_v22 = vld [vmem:[#allocation13 + $0x180] sm:$0xff] }
 0x2cd   :  { %v3579_v37 = vpop.f32.mrb[110].mxu1  ;;  %v3500_v38 = vpop.f32.mrb[111].mxu0  ;;  %4171 = vmatprep.subr.bf16.mxu0 %v4170_v15  ;;  %4299 = vmatprep.subr.bf16.mxu1 %v4298_v18  ;;  %v4178_v6 = vpack.c.bf16 %v2442_v24, %v2439_v42  ;;  %v4180_v18 = vpack.c.bf16 %v2441_v9, %v2438_v8  ;;  %v4184_v34 = vpack.c.bf16 %v2447_v23, %v2444_v22 }
 0x2ce   :  { %v1860_v46 = vadd.f32 %v3578_v27, %v1715_v31  ;;  %v3501_v47 = vadd.f32 %v3500_v38, %v3499_v32  ;;  %v3580_v48 = vpop.f32.mrb[111].mxu1  ;;  %2105 = vmatmul.mubr.f32.gmra.mrb[138].mxu0 %v1913_v29  ;;  %2266 = vmatmul.mubr.f32.gmra.mrb[138].mxu1 %v1913_v29  ;;  %v2451_v27 = vld [vmem:[#allocation13 + $0x1b8] sm:$0xff]  ;;  %v2454_v29 = vld [vmem:[#allocation13 + $0x1d0] sm:$0xff] }
 0x2cf   :  { %v3581_v54 = vadd.f32 %v3580_v48, %v3579_v37  ;;  %2110 = vmatprep.mubr.f32.mxu0 %v4624_v12  ;;  %2271 = vmatprep.mubr.f32.mxu1 %v4624_v12  ;;  %v4186_v37 = vpack.c.bf16 %v2454_v29, %v2451_v27  ;;  %v2450_v38 = vld [vmem:[#allocation13 + $0x1b0] sm:$0xff]  ;;  %v2468_v27 = vld [vmem:[#allocation13 + $0x240] sm:$0xff]  ;;  %v2471_v29 = vld [vmem:[#allocation13 + $0x258] sm:$0xff] }
 0x2d0   :  { %v1914_v55 = vmul.f32 0.5, %v1860_v46  ;;  %v1720_v56 = vadd.f32 %v3501_v47, %v5027_v33  ;;  %v3502_v57 = vpop.f32.mrb[112].mxu0  ;;  %4173 = vmatpush1.bf16.msra.mxu0 %v4172_v3  ;;  %4301 = vmatpush3.bf16.msra.mxu1 %v4300_v36  ;;  %v2448_v33 = vld [vmem:[#allocation13 + $0x1a0] sm:$0xff] }
 0x2d1   :  { %v3582_v5 = vpop.f32.mrb[112].mxu1  ;;  %v3503_v7 = vpop.f32.mrb[113].mxu0  ;;  %4175 = vmatprep.subr.bf16.mxu0 %v4174_v40  ;;  %4303 = vmatprep.subr.bf16.mxu1 %v4302_v43  ;;  %v4182_v21 = vpack.c.bf16 %v2448_v33, %v2445_v1  ;;  %v2453_v40 = vld [vmem:[#allocation13 + $0x1c8] sm:$0xff]  ;;  %v2460_v46 = vld [vmem:[#allocation13 + $0x200] sm:$0xff]  ;;  %v2462_v33 = vld [vmem:[#allocation13 + $0x210] sm:$0xff] }
 0x2d2   :  { %v1865_v10 = vadd.f32 %v3581_v54, %v1720_v56  ;;  %v3504_v19 = vadd.f32 %v3503_v7, %v3502_v57  ;;  %v3583_v11 = vpop.f32.mrb[113].mxu1  ;;  %2111 = vmatmul.mubr.f32.gmra.mrb[140].mxu0 %v1914_v55  ;;  %2272 = vmatmul.mubr.f32.gmra.mrb[140].mxu1 %v1914_v55  ;;  %v4188_v52 = vpack.c.bf16 %v2453_v40, %v2450_v38  ;;  %v2456_v56 = vld [vmem:[#allocation13 + $0x1e0] sm:$0xff]  ;;  %v2459_v57 = vld [vmem:[#allocation13 + $0x1f8] sm:$0xff] }
 0x2d3   :  { %v3584_v13 = vadd.f32 %v3583_v11, %v3582_v5  ;;  %2116 = vmatprep.mubr.f32.mxu0 %v4624_v12  ;;  %2277 = vmatprep.mubr.f32.mxu1 %v4624_v12  ;;  %v4190_v55 = vpack.c.bf16 %v2460_v46, %v2457_v45  ;;  %v2463_v7 = vld [vmem:[#allocation13 + $0x218] sm:$0xff]  ;;  %v4200_v38 = vpack.c.bf16 %v2471_v29, %v2468_v27  ;;  %v2477_v45 = vld [vmem:[#allocation13 + $0x288] sm:$0xff]  ;;  %v2492_v29 = vld [vmem:[#allocation13 + $0x300] sm:$0xff] }
 0x2d4   :  { %v1915_v14 = vmul.f32 0.5, %v1865_v10  ;;  %v1725_v15 = vadd.f32 %v3504_v19, %v5030_v41  ;;  %v3505_v17 = vpop.f32.mrb[114].mxu0  ;;  %4177 = vmatpush1.bf16.msra.mxu0 %v4176_v59  ;;  %4305 = vmatpush3.bf16.msra.mxu1 %v4304_v63  ;;  %v4192_v10 = vpack.c.bf16 %v2459_v57, %v2456_v56 }
 0x2d5   :  { %v3585_v2 = vpop.f32.mrb[114].mxu1  ;;  %v3506_v28 = vpop.f32.mrb[115].mxu0  ;;  %4179 = vmatprep.subr.bf16.mxu0 %v4178_v6  ;;  %4307 = vmatprep.subr.bf16.mxu1 %v4306_v50  ;;  %v2466_v6 = vld [vmem:[#allocation13 + $0x230] sm:$0xff] }
 0x2d6   :  { %v1870_v16 = vadd.f32 %v3584_v13, %v1725_v15  ;;  %v3507_v25 = vadd.f32 %v3506_v28, %v3505_v17  ;;  %v3586_v26 = vpop.f32.mrb[115].mxu1  ;;  %2117 = vmatmul.mubr.f32.gmra.mrb[142].mxu0 %v1915_v14  ;;  %2278 = vmatmul.mubr.f32.gmra.mrb[142].mxu1 %v1915_v14  ;;  %v4194_v1 = vpack.c.bf16 %v2466_v6, %v2463_v7  ;;  %v2465_v13 = vld [vmem:[#allocation13 + $0x228] sm:$0xff] }
 0x2d7   :  { %v3587_v31 = vadd.f32 %v3586_v26, %v3585_v2  ;;  %2122 = vmatprep.mubr.f32.mxu0 %v4624_v12  ;;  %2283 = vmatprep.mubr.f32.mxu1 %v4624_v12  ;;  %v2472_v2 = vld [vmem:[#allocation13 + $0x260] sm:$0xff]  ;;  %v4196_v23 = vpack.c.bf16 %v2465_v13, %v2462_v33 }
 0x2d8   :  { %v1916_v41 = vmul.f32 0.5, %v1870_v16  ;;  %v1730_v32 = vadd.f32 %v3507_v25, %v5033_v51  ;;  %v3508_v3 = vpop.f32.mrb[116].mxu0  ;;  %4181 = vmatpush1.bf16.msra.mxu0 %v4180_v18  ;;  %v2469_v18 = vld [vmem:[#allocation13 + $0x248] sm:$0xff]  ;;  %v2440_v33 = vld [vmem:[#allocation13 + $0x160] sm:$0xff] }
 0x2d9   :  { %v3588_v35 = vpop.f32.mrb[116].mxu1  ;;  %v3509_v36 = vpop.f32.mrb[117].mxu0  ;;  %4183 = vmatprep.subr.bf16.mxu0 %v4182_v21  ;;  %v4198_v26 = vpack.c.bf16 %v2472_v2, %v2469_v18  ;;  %v2493_v2 = vld [vmem:[#allocation13 + $0x308] sm:$0xff] }
 0x2da   :  { %v1875_v42 = vadd.f32 %v3587_v31, %v1730_v32  ;;  %v3510_v43 = vadd.f32 %v3509_v36, %v3508_v3  ;;  %v3589_v44 = vpop.f32.mrb[117].mxu1  ;;  %2123 = vmatmul.mubr.f32.gmra.mrb[144].mxu0 %v1916_v41  ;;  %2284 = vmatmul.mubr.f32.gmra.mrb[144].mxu1 %v1916_v41  ;;  %v2475_v3 = vld [vmem:[#allocation13 + $0x278] sm:$0xff] }
 0x2db   :  { %v3590_v47 = vadd.f32 %v3589_v44, %v3588_v35  ;;  %2128 = vmatprep.mubr.f32.mxu0 %v4624_v12  ;;  %2289 = vmatprep.mubr.f32.mxu1 %v4624_v12  ;;  %v2474_v44 = vld [vmem:[#allocation13 + $0x270] sm:$0xff] }
 0x2dc   :  { %v1917_v51 = vmul.f32 0.5, %v1875_v42  ;;  %v1735_v48 = vadd.f32 %v3510_v43, %v5036_v4  ;;  %v3511_v24 = vpop.f32.mrb[118].mxu0  ;;  %4185 = vmatpush1.bf16.msra.mxu0 %v4184_v34  ;;  %v2478_v34 = vld [vmem:[#allocation13 + $0x290] sm:$0xff] }
 0x2dd   :  { %v3591_v53 = vpop.f32.mrb[118].mxu1  ;;  %v3512_v54 = vpop.f32.mrb[119].mxu0  ;;  %4187 = vmatprep.subr.bf16.mxu0 %v4186_v37  ;;  %v4202_v43 = vpack.c.bf16 %v2478_v34, %v2475_v3  ;;  %v2494_v34 = vld [vmem:[#allocation13 + $0x310] sm:$0xff] }
 0x2de   :  { %v1880_v59 = vadd.f32 %v3590_v47, %v1735_v48  ;;  %v3513_v63 = vadd.f32 %v3512_v54, %v3511_v24  ;;  %v3592_v5 = vpop.f32.mrb[119].mxu1  ;;  %2129 = vmatmul.mubr.f32.gmra.mrb[146].mxu0 %v1917_v51  ;;  %2290 = vmatmul.mubr.f32.gmra.mrb[146].mxu1 %v1917_v51  ;;  %v2481_v48 = vld [vmem:[#allocation13 + $0x2a8] sm:$0xff]  ;;  %v2484_v24 = vld [vmem:[#allocation13 + $0x2c0] sm:$0xff] }
 0x2df   :  { %v3593_v8 = vadd.f32 %v3592_v5, %v3591_v53  ;;  %2134 = vmatprep.mubr.f32.mxu0 %v4624_v12  ;;  %2295 = vmatprep.mubr.f32.mxu1 %v4624_v12 }
 0x2e0   :  { %v1918_v4 = vmul.f32 0.5, %v1880_v59  ;;  %v1740_v9 = vadd.f32 %v3513_v63, %v5039_v0  ;;  %v3514_v50 = vpop.f32.mrb[120].mxu0  ;;  %4189 = vmatpush1.bf16.msra.mxu0 %v4188_v52  ;;  %v4206_v59 = vpack.c.bf16 %v2484_v24, %v2481_v48 }
 0x2e1   :  { %v3594_v19 = vpop.f32.mrb[120].mxu1  ;;  %v3515_v11 = vpop.f32.mrb[121].mxu0  ;;  %4191 = vmatprep.subr.bf16.mxu0 %v4190_v55  ;;  %v4204_v55 = vpack.c.bf16 %v2477_v45, %v2474_v44 }
 0x2e2   :  { %v1885_v14 = vadd.f32 %v3593_v8, %v1740_v9  ;;  %v3516_v15 = vadd.f32 %v3515_v11, %v3514_v50  ;;  %v3595_v17 = vpop.f32.mrb[121].mxu1  ;;  %2135 = vmatmul.mubr.f32.gmra.mrb[148].mxu0 %v1918_v4  ;;  %2296 = vmatmul.mubr.f32.gmra.mrb[148].mxu1 %v1918_v4  ;;  %v2480_v50 = vld [vmem:[#allocation13 + $0x2a0] sm:$0xff]  ;;  %v2487_v11 = vld [vmem:[#allocation13 + $0x2d8] sm:$0xff] }
 0x2e3   :  { %v3596_v28 = vadd.f32 %v3595_v17, %v3594_v19  ;;  %2140 = vmatprep.mubr.f32.mxu0 %v4624_v12  ;;  %2301 = vmatprep.mubr.f32.mxu1 %v4624_v12  ;;  %v2489_v17 = vld [vmem:[#allocation13 + $0x2e8] sm:$0xff] }
 0x2e4   :  { %v1919_v0 = vmul.f32 0.5, %v1885_v14  ;;  %v1745_v21 = vadd.f32 %v3516_v15, %v5042_v20  ;;  %v3517_v22 = vpop.f32.mrb[122].mxu0  ;;  %4193 = vmatpush1.bf16.msra.mxu0 %v4192_v10  ;;  %v2483_v10 = vld [vmem:[#allocation13 + $0x2b8] sm:$0xff]  ;;  %v2486_v14 = vld [vmem:[#allocation13 + $0x2d0] sm:$0xff] }
 0x2e5   :  { %v3597_v16 = vpop.f32.mrb[122].mxu1  ;;  %v3518_v25 = vpop.f32.mrb[123].mxu0  ;;  %4195 = vmatprep.subr.bf16.mxu0 %v4194_v1  ;;  %v4208_v19 = vpack.c.bf16 %v2483_v10, %v2480_v50  ;;  %v2490_v1 = vld [vmem:[#allocation13 + $0x2f0] sm:$0xff]  ;;  %v4212_v18 = vpack.c.bf16 %v2489_v17, %v2486_v14  ;;  %v2507_v50 = vld [vmem:[#allocation13 + $0x378] sm:$0xff]  ;;  %v2509_v17 = vld [vmem:[#allocation13 + $0x388] sm:$0xff] }
 0x2e6   :  { %v1890_v31 = vadd.f32 %v3596_v28, %v1745_v21  ;;  %v3519_v41 = vadd.f32 %v3518_v25, %v3517_v22  ;;  %v3598_v32 = vpop.f32.mrb[123].mxu1  ;;  %2141 = vmatmul.mubr.f32.gmra.mrb[150].mxu0 %v1919_v0  ;;  %2302 = vmatmul.mubr.f32.gmra.mrb[150].mxu1 %v1919_v0  ;;  %v4210_v13 = vpack.c.bf16 %v2490_v1, %v2487_v11  ;;  %v2542_v0 = vld [vmem:[#allocation13 + $0x490] sm:$0xff]  ;;  %v2545_v21 = vld [vmem:[#allocation13 + $0x4a8] sm:$0xff] }
 0x2e7   :  { %v3599_v35 = vadd.f32 %v3598_v32, %v3597_v16  ;;  %2146 = vmatprep.mubr.f32.mxu0 %v4624_v12  ;;  %2307 = vmatprep.mubr.f32.mxu1 %v4624_v12  ;;  %v4310_v22 = vpack.c.bf16 %v2545_v21, %v2542_v0 }
 0x2e8   :  { %v1920_v20 = vmul.f32 0.5, %v1890_v31  ;;  %v1750_v36 = vadd.f32 %v3519_v41, %v5045_v30  ;;  %v3520_v37 = vpop.f32.mrb[124].mxu0  ;;  %4197 = vmatpush1.bf16.msra.mxu0 %v4196_v23  ;;  %v5102_v23 = vld [vmem:[%s5409_s9] sm:$0xf]  ;;  %v2495_v31 = vld [vmem:[#allocation13 + $0x318] sm:$0xff] }
 0x2e9   :  { %v3600_v40 = vpop.f32.mrb[124].mxu1  ;;  %v3521_v42 = vpop.f32.mrb[125].mxu0  ;;  %4199 = vmatprep.subr.bf16.mxu0 %v4198_v26  ;;  %v5106_v16 = vrot.slane %v5102_v23, %v4832_v58  ;;  %v5110_v25 = vrot.slane %v5102_v23, %v4839_v61  ;;  %v4216_v45 = vpack.c.bf16 %v2495_v31, %v2492_v29  ;;  %v2510_v29 = vld [vmem:[#allocation13 + $0x390] sm:$0xff]  ;;  %v2513_v31 = vld [vmem:[#allocation13 + $0x3a8] sm:$0xff] }
 0x2ea   :  { %v1895_v46 = vadd.f32 %v3599_v35, %v1750_v36  ;;  %v3522_v47 = vadd.f32 %v3521_v42, %v3520_v37  ;;  %v3601_v51 = vpop.f32.mrb[125].mxu1  ;;  %2147 = vmatmul.mubr.f32.gmra.mrb[152].mxu0 %v1920_v20  ;;  %2308 = vmatmul.mubr.f32.gmra.mrb[152].mxu1 %v1920_v20  ;;  %v2497_v35 = vld [vmem:[#allocation13 + $0x328] sm:$0xff]  ;;  %v2499_v20 = vld [vmem:[#allocation13 + $0x338] sm:$0xff]  ;;  %v2502_v37 = vld [vmem:[#allocation13 + $0x350] sm:$0xff] }
 0x2eb   :  { %v3602_v52 = vadd.f32 %v3601_v51, %v3600_v40  ;;  %2152 = vmatprep.mubr.f32.mxu0 %v4624_v12  ;;  %2313 = vmatprep.mubr.f32.mxu1 %v4624_v12  ;;  %v2551_v40 = vld [vmem:[#allocation13 + $0x4d8] sm:$0xff]  ;;  %v2501_v51 = vld [vmem:[#allocation13 + $0x348] sm:$0xff] }
 0x2ec   :  { %v1921_v30 = vmul.f32 0.5, %v1895_v46  ;;  %v1755_v53 = vadd.f32 %v3522_v47, %v5048_v39  ;;  %v3523_v54 = vpop.f32.mrb[126].mxu0  ;;  %4201 = vmatpush1.bf16.msra.mxu0 %v4200_v38  ;;  %v2548_v38 = vld [vmem:[#allocation13 + $0x4c0] sm:$0xff]  ;;  %v4312_v46 = vpack.c.bf16 %v2497_v35, %v2494_v34  ;;  %v2498_v47 = vld [vmem:[#allocation13 + $0x330] sm:$0xff] }
 0x2ed   :  { %v3603_v56 = vpop.f32.mrb[126].mxu1  ;;  %v3524_v57 = vpop.f32.mrb[127].mxu0  ;;  %4203 = vmatprep.subr.bf16.mxu0 %v4202_v43 }
 0x2ee   :  { %v1900_v63 = vadd.f32 %v3602_v52, %v1755_v53  ;;  %v3525_v5 = vadd.f32 %v3524_v57, %v3523_v54  ;;  %v3604_v7 = vpop.f32.mrb[127].mxu1  ;;  %2153 = vmatmul.mubr.f32.gmra.mrb[154].mxu0 %v1921_v30  ;;  %2314 = vmatmul.mubr.f32.gmra.mrb[154].mxu1 %v1921_v30  ;;  %v4218_v53 = vpack.c.bf16 %v2502_v37, %v2499_v20  ;;  %v2505_v54 = vld [vmem:[#allocation13 + $0x368] sm:$0xff]  ;;  %v2503_v57 = vld [vmem:[#allocation13 + $0x358] sm:$0xff] }
 0x2ef   :  { %v3605_v6 = vadd.f32 %v3604_v7, %v3603_v56  ;;  %2158 = vmatprep.mubr.f32.mxu0 %v4624_v12  ;;  %2319 = vmatprep.mubr.f32.mxu1 %v4624_v12  ;;  %v2500_v56 = vld [vmem:[#allocation13 + $0x340] sm:$0xff]  ;;  %v2557_v7 = vld [vmem:[#allocation13 + $0x508] sm:$0xff] }
 0x2f0   :  { %v1922_v8 = vmul.f32 0.5, %v1900_v63  ;;  %v1760_v39 = vadd.f32 %v3525_v5, %v5051_v49  ;;  %4205 = vmatpush1.bf16.msra.mxu0 %v4204_v55  ;;  %v2443_v49 = vld [vmem:[#allocation13 + $0x178] sm:$0xff]  ;;  %v4314_v55 = vpack.c.bf16 %v2551_v40, %v2548_v38  ;;  %v2508_v63 = vld [vmem:[#allocation13 + $0x380] sm:$0xff]  ;;  %v2554_v5 = vld [vmem:[#allocation13 + $0x4f0] sm:$0xff]  ;;  %v4316_v10 = vpack.c.bf16 %v2503_v57, %v2500_v56 }
 0x2f1   :  { %4207 = vmatprep.subr.bf16.mxu0 %v4206_v59  ;;  %v4308_v15 = vpack.c.bf16 %v2443_v49, %v2440_v33  ;;  %v4222_v49 = vpack.c.bf16 %v2508_v63, %v2505_v54  ;;  %v4318_v14 = vpack.c.bf16 %v2557_v7, %v2554_v5  ;;  %v2517_v37 = vld [vmem:[#allocation13 + $0x3c8] sm:$0xff]  ;;  %v2512_v40 = vld [vmem:[#allocation13 + $0x3a0] sm:$0xff]  ;;  %v2519_v54 = vld [vmem:[#allocation13 + $0x3d8] sm:$0xff] }
 0x2f2   :  { %v1905_v4 = vadd.f32 %v3605_v6, %v1760_v39  ;;  %2159 = vmatmul.mubr.f32.gmra.mrb[156].mxu0 %v1922_v8  ;;  %2320 = vmatmul.mubr.f32.gmra.mrb[156].mxu1 %v1922_v8  ;;  %v2523_v7 = vld [vmem:[#allocation13 + $0x3f8] sm:$0xff] }
 0x2f3   :  { %2164 = vmatprep.mubr.f32.mxu0 %v4624_v12  ;;  %2325 = vmatprep.mubr.f32.mxu1 %v4624_v12  ;;  %v2496_v12 = vld [vmem:[#allocation13 + $0x320] sm:$0xff] }
 0x2f4   :  { %v1923_v9 = vmul.f32 0.5, %v1905_v4  ;;  %4209 = vmatpush1.bf16.msra.mxu0 %v4208_v19  ;;  %4309 = vmatpush3.bf16.msra.mxu1 %v4308_v15  ;;  %v4214_v28 = vpack.c.bf16 %v2496_v12, %v2493_v2  ;;  %v4220_v4 = vpack.c.bf16 %v2501_v51, %v2498_v47  ;;  %v2506_v15 = vld [vmem:[#allocation13 + $0x370] sm:$0xff]  ;;  %v2560_v12 = vld [vmem:[#allocation13 + $0x520] sm:$0xff]  ;;  %v2569_v47 = vld [vmem:[#allocation13 + $0x568] sm:$0xff] }
 0x2f5   :  { %4211 = vmatprep.subr.bf16.mxu0 %v4210_v13  ;;  %4311 = vmatprep.subr.bf16.mxu1 %v4310_v22  ;;  %v2511_v13 = vld [vmem:[#allocation13 + $0x398] sm:$0xff]  ;;  %v2514_v2 = vld [vmem:[#allocation13 + $0x3b0] sm:$0xff] }
 0x2f6   :  { %2165 = vmatmul.mubr.f32.gmra.mrb[158].mxu0 %v1923_v9  ;;  %2326 = vmatmul.mubr.f32.gmra.mrb[158].mxu1 %v1923_v9  ;;  %v2504_v9 = vld [vmem:[#allocation13 + $0x360] sm:$0xff] }
 0x2f8   :  { %4213 = vmatpush1.bf16.msra.mxu0 %v4212_v18 }
 0x2f9   :  { %4215 = vmatprep.subr.bf16.mxu0 %v4214_v28  ;;  %v2563_v28 = vld [vmem:[#allocation13 + $0x538] sm:$0xff] }
 0x2fa   :  { %v4322_v38 = vpack.c.bf16 %v2563_v28, %v2560_v12 }
 0x38d   :  { %v2076_v26 = vpop.f32.mrb[128].mxu0  ;;  %v5112_v27 = vpop.f32.mrb[128].mxu1 }
 0x38e   :  { %v2077_v41 = vadd.f32 %v2076_v26, %v5106_v16  ;;  %v2078_v32 = vpop.f32.mrb[129].mxu0  ;;  %v5115_v3 = vpop.f32.mrb[129].mxu1  ;;  %v4224_v26 = vpack.c.bf16 %v2507_v50, %v2504_v9  ;;  %v2526_v50 = vld [vmem:[#allocation13 + $0x410] sm:$0xff] }
 0x38f   :  { %v2079_v36 = vadd.f32 %v2078_v32, %v5110_v25 }
 0x390   :  { %v2332_v48 = vmax.f32 %v2077_v41, 0.0  ;;  %v4320_v41 = vpack.c.bf16 %v2509_v17, %v2506_v15  ;;  %v2525_v15 = vld [vmem:[#allocation13 + $0x408] sm:$0xff] }
 0x391   :  { %v2333_v42 = vmax.f32 %v2079_v36, 0.0  ;;  %v2082_v43 = vpop.f32.mrb[130].mxu0  ;;  %v5118_v44 = vpop.f32.mrb[130].mxu1  ;;  %v4226_v36 = vpack.c.bf16 %v2514_v2, %v2511_v13 }
 0x392   :  { %v2083_v24 = vadd.f32 %v2082_v43, %v5106_v16  ;;  %v2084_v52 = vpop.f32.mrb[131].mxu0  ;;  %v5121_v30 = vpop.f32.mrb[131].mxu1 }
 0x393   :  { %v2085_v59 = vadd.f32 %v2084_v52, %v5110_v25  ;;  %2669 = vmatprep.mubr.f32.mxu0 %v2333_v42  ;;  %2991 = vmatprep.mubr.f32.mxu1 %v2333_v42  ;;  %v2515_v42 = vld [vmem:[#allocation13 + $0x3b8] sm:$0xff]  ;;  %v4228_v52 = vpack.c.bf16 %v2513_v31, %v2510_v29  ;;  %v2524_v29 = vld [vmem:[#allocation13 + $0x400] sm:$0xff] }
 0x394   :  { %2670 = vmatmul.mubr.f32.vlgmr.msra.gmra.mrb[160].mxu0 %v2332_v48  ;;  %2992 = vmatmul.mubr.f32.vlgmr.msra.gmra.mrb[160].mxu1 %v2332_v48  ;;  %v2336_v19 = vmax.f32 %v2083_v24, 0.0  ;;  %v2527_v31 = vld [vmem:[#allocation13 + $0x418] sm:$0xff] }
 0x395   :  { %v2337_v6 = vmax.f32 %v2085_v59, 0.0  ;;  %v2088_v8 = vpop.f32.mrb[132].mxu0  ;;  %v5124_v39 = vpop.f32.mrb[132].mxu1  ;;  %4217 = vmatpush1.bf16.msra.mxu0 %v4216_v45  ;;  %4313 = vmatpush3.bf16.msra.mxu1 %v4312_v46  ;;  %v2520_v45 = vld [vmem:[#allocation13 + $0x3e0] sm:$0xff]  ;;  %v2566_v46 = vld [vmem:[#allocation13 + $0x550] sm:$0xff] }
 0x396   :  { %v2089_v11 = vadd.f32 %v2088_v8, %v5106_v16  ;;  %v2090_v1 = vpop.f32.mrb[133].mxu0  ;;  %v5127_v33 = vpop.f32.mrb[133].mxu1  ;;  %4219 = vmatprep.subr.bf16.mxu0 %v4218_v53  ;;  %4315 = vmatprep.subr.bf16.mxu1 %v4314_v55  ;;  %v2516_v53 = vld [vmem:[#allocation13 + $0x3c0] sm:$0xff]  ;;  %v4324_v55 = vpack.c.bf16 %v2515_v42, %v2512_v40  ;;  %v4230_v5 = vpack.c.bf16 %v2520_v45, %v2517_v37  ;;  %v2518_v8 = vld [vmem:[#allocation13 + $0x3d0] sm:$0xff] }
 0x397   :  { %v2091_v18 = vadd.f32 %v2090_v1, %v5110_v25  ;;  %2675 = vmatprep.mubr.f32.mxu0 %v2337_v6  ;;  %2996 = vmatprep.mubr.f32.mxu1 %v2337_v6  ;;  %v4326_v6 = vpack.c.bf16 %v2569_v47, %v2566_v46  ;;  %v4232_v13 = vpack.c.bf16 %v2519_v54, %v2516_v53  ;;  %v2528_v42 = vld [vmem:[#allocation13 + $0x420] sm:$0xff]  ;;  %v2535_v53 = vld [vmem:[#allocation13 + $0x458] sm:$0xff] }
 0x398   :  { %2676 = vmatmul.mubr.f32.gmra.mrb[162].mxu0 %v2336_v19  ;;  %2997 = vmatmul.mubr.f32.gmra.mrb[162].mxu1 %v2336_v19  ;;  %v2340_v32 = vmax.f32 %v2089_v11, 0.0  ;;  %v2575_v19 = vld [vmem:[#allocation13 + $0x598] sm:$0xff]  ;;  %v4332_v45 = vpack.c.bf16 %v2527_v31, %v2524_v29 }
 0x399   :  { %v2341_v0 = vmax.f32 %v2091_v18, 0.0  ;;  %v2094_v21 = vpop.f32.mrb[134].mxu0  ;;  %v5130_v22 = vpop.f32.mrb[134].mxu1  ;;  %4221 = vmatpush1.bf16.msra.mxu0 %v4220_v4  ;;  %4317 = vmatpush3.bf16.msra.mxu1 %v4316_v10  ;;  %v2521_v4 = vld [vmem:[#allocation13 + $0x3e8] sm:$0xff]  ;;  %v2572_v10 = vld [vmem:[#allocation13 + $0x580] sm:$0xff] }
 0x39a   :  { %v2095_v34 = vadd.f32 %v2094_v21, %v5106_v16  ;;  %v2096_v35 = vpop.f32.mrb[135].mxu0  ;;  %v5133_v20 = vpop.f32.mrb[135].mxu1  ;;  %4223 = vmatprep.subr.bf16.mxu0 %v4222_v49  ;;  %4319 = vmatprep.subr.bf16.mxu1 %v4318_v14  ;;  %v2522_v14 = vld [vmem:[#allocation13 + $0x3f0] sm:$0xff]  ;;  %v4328_v17 = vpack.c.bf16 %v2521_v4, %v2518_v8  ;;  %v2529_v21 = vld [vmem:[#allocation13 + $0x428] sm:$0xff] }
 0x39b   :  { %v2097_v43 = vadd.f32 %v2096_v35, %v5110_v25  ;;  %2681 = vmatprep.mubr.f32.mxu0 %v2341_v0  ;;  %3001 = vmatprep.mubr.f32.mxu1 %v2341_v0  ;;  %v4234_v0 = vpack.c.bf16 %v2526_v50, %v2523_v7  ;;  %v2581_v35 = vld [vmem:[#allocation13 + $0x5c8] sm:$0xff]  ;;  %v4236_v40 = vpack.c.bf16 %v2525_v15, %v2522_v14  ;;  %v2587_v7 = vld [vmem:[#allocation13 + $0x5f8] sm:$0xff]  ;;  %v2534_v50 = vld [vmem:[#allocation13 + $0x450] sm:$0xff] }
 0x39c   :  { %2682 = vmatmul.mubr.f32.gmra.mrb[164].mxu0 %v2340_v32  ;;  %3002 = vmatmul.mubr.f32.gmra.mrb[164].mxu1 %v2340_v32  ;;  %v2344_v56 = vmax.f32 %v2095_v34, 0.0  ;;  %v2532_v32 = vld [vmem:[#allocation13 + $0x440] sm:$0xff]  ;;  %v2578_v34 = vld [vmem:[#allocation13 + $0x5b0] sm:$0xff]  ;;  %v2537_v15 = vld [vmem:[#allocation13 + $0x468] sm:$0xff] }
 0x39d   :  { %v2345_v51 = vmax.f32 %v2097_v43, 0.0  ;;  %v2100_v48 = vpop.f32.mrb[136].mxu0  ;;  %v5136_v24 = vpop.f32.mrb[136].mxu1  ;;  %4225 = vmatpush1.bf16.msra.mxu0 %v4224_v26  ;;  %4321 = vmatpush3.bf16.msra.mxu1 %v4320_v41  ;;  %v4330_v26 = vpack.c.bf16 %v2575_v19, %v2572_v10  ;;  %v2531_v43 = vld [vmem:[#allocation13 + $0x438] sm:$0xff]  ;;  %v4334_v54 = vpack.c.bf16 %v2581_v35, %v2578_v34 }
 0x39e   :  { %v2101_v57 = vadd.f32 %v2100_v48, %v5106_v16  ;;  %v2102_v59 = vpop.f32.mrb[137].mxu0  ;;  %v5139_v63 = vpop.f32.mrb[137].mxu1  ;;  %4227 = vmatprep.subr.bf16.mxu0 %v4226_v36  ;;  %4323 = vmatprep.subr.bf16.mxu1 %v4322_v38 }
 0x39f   :  { %v2103_v9 = vadd.f32 %v2102_v59, %v5110_v25  ;;  %2687 = vmatprep.mubr.f32.mxu0 %v2345_v51  ;;  %3006 = vmatprep.mubr.f32.mxu1 %v2345_v51  ;;  %v2538_v59 = vld [vmem:[#allocation13 + $0x470] sm:$0xff] }
 0x3a0   :  { %2688 = vmatmul.mubr.f32.gmra.mrb[166].mxu0 %v2344_v56  ;;  %3007 = vmatmul.mubr.f32.gmra.mrb[166].mxu1 %v2344_v56  ;;  %v2348_v18 = vmax.f32 %v2101_v57, 0.0  ;;  %v2533_v56 = vld [vmem:[#allocation13 + $0x448] sm:$0xff]  ;;  %v4242_v14 = vpack.c.bf16 %v2538_v59, %v2535_v53 }
 0x3a1   :  { %v2349_v11 = vmax.f32 %v2103_v9, 0.0  ;;  %v2106_v1 = vpop.f32.mrb[138].mxu0  ;;  %v5142_v49 = vpop.f32.mrb[138].mxu1  ;;  %4229 = vmatpush1.bf16.msra.mxu0 %v4228_v52  ;;  %4325 = vmatpush3.bf16.msra.mxu1 %v4324_v55  ;;  %v4238_v52 = vpack.c.bf16 %v2532_v32, %v2529_v21  ;;  %v2530_v55 = vld [vmem:[#allocation13 + $0x430] sm:$0xff]  ;;  %v4240_v9 = vpack.c.bf16 %v2531_v43, %v2528_v42  ;;  %v2544_v21 = vld [vmem:[#allocation13 + $0x4a0] sm:$0xff]  ;;  %v2543_v43 = vld [vmem:[#allocation13 + $0x498] sm:$0xff] }
 0x3a2   :  { %v2107_v2 = vadd.f32 %v2106_v1, %v5106_v16  ;;  %v2108_v12 = vpop.f32.mrb[139].mxu0  ;;  %v5145_v28 = vpop.f32.mrb[139].mxu1  ;;  %4231 = vmatprep.subr.bf16.mxu0 %v4230_v5  ;;  %4327 = vmatprep.subr.bf16.mxu1 %v4326_v6  ;;  %v2584_v5 = vld [vmem:[#allocation13 + $0x5e0] sm:$0xff]  ;;  %v4336_v10 = vpack.c.bf16 %v2533_v56, %v2530_v55 }
 0x3a3   :  { %v2109_v41 = vadd.f32 %v2108_v12, %v5110_v25  ;;  %2693 = vmatprep.mubr.f32.mxu0 %v2349_v11  ;;  %3011 = vmatprep.mubr.f32.mxu1 %v2349_v11  ;;  %v2540_v42 = vld [vmem:[#allocation13 + $0x480] sm:$0xff] }
 0x3a4   :  { %2694 = vmatmul.mubr.f32.gmra.mrb[168].mxu0 %v2348_v18  ;;  %3012 = vmatmul.mubr.f32.gmra.mrb[168].mxu1 %v2348_v18  ;;  %v2352_v46 = vmax.f32 %v2107_v2, 0.0  ;;  %v2536_v18 = vld [vmem:[#allocation13 + $0x460] sm:$0xff]  ;;  %v2539_v2 = vld [vmem:[#allocation13 + $0x478] sm:$0xff] }
 0x3a5   :  { %v2353_v36 = vmax.f32 %v2109_v41, 0.0  ;;  %v2112_v37 = vpop.f32.mrb[140].mxu0  ;;  %v5148_v38 = vpop.f32.mrb[140].mxu1  ;;  %4233 = vmatpush1.bf16.msra.mxu0 %v4232_v13  ;;  %4329 = vmatpush3.bf16.msra.mxu1 %v4328_v17  ;;  %v4338_v17 = vpack.c.bf16 %v2587_v7, %v2584_v5  ;;  %v4244_v41 = vpack.c.bf16 %v2537_v15, %v2534_v50  ;;  %v4340_v32 = vpack.c.bf16 %v2539_v2, %v2536_v18  ;;  %v2546_v7 = vld [vmem:[#allocation13 + $0x4b0] sm:$0xff]  ;;  %v2556_v50 = vld [vmem:[#allocation13 + $0x500] sm:$0xff] }
 0x3a6   :  { %v2113_v47 = vadd.f32 %v2112_v37, %v5106_v16  ;;  %v2114_v51 = vpop.f32.mrb[141].mxu0  ;;  %v5151_v48 = vpop.f32.mrb[141].mxu1  ;;  %4235 = vmatprep.subr.bf16.mxu0 %v4234_v0  ;;  %4331 = vmatprep.subr.bf16.mxu1 %v4330_v26  ;;  %v2541_v0 = vld [vmem:[#allocation13 + $0x488] sm:$0xff] }
 0x3a7   :  { %v2115_v57 = vadd.f32 %v2114_v51, %v5110_v25  ;;  %2699 = vmatprep.mubr.f32.mxu0 %v2353_v36  ;;  %3016 = vmatprep.mubr.f32.mxu1 %v2353_v36 }
 0x3a8   :  { %2700 = vmatmul.mubr.f32.gmra.mrb[170].mxu0 %v2352_v46  ;;  %3017 = vmatmul.mubr.f32.gmra.mrb[170].mxu1 %v2352_v46  ;;  %v2356_v19 = vmax.f32 %v2113_v47, 0.0  ;;  %v2547_v46 = vld [vmem:[#allocation13 + $0x4b8] sm:$0xff]  ;;  %v2550_v47 = vld [vmem:[#allocation13 + $0x4d0] sm:$0xff] }
 0x3a9   :  { %v2357_v6 = vmax.f32 %v2115_v57, 0.0  ;;  %v2118_v8 = vpop.f32.mrb[142].mxu0  ;;  %v5154_v4 = vpop.f32.mrb[142].mxu1  ;;  %4237 = vmatpush1.bf16.msra.mxu0 %v4236_v40  ;;  %4333 = vmatpush3.bf16.msra.mxu1 %v4332_v45  ;;  %v4246_v40 = vpack.c.bf16 %v2544_v21, %v2541_v0  ;;  %v4250_v5 = vpack.c.bf16 %v2550_v47, %v2547_v46  ;;  %v2555_v0 = vld [vmem:[#allocation13 + $0x4f8] sm:$0xff]  ;;  %v2558_v46 = vld [vmem:[#allocation13 + $0x510] sm:$0xff]  ;;  %v2561_v47 = vld [vmem:[#allocation13 + $0x528] sm:$0xff] }
 0x3aa   :  { %v2119_v11 = vadd.f32 %v2118_v8, %v5106_v16  ;;  %v2120_v1 = vpop.f32.mrb[143].mxu0  ;;  %v5157_v13 = vpop.f32.mrb[143].mxu1  ;;  %4239 = vmatprep.subr.bf16.mxu0 %v4238_v52  ;;  %4335 = vmatprep.subr.bf16.mxu1 %v4334_v54  ;;  %v4248_v54 = vpack.c.bf16 %v2543_v43, %v2540_v42 }
 0x3ab   :  { %v2121_v12 = vadd.f32 %v2120_v1, %v5110_v25  ;;  %2705 = vmatprep.mubr.f32.mxu0 %v2357_v6  ;;  %3021 = vmatprep.mubr.f32.mxu1 %v2357_v6  ;;  %v2549_v6 = vld [vmem:[#allocation13 + $0x4c8] sm:$0xff] }
 0x3ac   :  { %2706 = vmatmul.mubr.f32.gmra.mrb[172].mxu0 %v2356_v19  ;;  %3022 = vmatmul.mubr.f32.gmra.mrb[172].mxu1 %v2356_v19  ;;  %v2360_v34 = vmax.f32 %v2119_v11, 0.0  ;;  %v4252_v1 = vpack.c.bf16 %v2549_v6, %v2546_v7 }
 0x3ad   :  { %v2361_v26 = vmax.f32 %v2121_v12, 0.0  ;;  %v2124_v29 = vpop.f32.mrb[144].mxu0  ;;  %v5160_v31 = vpop.f32.mrb[144].mxu1  ;;  %4241 = vmatpush1.bf16.msra.mxu0 %v4240_v9  ;;  %4337 = vmatpush3.bf16.msra.mxu1 %v4336_v10  ;;  %v2553_v9 = vld [vmem:[#allocation13 + $0x4e8] sm:$0xff]  ;;  %v2552_v12 = vld [vmem:[#allocation13 + $0x4e0] sm:$0xff] }
 0x3ae   :  { %v2125_v35 = vadd.f32 %v2124_v29, %v5106_v16  ;;  %v2126_v36 = vpop.f32.mrb[145].mxu0  ;;  %v5163_v37 = vpop.f32.mrb[145].mxu1  ;;  %4243 = vmatprep.subr.bf16.mxu0 %v4242_v14  ;;  %4339 = vmatprep.subr.bf16.mxu1 %v4338_v17  ;;  %v4254_v2 = vpack.c.bf16 %v2556_v50, %v2553_v9  ;;  %v2562_v29 = vld [vmem:[#allocation13 + $0x530] sm:$0xff] }
 0x3af   :  { %v2127_v45 = vadd.f32 %v2126_v36, %v5110_v25  ;;  %2711 = vmatprep.mubr.f32.mxu0 %v2361_v26  ;;  %3026 = vmatprep.mubr.f32.mxu1 %v2361_v26  ;;  %v2559_v26 = vld [vmem:[#allocation13 + $0x518] sm:$0xff] }
 0x3b0   :  { %2712 = vmatmul.mubr.f32.gmra.mrb[174].mxu0 %v2360_v34  ;;  %3027 = vmatmul.mubr.f32.gmra.mrb[174].mxu1 %v2360_v34  ;;  %v2364_v55 = vmax.f32 %v2125_v35, 0.0  ;;  %v4256_v35 = vpack.c.bf16 %v2555_v0, %v2552_v12 }
 0x3b1   :  { %v2365_v51 = vmax.f32 %v2127_v45, 0.0  ;;  %v2130_v52 = vpop.f32.mrb[146].mxu0  ;;  %v5166_v53 = vpop.f32.mrb[146].mxu1  ;;  %4245 = vmatpush1.bf16.msra.mxu0 %v4244_v41  ;;  %4341 = vmatpush3.bf16.msra.mxu1 %v4340_v32  ;;  %v4258_v45 = vpack.c.bf16 %v2562_v29, %v2559_v26 }
 0x3b2   :  { %v2131_v56 = vadd.f32 %v2130_v52, %v5106_v16  ;;  %v2132_v57 = vpop.f32.mrb[147].mxu0  ;;  %v5169_v59 = vpop.f32.mrb[147].mxu1  ;;  %4247 = vmatprep.subr.bf16.mxu0 %v4246_v40  ;;  %v2565_v52 = vld [vmem:[#allocation13 + $0x548] sm:$0xff] }
 0x3b3   :  { %v2133_v8 = vadd.f32 %v2132_v57, %v5110_v25  ;;  %2717 = vmatprep.mubr.f32.mxu0 %v2365_v51  ;;  %3031 = vmatprep.mubr.f32.mxu1 %v2365_v51 }
 0x3b4   :  { %2718 = vmatmul.mubr.f32.gmra.mrb[176].mxu0 %v2364_v55  ;;  %3032 = vmatmul.mubr.f32.gmra.mrb[176].mxu1 %v2364_v55  ;;  %v2368_v14 = vmax.f32 %v2131_v56, 0.0 }
 0x3b5   :  { %v2369_v10 = vmax.f32 %v2133_v8, 0.0  ;;  %v2136_v19 = vpop.f32.mrb[148].mxu0  ;;  %v5172_v11 = vpop.f32.mrb[148].mxu1  ;;  %4249 = vmatpush1.bf16.msra.mxu0 %v4248_v54  ;;  %v2568_v54 = vld [vmem:[#allocation13 + $0x560] sm:$0xff] }
 0x3b6   :  { %v2137_v15 = vadd.f32 %v2136_v19, %v5106_v16  ;;  %v2138_v17 = vpop.f32.mrb[149].mxu0  ;;  %v5175_v18 = vpop.f32.mrb[149].mxu1  ;;  %4251 = vmatprep.subr.bf16.mxu0 %v4250_v5  ;;  %v4260_v5 = vpack.c.bf16 %v2561_v47, %v2558_v46  ;;  %v4262_v50 = vpack.c.bf16 %v2568_v54, %v2565_v52  ;;  %v2567_v19 = vld [vmem:[#allocation13 + $0x558] sm:$0xff] }
 0x3b7   :  { %v2139_v21 = vadd.f32 %v2138_v17, %v5110_v25  ;;  %2723 = vmatprep.mubr.f32.mxu0 %v2369_v10  ;;  %3036 = vmatprep.mubr.f32.mxu1 %v2369_v10  ;;  %v2564_v10 = vld [vmem:[#allocation13 + $0x540] sm:$0xff] }
 0x3b8   :  { %2724 = vmatmul.mubr.f32.gmra.mrb[178].mxu0 %v2368_v14  ;;  %3037 = vmatmul.mubr.f32.gmra.mrb[178].mxu1 %v2368_v14  ;;  %v2372_v36 = vmax.f32 %v2137_v15, 0.0  ;;  %v2571_v14 = vld [vmem:[#allocation13 + $0x578] sm:$0xff]  ;;  %v2574_v15 = vld [vmem:[#allocation13 + $0x590] sm:$0xff]  ;;  %v4264_v0 = vpack.c.bf16 %v2567_v19, %v2564_v10 }
 0x3b9   :  { %v2373_v41 = vmax.f32 %v2139_v21, 0.0  ;;  %v2142_v32 = vpop.f32.mrb[150].mxu0  ;;  %v5178_v34 = vpop.f32.mrb[150].mxu1  ;;  %4253 = vmatpush1.bf16.msra.mxu0 %v4252_v1  ;;  %v2583_v19 = vld [vmem:[#allocation13 + $0x5d8] sm:$0xff] }
 0x3ba   :  { %v2143_v40 = vadd.f32 %v2142_v32, %v5106_v16  ;;  %v2144_v42 = vpop.f32.mrb[151].mxu0  ;;  %v5181_v43 = vpop.f32.mrb[151].mxu1  ;;  %4255 = vmatprep.subr.bf16.mxu0 %v4254_v2  ;;  %v4266_v32 = vpack.c.bf16 %v2574_v15, %v2571_v14 }
 0x3bb   :  { %v2145_v51 = vadd.f32 %v2144_v42, %v5110_v25  ;;  %2729 = vmatprep.mubr.f32.mxu0 %v2373_v41  ;;  %3041 = vmatprep.mubr.f32.mxu1 %v2373_v41  ;;  %v2577_v42 = vld [vmem:[#allocation13 + $0x5a8] sm:$0xff] }
 0x3bc   :  { %2730 = vmatmul.mubr.f32.gmra.mrb[180].mxu0 %v2372_v36  ;;  %3042 = vmatmul.mubr.f32.gmra.mrb[180].mxu1 %v2372_v36  ;;  %v2376_v7 = vmax.f32 %v2143_v40, 0.0  ;;  %v2573_v36 = vld [vmem:[#allocation13 + $0x588] sm:$0xff] }
 0x3bd   :  { %v2377_v55 = vmax.f32 %v2145_v51, 0.0  ;;  %v2148_v56 = vpop.f32.mrb[152].mxu0  ;;  %v5184_v57 = vpop.f32.mrb[152].mxu1  ;;  %4257 = vmatpush1.bf16.msra.mxu0 %v4256_v35  ;;  %v2570_v35 = vld [vmem:[#allocation13 + $0x570] sm:$0xff] }
 0x3be   :  { %v2149_v6 = vadd.f32 %v2148_v56, %v5106_v16  ;;  %v2150_v8 = vpop.f32.mrb[153].mxu0  ;;  %v5187_v9 = vpop.f32.mrb[153].mxu1  ;;  %4259 = vmatprep.subr.bf16.mxu0 %v4258_v45  ;;  %v2580_v45 = vld [vmem:[#allocation13 + $0x5c0] sm:$0xff]  ;;  %v4268_v52 = vpack.c.bf16 %v2573_v36, %v2570_v35  ;;  %v2582_v35 = vld [vmem:[#allocation13 + $0x5d0] sm:$0xff]  ;;  %v2585_v36 = vld [vmem:[#allocation13 + $0x5e8] sm:$0xff] }
 0x3bf   :  { %v2151_v1 = vadd.f32 %v2150_v8, %v5110_v25  ;;  %2735 = vmatprep.mubr.f32.mxu0 %v2377_v55  ;;  %3046 = vmatprep.mubr.f32.mxu1 %v2377_v55  ;;  %v2579_v8 = vld [vmem:[#allocation13 + $0x5b8] sm:$0xff] }
 0x3c0   :  { %2736 = vmatmul.mubr.f32.gmra.mrb[182].mxu0 %v2376_v7  ;;  %3047 = vmatmul.mubr.f32.gmra.mrb[182].mxu1 %v2376_v7  ;;  %v2380_v21 = vmax.f32 %v2149_v6, 0.0  ;;  %v4270_v7 = vpack.c.bf16 %v2580_v45, %v2577_v42  ;;  %v2576_v6 = vld [vmem:[#allocation13 + $0x5a0] sm:$0xff]  ;;  %v4276_v45 = vpack.c.bf16 %v2585_v36, %v2582_v35 }
 0x3c1   :  { %v2381_v17 = vmax.f32 %v2151_v1, 0.0  ;;  %v2154_v2 = vpop.f32.mrb[154].mxu0  ;;  %v5190_v12 = vpop.f32.mrb[154].mxu1  ;;  %4261 = vmatpush1.bf16.msra.mxu0 %v4260_v5  ;;  %v2586_v1 = vld [vmem:[#allocation13 + $0x5f0] sm:$0xff] }
 0x3c2   :  { %v2155_v26 = vadd.f32 %v2154_v2, %v5106_v16  ;;  %v2156_v29 = vpop.f32.mrb[155].mxu0  ;;  %v5193_v41 = vpop.f32.mrb[155].mxu1  ;;  %4263 = vmatprep.subr.bf16.mxu0 %v4262_v50  ;;  %v5203_v50 = vrot.slane %v5102_v23, %v4841_v62  ;;  %v4272_v2 = vpack.c.bf16 %v2579_v8, %v2576_v6 }
 0x3c3   :  { %v2157_v40 = vadd.f32 %v2156_v29, %v5110_v25  ;;  %2741 = vmatprep.mubr.f32.mxu0 %v2381_v17  ;;  %3051 = vmatprep.mubr.f32.mxu1 %v2381_v17 }
 0x3c4   :  { %2742 = vmatmul.mubr.f32.gmra.mrb[184].mxu0 %v2380_v21  ;;  %3052 = vmatmul.mubr.f32.gmra.mrb[184].mxu1 %v2380_v21  ;;  %v2384_v54 = vmax.f32 %v2155_v26, 0.0  ;;  %v2264_v8 = vadd.f32 %v5139_v63, %v5203_v50  ;;  %v2300_v36 = vadd.f32 %v5175_v18, %v5203_v50 }
 0x3c5   :  { %v2385_v46 = vmax.f32 %v2157_v40, 0.0  ;;  %v2160_v47 = vpop.f32.mrb[156].mxu0  ;;  %v5196_v51 = vpop.f32.mrb[156].mxu1  ;;  %4265 = vmatpush1.bf16.msra.mxu0 %v4264_v0  ;;  %v5210_v0 = vrot.slane %v5102_v23, %v4837_v60  ;;  %v2240_v40 = vadd.f32 %v5115_v3, %v5203_v50 }
 0x3c6   :  { %v2161_v55 = vadd.f32 %v2160_v47, %v5106_v16  ;;  %v2162_v56 = vpop.f32.mrb[157].mxu0  ;;  %v5199_v5 = vpop.f32.mrb[157].mxu1  ;;  %4267 = vmatprep.subr.bf16.mxu0 %v4266_v32  ;;  %v4274_v32 = vpack.c.bf16 %v2586_v1, %v2583_v19  ;;  %v2270_v19 = vadd.f32 %v5145_v28, %v5203_v50 }
 0x3c7   :  { %v2163_v10 = vadd.f32 %v2162_v56, %v5110_v25  ;;  %2747 = vmatprep.mubr.f32.mxu0 %v2385_v46  ;;  %3056 = vmatprep.mubr.f32.mxu1 %v2385_v46  ;;  %v2335_v47 = vmax.f32 %v2240_v40, 0.0  ;;  %v2244_v3 = vadd.f32 %v5118_v44, %v5210_v0  ;;  %v2268_v63 = vadd.f32 %v5142_v49, %v5210_v0 }
 0x3c8   :  { %2748 = vmatmul.mubr.f32.gmra.mrb[186].mxu0 %v2384_v54  ;;  %3057 = vmatmul.mubr.f32.gmra.mrb[186].mxu1 %v2384_v54  ;;  %v2388_v62 = vmax.f32 %v2161_v55, 0.0  ;;  %v2250_v55 = vadd.f32 %v5124_v39, %v5210_v0  ;;  %v2355_v1 = vmax.f32 %v2270_v19, 0.0  ;;  %v2274_v28 = vadd.f32 %v5148_v38, %v5210_v0 }
 0x3c9   :  { %v2389_v14 = vmax.f32 %v2163_v10, 0.0  ;;  %v2166_v15 = vpop.f32.mrb[158].mxu0  ;;  %v5206_v17 = vpop.f32.mrb[158].mxu1  ;;  %4269 = vmatpush1.bf16.msra.mxu0 %v4268_v52  ;;  %v2246_v52 = vadd.f32 %v5121_v30, %v5203_v50  ;;  %v2338_v30 = vmax.f32 %v2244_v3, 0.0  ;;  %v2351_v10 = vmax.f32 %v2264_v8, 0.0 }
 0x3ca   :  { %v2167_v21 = vadd.f32 %v2166_v15, %v5106_v16  ;;  %v2168_v26 = vpop.f32.mrb[159].mxu0  ;;  %v5213_v29 = vpop.f32.mrb[159].mxu1  ;;  %4271 = vmatprep.subr.bf16.mxu0 %v4270_v7  ;;  %v2238_v16 = vadd.f32 %v5112_v27, %v5210_v0  ;;  %v2252_v27 = vadd.f32 %v5127_v33, %v5203_v50  ;;  %v2258_v7 = vadd.f32 %v5133_v20, %v5203_v50 }
 0x3cb   :  { %v2169_v42 = vadd.f32 %v2168_v26, %v5110_v25  ;;  %2753 = vmatprep.mubr.f32.mxu0 %v2389_v14  ;;  %3061 = vmatprep.mubr.f32.mxu1 %v2389_v14  ;;  %v2339_v54 = vmax.f32 %v2246_v52, 0.0  ;;  %v2342_v44 = vmax.f32 %v2250_v55, 0.0  ;;  %v2256_v33 = vadd.f32 %v5130_v22, %v5210_v0 }
 0x3cc   :  { %2754 = vmatmul.mubr.f32.gmra.mrb[188].mxu0 %v2388_v62  ;;  %3062 = vmatmul.mubr.f32.gmra.mrb[188].mxu1 %v2388_v62  ;;  %v2392_v46 = vmax.f32 %v2167_v21, 0.0  ;;  %v2334_v25 = vmax.f32 %v2238_v16, 0.0  ;;  %v2343_v56 = vmax.f32 %v2252_v27, 0.0  ;;  %v2347_v6 = vmax.f32 %v2258_v7, 0.0 }
 0x3cd   :  { %v2393_v23 = vmax.f32 %v2169_v42, 0.0  ;;  %4273 = vmatpush1.bf16.msra.mxu0 %v4272_v2  ;;  %v2346_v39 = vmax.f32 %v2256_v33, 0.0  ;;  %v2262_v20 = vadd.f32 %v5136_v24, %v5210_v0  ;;  %v2276_v14 = vadd.f32 %v5151_v48, %v5203_v50 }
 0x3ce   :  { %4275 = vmatprep.subr.bf16.mxu0 %v4274_v32  ;;  %v2354_v24 = vmax.f32 %v2268_v63, 0.0  ;;  %v2282_v2 = vadd.f32 %v5157_v13, %v5203_v50  ;;  %v2358_v49 = vmax.f32 %v2274_v28, 0.0  ;;  %v2280_v48 = vadd.f32 %v5154_v4, %v5210_v0 }
 0x3cf   :  { %2759 = vmatprep.mubr.f32.mxu0 %v2393_v23  ;;  %3066 = vmatprep.mubr.f32.mxu1 %v2393_v23  ;;  %v2350_v22 = vmax.f32 %v2262_v20, 0.0  ;;  %v2359_v15 = vmax.f32 %v2276_v14, 0.0  ;;  %v2288_v21 = vadd.f32 %v5163_v37, %v5203_v50  ;;  %v2286_v13 = vadd.f32 %v5160_v31, %v5210_v0 }
 0x3d0   :  { %2760 = vmatmul.mubr.f32.gmra.mrb[190].mxu0 %v2392_v46  ;;  %3067 = vmatmul.mubr.f32.gmra.mrb[190].mxu1 %v2392_v46  ;;  %v2363_v62 = vmax.f32 %v2282_v2, 0.0  ;;  %v2362_v38 = vmax.f32 %v2280_v48, 0.0  ;;  %v2294_v32 = vadd.f32 %v5169_v59, %v5203_v50  ;;  %v2292_v37 = vadd.f32 %v5166_v53, %v5210_v0 }
 0x3d1   :  { %4277 = vmatpush1.bf16.msra.mxu0 %v4276_v45  ;;  %2830 = vmatprep.mubr.f32.mxu0 %v2335_v47  ;;  %v2367_v26 = vmax.f32 %v2288_v21, 0.0  ;;  %v2366_v4 = vmax.f32 %v2286_v13, 0.0  ;;  %v2298_v59 = vadd.f32 %v5172_v11, %v5210_v0  ;;  %v2375_v40 = vmax.f32 %v2300_v36, 0.0 }
 0x3d2   :  { %3136 = vmatprep.mubr.f32.mxu1 %v2335_v47  ;;  %v2371_v35 = vmax.f32 %v2294_v32, 0.0  ;;  %v2370_v31 = vmax.f32 %v2292_v37, 0.0  ;;  %v2306_v42 = vadd.f32 %v5181_v43, %v5203_v50  ;;  %v2304_v18 = vadd.f32 %v5178_v34, %v5210_v0 }
 0x3d3   :  { %v2374_v53 = vmax.f32 %v2298_v59, 0.0  ;;  %v2312_v45 = vadd.f32 %v5187_v9, %v5203_v50  ;;  %v2310_v43 = vadd.f32 %v5184_v57, %v5210_v0  ;;  %v2318_v46 = vadd.f32 %v5193_v41, %v5203_v50 }
 0x3d4   :  { %2831 = vmatmul.mubr.f32.vlgmr.msra.gmra.mrb[160].mxu0 %v2334_v25  ;;  %3137 = vmatmul.mubr.f32.vlgmr.msra.gmra.mrb[192].mxu1 %v2334_v25  ;;  %v2379_v23 = vmax.f32 %v2306_v42, 0.0  ;;  %v2378_v11 = vmax.f32 %v2304_v18, 0.0  ;;  %v2316_v9 = vadd.f32 %v5190_v12, %v5210_v0  ;;  %v2324_v52 = vadd.f32 %v5199_v5, %v5203_v50 }
 0x3d5   :  { %2836 = vmatprep.mubr.f32.mxu0 %v2339_v54  ;;  %3141 = vmatprep.mubr.f32.mxu1 %v2339_v54  ;;  %v2383_v16 = vmax.f32 %v2312_v45, 0.0  ;;  %v2382_v34 = vmax.f32 %v2310_v43, 0.0  ;;  %v2387_v47 = vmax.f32 %v2318_v46, 0.0  ;;  %v2322_v41 = vadd.f32 %v5196_v51, %v5210_v0 }
 0x3d6   :  { %v2386_v57 = vmax.f32 %v2316_v9, 0.0  ;;  %v2391_v25 = vmax.f32 %v2324_v52, 0.0  ;;  %v2330_v3 = vadd.f32 %v5213_v29, %v5203_v50  ;;  %v2328_v5 = vadd.f32 %v5206_v17, %v5210_v0 }
 0x3d7   :  { %v2390_v12 = vmax.f32 %v2322_v41, 0.0 }
 0x3d8   :  { %2837 = vmatmul.mubr.f32.gmra.mrb[162].mxu0 %v2338_v30  ;;  %3142 = vmatmul.mubr.f32.gmra.mrb[194].mxu1 %v2338_v30  ;;  %v2395_v54 = vmax.f32 %v2330_v3, 0.0  ;;  %v2394_v27 = vmax.f32 %v2328_v5, 0.0 }
 0x3d9   :  { %2842 = vmatprep.mubr.f32.mxu0 %v2343_v56  ;;  %3146 = vmatprep.mubr.f32.mxu1 %v2343_v56 }
 0x3dc   :  { %2843 = vmatmul.mubr.f32.gmra.mrb[164].mxu0 %v2342_v44  ;;  %3147 = vmatmul.mubr.f32.gmra.mrb[196].mxu1 %v2342_v44 }
 0x3dd   :  { %2848 = vmatprep.mubr.f32.mxu0 %v2347_v6  ;;  %3151 = vmatprep.mubr.f32.mxu1 %v2347_v6 }
 0x3e0   :  { %2849 = vmatmul.mubr.f32.gmra.mrb[166].mxu0 %v2346_v39  ;;  %3152 = vmatmul.mubr.f32.gmra.mrb[198].mxu1 %v2346_v39 }
 0x3e1   :  { %2854 = vmatprep.mubr.f32.mxu0 %v2351_v10  ;;  %3156 = vmatprep.mubr.f32.mxu1 %v2351_v10 }
 0x3e4   :  { %2855 = vmatmul.mubr.f32.gmra.mrb[168].mxu0 %v2350_v22  ;;  %3157 = vmatmul.mubr.f32.gmra.mrb[200].mxu1 %v2350_v22 }
 0x3e5   :  { %2860 = vmatprep.mubr.f32.mxu0 %v2355_v1  ;;  %3161 = vmatprep.mubr.f32.mxu1 %v2355_v1 }
 0x3e8   :  { %2861 = vmatmul.mubr.f32.gmra.mrb[170].mxu0 %v2354_v24  ;;  %3162 = vmatmul.mubr.f32.gmra.mrb[202].mxu1 %v2354_v24 }
 0x3e9   :  { %2866 = vmatprep.mubr.f32.mxu0 %v2359_v15  ;;  %3166 = vmatprep.mubr.f32.mxu1 %v2359_v15 }
 0x3ec   :  { %2867 = vmatmul.mubr.f32.gmra.mrb[172].mxu0 %v2358_v49  ;;  %3167 = vmatmul.mubr.f32.gmra.mrb[204].mxu1 %v2358_v49 }
 0x3ed   :  { %2872 = vmatprep.mubr.f32.mxu0 %v2363_v62  ;;  %3171 = vmatprep.mubr.f32.mxu1 %v2363_v62 }
 0x3f0   :  { %2873 = vmatmul.mubr.f32.gmra.mrb[174].mxu0 %v2362_v38  ;;  %3172 = vmatmul.mubr.f32.gmra.mrb[206].mxu1 %v2362_v38 }
 0x3f1   :  { %2878 = vmatprep.mubr.f32.mxu0 %v2367_v26  ;;  %3176 = vmatprep.mubr.f32.mxu1 %v2367_v26 }
 0x3f4   :  { %2879 = vmatmul.mubr.f32.gmra.mrb[176].mxu0 %v2366_v4  ;;  %3177 = vmatmul.mubr.f32.gmra.mrb[208].mxu1 %v2366_v4 }
 0x3f5   :  { %2884 = vmatprep.mubr.f32.mxu0 %v2371_v35  ;;  %3181 = vmatprep.mubr.f32.mxu1 %v2371_v35 }
 0x3f8   :  { %2885 = vmatmul.mubr.f32.gmra.mrb[178].mxu0 %v2370_v31  ;;  %3182 = vmatmul.mubr.f32.gmra.mrb[210].mxu1 %v2370_v31 }
 0x3f9   :  { %2890 = vmatprep.mubr.f32.mxu0 %v2375_v40  ;;  %3186 = vmatprep.mubr.f32.mxu1 %v2375_v40 }
 0x3fc   :  { %2891 = vmatmul.mubr.f32.gmra.mrb[180].mxu0 %v2374_v53  ;;  %3187 = vmatmul.mubr.f32.gmra.mrb[212].mxu1 %v2374_v53 }
 0x3fd   :  { %2896 = vmatprep.mubr.f32.mxu0 %v2379_v23  ;;  %3191 = vmatprep.mubr.f32.mxu1 %v2379_v23 }
 0x400   :  { %2897 = vmatmul.mubr.f32.gmra.mrb[182].mxu0 %v2378_v11  ;;  %3192 = vmatmul.mubr.f32.gmra.mrb[214].mxu1 %v2378_v11  ;;  %v2588_v11 = vld [vmem:[%s5411_s11] sm:$0x7]  ;;  %s4625_s11 = smov [#allocation14]  }
 0x401   :  { %2902 = vmatprep.mubr.f32.mxu0 %v2383_v16  ;;  %3196 = vmatprep.mubr.f32.mxu1 %v2383_v16  ;;  %v5312_v46 = vrot.slane %v2588_v11, %v4832_v58  ;;  %s3270_s18 = sshll.u32 %s4625_s11, 4  ;;  %s3271_s18 = int_to_ptr.vmem [resolvable:$true] %s3270_s18 }
 0x402   :  { %s4577_s1 = scalar_lea.vmem %s3271_s18, 6144  ;;  %p4582_p1 = scmp.lt.s32.totalorder %s3271_s18, %s3271_s18 }
 0x403   :  { %p4578_p0 = scmp.ne.s32.totalorder %s3271_s18, %s4577_s1  ;;  %p4583_p2 = scmp.lt.s32.totalorder %s4577_s1, %s4577_s1 }
 0x404   :  { %2903 = vmatmul.mubr.f32.gmra.mrb[184].mxu0 %v2382_v34  ;;  %3197 = vmatmul.mubr.f32.gmra.mrb[216].mxu1 %v2382_v34  ;;  %v5315_v34 = vrot.slane %v2588_v11, %v4837_v60 }
 0x405   :  { %2908 = vmatprep.mubr.f32.mxu0 %v2387_v47  ;;  %3201 = vmatprep.mubr.f32.mxu1 %v2387_v47  ;;  %v5320_v47 = vrot.slane %v2588_v11, %v4839_v61  ;;  %p4584_p3 = por %p4583_p2, %p4582_p1 }
 0x407   :  { %p4585_p4 = pnand %p4584_p3, %p4578_p0 }
 0x408   :  { %2909 = vmatmul.mubr.f32.gmra.mrb[186].mxu0 %v2386_v57  ;;  %3202 = vmatmul.mubr.f32.gmra.mrb[218].mxu1 %v2386_v57 }
 0x409   :  { %2914 = vmatprep.mubr.f32.mxu0 %v2391_v25  ;;  %3206 = vmatprep.mubr.f32.mxu1 %v2391_v25 }
 0x40c   :  { %2915 = vmatmul.mubr.f32.gmra.mrb[188].mxu0 %v2390_v12  ;;  %3207 = vmatmul.mubr.f32.gmra.mrb[220].mxu1 %v2390_v12 }
 0x40d   :  { %2920 = vmatprep.mubr.f32.mxu0 %v2395_v54  ;;  %3211 = vmatprep.mubr.f32.mxu1 %v2395_v54 }
 0x410   :  { %2921 = vmatmul.mubr.f32.gmra.mrb[190].mxu0 %v2394_v27  ;;  %3212 = vmatmul.mubr.f32.gmra.mrb[222].mxu1 %v2394_v27 }
 0x467   :  { %v3638_v51 = vpop.f32.mrb[160].mxu1 }
 0x468   :  { %v3639_v30 = vpop.f32.mrb[161].mxu1 }
 0x469   :  { %v3640_v55 = vadd.f32 %v3639_v30, %v3638_v51 }
 0x46b   :  { %v3641_v50 = vpop.f32.mrb[162].mxu1  ;;  %v2994_v12 = vadd.f32 %v3640_v55, %v5315_v34 }
 0x46c   :  { %v3642_v29 = vpop.f32.mrb[163].mxu1 }
 0x46d   :  { %v5280_v56 = vadd.f32 %v3642_v29, %v3641_v50 }
 0x46f   :  { %v3644_v7 = vpop.f32.mrb[164].mxu1  ;;  %v2999_v50 = vadd.f32 %v5280_v56, %v5315_v34 }
 0x470   :  { %v3645_v44 = vpop.f32.mrb[165].mxu1 }
 0x471   :  { %v5282_v33 = vadd.f32 %v3645_v44, %v3644_v7 }
 0x473   :  { %v3647_v17 = vpop.f32.mrb[166].mxu1 }
 0x474   :  { %v3648_v0 = vpop.f32.mrb[167].mxu1 }
 0x475   :  { %v5284_v6 = vadd.f32 %v3648_v0, %v3647_v17 }
 0x477   :  { %v3650_v8 = vpop.f32.mrb[168].mxu1 }
 0x478   :  { %v3651_v39 = vpop.f32.mrb[169].mxu1 }
 0x479   :  { %v5286_v20 = vadd.f32 %v3651_v39, %v3650_v8 }
 0x47b   :  { %v3653_v10 = vpop.f32.mrb[170].mxu1 }
 0x47c   :  { %v3654_v19 = vpop.f32.mrb[171].mxu1 }
 0x47d   :  { %v5288_v22 = vadd.f32 %v3654_v19, %v3653_v10  ;;  %v3004_v10 = vadd.f32 %v5282_v33, %v5315_v34 }
 0x47f   :  { %v3656_v63 = vpop.f32.mrb[172].mxu1 }
 0x480   :  { %v3657_v1 = vpop.f32.mrb[173].mxu1 }
 0x481   :  { %v5290_v14 = vadd.f32 %v3657_v1, %v3656_v63 }
 0x483   :  { %v3659_v24 = vpop.f32.mrb[174].mxu1 }
 0x484   :  { %v3660_v28 = vpop.f32.mrb[175].mxu1 }
 0x485   :  { %v5292_v15 = vadd.f32 %v3660_v28, %v3659_v24 }
 0x487   :  { %v3662_v2 = vpop.f32.mrb[176].mxu1 }
 0x488   :  { %v3663_v49 = vpop.f32.mrb[177].mxu1 }
 0x489   :  { %v5294_v48 = vadd.f32 %v3663_v49, %v3662_v2 }
 0x48b   :  { %v3665_v62 = vpop.f32.mrb[178].mxu1 }
 0x48c   :  { %v3666_v21 = vpop.f32.mrb[179].mxu1 }
 0x48d   :  { %v5296_v38 = vadd.f32 %v3666_v21, %v3665_v62  ;;  %v3009_v62 = vadd.f32 %v5284_v6, %v5315_v34 }
 0x48f   :  { %v3668_v13 = vpop.f32.mrb[180].mxu1 }
 0x490   :  { %v3669_v26 = vpop.f32.mrb[181].mxu1 }
 0x491   :  { %v5298_v32 = vadd.f32 %v3669_v26, %v3668_v13 }
 0x493   :  { %v3671_v4 = vpop.f32.mrb[182].mxu1 }
 0x494   :  { %v3672_v37 = vpop.f32.mrb[183].mxu1 }
 0x495   :  { %v5300_v35 = vadd.f32 %v3672_v37, %v3671_v4 }
 0x497   :  { %v3674_v36 = vpop.f32.mrb[184].mxu1 }
 0x498   :  { %v3675_v31 = vpop.f32.mrb[185].mxu1 }
 0x499   :  { %v5302_v59 = vadd.f32 %v3675_v31, %v3674_v36 }
 0x49b   :  { %v3677_v40 = vpop.f32.mrb[186].mxu1 }
 0x49c   :  { %v3678_v42 = vpop.f32.mrb[187].mxu1 }
 0x49d   :  { %v5304_v53 = vadd.f32 %v3678_v42, %v3677_v40  ;;  %v3014_v40 = vadd.f32 %v5286_v20, %v5315_v34 }
 0x49f   :  { %v3680_v18 = vpop.f32.mrb[188].mxu1 }
 0x4a0   :  { %v3681_v23 = vpop.f32.mrb[189].mxu1 }
 0x4a1   :  { %v5306_v45 = vadd.f32 %v3681_v23, %v3680_v18 }
 0x4a3   :  { %v3683_v43 = vpop.f32.mrb[190].mxu1 }
 0x4a4   :  { %v3684_v16 = vpop.f32.mrb[191].mxu1 }
 0x4a5   :  { %v5317_v9 = vadd.f32 %v3684_v16, %v3683_v43 }
 0x4a7   :  { %v2832_v52 = vpop.f32.mrb[160].mxu0  ;;  %v3718_v57 = vpop.f32.mrb[192].mxu1 }
 0x4a8   :  { %v4342_v41 = vadd.f32 %v2832_v52, %v5312_v46  ;;  %v2834_v25 = vpop.f32.mrb[161].mxu0  ;;  %v3719_v3 = vpop.f32.mrb[193].mxu1 }
 0x4a9   :  { %v4343_v5 = vadd.f32 %v2834_v25, %v5320_v47  ;;  %v3720_v58 = vadd.f32 %v3719_v3, %v3718_v57  ;;  %v3019_v57 = vadd.f32 %v5288_v22, %v5315_v34 }
 0x4aa   :  { %3217 = vst [vmem:[#allocation14] sm:$0xff] %v4342_v41 }
 0x4ab   :  { %3218 = vst [vmem:[#allocation14 + $0x8] sm:$0xff] %v4343_v5  ;;  %v3139_v60 = vadd.f32 %v3720_v58, %v2994_v12  ;;  %v2838_v54 = vpop.f32.mrb[162].mxu0  ;;  %v3721_v27 = vpop.f32.mrb[194].mxu1 }
 0x4ac   :  { %v4344_v51 = vadd.f32 %v2838_v54, %v5312_v46  ;;  %v2840_v61 = vpop.f32.mrb[163].mxu0  ;;  %v3722_v30 = vpop.f32.mrb[195].mxu1  ;;  %v3024_v54 = vadd.f32 %v5290_v14, %v5315_v34 }
 0x4ad   :  { %3219 = vst [vmem:[#allocation14 + $0x10] sm:$0xff] %v3139_v60  ;;  %v4345_v29 = vadd.f32 %v2840_v61, %v5320_v47  ;;  %v3723_v7 = vadd.f32 %v3722_v30, %v3721_v27 }
 0x4ae   :  { %3220 = vst [vmem:[#allocation14 + $0x18] sm:$0xff] %v4344_v51 }
 0x4af   :  { %3221 = vst [vmem:[#allocation14 + $0x20] sm:$0xff] %v4345_v29  ;;  %v3144_v55 = vadd.f32 %v3723_v7, %v2999_v50  ;;  %v2844_v44 = vpop.f32.mrb[164].mxu0  ;;  %v3724_v17 = vpop.f32.mrb[196].mxu1 }
 0x4b0   :  { %v4346_v0 = vadd.f32 %v2844_v44, %v5312_v46  ;;  %v2846_v8 = vpop.f32.mrb[165].mxu0  ;;  %v3725_v39 = vpop.f32.mrb[197].mxu1 }
 0x4b1   :  { %3222 = vst [vmem:[#allocation14 + $0x28] sm:$0xff] %v3144_v55  ;;  %v4347_v19 = vadd.f32 %v2846_v8, %v5320_v47  ;;  %v3726_v56 = vadd.f32 %v3725_v39, %v3724_v17  ;;  %v3029_v55 = vadd.f32 %v5292_v15, %v5315_v34 }
 0x4b2   :  { %3223 = vst [vmem:[#allocation14 + $0x30] sm:$0xff] %v4346_v0 }
 0x4b3   :  { %3224 = vst [vmem:[#allocation14 + $0x38] sm:$0xff] %v4347_v19  ;;  %v3149_v63 = vadd.f32 %v3726_v56, %v3004_v10  ;;  %v2850_v1 = vpop.f32.mrb[166].mxu0  ;;  %v3727_v24 = vpop.f32.mrb[198].mxu1  ;;  %v3034_v56 = vadd.f32 %v5294_v48, %v5315_v34 }
 0x4b4   :  { %v4348_v28 = vadd.f32 %v2850_v1, %v5312_v46  ;;  %v2852_v2 = vpop.f32.mrb[167].mxu0  ;;  %v3728_v49 = vpop.f32.mrb[199].mxu1 }
 0x4b5   :  { %3225 = vst [vmem:[#allocation14 + $0x40] sm:$0xff] %v3149_v63  ;;  %v4349_v21 = vadd.f32 %v2852_v2, %v5320_v47  ;;  %v3729_v33 = vadd.f32 %v3728_v49, %v3727_v24 }
 0x4b6   :  { %3226 = vst [vmem:[#allocation14 + $0x48] sm:$0xff] %v4348_v28 }
 0x4b7   :  { %3227 = vst [vmem:[#allocation14 + $0x50] sm:$0xff] %v4349_v21  ;;  %v3154_v13 = vadd.f32 %v3729_v33, %v3009_v62  ;;  %v2856_v26 = vpop.f32.mrb[168].mxu0  ;;  %v3730_v4 = vpop.f32.mrb[200].mxu1  ;;  %v3039_v21 = vadd.f32 %v5296_v38, %v5315_v34 }
 0x4b8   :  { %v4350_v37 = vadd.f32 %v2856_v26, %v5312_v46  ;;  %v2858_v36 = vpop.f32.mrb[169].mxu0  ;;  %v3731_v31 = vpop.f32.mrb[201].mxu1 }
 0x4b9   :  { %3228 = vst [vmem:[#allocation14 + $0x58] sm:$0xff] %v3154_v13  ;;  %v4351_v42 = vadd.f32 %v2858_v36, %v5320_v47  ;;  %v3732_v6 = vadd.f32 %v3731_v31, %v3730_v4 }
 0x4ba   :  { %3229 = vst [vmem:[#allocation14 + $0x60] sm:$0xff] %v4350_v37 }
 0x4bb   :  { %3230 = vst [vmem:[#allocation14 + $0x68] sm:$0xff] %v4351_v42  ;;  %v3159_v18 = vadd.f32 %v3732_v6, %v3014_v40  ;;  %v2862_v23 = vpop.f32.mrb[170].mxu0  ;;  %v3733_v11 = vpop.f32.mrb[202].mxu1  ;;  %v3044_v40 = vadd.f32 %v5298_v32, %v5315_v34 }
 0x4bc   :  { %v4352_v43 = vadd.f32 %v2862_v23, %v5312_v46  ;;  %v2864_v16 = vpop.f32.mrb[171].mxu0  ;;  %v3734_v52 = vpop.f32.mrb[203].mxu1 }
 0x4bd   :  { %3231 = vst [vmem:[#allocation14 + $0x70] sm:$0xff] %v3159_v18  ;;  %v4353_v41 = vadd.f32 %v2864_v16, %v5320_v47  ;;  %v3735_v20 = vadd.f32 %v3734_v52, %v3733_v11  ;;  %v3049_v52 = vadd.f32 %v5300_v35, %v5315_v34 }
 0x4be   :  { %3232 = vst [vmem:[#allocation14 + $0x78] sm:$0xff] %v4352_v43 }
 0x4bf   :  { %3233 = vst [vmem:[#allocation14 + $0x80] sm:$0xff] %v4353_v41  ;;  %v3164_v25 = vadd.f32 %v3735_v20, %v3019_v57  ;;  %v2868_v3 = vpop.f32.mrb[172].mxu0  ;;  %v3736_v12 = vpop.f32.mrb[204].mxu1 }
 0x4c0   :  { %v4354_v5 = vadd.f32 %v2868_v3, %v5312_v46  ;;  %v2870_v58 = vpop.f32.mrb[173].mxu0  ;;  %v3737_v60 = vpop.f32.mrb[205].mxu1 }
 0x4c1   :  { %3234 = vst [vmem:[#allocation14 + $0x88] sm:$0xff] %v3164_v25  ;;  %v4355_v27 = vadd.f32 %v2870_v58, %v5320_v47  ;;  %v3738_v22 = vadd.f32 %v3737_v60, %v3736_v12  ;;  %v3054_v58 = vadd.f32 %v5302_v59, %v5315_v34 }
 0x4c2   :  { %3235 = vst [vmem:[#allocation14 + $0x90] sm:$0xff] %v4354_v5 }
 0x4c3   :  { %3236 = vst [vmem:[#allocation14 + $0x98] sm:$0xff] %v4355_v27  ;;  %v3169_v51 = vadd.f32 %v3738_v22, %v3024_v54  ;;  %v2874_v61 = vpop.f32.mrb[174].mxu0  ;;  %v3739_v30 = vpop.f32.mrb[206].mxu1 }
 0x4c4   :  { %v4356_v50 = vadd.f32 %v2874_v61, %v5312_v46  ;;  %v2876_v29 = vpop.f32.mrb[175].mxu0  ;;  %v3740_v7 = vpop.f32.mrb[207].mxu1 }
 0x4c5   :  { %3237 = vst [vmem:[#allocation14 + $0xa0] sm:$0xff] %v3169_v51  ;;  %v4357_v44 = vadd.f32 %v2876_v29, %v5320_v47  ;;  %v3741_v14 = vadd.f32 %v3740_v7, %v3739_v30 }
 0x4c6   :  { %3238 = vst [vmem:[#allocation14 + $0xa8] sm:$0xff] %v4356_v50  ;;  %v3059_v50 = vadd.f32 %v5304_v53, %v5315_v34 }
 0x4c7   :  { %3239 = vst [vmem:[#allocation14 + $0xb0] sm:$0xff] %v4357_v44  ;;  %v3174_v17 = vadd.f32 %v3741_v14, %v3029_v55  ;;  %v2880_v0 = vpop.f32.mrb[176].mxu0  ;;  %v3742_v8 = vpop.f32.mrb[208].mxu1 }
 0x4c8   :  { %v4358_v39 = vadd.f32 %v2880_v0, %v5312_v46  ;;  %v2882_v10 = vpop.f32.mrb[177].mxu0  ;;  %v3743_v19 = vpop.f32.mrb[209].mxu1 }
 0x4c9   :  { %3240 = vst [vmem:[#allocation14 + $0xb8] sm:$0xff] %v3174_v17  ;;  %v4359_v63 = vadd.f32 %v2882_v10, %v5320_v47  ;;  %v3744_v15 = vadd.f32 %v3743_v19, %v3742_v8  ;;  %v3064_v8 = vadd.f32 %v5306_v45, %v5315_v34 }
 0x4ca   :  { %3241 = vst [vmem:[#allocation14 + $0xc0] sm:$0xff] %v4358_v39 }
 0x4cb   :  { %3242 = vst [vmem:[#allocation14 + $0xc8] sm:$0xff] %v4359_v63  ;;  %v3179_v1 = vadd.f32 %v3744_v15, %v3034_v56  ;;  %v2886_v24 = vpop.f32.mrb[178].mxu0  ;;  %v3745_v28 = vpop.f32.mrb[210].mxu1 }
 0x4cc   :  { %v4360_v2 = vadd.f32 %v2886_v24, %v5312_v46  ;;  %v2888_v49 = vpop.f32.mrb[179].mxu0  ;;  %v3746_v62 = vpop.f32.mrb[211].mxu1  ;;  %v3069_v24 = vadd.f32 %v5317_v9, %v5315_v34 }
 0x4cd   :  { %3243 = vst [vmem:[#allocation14 + $0xd0] sm:$0xff] %v3179_v1  ;;  %v4361_v33 = vadd.f32 %v2888_v49, %v5320_v47  ;;  %v3747_v48 = vadd.f32 %v3746_v62, %v3745_v28 }
 0x4ce   :  { %3244 = vst [vmem:[#allocation14 + $0xd8] sm:$0xff] %v4360_v2 }
 0x4cf   :  { %3245 = vst [vmem:[#allocation14 + $0xe0] sm:$0xff] %v4361_v33  ;;  %v3184_v13 = vadd.f32 %v3747_v48, %v3039_v21  ;;  %v2892_v26 = vpop.f32.mrb[180].mxu0  ;;  %v3748_v4 = vpop.f32.mrb[212].mxu1 }
 0x4d0   :  { %v4362_v37 = vadd.f32 %v2892_v26, %v5312_v46  ;;  %v2894_v36 = vpop.f32.mrb[181].mxu0  ;;  %v3749_v31 = vpop.f32.mrb[213].mxu1 }
 0x4d1   :  { %3246 = vst [vmem:[#allocation14 + $0xe8] sm:$0xff] %v3184_v13  ;;  %v4363_v42 = vadd.f32 %v2894_v36, %v5320_v47  ;;  %v3750_v38 = vadd.f32 %v3749_v31, %v3748_v4 }
 0x4d2   :  { %3247 = vst [vmem:[#allocation14 + $0xf0] sm:$0xff] %v4362_v37 }
 0x4d3   :  { %3248 = vst [vmem:[#allocation14 + $0xf8] sm:$0xff] %v4363_v42  ;;  %v3189_v6 = vadd.f32 %v3750_v38, %v3044_v40  ;;  %v2898_v18 = vpop.f32.mrb[182].mxu0  ;;  %v3751_v23 = vpop.f32.mrb[214].mxu1 }
 0x4d4   :  { %v4364_v11 = vadd.f32 %v2898_v18, %v5312_v46  ;;  %v2900_v43 = vpop.f32.mrb[183].mxu0  ;;  %v3752_v16 = vpop.f32.mrb[215].mxu1 }
 0x4d5   :  { %3249 = vst [vmem:[#allocation14 + $0x100] sm:$0xff] %v3189_v6  ;;  %v4365_v57 = vadd.f32 %v2900_v43, %v5320_v47  ;;  %v3753_v32 = vadd.f32 %v3752_v16, %v3751_v23 }
 0x4d6   :  { %3250 = vst [vmem:[#allocation14 + $0x108] sm:$0xff] %v4364_v11 }
 0x4d7   :  { %3251 = vst [vmem:[#allocation14 + $0x110] sm:$0xff] %v4365_v57  ;;  %v3194_v41 = vadd.f32 %v3753_v32, %v3049_v52  ;;  %v2904_v20 = vpop.f32.mrb[184].mxu0  ;;  %v3754_v25 = vpop.f32.mrb[216].mxu1 }
 0x4d8   :  { %v4366_v3 = vadd.f32 %v2904_v20, %v5312_v46  ;;  %v2906_v12 = vpop.f32.mrb[185].mxu0  ;;  %v3755_v5 = vpop.f32.mrb[217].mxu1 }
 0x4d9   :  { %3252 = vst [vmem:[#allocation14 + $0x118] sm:$0xff] %v3194_v41  ;;  %v4367_v60 = vadd.f32 %v2906_v12, %v5320_v47  ;;  %v3756_v35 = vadd.f32 %v3755_v5, %v3754_v25 }
 0x4da   :  { %3253 = vst [vmem:[#allocation14 + $0x120] sm:$0xff] %v4366_v3 }
 0x4db   :  { %3254 = vst [vmem:[#allocation14 + $0x128] sm:$0xff] %v4367_v60  ;;  %v3199_v54 = vadd.f32 %v3756_v35, %v3054_v58  ;;  %v2910_v27 = vpop.f32.mrb[186].mxu0  ;;  %v3757_v22 = vpop.f32.mrb[218].mxu1 }
 0x4dc   :  { %v4368_v51 = vadd.f32 %v2910_v27, %v5312_v46  ;;  %v2912_v61 = vpop.f32.mrb[187].mxu0  ;;  %v3758_v30 = vpop.f32.mrb[219].mxu1 }
 0x4dd   :  { %3255 = vst [vmem:[#allocation14 + $0x130] sm:$0xff] %v3199_v54  ;;  %v4369_v29 = vadd.f32 %v2912_v61, %v5320_v47  ;;  %v3759_v59 = vadd.f32 %v3758_v30, %v3757_v22 }
 0x4de   :  { %3256 = vst [vmem:[#allocation14 + $0x138] sm:$0xff] %v4368_v51 }
 0x4df   :  { %3257 = vst [vmem:[#allocation14 + $0x140] sm:$0xff] %v4369_v29  ;;  %v3204_v7 = vadd.f32 %v3759_v59, %v3059_v50  ;;  %v2916_v55 = vpop.f32.mrb[188].mxu0  ;;  %v3760_v44 = vpop.f32.mrb[220].mxu1 }
 0x4e0   :  { %v4370_v14 = vadd.f32 %v2916_v55, %v5312_v46  ;;  %v2918_v17 = vpop.f32.mrb[189].mxu0  ;;  %v3761_v0 = vpop.f32.mrb[221].mxu1 }
 0x4e1   :  { %3258 = vst [vmem:[#allocation14 + $0x148] sm:$0xff] %v3204_v7  ;;  %v4371_v39 = vadd.f32 %v2918_v17, %v5320_v47  ;;  %v3762_v53 = vadd.f32 %v3761_v0, %v3760_v44 }
 0x4e2   :  { %3259 = vst [vmem:[#allocation14 + $0x150] sm:$0xff] %v4370_v14 }
 0x4e3   :  { %3260 = vst [vmem:[#allocation14 + $0x158] sm:$0xff] %v4371_v39  ;;  %v3209_v10 = vadd.f32 %v3762_v53, %v3064_v8  ;;  %v2922_v19 = vpop.f32.mrb[190].mxu0  ;;  %v3763_v56 = vpop.f32.mrb[222].mxu1 }
 0x4e4   :  { %v4372_v63 = vadd.f32 %v2922_v19, %v5312_v46  ;;  %v2924_v15 = vpop.f32.mrb[191].mxu0  ;;  %v3764_v1 = vpop.f32.mrb[223].mxu1 }
 0x4e5   :  { %3261 = vst [vmem:[#allocation14 + $0x160] sm:$0xff] %v3209_v10  ;;  %v4373_v45 = vadd.f32 %v2924_v15, %v5320_v47  ;;  %v3765_v28 = vadd.f32 %v3764_v1, %v3763_v56 }
 0x4e6   :  { %3262 = vst [vmem:[#allocation14 + $0x168] sm:$0xff] %v4372_v63 }
 0x4e7   :  { %3263 = vst [vmem:[#allocation14 + $0x170] sm:$0xff] %v4373_v45  ;;  %v3214_v2 = vadd.f32 %v3765_v28, %v3069_v24 }
 0x4e9   :  { %3264 = vst [vmem:[#allocation14 + $0x178] sm:$0xff] %v3214_v2 }
 0x4ea   :  { %4588 = shalt.err (!%p4585_p4)
}
 0x4eb   :  { %s4589_s22 = scalar_lea.hbm %s5412_s12, 6144 }
 0x4ec   :  { %p4590_p5 = scmp.ne.s32.totalorder %s5412_s12, %s4589_s22  ;;  %p4593_p6 = scmp.lt.u32.totalorder %s4589_s22, %s5412_s12 }
 0x4ee   :  { %p4595_p7 = pnand %p4593_p6, %p4590_p5 }
 0x4f0   :  { %4598 = shalt.err (!%p4595_p7)
}
 0x4f1   :  { %3276 = dma.vmem_to_hbm [thread:$0]  %s3271_s18, 6144, %s5412_s12, [#allocation4], %s4622_s6, %s4622_s6, %s4623_s13  }
 0x4f2   :  { %4607 = dma.done.wait [#allocation4], 6144  }
 0x4f3   :  { %4608 = vsyncadd [#allocation4], 4294961152 }
 0x4f4   :  { %3280 = vsyncpa [#allocation3], 1 }
 0x4f5   :  { %3281 = vsyncpa [#allocation6], 1 }
 0x4f6   :  { %3282 = vsyncpa [#allocation9], 1 }
 0x4f7   :  { %3283 = vsyncpa [#allocation12], 1 }
 0x4f8   :  { %3284 = vsyncpa [#allocation4], 1 }

// kernel: tpu_custom_call.1
= control target key start
LH: loop header
LB: loop body
LE: loop exit
PB: predicated region body
PF: predicated region fallthrough
CT: control target
= control target key end

     0   :  { %17 = vsyncpa [#allocation3], 0  ;;  %s5400_s0 = inlined_call_operand.hbm [shape: f32[128,256], index: 0, kind: input, shape index: {}]   ;;  %s5401_s1 = inlined_call_operand.hbm [shape: f32[128,128], index: 1, kind: input, shape index: {}]   ;;  %s5402_s2 = inlined_call_operand.hbm [shape: f32[256,512], index: 2, kind: input, shape index: {}]   ;;  %s5403_s3 = inlined_call_operand.vmem [shape: f32[1,512], index: 3, kind: input, shape index: {}]   ;;  %s5404_s4 = inlined_call_operand.hbm [shape: f32[128,512], index: 4, kind: input, shape index: {}]   ;;  %s5405_s5 = inlined_call_operand.vmem [shape: f32[1,512], index: 5, kind: input, shape index: {}]   ;;  %s5406_s6 = inlined_call_operand.hbm [shape: f32[1024,128], index: 6, kind: input, shape index: {}]   ;;  %s5407_s7 = inlined_call_operand.vmem [shape: f32[1,128], index: 7, kind: input, shape index: {}]   ;;  %s5408_s8 = inlined_call_operand.hbm [shape: f32[128,512], index: 8, kind: input, shape index: {}]   ;;  %s5409_s9 = inlined_call_operand.vmem [shape: f32[1,512], index: 9, kind: input, shape index: {}]   ;;  %s5410_s10 = inlined_call_operand.hbm [shape: f32[512,384], index: 10, kind: input, shape index: {}]   ;;  %s5411_s11 = inlined_call_operand.vmem [shape: f32[1,384], index: 11, kind: input, shape index: {}]   ;;  %s5412_s12 = inlined_call_operand.hbm [shape: f32[128,384], index: 12, kind: output, shape index: {}]  }
   0x1   :  { %18 = vsyncpa [#allocation6], 0 }
   0x2   :  { %19 = vsyncpa [#allocation9], 0 }
   0x3   :  { %20 = vsyncpa [#allocation12], 0 }
   0x4   :  { %21 = vsyncpa [#allocation4], 0  ;;  %s4609_s21 = smov [#allocation5]   ;;  %s4423_s25 = scalar_lea.hbm %s5401_s1, 2048 }
   0x5   :  { %s39_s22 = sshll.u32 %s4609_s21, 4  ;;  %p4424_p0 = scmp.ne.s32.totalorder %s5401_s1, %s4423_s25  ;;  %s40_s22 = int_to_ptr.vmem [resolvable:$true] %s39_s22 }
   0x6   :  { %p4427_p1 = scmp.lt.u32.totalorder %s4423_s25, %s5401_s1 }
   0x8   :  { %p4429_p2 = pnand %p4427_p1, %p4424_p0 }
   0xa   :  { %4432 = shalt.err (!%p4429_p2)
}
   0xb   :  { %s4433_s30 = scalar_lea.vmem %s40_s22, 2048  ;;  %p4438_p4 = scmp.lt.s32.totalorder %s40_s22, %s40_s22 }
   0xc   :  { %p4434_p3 = scmp.ne.s32.totalorder %s40_s22, %s4433_s30  ;;  %p4439_p5 = scmp.lt.s32.totalorder %s4433_s30, %s4433_s30 }
   0xe   :  { %p4440_p6 = por %p4439_p5, %p4438_p4 }
  0x10   :  { %p4441_p7 = pnand %p4440_p6, %p4434_p3 }
  0x12   :  { %4444 = shalt.err (!%p4441_p7)
}
  0x13   :  { %s4610_s13 = smov 128   ;;  %s4611_s14 = smov 8  }
  0x14   :  { %45 = dma.hbm_to_vmem [thread:$0]  %s5401_s1, 2048, %s40_s22, [#allocation6], %s4610_s13, %s4610_s13, %s4611_s14  }
  0x15   :  { %s4612_s17 = smov [#allocation8]   ;;  %s4613_s19 = smov [#allocation11]  }
  0x16   :  { %s65_s18 = sshll.u32 %s4612_s17, 4  ;;  %s93_s20 = sshll.u32 %s4613_s19, 4  ;;  %s66_s18 = int_to_ptr.vmem [resolvable:$true] %s65_s18  ;;  %s94_s20 = int_to_ptr.vmem [resolvable:$true] %s93_s20 }
  0x17   :  { %s4445_s24 = scalar_lea.hbm %s5404_s4, 8192 }
  0x18   :  { %p4446_p8 = scmp.ne.s32.totalorder %s5404_s4, %s4445_s24  ;;  %p4449_p9 = scmp.lt.u32.totalorder %s4445_s24, %s5404_s4 }
  0x1a   :  { %p4451_p10 = pnand %p4449_p9, %p4446_p8 }
  0x1c   :  { %4454 = shalt.err (!%p4451_p10)
}
  0x1d   :  { %s4455_s1 = scalar_lea.vmem %s66_s18, 8192  ;;  %p4460_p12 = scmp.lt.s32.totalorder %s66_s18, %s66_s18 }
  0x1e   :  { %p4456_p11 = scmp.ne.s32.totalorder %s66_s18, %s4455_s1  ;;  %p4461_p13 = scmp.lt.s32.totalorder %s4455_s1, %s4455_s1 }
  0x20   :  { %p4462_p0 = por %p4461_p13, %p4460_p12 }
  0x22   :  { %p4463_p1 = pnand %p4462_p0, %p4456_p11 }
  0x24   :  { %4466 = shalt.err (!%p4463_p1)
}
  0x25   :  { %s4614_s22 = smov 512   ;;  %s4615_s29 = smov 32  }
  0x26   :  { %71 = dma.hbm_to_vmem [thread:$0]  %s5404_s4, 8192, %s66_s18, [#allocation9], %s4614_s22, %s4614_s22, %s4615_s29  }
  0x27   :  { %s4467_s19 = scalar_lea.hbm %s5408_s8, 8192 }
  0x28   :  { %p4468_p2 = scmp.ne.s32.totalorder %s5408_s8, %s4467_s19  ;;  %p4471_p3 = scmp.lt.u32.totalorder %s4467_s19, %s5408_s8 }
  0x2a   :  { %p4473_p4 = pnand %p4471_p3, %p4468_p2 }
  0x2c   :  { %4476 = shalt.err (!%p4473_p4)
}
  0x2d   :  { %s4477_s26 = scalar_lea.vmem %s94_s20, 8192  ;;  %p4482_p6 = scmp.lt.s32.totalorder %s94_s20, %s94_s20 }
  0x2e   :  { %p4478_p5 = scmp.ne.s32.totalorder %s94_s20, %s4477_s26  ;;  %p4483_p7 = scmp.lt.s32.totalorder %s4477_s26, %s4477_s26 }
  0x30   :  { %p4484_p8 = por %p4483_p7, %p4482_p6 }
  0x32   :  { %p4485_p9 = pnand %p4484_p8, %p4478_p5 }
  0x34   :  { %4488 = shalt.err (!%p4485_p9)
}
  0x35   :  { %99 = dma.hbm_to_vmem [thread:$0]  %s5408_s8, 8192, %s94_s20, [#allocation12], %s4614_s22, %s4614_s22, %s4615_s29  }
  0x36   :  { %s4616_s27 = smov [#allocation2]   ;;  %s4489_s15 = scalar_lea.hbm %s5400_s0, 4096 }
  0x37   :  { %s27_s28 = sshll.u32 %s4616_s27, 4  ;;  %p4490_p10 = scmp.ne.s32.totalorder %s5400_s0, %s4489_s15  ;;  %s28_s28 = int_to_ptr.vmem [resolvable:$true] %s27_s28 }
  0x38   :  { %p4493_p11 = scmp.lt.u32.totalorder %s4489_s15, %s5400_s0 }
  0x3a   :  { %p4495_p12 = pnand %p4493_p11, %p4490_p10 }
  0x3c   :  { %4498 = shalt.err (!%p4495_p12)
}
  0x3d   :  { %s4499_s23 = scalar_lea.vmem %s28_s28, 4096  ;;  %p4504_p0 = scmp.lt.s32.totalorder %s28_s28, %s28_s28 }
  0x3e   :  { %p4500_p13 = scmp.ne.s32.totalorder %s28_s28, %s4499_s23  ;;  %p4505_p1 = scmp.lt.s32.totalorder %s4499_s23, %s4499_s23 }
  0x40   :  { %p4506_p2 = por %p4505_p1, %p4504_p0 }
  0x42   :  { %p4507_p3 = pnand %p4506_p2, %p4500_p13 }
  0x44   :  { %4510 = shalt.err (!%p4507_p3)
}
  0x45   :  { %s4617_s8 = smov 256   ;;  %s4618_s20 = smov 16  }
  0x46   :  { %33 = dma.hbm_to_vmem [thread:$0]  %s5400_s0, 4096, %s28_s28, [#allocation3], %s4617_s8, %s4617_s8, %s4618_s20  }
  0x47   :  { %s4619_s26 = smov [#allocation7]   ;;  %s4620_s18 = smov [#allocation10]  }
  0x48   :  { %s51_s4 = sshll.u32 %s4619_s26, 4  ;;  %s79_s27 = sshll.u32 %s4620_s18, 4  ;;  %s52_s4 = int_to_ptr.vmem [resolvable:$true] %s51_s4  ;;  %s4748_s27 = int_to_ptr.vmem [resolvable:$true] %s79_s27 }
  0x49   :  { %s4511_s15 = scalar_lea.hbm %s5402_s2, 16384 }
  0x4a   :  { %p4512_p4 = scmp.ne.s32.totalorder %s5402_s2, %s4511_s15  ;;  %p4515_p5 = scmp.lt.u32.totalorder %s4511_s15, %s5402_s2 }
  0x4c   :  { %p4517_p6 = pnand %p4515_p5, %p4512_p4 }
  0x4e   :  { %4520 = shalt.err (!%p4517_p6)
}
  0x4f   :  { %s4521_s0 = scalar_lea.vmem %s52_s4, 16384  ;;  %p4526_p8 = scmp.lt.s32.totalorder %s52_s4, %s52_s4 }
  0x50   :  { %p4522_p7 = scmp.ne.s32.totalorder %s52_s4, %s4521_s0  ;;  %p4527_p9 = scmp.lt.s32.totalorder %s4521_s0, %s4521_s0 }
  0x52   :  { %p4528_p10 = por %p4527_p9, %p4526_p8 }
  0x54   :  { %p4529_p11 = pnand %p4528_p10, %p4522_p7 }
  0x56   :  { %4532 = shalt.err (!%p4529_p11)
}
  0x57   :  { %57 = dma.hbm_to_vmem [thread:$0]  %s5402_s2, 16384, %s52_s4, [#allocation6], %s4614_s22, %s4614_s22, %s4615_s29  }
  0x58   :  { %s4533_s24 = scalar_lea.hbm %s5406_s6, 16384 }
  0x59   :  { %p4534_p12 = scmp.ne.s32.totalorder %s5406_s6, %s4533_s24  ;;  %p4537_p13 = scmp.lt.u32.totalorder %s4533_s24, %s5406_s6 }
  0x5b   :  { %p4539_p0 = pnand %p4537_p13, %p4534_p12 }
  0x5d   :  { %4542 = shalt.err (!%p4539_p0)
}
  0x5e   :  { %s4543_s30 = scalar_lea.vmem %s4748_s27, 16384  ;;  %p4548_p2 = scmp.lt.s32.totalorder %s4748_s27, %s4748_s27 }
  0x5f   :  { %p4544_p1 = scmp.ne.s32.totalorder %s4748_s27, %s4543_s30  ;;  %p4549_p3 = scmp.lt.s32.totalorder %s4543_s30, %s4543_s30 }
  0x61   :  { %p4550_p4 = por %p4549_p3, %p4548_p2 }
  0x63   :  { %p4551_p5 = pnand %p4550_p4, %p4544_p1 }
  0x65   :  { %4554 = shalt.err (!%p4551_p5)
}
  0x66   :  { %85 = dma.hbm_to_vmem [thread:$0]  %s5406_s6, 16384, %s4748_s27, [#allocation9], %s4610_s13, %s4610_s13, %s4611_s14  }
  0x67   :  { %s4621_s29 = smov [#allocation13]   ;;  %s4555_s17 = scalar_lea.hbm %s5410_s10, 24576 }
  0x68   :  { %s107_s4 = sshll.u32 %s4621_s29, 4  ;;  %p4556_p6 = scmp.ne.s32.totalorder %s5410_s10, %s4555_s17  ;;  %s108_s4 = int_to_ptr.vmem [resolvable:$true] %s107_s4 }
  0x69   :  { %p4559_p7 = scmp.lt.u32.totalorder %s4555_s17, %s5410_s10 }
  0x6b   :  { %p4561_p8 = pnand %p4559_p7, %p4556_p6 }
  0x6d   :  { %4564 = shalt.err (!%p4561_p8)
}
  0x6e   :  { %s4565_s23 = scalar_lea.vmem %s108_s4, 24576  ;;  %p4570_p10 = scmp.lt.s32.totalorder %s108_s4, %s108_s4 }
  0x6f   :  { %p4566_p9 = scmp.ne.s32.totalorder %s108_s4, %s4565_s23  ;;  %p4571_p11 = scmp.lt.s32.totalorder %s4565_s23, %s4565_s23 }
  0x71   :  { %p4572_p12 = por %p4571_p11, %p4570_p10 }
  0x73   :  { %p4573_p13 = pnand %p4572_p12, %p4566_p9 }
  0x75   :  { %4576 = shalt.err (!%p4573_p13)
}
  0x76   :  { %s4622_s6 = smov 384   ;;  %s4623_s13 = smov 24  }
  0x77   :  { %113 = dma.hbm_to_vmem [thread:$0]  %s5410_s10, 24576, %s108_s4, [#allocation12], %s4622_s6, %s4622_s6, %s4623_s13  }
  0x78   :  { %4599 = dma.done.wait [#allocation3], 4096  }
  0x79   :  { %4600 = vsyncadd [#allocation3], 4294963200 }
  0x7a   :  { %4601 = dma.done.wait [#allocation6], 18432  }
  0x7b   :  { %4602 = vsyncadd [#allocation6], 4294948864 }
  0x7c   :  { %4603 = dma.done.wait [#allocation9], 24576  }
  0x7d   :  { %4604 = vsyncadd [#allocation9], 4294942720 }
  0x7e   :  { %4605 = dma.done.wait [#allocation12], 32768  }
  0x7f   :  { %4606 = vsyncadd [#allocation12], 4294934528  ;;  %v186_v0 = vld [vmem:[#allocation7 + $0x8] sm:$0xff]  ;;  %v188_v2 = vld [vmem:[#allocation7 + $0x18] sm:$0xff] }
  0x80   :  { %v190_v1 = vld [vmem:[#allocation7 + $0x28] sm:$0xff]  ;;  %v192_v4 = vld [vmem:[#allocation7 + $0x38] sm:$0xff]  ;;  %v185_v5 = vld [vmem:[#allocation7] sm:$0xff] }
  0x81   :  { %v3766_v3 = vpack.c.bf16 %v190_v1, %v186_v0  ;;  %v189_v6 = vld [vmem:[#allocation7 + $0x20] sm:$0xff]  ;;  %v3830_v7 = vpack.c.bf16 %v192_v4, %v188_v2  ;;  %v187_v9 = vld [vmem:[#allocation7 + $0x10] sm:$0xff]  ;;  %v194_v11 = vld [vmem:[#allocation7 + $0x48] sm:$0xff] }
  0x82   :  { %v3768_v8 = vpack.c.bf16 %v189_v6, %v185_v5  ;;  %v191_v10 = vld [vmem:[#allocation7 + $0x30] sm:$0xff]  ;;  %v198_v13 = vld [vmem:[#allocation7 + $0x68] sm:$0xff]  ;;  %v196_v14 = vld [vmem:[#allocation7 + $0x58] sm:$0xff] }
  0x83   :  { %3767 = vmatprep.subr.bf16.mxu0 %v3766_v3  ;;  %v3832_v12 = vpack.c.bf16 %v191_v10, %v187_v9  ;;  %v200_v15 = vld [vmem:[#allocation7 + $0x78] sm:$0xff]  ;;  %3831 = vmatprep.subr.bf16.mxu1 %v3830_v7  ;;  %v3770_v16 = vpack.c.bf16 %v198_v13, %v194_v11  ;;  %v193_v18 = vld [vmem:[#allocation7 + $0x40] sm:$0xff]  ;;  %v195_v20 = vld [vmem:[#allocation7 + $0x50] sm:$0xff] }
  0x84   :  { %3769 = vmatpush1.bf16.msra.mxu0 %v3768_v8  ;;  %v3834_v17 = vpack.c.bf16 %v200_v15, %v196_v14  ;;  %v197_v19 = vld [vmem:[#allocation7 + $0x60] sm:$0xff]  ;;  %v199_v22 = vld [vmem:[#allocation7 + $0x70] sm:$0xff]  ;;  %v202_v23 = vld [vmem:[#allocation7 + $0x88] sm:$0xff] }
  0x85   :  { %3833 = vmatpush1.bf16.msra.mxu1 %v3832_v12  ;;  %v3772_v21 = vpack.c.bf16 %v197_v19, %v193_v18  ;;  %v206_v24 = vld [vmem:[#allocation7 + $0xa8] sm:$0xff]  ;;  %3771 = vmatprep.subr.bf16.mxu0 %v3770_v16  ;;  %v3836_v25 = vpack.c.bf16 %v199_v22, %v195_v20  ;;  %v204_v27 = vld [vmem:[#allocation7 + $0x98] sm:$0xff]  ;;  %v201_v29 = vld [vmem:[#allocation7 + $0x80] sm:$0xff] }
  0x86   :  { %3835 = vmatprep.subr.bf16.mxu1 %v3834_v17  ;;  %v3774_v26 = vpack.c.bf16 %v206_v24, %v202_v23  ;;  %v208_v28 = vld [vmem:[#allocation7 + $0xb8] sm:$0xff]  ;;  %v205_v31 = vld [vmem:[#allocation7 + $0xa0] sm:$0xff]  ;;  %v203_v32 = vld [vmem:[#allocation7 + $0x90] sm:$0xff] }
  0x87   :  { %v3838_v30 = vpack.c.bf16 %v208_v28, %v204_v27  ;;  %v207_v33 = vld [vmem:[#allocation7 + $0xb0] sm:$0xff]  ;;  %v3776_v34 = vpack.c.bf16 %v205_v31, %v201_v29  ;;  %v210_v35 = vld [vmem:[#allocation7 + $0xc8] sm:$0xff]  ;;  %v212_v37 = vld [vmem:[#allocation7 + $0xd8] sm:$0xff] }
  0x88   :  { %3773 = vmatpush1.bf16.msra.mxu0 %v3772_v21  ;;  %v214_v36 = vld [vmem:[#allocation7 + $0xe8] sm:$0xff]  ;;  %v3840_v38 = vpack.c.bf16 %v207_v33, %v203_v32  ;;  %v216_v40 = vld [vmem:[#allocation7 + $0xf8] sm:$0xff]  ;;  %v209_v41 = vld [vmem:[#allocation7 + $0xc0] sm:$0xff] }
  0x89   :  { %3837 = vmatpush1.bf16.msra.mxu1 %v3836_v25  ;;  %3775 = vmatprep.subr.bf16.mxu0 %v3774_v26  ;;  %v3778_v39 = vpack.c.bf16 %v214_v36, %v210_v35  ;;  %v213_v42 = vld [vmem:[#allocation7 + $0xe0] sm:$0xff]  ;;  %v3842_v43 = vpack.c.bf16 %v216_v40, %v212_v37  ;;  %v211_v44 = vld [vmem:[#allocation7 + $0xd0] sm:$0xff]  ;;  %v218_v46 = vld [vmem:[#allocation7 + $0x108] sm:$0xff] }
  0x8a   :  { %3839 = vmatprep.subr.bf16.mxu1 %v3838_v30  ;;  %v215_v45 = vld [vmem:[#allocation7 + $0xf0] sm:$0xff]  ;;  %v222_v47 = vld [vmem:[#allocation7 + $0x128] sm:$0xff]  ;;  %v220_v48 = vld [vmem:[#allocation7 + $0x118] sm:$0xff]  ;;  %v3780_v50 = vpack.c.bf16 %v213_v42, %v209_v41 }
  0x8b   :  { %v224_v49 = vld [vmem:[#allocation7 + $0x138] sm:$0xff]  ;;  %v3844_v51 = vpack.c.bf16 %v215_v45, %v211_v44  ;;  %v3782_v52 = vpack.c.bf16 %v222_v47, %v218_v46  ;;  %v217_v53 = vld [vmem:[#allocation7 + $0x100] sm:$0xff]  ;;  %v219_v55 = vld [vmem:[#allocation7 + $0x110] sm:$0xff] }
  0x8c   :  { %3777 = vmatpush1.bf16.msra.mxu0 %v3776_v34  ;;  %v221_v54 = vld [vmem:[#allocation7 + $0x120] sm:$0xff]  ;;  %v3846_v56 = vpack.c.bf16 %v224_v49, %v220_v48  ;;  %v223_v57 = vld [vmem:[#allocation7 + $0x130] sm:$0xff]  ;;  %v226_v58 = vld [vmem:[#allocation7 + $0x148] sm:$0xff] }
  0x8d   :  { %3841 = vmatpush1.bf16.msra.mxu1 %v3840_v38  ;;  %3779 = vmatprep.subr.bf16.mxu0 %v3778_v39  ;;  %v230_v59 = vld [vmem:[#allocation7 + $0x168] sm:$0xff]  ;;  %v228_v60 = vld [vmem:[#allocation7 + $0x158] sm:$0xff]  ;;  %v3784_v62 = vpack.c.bf16 %v221_v54, %v217_v53  ;;  %v3848_v63 = vpack.c.bf16 %v223_v57, %v219_v55  ;;  %v225_v1 = vld [vmem:[#allocation7 + $0x140] sm:$0xff] }
  0x8e   :  { %3843 = vmatprep.subr.bf16.mxu1 %v3842_v43  ;;  %v232_v61 = vld [vmem:[#allocation7 + $0x178] sm:$0xff]  ;;  %v3786_v0 = vpack.c.bf16 %v230_v59, %v226_v58  ;;  %v229_v2 = vld [vmem:[#allocation7 + $0x160] sm:$0xff]  ;;  %v227_v3 = vld [vmem:[#allocation7 + $0x150] sm:$0xff] }
  0x8f   :  { %v3850_v4 = vpack.c.bf16 %v232_v61, %v228_v60  ;;  %v231_v5 = vld [vmem:[#allocation7 + $0x170] sm:$0xff]  ;;  %v234_v6 = vld [vmem:[#allocation7 + $0x188] sm:$0xff]  ;;  %v236_v8 = vld [vmem:[#allocation7 + $0x198] sm:$0xff]  ;;  %v3788_v10 = vpack.c.bf16 %v229_v2, %v225_v1 }
  0x90   :  { %3781 = vmatpush1.bf16.msra.mxu0 %v3780_v50  ;;  %v238_v7 = vld [vmem:[#allocation7 + $0x1a8] sm:$0xff]  ;;  %v240_v9 = vld [vmem:[#allocation7 + $0x1b8] sm:$0xff]  ;;  %v3852_v11 = vpack.c.bf16 %v231_v5, %v227_v3  ;;  %v233_v13 = vld [vmem:[#allocation7 + $0x180] sm:$0xff] }
  0x91   :  { %3845 = vmatpush1.bf16.msra.mxu1 %v3844_v51  ;;  %3783 = vmatprep.subr.bf16.mxu0 %v3782_v52  ;;  %v3790_v12 = vpack.c.bf16 %v238_v7, %v234_v6  ;;  %v237_v14 = vld [vmem:[#allocation7 + $0x1a0] sm:$0xff]  ;;  %v235_v15 = vld [vmem:[#allocation7 + $0x190] sm:$0xff]  ;;  %v3854_v16 = vpack.c.bf16 %v240_v9, %v236_v8  ;;  %v242_v18 = vld [vmem:[#allocation7 + $0x1c8] sm:$0xff] }
  0x92   :  { %3847 = vmatprep.subr.bf16.mxu1 %v3846_v56  ;;  %v239_v17 = vld [vmem:[#allocation7 + $0x1b0] sm:$0xff]  ;;  %v246_v19 = vld [vmem:[#allocation7 + $0x1e8] sm:$0xff]  ;;  %v244_v20 = vld [vmem:[#allocation7 + $0x1d8] sm:$0xff]  ;;  %v3792_v22 = vpack.c.bf16 %v237_v14, %v233_v13 }
  0x93   :  { %v248_v21 = vld [vmem:[#allocation7 + $0x1f8] sm:$0xff]  ;;  %v3856_v23 = vpack.c.bf16 %v239_v17, %v235_v15  ;;  %v3794_v24 = vpack.c.bf16 %v246_v19, %v242_v18  ;;  %v241_v25 = vld [vmem:[#allocation7 + $0x1c0] sm:$0xff]  ;;  %v243_v27 = vld [vmem:[#allocation7 + $0x1d0] sm:$0xff] }
  0x94   :  { %3785 = vmatpush1.bf16.msra.mxu0 %v3784_v62  ;;  %v245_v26 = vld [vmem:[#allocation7 + $0x1e0] sm:$0xff]  ;;  %v3858_v28 = vpack.c.bf16 %v248_v21, %v244_v20  ;;  %v247_v29 = vld [vmem:[#allocation7 + $0x1f0] sm:$0xff]  ;;  %v250_v30 = vld [vmem:[#allocation7 + $0x208] sm:$0xff] }
  0x95   :  { %3849 = vmatpush1.bf16.msra.mxu1 %v3848_v63  ;;  %3787 = vmatprep.subr.bf16.mxu0 %v3786_v0  ;;  %v254_v31 = vld [vmem:[#allocation7 + $0x228] sm:$0xff]  ;;  %v252_v32 = vld [vmem:[#allocation7 + $0x218] sm:$0xff]  ;;  %v3796_v34 = vpack.c.bf16 %v245_v26, %v241_v25  ;;  %v3860_v35 = vpack.c.bf16 %v247_v29, %v243_v27  ;;  %v249_v37 = vld [vmem:[#allocation7 + $0x200] sm:$0xff] }
  0x96   :  { %3851 = vmatprep.subr.bf16.mxu1 %v3850_v4  ;;  %v256_v33 = vld [vmem:[#allocation7 + $0x238] sm:$0xff]  ;;  %v3798_v36 = vpack.c.bf16 %v254_v31, %v250_v30  ;;  %v253_v38 = vld [vmem:[#allocation7 + $0x220] sm:$0xff]  ;;  %v251_v39 = vld [vmem:[#allocation7 + $0x210] sm:$0xff] }
  0x97   :  { %v3862_v40 = vpack.c.bf16 %v256_v33, %v252_v32  ;;  %v255_v41 = vld [vmem:[#allocation7 + $0x230] sm:$0xff]  ;;  %v258_v42 = vld [vmem:[#allocation7 + $0x248] sm:$0xff]  ;;  %v260_v44 = vld [vmem:[#allocation7 + $0x258] sm:$0xff]  ;;  %v3800_v46 = vpack.c.bf16 %v253_v38, %v249_v37 }
  0x98   :  { %3789 = vmatpush1.bf16.msra.mxu0 %v3788_v10  ;;  %v262_v43 = vld [vmem:[#allocation7 + $0x268] sm:$0xff]  ;;  %v264_v45 = vld [vmem:[#allocation7 + $0x278] sm:$0xff]  ;;  %v3864_v47 = vpack.c.bf16 %v255_v41, %v251_v39  ;;  %v257_v49 = vld [vmem:[#allocation7 + $0x240] sm:$0xff] }
  0x99   :  { %3853 = vmatpush1.bf16.msra.mxu1 %v3852_v11  ;;  %3791 = vmatprep.subr.bf16.mxu0 %v3790_v12  ;;  %v3802_v48 = vpack.c.bf16 %v262_v43, %v258_v42  ;;  %v261_v50 = vld [vmem:[#allocation7 + $0x260] sm:$0xff]  ;;  %v259_v51 = vld [vmem:[#allocation7 + $0x250] sm:$0xff]  ;;  %v3866_v52 = vpack.c.bf16 %v264_v45, %v260_v44  ;;  %v266_v54 = vld [vmem:[#allocation7 + $0x288] sm:$0xff] }
  0x9a   :  { %3855 = vmatprep.subr.bf16.mxu1 %v3854_v16  ;;  %v263_v53 = vld [vmem:[#allocation7 + $0x270] sm:$0xff]  ;;  %v270_v55 = vld [vmem:[#allocation7 + $0x2a8] sm:$0xff]  ;;  %v268_v56 = vld [vmem:[#allocation7 + $0x298] sm:$0xff]  ;;  %v3804_v58 = vpack.c.bf16 %v261_v50, %v257_v49 }
  0x9b   :  { %v272_v57 = vld [vmem:[#allocation7 + $0x2b8] sm:$0xff]  ;;  %v3868_v59 = vpack.c.bf16 %v263_v53, %v259_v51  ;;  %v3806_v60 = vpack.c.bf16 %v270_v55, %v266_v54  ;;  %v265_v61 = vld [vmem:[#allocation7 + $0x280] sm:$0xff]  ;;  %v267_v63 = vld [vmem:[#allocation7 + $0x290] sm:$0xff] }
  0x9c   :  { %3793 = vmatpush1.bf16.msra.mxu0 %v3792_v22  ;;  %v269_v62 = vld [vmem:[#allocation7 + $0x2a0] sm:$0xff]  ;;  %v3870_v0 = vpack.c.bf16 %v272_v57, %v268_v56  ;;  %v271_v1 = vld [vmem:[#allocation7 + $0x2b0] sm:$0xff]  ;;  %v274_v2 = vld [vmem:[#allocation7 + $0x2c8] sm:$0xff] }
  0x9d   :  { %3857 = vmatpush1.bf16.msra.mxu1 %v3856_v23  ;;  %3795 = vmatprep.subr.bf16.mxu0 %v3794_v24  ;;  %v278_v3 = vld [vmem:[#allocation7 + $0x2e8] sm:$0xff]  ;;  %v276_v4 = vld [vmem:[#allocation7 + $0x2d8] sm:$0xff]  ;;  %v3808_v6 = vpack.c.bf16 %v269_v62, %v265_v61  ;;  %v273_v7 = vld [vmem:[#allocation7 + $0x2c0] sm:$0xff]  ;;  %v3872_v8 = vpack.c.bf16 %v271_v1, %v267_v63 }
  0x9e   :  { %3859 = vmatprep.subr.bf16.mxu1 %v3858_v28  ;;  %v280_v5 = vld [vmem:[#allocation7 + $0x2f8] sm:$0xff]  ;;  %v3810_v9 = vpack.c.bf16 %v278_v3, %v274_v2  ;;  %v277_v10 = vld [vmem:[#allocation7 + $0x2e0] sm:$0xff]  ;;  %v275_v11 = vld [vmem:[#allocation7 + $0x2d0] sm:$0xff] }
  0x9f   :  { %v279_v12 = vld [vmem:[#allocation7 + $0x2f0] sm:$0xff]  ;;  %v3874_v13 = vpack.c.bf16 %v280_v5, %v276_v4  ;;  %v282_v14 = vld [vmem:[#allocation7 + $0x308] sm:$0xff]  ;;  %v284_v17 = vld [vmem:[#allocation7 + $0x318] sm:$0xff]  ;;  %v3812_v19 = vpack.c.bf16 %v277_v10, %v273_v7 }
  0xa0   :  { %3797 = vmatpush1.bf16.msra.mxu0 %v3796_v34  ;;  %v286_v15 = vld [vmem:[#allocation7 + $0x328] sm:$0xff]  ;;  %v288_v18 = vld [vmem:[#allocation7 + $0x338] sm:$0xff]  ;;  %v3876_v20 = vpack.c.bf16 %v279_v12, %v275_v11  ;;  %v281_v22 = vld [vmem:[#allocation7 + $0x300] sm:$0xff] }
  0xa1   :  { %3861 = vmatpush1.bf16.msra.mxu1 %v3860_v35  ;;  %3799 = vmatprep.subr.bf16.mxu0 %v3798_v36  ;;  %v138_v16 = vld [vmem:[#allocation2 + $0x8] sm:$0xff]  ;;  %v3814_v21 = vpack.c.bf16 %v286_v15, %v282_v14  ;;  %v285_v23 = vld [vmem:[#allocation7 + $0x320] sm:$0xff]  ;;  %v283_v24 = vld [vmem:[#allocation7 + $0x310] sm:$0xff]  ;;  %v3878_v25 = vpack.c.bf16 %v288_v18, %v284_v17 }
  0xa2   :  { %3863 = vmatprep.subr.bf16.mxu1 %v3862_v40  ;;  %399 = vmatprep.mubr.f32.mxu0 %v138_v16  ;;  %v287_v26 = vld [vmem:[#allocation7 + $0x330] sm:$0xff]  ;;  %v290_v27 = vld [vmem:[#allocation7 + $0x348] sm:$0xff]  ;;  %v292_v29 = vld [vmem:[#allocation7 + $0x358] sm:$0xff]  ;;  %v3816_v31 = vpack.c.bf16 %v285_v23, %v281_v22 }
  0xa3   :  { %560 = vmatprep.mubr.f32.mxu1 %v138_v16  ;;  %v294_v28 = vld [vmem:[#allocation7 + $0x368] sm:$0xff]  ;;  %v296_v30 = vld [vmem:[#allocation7 + $0x378] sm:$0xff]  ;;  %v3880_v32 = vpack.c.bf16 %v287_v26, %v283_v24  ;;  %v289_v34 = vld [vmem:[#allocation7 + $0x340] sm:$0xff] }
  0xa4   :  { %3801 = vmatpush1.bf16.msra.mxu0 %v3800_v46  ;;  %v3818_v33 = vpack.c.bf16 %v294_v28, %v290_v27  ;;  %v293_v35 = vld [vmem:[#allocation7 + $0x360] sm:$0xff]  ;;  %v291_v36 = vld [vmem:[#allocation7 + $0x350] sm:$0xff]  ;;  %v3882_v37 = vpack.c.bf16 %v296_v30, %v292_v29  ;;  %v298_v39 = vld [vmem:[#allocation7 + $0x388] sm:$0xff] }
  0xa5   :  { %3865 = vmatpush1.bf16.msra.mxu1 %v3864_v47  ;;  %3803 = vmatprep.subr.bf16.mxu0 %v3802_v48  ;;  %v295_v38 = vld [vmem:[#allocation7 + $0x370] sm:$0xff]  ;;  %v302_v40 = vld [vmem:[#allocation7 + $0x3a8] sm:$0xff]  ;;  %v300_v41 = vld [vmem:[#allocation7 + $0x398] sm:$0xff]  ;;  %v3820_v43 = vpack.c.bf16 %v293_v35, %v289_v34 }
  0xa6   :  { %3867 = vmatprep.subr.bf16.mxu1 %v3866_v52  ;;  %v304_v42 = vld [vmem:[#allocation7 + $0x3b8] sm:$0xff]  ;;  %v3884_v44 = vpack.c.bf16 %v295_v38, %v291_v36  ;;  %v3822_v45 = vpack.c.bf16 %v302_v40, %v298_v39  ;;  %v297_v46 = vld [vmem:[#allocation7 + $0x380] sm:$0xff]  ;;  %v299_v48 = vld [vmem:[#allocation7 + $0x390] sm:$0xff] }
  0xa7   :  { %v301_v47 = vld [vmem:[#allocation7 + $0x3a0] sm:$0xff]  ;;  %v3886_v49 = vpack.c.bf16 %v304_v42, %v300_v41  ;;  %v303_v50 = vld [vmem:[#allocation7 + $0x3b0] sm:$0xff]  ;;  %v306_v51 = vld [vmem:[#allocation7 + $0x3c8] sm:$0xff] }
  0xa8   :  { %3805 = vmatpush1.bf16.msra.mxu0 %v3804_v58  ;;  %v310_v52 = vld [vmem:[#allocation7 + $0x3e8] sm:$0xff]  ;;  %v308_v53 = vld [vmem:[#allocation7 + $0x3d8] sm:$0xff]  ;;  %v3824_v55 = vpack.c.bf16 %v301_v47, %v297_v46  ;;  %v3888_v56 = vpack.c.bf16 %v303_v50, %v299_v48  ;;  %v305_v58 = vld [vmem:[#allocation7 + $0x3c0] sm:$0xff] }
  0xa9   :  { %3869 = vmatpush1.bf16.msra.mxu1 %v3868_v59  ;;  %3807 = vmatprep.subr.bf16.mxu0 %v3806_v60  ;;  %v312_v54 = vld [vmem:[#allocation7 + $0x3f8] sm:$0xff]  ;;  %v3826_v57 = vpack.c.bf16 %v310_v52, %v306_v51  ;;  %v309_v59 = vld [vmem:[#allocation7 + $0x3e0] sm:$0xff]  ;;  %v307_v60 = vld [vmem:[#allocation7 + $0x3d0] sm:$0xff] }
  0xaa   :  { %3871 = vmatprep.subr.bf16.mxu1 %v3870_v0  ;;  %v3890_v61 = vpack.c.bf16 %v312_v54, %v308_v53  ;;  %v311_v62 = vld [vmem:[#allocation7 + $0x3f0] sm:$0xff]  ;;  %v722_v63 = vld [vmem:[#allocation8 + $0x8] sm:$0xff]  ;;  %v724_v1 = vld [vmem:[#allocation8 + $0x18] sm:$0xff]  ;;  %v3828_v3 = vpack.c.bf16 %v309_v59, %v305_v58 }
  0xab   :  { %v726_v0 = vld [vmem:[#allocation8 + $0x28] sm:$0xff]  ;;  %v728_v2 = vld [vmem:[#allocation8 + $0x38] sm:$0xff]  ;;  %v3892_v4 = vpack.c.bf16 %v311_v62, %v307_v60  ;;  %v725_v7 = vld [vmem:[#allocation8 + $0x20] sm:$0xff] }
  0xac   :  { %3809 = vmatpush1.bf16.msra.mxu0 %v3808_v6  ;;  %v3894_v5 = vpack.c.bf16 %v726_v0, %v722_v63  ;;  %v721_v6 = vld [vmem:[#allocation8] sm:$0xff]  ;;  %v727_v10 = vld [vmem:[#allocation8 + $0x30] sm:$0xff]  ;;  %v730_v11 = vld [vmem:[#allocation8 + $0x48] sm:$0xff] }
  0xad   :  { %3873 = vmatpush1.bf16.msra.mxu1 %v3872_v8  ;;  %3811 = vmatprep.subr.bf16.mxu0 %v3810_v9  ;;  %v3926_v8 = vpack.c.bf16 %v728_v2, %v724_v1  ;;  %v723_v9 = vld [vmem:[#allocation8 + $0x10] sm:$0xff]  ;;  %v734_v12 = vld [vmem:[#allocation8 + $0x68] sm:$0xff]  ;;  %v3896_v14 = vpack.c.bf16 %v725_v7, %v721_v6  ;;  %v732_v15 = vld [vmem:[#allocation8 + $0x58] sm:$0xff] }
  0xae   :  { %3875 = vmatprep.subr.bf16.mxu1 %v3874_v13  ;;  %v137_v13 = vld [vmem:[#allocation2] sm:$0xff]  ;;  %v736_v16 = vld [vmem:[#allocation8 + $0x78] sm:$0xff]  ;;  %v3928_v18 = vpack.c.bf16 %v727_v10, %v723_v9  ;;  %v731_v22 = vld [vmem:[#allocation8 + $0x50] sm:$0xff] }
  0xaf   :  { %v140_v17 = vld [vmem:[#allocation2 + $0x18] sm:$0xff]  ;;  %v3930_v23 = vpack.c.bf16 %v736_v16, %v732_v15  ;;  %v735_v24 = vld [vmem:[#allocation8 + $0x70] sm:$0xff]  ;;  %v742_v26 = vld [vmem:[#allocation8 + $0xa8] sm:$0xff] }
  0xb0   :  { %3813 = vmatpush1.bf16.msra.mxu0 %v3812_v19  ;;  %v3898_v19 = vpack.c.bf16 %v734_v12, %v730_v11  ;;  %v139_v27 = vld [vmem:[#allocation2 + $0x10] sm:$0xff]  ;;  %v740_v28 = vld [vmem:[#allocation8 + $0x98] sm:$0xff]  ;;  %v142_v30 = vld [vmem:[#allocation2 + $0x28] sm:$0xff] }
  0xb1   :  { %3877 = vmatpush1.bf16.msra.mxu1 %v3876_v20  ;;  %3815 = vmatprep.subr.bf16.mxu0 %v3814_v21  ;;  %v729_v20 = vld [vmem:[#allocation8 + $0x40] sm:$0xff]  ;;  %v744_v29 = vld [vmem:[#allocation8 + $0xb8] sm:$0xff]  ;;  %v739_v36 = vld [vmem:[#allocation8 + $0x90] sm:$0xff] }
  0xb2   :  { %3879 = vmatprep.subr.bf16.mxu1 %v3878_v25  ;;  %v733_v21 = vld [vmem:[#allocation8 + $0x60] sm:$0xff]  ;;  %v738_v25 = vld [vmem:[#allocation8 + $0x88] sm:$0xff]  ;;  %v743_v38 = vld [vmem:[#allocation8 + $0xb0] sm:$0xff] }
  0xb3   :  { %v737_v34 = vld [vmem:[#allocation8 + $0x80] sm:$0xff]  ;;  %v746_v39 = vld [vmem:[#allocation8 + $0xc8] sm:$0xff]  ;;  %v748_v42 = vld [vmem:[#allocation8 + $0xd8] sm:$0xff]  ;;  %v3936_v46 = vpack.c.bf16 %v743_v38, %v739_v36 }
  0xb4   :  { %3817 = vmatpush1.bf16.msra.mxu0 %v3816_v31  ;;  %v3900_v31 = vpack.c.bf16 %v733_v21, %v729_v20  ;;  %v741_v35 = vld [vmem:[#allocation8 + $0xa0] sm:$0xff]  ;;  %v750_v40 = vld [vmem:[#allocation8 + $0xe8] sm:$0xff]  ;;  %v747_v50 = vld [vmem:[#allocation8 + $0xd0] sm:$0xff] }
  0xb5   :  { %3881 = vmatpush1.bf16.msra.mxu1 %v3880_v32  ;;  %3819 = vmatprep.subr.bf16.mxu0 %v3818_v33  ;;  %v3932_v32 = vpack.c.bf16 %v735_v24, %v731_v22  ;;  %v3902_v33 = vpack.c.bf16 %v742_v26, %v738_v25  ;;  %v141_v41 = vld [vmem:[#allocation2 + $0x20] sm:$0xff]  ;;  %v3906_v47 = vpack.c.bf16 %v750_v40, %v746_v39  ;;  %v751_v52 = vld [vmem:[#allocation8 + $0xf0] sm:$0xff]  ;;  %v754_v53 = vld [vmem:[#allocation8 + $0x108] sm:$0xff] }
  0xb6   :  { %3883 = vmatprep.subr.bf16.mxu1 %v3882_v37  ;;  %v3934_v37 = vpack.c.bf16 %v744_v29, %v740_v28  ;;  %v745_v48 = vld [vmem:[#allocation8 + $0xc0] sm:$0xff]  ;;  %v758_v54 = vld [vmem:[#allocation8 + $0x128] sm:$0xff]  ;;  %v3940_v60 = vpack.c.bf16 %v751_v52, %v747_v50  ;;  %v755_v0 = vld [vmem:[#allocation8 + $0x110] sm:$0xff] }
  0xb7   :  { %v146_v58 = vld [vmem:[#allocation2 + $0x48] sm:$0xff]  ;;  %v753_v62 = vld [vmem:[#allocation8 + $0x100] sm:$0xff]  ;;  %v759_v2 = vld [vmem:[#allocation8 + $0x130] sm:$0xff] }
  0xb8   :  { %3821 = vmatpush1.bf16.msra.mxu0 %v3820_v43  ;;  %v752_v43 = vld [vmem:[#allocation8 + $0xf8] sm:$0xff]  ;;  %v757_v63 = vld [vmem:[#allocation8 + $0x120] sm:$0xff]  ;;  %v3944_v10 = vpack.c.bf16 %v759_v2, %v755_v0  ;;  %v767_v16 = vld [vmem:[#allocation8 + $0x170] sm:$0xff] }
  0xb9   :  { %3885 = vmatpush1.bf16.msra.mxu1 %v3884_v44  ;;  %3823 = vmatprep.subr.bf16.mxu0 %v3822_v45  ;;  %v144_v44 = vld [vmem:[#allocation2 + $0x38] sm:$0xff]  ;;  %v3904_v45 = vpack.c.bf16 %v741_v35, %v737_v34  ;;  %v3938_v51 = vpack.c.bf16 %v752_v43, %v748_v42  ;;  %v3912_v9 = vpack.c.bf16 %v757_v63, %v753_v62  ;;  %v761_v12 = vld [vmem:[#allocation8 + $0x140] sm:$0xff]  ;;  %v150_v22 = vld [vmem:[#allocation2 + $0x68] sm:$0xff] }
  0xba   :  { %3887 = vmatprep.subr.bf16.mxu1 %v3886_v49  ;;  %v749_v49 = vld [vmem:[#allocation8 + $0xe0] sm:$0xff]  ;;  %v764_v6 = vld [vmem:[#allocation8 + $0x158] sm:$0xff]  ;;  %v771_v28 = vld [vmem:[#allocation8 + $0x190] sm:$0xff] }
  0xbb   :  { %v3908_v59 = vpack.c.bf16 %v749_v49, %v745_v48  ;;  %v768_v7 = vld [vmem:[#allocation8 + $0x178] sm:$0xff]  ;;  %v769_v26 = vld [vmem:[#allocation8 + $0x180] sm:$0xff]  ;;  %v779_v42 = vld [vmem:[#allocation8 + $0x1d0] sm:$0xff] }
  0xbc   :  { %3825 = vmatpush1.bf16.msra.mxu0 %v3824_v55  ;;  %v143_v55 = vld [vmem:[#allocation2 + $0x30] sm:$0xff]  ;;  %v3946_v15 = vpack.c.bf16 %v768_v7, %v764_v6  ;;  %v772_v20 = vld [vmem:[#allocation8 + $0x198] sm:$0xff]  ;;  %v777_v40 = vld [vmem:[#allocation8 + $0x1c0] sm:$0xff] }
  0xbd   :  { %3889 = vmatpush1.bf16.msra.mxu1 %v3888_v56  ;;  %3827 = vmatprep.subr.bf16.mxu0 %v3826_v57  ;;  %v756_v56 = vld [vmem:[#allocation8 + $0x118] sm:$0xff]  ;;  %v1241_v48 = vld [vmem:[#allocation10 + $0x180] sm:$0xff]  ;;  %v1242_v49 = vld [vmem:[#allocation10 + $0x188] sm:$0xff] }
  0xbe   :  { %3891 = vmatprep.subr.bf16.mxu1 %v3890_v61  ;;  %v760_v57 = vld [vmem:[#allocation8 + $0x138] sm:$0xff]  ;;  %v3910_v61 = vpack.c.bf16 %v758_v54, %v754_v53  ;;  %v154_v50 = vld [vmem:[#allocation2 + $0x88] sm:$0xff]  ;;  %v3990_v54 = vpack.c.bf16 %v1242_v49, %v1241_v48  ;;  %v161_v63 = vld [vmem:[#allocation2 + $0xc0] sm:$0xff] }
  0xbf   :  { %v3942_v1 = vpack.c.bf16 %v760_v57, %v756_v56  ;;  %v776_v21 = vld [vmem:[#allocation8 + $0x1b8] sm:$0xff]  ;;  %v155_v57 = vld [vmem:[#allocation2 + $0x90] sm:$0xff]  ;;  %v162_v62 = vld [vmem:[#allocation2 + $0xc8] sm:$0xff] }
  0xc0   :  { %3829 = vmatpush1.bf16.msra.mxu0 %v3828_v3  ;;  %v762_v3 = vld [vmem:[#allocation8 + $0x148] sm:$0xff]  ;;  %v3950_v29 = vpack.c.bf16 %v776_v21, %v772_v20  ;;  %v780_v34 = vld [vmem:[#allocation8 + $0x1d8] sm:$0xff]  ;;  %v1193_v6 = vld [vmem:[#allocation10] sm:$0xff] }
  0xc1   :  { %3893 = vmatpush1.bf16.msra.mxu1 %v3892_v4  ;;  %3895 = vmatprep.subr.bf16.mxu0 %v3894_v5  ;;  %v766_v4 = vld [vmem:[#allocation8 + $0x168] sm:$0xff]  ;;  %v145_v5 = vld [vmem:[#allocation2 + $0x40] sm:$0xff]  ;;  %v784_v35 = vld [vmem:[#allocation8 + $0x1f8] sm:$0xff] }
  0xc2   :  { %3927 = vmatprep.subr.bf16.mxu1 %v3926_v8  ;;  %v148_v8 = vld [vmem:[#allocation2 + $0x58] sm:$0xff]  ;;  %v3914_v11 = vpack.c.bf16 %v766_v4, %v762_v3  ;;  %v3954_v43 = vpack.c.bf16 %v784_v35, %v780_v34  ;;  %v166_v2 = vld [vmem:[#allocation2 + $0xe8] sm:$0xff]  ;;  %v165_v3 = vld [vmem:[#allocation2 + $0xe0] sm:$0xff] }
  0xc3   :  { %400 = vmatmul.mubr.f32.vlgmr.msra.gmra.mrb[0].mxu0 %v137_v13  ;;  %v152_v36 = vld [vmem:[#allocation2 + $0x78] sm:$0xff]  ;;  %v1194_v7 = vld [vmem:[#allocation10 + $0x8] sm:$0xff]  ;;  %v1227_v21 = vld [vmem:[#allocation10 + $0x110] sm:$0xff] }
  0xc4   :  { %561 = vmatmul.mubr.f32.vlgmr.msra.gmra.mrb[0].mxu1 %v137_v13  ;;  %3897 = vmatpush1.bf16.msra.mxu0 %v3896_v14  ;;  %v765_v13 = vld [vmem:[#allocation8 + $0x160] sm:$0xff]  ;;  %v763_v14 = vld [vmem:[#allocation8 + $0x150] sm:$0xff]  ;;  %v156_v56 = vld [vmem:[#allocation2 + $0x98] sm:$0xff] }
  0xc5   :  { %405 = vmatprep.mubr.f32.mxu0 %v140_v17  ;;  %566 = vmatprep.mubr.f32.mxu1 %v140_v17  ;;  %v770_v17 = vld [vmem:[#allocation8 + $0x188] sm:$0xff]  ;;  %v3948_v24 = vpack.c.bf16 %v767_v16, %v763_v14  ;;  %v164_v0 = vld [vmem:[#allocation2 + $0xd8] sm:$0xff]  ;;  %v1243_v14 = vld [vmem:[#allocation10 + $0x190] sm:$0xff]  ;;  %v3960_v16 = vpack.c.bf16 %v1194_v7, %v1193_v6 }
  0xc6   :  { %3929 = vmatpush1.bf16.msra.mxu1 %v3928_v18  ;;  %3899 = vmatprep.subr.bf16.mxu0 %v3898_v19  ;;  %v774_v18 = vld [vmem:[#allocation8 + $0x1a8] sm:$0xff]  ;;  %v147_v19 = vld [vmem:[#allocation2 + $0x50] sm:$0xff]  ;;  %v168_v4 = vld [vmem:[#allocation2 + $0xf8] sm:$0xff] }
  0xc7   :  { %406 = vmatmul.mubr.f32.gmra.mrb[2].mxu0 %v139_v27  ;;  %3931 = vmatprep.subr.bf16.mxu1 %v3930_v23  ;;  %v3916_v23 = vpack.c.bf16 %v765_v13, %v761_v12  ;;  %v3918_v25 = vpack.c.bf16 %v774_v18, %v770_v17  ;;  %v4624_v12 = vmov 0.0   ;;  %v169_v13 = vld [vmem:[#allocation5] sm:$0xff]  ;;  %v1196_v20 = vld [vmem:[#allocation10 + $0x18] sm:$0xff]  ;;  %v1203_v7 = vld [vmem:[#allocation10 + $0x50] sm:$0xff] }
  0xc8   :  { %567 = vmatmul.mubr.f32.gmra.mrb[2].mxu1 %v139_v27  ;;  %411 = vmatprep.mubr.f32.mxu0 %v142_v30  ;;  %v773_v27 = vld [vmem:[#allocation8 + $0x1a0] sm:$0xff]  ;;  %v1232_v49 = vld [vmem:[#allocation10 + $0x138] sm:$0xff] }
  0xc9   :  { %572 = vmatprep.mubr.f32.mxu1 %v142_v30  ;;  %3901 = vmatpush1.bf16.msra.mxu0 %v3900_v31  ;;  %v775_v30 = vld [vmem:[#allocation8 + $0x1b0] sm:$0xff]  ;;  %v778_v31 = vld [vmem:[#allocation8 + $0x1c8] sm:$0xff]  ;;  %v1229_v34 = vld [vmem:[#allocation10 + $0x120] sm:$0xff] }
  0xca   :  { %3933 = vmatpush1.bf16.msra.mxu1 %v3932_v32  ;;  %3903 = vmatprep.subr.bf16.mxu0 %v3902_v33  ;;  %v782_v32 = vld [vmem:[#allocation8 + $0x1e8] sm:$0xff]  ;;  %v149_v33 = vld [vmem:[#allocation2 + $0x60] sm:$0xff]  ;;  %v3952_v38 = vpack.c.bf16 %v775_v30, %v771_v28 }
  0xcb   :  { %412 = vmatmul.mubr.f32.gmra.mrb[4].mxu0 %v141_v41  ;;  %3935 = vmatprep.subr.bf16.mxu1 %v3934_v37  ;;  %v3920_v37 = vpack.c.bf16 %v773_v27, %v769_v26  ;;  %v3922_v39 = vpack.c.bf16 %v782_v32, %v778_v31  ;;  %v170_v26 = vld [vmem:[#allocation5 + $0x8] sm:$0xff]  ;;  %v1245_v27 = vld [vmem:[#allocation10 + $0x1a0] sm:$0xff] }
  0xcc   :  { %573 = vmatmul.mubr.f32.gmra.mrb[4].mxu1 %v141_v41  ;;  %417 = vmatprep.mubr.f32.mxu0 %v144_v44  ;;  %v781_v41 = vld [vmem:[#allocation8 + $0x1e0] sm:$0xff]  ;;  %v1246_v28 = vld [vmem:[#allocation10 + $0x1a8] sm:$0xff] }
  0xcd   :  { %578 = vmatprep.mubr.f32.mxu1 %v144_v44  ;;  %3905 = vmatpush1.bf16.msra.mxu0 %v3904_v45  ;;  %v783_v44 = vld [vmem:[#allocation8 + $0x1f0] sm:$0xff]  ;;  %v1209_v45 = vld [vmem:[#allocation10 + $0x80] sm:$0xff]  ;;  %v3998_v35 = vpack.c.bf16 %v1246_v28, %v1245_v27  ;;  %v1224_v27 = vld [vmem:[#allocation10 + $0xf8] sm:$0xff] }
  0xce   :  { %3937 = vmatpush1.bf16.msra.mxu1 %v3936_v46  ;;  %3907 = vmatprep.subr.bf16.mxu0 %v3906_v47  ;;  %v1210_v46 = vld [vmem:[#allocation10 + $0x88] sm:$0xff]  ;;  %v151_v47 = vld [vmem:[#allocation2 + $0x70] sm:$0xff]  ;;  %v3956_v52 = vpack.c.bf16 %v783_v44, %v779_v42  ;;  %v1197_v32 = vld [vmem:[#allocation10 + $0x20] sm:$0xff] }
  0xcf   :  { %418 = vmatmul.mubr.f32.gmra.mrb[6].mxu0 %v143_v55  ;;  %3939 = vmatprep.subr.bf16.mxu1 %v3938_v51  ;;  %v3924_v51 = vpack.c.bf16 %v781_v41, %v777_v40  ;;  %v3958_v53 = vpack.c.bf16 %v1210_v46, %v1209_v45  ;;  %v1247_v40 = vld [vmem:[#allocation10 + $0x1b0] sm:$0xff]  ;;  %v1248_v41 = vld [vmem:[#allocation10 + $0x1b8] sm:$0xff] }
  0xd0   :  { %579 = vmatmul.mubr.f32.gmra.mrb[6].mxu1 %v143_v55  ;;  %423 = vmatprep.mubr.f32.mxu0 %v146_v58  ;;  %v153_v55 = vld [vmem:[#allocation2 + $0x80] sm:$0xff]  ;;  %v1199_v45 = vld [vmem:[#allocation10 + $0x30] sm:$0xff]  ;;  %v1200_v46 = vld [vmem:[#allocation10 + $0x38] sm:$0xff]  ;;  %v4002_v48 = vpack.c.bf16 %v1248_v41, %v1247_v40 }
  0xd1   :  { %584 = vmatprep.mubr.f32.mxu1 %v146_v58  ;;  %3909 = vmatpush1.bf16.msra.mxu0 %v3908_v59  ;;  %v158_v58 = vld [vmem:[#allocation2 + $0xa8] sm:$0xff]  ;;  %v157_v59 = vld [vmem:[#allocation2 + $0xa0] sm:$0xff]  ;;  %v175_v28 = vld [vmem:[#allocation5 + $0x30] sm:$0xff] }
  0xd2   :  { %3941 = vmatpush1.bf16.msra.mxu1 %v3940_v60  ;;  %3911 = vmatprep.subr.bf16.mxu0 %v3910_v61  ;;  %v160_v60 = vld [vmem:[#allocation2 + $0xb8] sm:$0xff]  ;;  %v159_v61 = vld [vmem:[#allocation2 + $0xb0] sm:$0xff] }
  0xd3   :  { %424 = vmatmul.mubr.f32.gmra.mrb[8].mxu0 %v145_v5  ;;  %3943 = vmatprep.subr.bf16.mxu1 %v3942_v1  ;;  %v163_v1 = vld [vmem:[#allocation2 + $0xd0] sm:$0xff] }
  0xd4   :  { %585 = vmatmul.mubr.f32.gmra.mrb[8].mxu1 %v145_v5  ;;  %429 = vmatprep.mubr.f32.mxu0 %v148_v8  ;;  %v167_v5 = vld [vmem:[#allocation2 + $0xf0] sm:$0xff] }
  0xd5   :  { %590 = vmatprep.mubr.f32.mxu1 %v148_v8  ;;  %3913 = vmatpush1.bf16.msra.mxu0 %v3912_v9  ;;  %v1225_v8 = vld [vmem:[#allocation10 + $0x100] sm:$0xff]  ;;  %v1226_v9 = vld [vmem:[#allocation10 + $0x108] sm:$0xff] }
  0xd6   :  { %3945 = vmatpush1.bf16.msra.mxu1 %v3944_v10  ;;  %3915 = vmatprep.subr.bf16.mxu0 %v3914_v11  ;;  %v1211_v10 = vld [vmem:[#allocation10 + $0x90] sm:$0xff]  ;;  %v1212_v11 = vld [vmem:[#allocation10 + $0x98] sm:$0xff]  ;;  %v3992_v17 = vpack.c.bf16 %v1226_v9, %v1225_v8 }
  0xd7   :  { %430 = vmatmul.mubr.f32.gmra.mrb[10].mxu0 %v147_v19  ;;  %3947 = vmatprep.subr.bf16.mxu1 %v3946_v15  ;;  %v1244_v15 = vld [vmem:[#allocation10 + $0x198] sm:$0xff]  ;;  %v3962_v18 = vpack.c.bf16 %v1212_v11, %v1211_v10  ;;  %v1235_v9 = vld [vmem:[#allocation10 + $0x150] sm:$0xff] }
  0xd8   :  { %591 = vmatmul.mubr.f32.gmra.mrb[10].mxu1 %v147_v19  ;;  %435 = vmatprep.mubr.f32.mxu0 %v150_v22  ;;  %v1195_v19 = vld [vmem:[#allocation10 + $0x10] sm:$0xff]  ;;  %v1204_v8 = vld [vmem:[#allocation10 + $0x58] sm:$0xff] }
  0xd9   :  { %596 = vmatprep.mubr.f32.mxu1 %v150_v22  ;;  %3917 = vmatpush1.bf16.msra.mxu0 %v3916_v23  ;;  %v3994_v22 = vpack.c.bf16 %v1244_v15, %v1243_v14  ;;  %v1228_v23 = vld [vmem:[#allocation10 + $0x118] sm:$0xff]  ;;  %v1222_v14 = vld [vmem:[#allocation10 + $0xe8] sm:$0xff] }
  0xda   :  { %3949 = vmatpush1.bf16.msra.mxu1 %v3948_v24  ;;  %3919 = vmatprep.subr.bf16.mxu0 %v3918_v25  ;;  %v1213_v24 = vld [vmem:[#allocation10 + $0xa0] sm:$0xff]  ;;  %v1214_v25 = vld [vmem:[#allocation10 + $0xa8] sm:$0xff]  ;;  %v3996_v30 = vpack.c.bf16 %v1228_v23, %v1227_v21  ;;  %v1236_v11 = vld [vmem:[#allocation10 + $0x158] sm:$0xff] }
  0xdb   :  { %436 = vmatmul.mubr.f32.gmra.mrb[12].mxu0 %v149_v33  ;;  %3951 = vmatprep.subr.bf16.mxu1 %v3950_v29  ;;  %v3964_v29 = vpack.c.bf16 %v1196_v20, %v1195_v19  ;;  %v3966_v31 = vpack.c.bf16 %v1214_v25, %v1213_v24  ;;  %v174_v15 = vld [vmem:[#allocation5 + $0x28] sm:$0xff]  ;;  %v4012_v19 = vpack.c.bf16 %v1236_v11, %v1235_v9  ;;  %v1205_v21 = vld [vmem:[#allocation10 + $0x60] sm:$0xff] }
  0xdc   :  { %597 = vmatmul.mubr.f32.gmra.mrb[12].mxu1 %v149_v33  ;;  %441 = vmatprep.mubr.f32.mxu0 %v152_v36  ;;  %v1198_v33 = vld [vmem:[#allocation10 + $0x28] sm:$0xff]  ;;  %v1237_v23 = vld [vmem:[#allocation10 + $0x160] sm:$0xff] }
  0xdd   :  { %602 = vmatprep.mubr.f32.mxu1 %v152_v36  ;;  %3921 = vmatpush1.bf16.msra.mxu0 %v3920_v37  ;;  %v1230_v36 = vld [vmem:[#allocation10 + $0x128] sm:$0xff]  ;;  %v1215_v37 = vld [vmem:[#allocation10 + $0xb0] sm:$0xff]  ;;  %v3968_v42 = vpack.c.bf16 %v1198_v33, %v1197_v32  ;;  %v1289_v9 = vld [vmem:[#allocation10 + $0x300] sm:$0xff] }
  0xde   :  { %3953 = vmatpush1.bf16.msra.mxu1 %v3952_v38  ;;  %3923 = vmatprep.subr.bf16.mxu0 %v3922_v39  ;;  %v1216_v38 = vld [vmem:[#allocation10 + $0xb8] sm:$0xff]  ;;  %v171_v39 = vld [vmem:[#allocation5 + $0x10] sm:$0xff]  ;;  %v1238_v25 = vld [vmem:[#allocation10 + $0x168] sm:$0xff] }
  0xdf   :  { %442 = vmatmul.mubr.f32.gmra.mrb[14].mxu0 %v151_v47  ;;  %3955 = vmatprep.subr.bf16.mxu1 %v3954_v43  ;;  %v4000_v43 = vpack.c.bf16 %v1230_v36, %v1229_v34  ;;  %v3970_v44 = vpack.c.bf16 %v1216_v38, %v1215_v37  ;;  %v4016_v32 = vpack.c.bf16 %v1238_v25, %v1237_v23  ;;  %v1207_v34 = vld [vmem:[#allocation10 + $0x70] sm:$0xff]  ;;  %v1240_v38 = vld [vmem:[#allocation10 + $0x178] sm:$0xff] }
  0xe0   :  { %603 = vmatmul.mubr.f32.gmra.mrb[14].mxu1 %v151_v47  ;;  %447 = vmatprep.mubr.f32.mxu0 %v154_v50  ;;  %v1231_v47 = vld [vmem:[#allocation10 + $0x130] sm:$0xff] }
  0xe1   :  { %608 = vmatprep.mubr.f32.mxu1 %v154_v50  ;;  %3925 = vmatpush1.bf16.msra.mxu0 %v3924_v51  ;;  %v1217_v50 = vld [vmem:[#allocation10 + $0xc0] sm:$0xff]  ;;  %v1218_v51 = vld [vmem:[#allocation10 + $0xc8] sm:$0xff]  ;;  %v1239_v37 = vld [vmem:[#allocation10 + $0x170] sm:$0xff] }
  0xe2   :  { %3957 = vmatpush1.bf16.msra.mxu1 %v3956_v52  ;;  %3959 = vmatprep.subr.bf16.mxu0 %v3958_v53  ;;  %v172_v52 = vld [vmem:[#allocation5 + $0x18] sm:$0xff]  ;;  %v1249_v53 = vld [vmem:[#allocation10 + $0x1c0] sm:$0xff]  ;;  %v4020_v41 = vpack.c.bf16 %v1240_v38, %v1239_v37  ;;  %v1259_v25 = vld [vmem:[#allocation10 + $0x210] sm:$0xff] }
  0xe3   :  { %448 = vmatmul.mubr.f32.gmra.mrb[16].mxu0 %v153_v55  ;;  %3991 = vmatprep.subr.bf16.mxu1 %v3990_v54  ;;  %v1250_v54 = vld [vmem:[#allocation10 + $0x1c8] sm:$0xff] }
  0xe4   :  { %609 = vmatmul.mubr.f32.gmra.mrb[16].mxu1 %v153_v55  ;;  %453 = vmatprep.mubr.f32.mxu0 %v156_v56  ;;  %v3972_v55 = vpack.c.bf16 %v1200_v46, %v1199_v45  ;;  %v1305_v46 = vld [vmem:[#allocation10 + $0x380] sm:$0xff] }
  0xe5   :  { %614 = vmatprep.mubr.f32.mxu1 %v156_v56  ;;  %v4004_v56 = vpack.c.bf16 %v1232_v49, %v1231_v47  ;;  %v1306_v47 = vld [vmem:[#allocation10 + $0x388] sm:$0xff] }
  0xe6   :  { %v4054_v49 = vpack.c.bf16 %v1306_v47, %v1305_v46 }
  0xe7   :  { %454 = vmatmul.mubr.f32.gmra.mrb[18].mxu0 %v155_v57 }
  0xe8   :  { %615 = vmatmul.mubr.f32.gmra.mrb[18].mxu1 %v155_v57  ;;  %459 = vmatprep.mubr.f32.mxu0 %v158_v58  ;;  %v3974_v57 = vpack.c.bf16 %v1218_v51, %v1217_v50  ;;  %v179_v50 = vld [vmem:[#allocation5 + $0x50] sm:$0xff]  ;;  %v180_v51 = vld [vmem:[#allocation5 + $0x58] sm:$0xff] }
  0xe9   :  { %620 = vmatprep.mubr.f32.mxu1 %v158_v58  ;;  %v1201_v58 = vld [vmem:[#allocation10 + $0x40] sm:$0xff] }
  0xeb   :  { %460 = vmatmul.mubr.f32.gmra.mrb[20].mxu0 %v157_v59 }
  0xec   :  { %621 = vmatmul.mubr.f32.gmra.mrb[20].mxu1 %v157_v59  ;;  %465 = vmatprep.mubr.f32.mxu0 %v160_v60  ;;  %v1202_v59 = vld [vmem:[#allocation10 + $0x48] sm:$0xff] }
  0xed   :  { %626 = vmatprep.mubr.f32.mxu1 %v160_v60  ;;  %v1233_v60 = vld [vmem:[#allocation10 + $0x140] sm:$0xff] }
  0xef   :  { %466 = vmatmul.mubr.f32.gmra.mrb[22].mxu0 %v159_v61 }
  0xf0   :  { %627 = vmatmul.mubr.f32.gmra.mrb[22].mxu1 %v159_v61  ;;  %471 = vmatprep.mubr.f32.mxu0 %v162_v62  ;;  %v4006_v61 = vpack.c.bf16 %v1250_v54, %v1249_v53  ;;  %v182_v53 = vld [vmem:[#allocation5 + $0x68] sm:$0xff]  ;;  %v183_v54 = vld [vmem:[#allocation5 + $0x70] sm:$0xff] }
  0xf1   :  { %632 = vmatprep.mubr.f32.mxu1 %v162_v62  ;;  %v1234_v62 = vld [vmem:[#allocation10 + $0x148] sm:$0xff] }
  0xf3   :  { %472 = vmatmul.mubr.f32.gmra.mrb[24].mxu0 %v161_v63 }
  0xf4   :  { %633 = vmatmul.mubr.f32.gmra.mrb[24].mxu1 %v161_v63  ;;  %477 = vmatprep.mubr.f32.mxu0 %v164_v0  ;;  %v1219_v63 = vld [vmem:[#allocation10 + $0xd0] sm:$0xff] }
  0xf5   :  { %638 = vmatprep.mubr.f32.mxu1 %v164_v0  ;;  %v1220_v0 = vld [vmem:[#allocation10 + $0xd8] sm:$0xff] }
  0xf6   :  { %v3978_v6 = vpack.c.bf16 %v1220_v0, %v1219_v63 }
  0xf7   :  { %478 = vmatmul.mubr.f32.gmra.mrb[26].mxu0 %v163_v1 }
  0xf8   :  { %639 = vmatmul.mubr.f32.gmra.mrb[26].mxu1 %v163_v1  ;;  %483 = vmatprep.mubr.f32.mxu0 %v166_v2  ;;  %v173_v1 = vld [vmem:[#allocation5 + $0x20] sm:$0xff] }
  0xf9   :  { %644 = vmatprep.mubr.f32.mxu1 %v166_v2  ;;  %v1251_v2 = vld [vmem:[#allocation10 + $0x1d0] sm:$0xff] }
  0xfb   :  { %484 = vmatmul.mubr.f32.gmra.mrb[28].mxu0 %v165_v3 }
  0xfc   :  { %645 = vmatmul.mubr.f32.gmra.mrb[28].mxu1 %v165_v3  ;;  %489 = vmatprep.mubr.f32.mxu0 %v168_v4  ;;  %v1252_v3 = vld [vmem:[#allocation10 + $0x1d8] sm:$0xff] }
  0xfd   :  { %650 = vmatprep.mubr.f32.mxu1 %v168_v4  ;;  %v3976_v4 = vpack.c.bf16 %v1202_v59, %v1201_v58  ;;  %v4010_v10 = vpack.c.bf16 %v1252_v3, %v1251_v2  ;;  %v313_v59 = vld [vmem:[%s5403_s3] sm:$0xf] }
  0xff   :  { %490 = vmatmul.mubr.f32.gmra.mrb[30].mxu0 %v167_v5 }
 0x100   :  { %651 = vmatmul.mubr.f32.gmra.mrb[30].mxu1 %v167_v5  ;;  %871 = vmatprep.mubr.f32.mxu0 %v4624_v12  ;;  %v4008_v5 = vpack.c.bf16 %v1234_v62, %v1233_v60 }
 0x101   :  { %1032 = vmatprep.mubr.f32.mxu1 %v4624_v12 }
 0x103   :  { %872 = vmatmul.mubr.f32.vlgmr.msra.gmra.mrb[32].mxu0 %v169_v13 }
 0x104   :  { %1033 = vmatmul.mubr.f32.vlgmr.msra.gmra.mrb[32].mxu1 %v169_v13  ;;  %877 = vmatprep.mubr.f32.mxu0 %v4624_v12  ;;  %v1221_v13 = vld [vmem:[#allocation10 + $0xe0] sm:$0xff] }
 0x105   :  { %1038 = vmatprep.mubr.f32.mxu1 %v4624_v12  ;;  %3961 = vmatpush3.bf16.msra.mxu0 %v3960_v16  ;;  %v1253_v16 = vld [vmem:[#allocation10 + $0x1e0] sm:$0xff]  ;;  %v3982_v20 = vpack.c.bf16 %v1222_v14, %v1221_v13 }
 0x106   :  { %3993 = vmatpush3.bf16.msra.mxu1 %v3992_v17  ;;  %3963 = vmatprep.subr.bf16.mxu0 %v3962_v18  ;;  %v1254_v17 = vld [vmem:[#allocation10 + $0x1e8] sm:$0xff]  ;;  %v3980_v18 = vpack.c.bf16 %v1204_v8, %v1203_v7 }
 0x107   :  { %878 = vmatmul.mubr.f32.gmra.mrb[34].mxu0 %v170_v26  ;;  %3995 = vmatprep.subr.bf16.mxu1 %v3994_v22  ;;  %v1206_v22 = vld [vmem:[#allocation10 + $0x68] sm:$0xff]  ;;  %v4014_v24 = vpack.c.bf16 %v1254_v17, %v1253_v16  ;;  %v1276_v16 = vld [vmem:[#allocation10 + $0x298] sm:$0xff] }
 0x108   :  { %1039 = vmatmul.mubr.f32.gmra.mrb[34].mxu1 %v170_v26  ;;  %883 = vmatprep.mubr.f32.mxu0 %v4624_v12  ;;  %v1223_v26 = vld [vmem:[#allocation10 + $0xf0] sm:$0xff]  ;;  %v1258_v8 = vld [vmem:[#allocation10 + $0x208] sm:$0xff] }
 0x109   :  { %1044 = vmatprep.mubr.f32.mxu1 %v4624_v12  ;;  %3965 = vmatpush3.bf16.msra.mxu0 %v3964_v29  ;;  %v1255_v29 = vld [vmem:[#allocation10 + $0x1f0] sm:$0xff]  ;;  %v3986_v33 = vpack.c.bf16 %v1224_v27, %v1223_v26  ;;  %v1260_v26 = vld [vmem:[#allocation10 + $0x218] sm:$0xff] }
 0x10a   :  { %3997 = vmatpush3.bf16.msra.mxu1 %v3996_v30  ;;  %3967 = vmatprep.subr.bf16.mxu0 %v3966_v31  ;;  %v1256_v30 = vld [vmem:[#allocation10 + $0x1f8] sm:$0xff]  ;;  %v3984_v31 = vpack.c.bf16 %v1206_v22, %v1205_v21  ;;  %v4028_v47 = vpack.c.bf16 %v1260_v26, %v1259_v25  ;;  %v1295_v26 = vld [vmem:[#allocation10 + $0x330] sm:$0xff] }
 0x10b   :  { %884 = vmatmul.mubr.f32.gmra.mrb[36].mxu0 %v171_v39  ;;  %3999 = vmatprep.subr.bf16.mxu1 %v3998_v35  ;;  %v1208_v35 = vld [vmem:[#allocation10 + $0x78] sm:$0xff]  ;;  %v4018_v36 = vpack.c.bf16 %v1256_v30, %v1255_v29 }
 0x10c   :  { %1045 = vmatmul.mubr.f32.gmra.mrb[36].mxu1 %v171_v39  ;;  %889 = vmatprep.mubr.f32.mxu0 %v4624_v12  ;;  %v176_v39 = vld [vmem:[#allocation5 + $0x38] sm:$0xff]  ;;  %v3988_v40 = vpack.c.bf16 %v1208_v35, %v1207_v34 }
 0x10d   :  { %1050 = vmatprep.mubr.f32.mxu1 %v4624_v12  ;;  %3969 = vmatpush3.bf16.msra.mxu0 %v3968_v42  ;;  %v1273_v42 = vld [vmem:[#allocation10 + $0x280] sm:$0xff]  ;;  %v1292_v34 = vld [vmem:[#allocation10 + $0x318] sm:$0xff] }
 0x10e   :  { %4001 = vmatpush3.bf16.msra.mxu1 %v4000_v43  ;;  %3971 = vmatprep.subr.bf16.mxu0 %v3970_v44  ;;  %v1274_v43 = vld [vmem:[#allocation10 + $0x288] sm:$0xff]  ;;  %v177_v44 = vld [vmem:[#allocation5 + $0x40] sm:$0xff] }
 0x10f   :  { %890 = vmatmul.mubr.f32.gmra.mrb[38].mxu0 %v172_v52  ;;  %4003 = vmatprep.subr.bf16.mxu1 %v4002_v48  ;;  %v4022_v45 = vpack.c.bf16 %v1274_v43, %v1273_v42  ;;  %v178_v48 = vld [vmem:[#allocation5 + $0x48] sm:$0xff]  ;;  %v1309_v42 = vld [vmem:[#allocation10 + $0x3a0] sm:$0xff] }
 0x110   :  { %1051 = vmatmul.mubr.f32.gmra.mrb[38].mxu1 %v172_v52  ;;  %895 = vmatprep.mubr.f32.mxu0 %v4624_v12  ;;  %v181_v52 = vld [vmem:[#allocation5 + $0x60] sm:$0xff]  ;;  %v1310_v43 = vld [vmem:[#allocation10 + $0x3a8] sm:$0xff] }
 0x111   :  { %1056 = vmatprep.mubr.f32.mxu1 %v4624_v12  ;;  %3973 = vmatpush3.bf16.msra.mxu0 %v3972_v55  ;;  %v184_v55 = vld [vmem:[#allocation5 + $0x78] sm:$0xff] }
 0x112   :  { %4005 = vmatpush3.bf16.msra.mxu1 %v4004_v56  ;;  %3975 = vmatprep.subr.bf16.mxu0 %v3974_v57  ;;  %v315_v56 = vlaneseq }
 0x113   :  { %896 = vmatmul.mubr.f32.gmra.mrb[40].mxu0 %v173_v1  ;;  %4007 = vmatprep.subr.bf16.mxu1 %v4006_v61 }
 0x114   :  { %1057 = vmatmul.mubr.f32.gmra.mrb[40].mxu1 %v173_v1  ;;  %901 = vmatprep.mubr.f32.mxu0 %v4624_v12  ;;  %v316_v57 = vshrl.u32 %v315_v56, 7 }
 0x115   :  { %1062 = vmatprep.mubr.f32.mxu1 %v4624_v12  ;;  %3977 = vmatpush3.bf16.msra.mxu0 %v3976_v4  ;;  %v1257_v4 = vld [vmem:[#allocation10 + $0x200] sm:$0xff] }
 0x116   :  { %4009 = vmatpush3.bf16.msra.mxu1 %v4008_v5  ;;  %3979 = vmatprep.subr.bf16.mxu0 %v3978_v6  ;;  %v4832_v58 = vsub.s32 0, %v316_v57  ;;  %v4837_v60 = vsub.s32 2, %v316_v57  ;;  %v4839_v61 = vsub.s32 1, %v316_v57  ;;  %v4841_v62 = vsub.s32 3, %v316_v57  ;;  %v1293_v57 = vld [vmem:[#allocation10 + $0x320] sm:$0xff] }
 0x117   :  { %902 = vmatmul.mubr.f32.gmra.mrb[42].mxu0 %v174_v15  ;;  %4011 = vmatprep.subr.bf16.mxu1 %v4010_v10  ;;  %v1290_v10 = vld [vmem:[#allocation10 + $0x308] sm:$0xff]  ;;  %v4024_v23 = vpack.c.bf16 %v1258_v8, %v1257_v4  ;;  %v1280_v8 = vld [vmem:[#allocation10 + $0x2b8] sm:$0xff] }
 0x118   :  { %1063 = vmatmul.mubr.f32.gmra.mrb[42].mxu1 %v174_v15  ;;  %907 = vmatprep.mubr.f32.mxu0 %v4624_v12  ;;  %v4844_v63 = vrot.slane %v313_v59, %v4832_v58  ;;  %v4847_v0 = vrot.slane %v313_v59, %v4837_v60  ;;  %v4850_v1 = vrot.slane %v313_v59, %v4839_v61  ;;  %v1275_v15 = vld [vmem:[#allocation10 + $0x290] sm:$0xff] }
 0x119   :  { %1068 = vmatprep.mubr.f32.mxu1 %v4624_v12  ;;  %3981 = vmatpush3.bf16.msra.mxu0 %v3980_v18  ;;  %v4853_v2 = vrot.slane %v313_v59, %v4841_v62  ;;  %v1307_v18 = vld [vmem:[#allocation10 + $0x390] sm:$0xff]  ;;  %v1294_v59 = vld [vmem:[#allocation10 + $0x328] sm:$0xff] }
 0x11a   :  { %4013 = vmatpush3.bf16.msra.mxu1 %v4012_v19  ;;  %3983 = vmatprep.subr.bf16.mxu0 %v3982_v20  ;;  %v1308_v19 = vld [vmem:[#allocation10 + $0x398] sm:$0xff] }
 0x11b   :  { %908 = vmatmul.mubr.f32.gmra.mrb[44].mxu0 %v175_v28  ;;  %4015 = vmatprep.subr.bf16.mxu1 %v4014_v24  ;;  %v4056_v24 = vpack.c.bf16 %v1290_v10, %v1289_v9  ;;  %v4058_v38 = vpack.c.bf16 %v1308_v19, %v1307_v18  ;;  %v1311_v10 = vld [vmem:[#allocation10 + $0x3b0] sm:$0xff]  ;;  %v1264_v19 = vld [vmem:[#allocation10 + $0x238] sm:$0xff] }
 0x11c   :  { %1069 = vmatmul.mubr.f32.gmra.mrb[44].mxu1 %v175_v28  ;;  %913 = vmatprep.mubr.f32.mxu0 %v4624_v12  ;;  %v1263_v18 = vld [vmem:[#allocation10 + $0x230] sm:$0xff] }
 0x11d   :  { %1074 = vmatprep.mubr.f32.mxu1 %v4624_v12  ;;  %3985 = vmatpush3.bf16.msra.mxu0 %v3984_v31 }
 0x11e   :  { %4017 = vmatpush3.bf16.msra.mxu1 %v4016_v32  ;;  %3987 = vmatprep.subr.bf16.mxu0 %v3986_v33  ;;  %v4026_v32 = vpack.c.bf16 %v1276_v16, %v1275_v15  ;;  %v1291_v33 = vld [vmem:[#allocation10 + $0x310] sm:$0xff] }
 0x11f   :  { %914 = vmatmul.mubr.f32.gmra.mrb[46].mxu0 %v176_v39  ;;  %4019 = vmatprep.subr.bf16.mxu1 %v4018_v36 }
 0x120   :  { %1075 = vmatmul.mubr.f32.gmra.mrb[46].mxu1 %v176_v39  ;;  %919 = vmatprep.mubr.f32.mxu0 %v4624_v12  ;;  %v1277_v39 = vld [vmem:[#allocation10 + $0x2a0] sm:$0xff] }
 0x121   :  { %1080 = vmatprep.mubr.f32.mxu1 %v4624_v12  ;;  %3989 = vmatpush3.bf16.msra.mxu0 %v3988_v40  ;;  %v1278_v40 = vld [vmem:[#allocation10 + $0x2a8] sm:$0xff] }
 0x122   :  { %4021 = vmatpush3.bf16.msra.mxu1 %v4020_v41  ;;  %4023 = vmatprep.subr.bf16.mxu0 %v4022_v45  ;;  %v4030_v56 = vpack.c.bf16 %v1278_v40, %v1277_v39  ;;  %v4036_v40 = vpack.c.bf16 %v1264_v19, %v1263_v18  ;;  %v1299_v19 = vld [vmem:[#allocation10 + $0x350] sm:$0xff] }
 0x123   :  { %920 = vmatmul.mubr.f32.gmra.mrb[48].mxu0 %v177_v44  ;;  %4055 = vmatprep.subr.bf16.mxu1 %v4054_v49  ;;  %v1261_v49 = vld [vmem:[#allocation10 + $0x220] sm:$0xff] }
 0x124   :  { %1081 = vmatmul.mubr.f32.gmra.mrb[48].mxu1 %v177_v44  ;;  %925 = vmatprep.mubr.f32.mxu0 %v4624_v12 }
 0x125   :  { %1086 = vmatprep.mubr.f32.mxu1 %v4624_v12 }
 0x127   :  { %926 = vmatmul.mubr.f32.gmra.mrb[50].mxu0 %v178_v48 }
 0x128   :  { %1087 = vmatmul.mubr.f32.gmra.mrb[50].mxu1 %v178_v48  ;;  %931 = vmatprep.mubr.f32.mxu0 %v4624_v12  ;;  %v4060_v48 = vpack.c.bf16 %v1292_v34, %v1291_v33  ;;  %v1282_v33 = vld [vmem:[#allocation10 + $0x2c8] sm:$0xff] }
 0x129   :  { %1092 = vmatprep.mubr.f32.mxu1 %v4624_v12 }
 0x12b   :  { %932 = vmatmul.mubr.f32.gmra.mrb[52].mxu0 %v179_v50 }
 0x12c   :  { %1093 = vmatmul.mubr.f32.gmra.mrb[52].mxu1 %v179_v50  ;;  %937 = vmatprep.mubr.f32.mxu0 %v4624_v12  ;;  %v1262_v50 = vld [vmem:[#allocation10 + $0x228] sm:$0xff] }
 0x12d   :  { %1098 = vmatprep.mubr.f32.mxu1 %v4624_v12  ;;  %v4032_v16 = vpack.c.bf16 %v1262_v50, %v1261_v49  ;;  %v1297_v50 = vld [vmem:[#allocation10 + $0x340] sm:$0xff] }
 0x12f   :  { %938 = vmatmul.mubr.f32.gmra.mrb[54].mxu0 %v180_v51 }
 0x130   :  { %1099 = vmatmul.mubr.f32.gmra.mrb[54].mxu1 %v180_v51  ;;  %943 = vmatprep.mubr.f32.mxu0 %v4624_v12 }
 0x131   :  { %1104 = vmatprep.mubr.f32.mxu1 %v4624_v12 }
 0x133   :  { %944 = vmatmul.mubr.f32.gmra.mrb[56].mxu0 %v181_v52 }
 0x134   :  { %1105 = vmatmul.mubr.f32.gmra.mrb[56].mxu1 %v181_v52  ;;  %949 = vmatprep.mubr.f32.mxu0 %v4624_v12 }
 0x135   :  { %1110 = vmatprep.mubr.f32.mxu1 %v4624_v12 }
 0x137   :  { %950 = vmatmul.mubr.f32.gmra.mrb[58].mxu0 %v182_v53 }
 0x138   :  { %1111 = vmatmul.mubr.f32.gmra.mrb[58].mxu1 %v182_v53  ;;  %955 = vmatprep.mubr.f32.mxu0 %v4624_v12 }
 0x139   :  { %1116 = vmatprep.mubr.f32.mxu1 %v4624_v12 }
 0x13b   :  { %956 = vmatmul.mubr.f32.gmra.mrb[60].mxu0 %v183_v54 }
 0x13c   :  { %1117 = vmatmul.mubr.f32.gmra.mrb[60].mxu1 %v183_v54  ;;  %961 = vmatprep.mubr.f32.mxu0 %v4624_v12 }
 0x13d   :  { %1122 = vmatprep.mubr.f32.mxu1 %v4624_v12 }
 0x13f   :  { %962 = vmatmul.mubr.f32.gmra.mrb[62].mxu0 %v184_v55 }
 0x140   :  { %1123 = vmatmul.mubr.f32.gmra.mrb[62].mxu1 %v184_v55 }
 0x196   :  { %v401_v3 = vpop.f32.mrb[0].mxu0 }
 0x197   :  { %v402_v5 = vadd.f32 %v401_v3, %v4844_v63  ;;  %v562_v6 = vpop.f32.mrb[0].mxu1  ;;  %v403_v7 = vpop.f32.mrb[1].mxu0 }
 0x198   :  { %v563_v11 = vadd.f32 %v562_v6, %v4847_v0  ;;  %v404_v13 = vadd.f32 %v403_v7, %v4850_v1  ;;  %v564_v14 = vpop.f32.mrb[1].mxu1  ;;  %v4062_v6 = vpack.c.bf16 %v1310_v43, %v1309_v42  ;;  %v1279_v7 = vld [vmem:[#allocation10 + $0x2b0] sm:$0xff]  ;;  %v1265_v42 = vld [vmem:[#allocation10 + $0x240] sm:$0xff]  ;;  %v1266_v43 = vld [vmem:[#allocation10 + $0x248] sm:$0xff] }
 0x199   :  { %v565_v17 = vadd.f32 %v564_v14, %v4853_v2  ;;  %v657_v27 = vmax.f32 %v402_v5, 0.0  ;;  %v4034_v25 = vpack.c.bf16 %v1280_v8, %v1279_v7  ;;  %v4040_v8 = vpack.c.bf16 %v1266_v43, %v1265_v42  ;;  %v1301_v43 = vld [vmem:[#allocation10 + $0x360] sm:$0xff] }
 0x19a   :  { %v659_v20 = vmax.f32 %v563_v11, 0.0  ;;  %v658_v21 = vmax.f32 %v404_v13, 0.0  ;;  %v407_v22 = vpop.f32.mrb[2].mxu0  ;;  %v1312_v11 = vld [vmem:[#allocation10 + $0x3b8] sm:$0xff] }
 0x19b   :  { %v660_v28 = vmax.f32 %v565_v17, 0.0  ;;  %v408_v29 = vadd.f32 %v407_v22, %v4844_v63  ;;  %v568_v30 = vpop.f32.mrb[2].mxu1  ;;  %v409_v31 = vpop.f32.mrb[3].mxu0  ;;  %v4064_v17 = vpack.c.bf16 %v1294_v59, %v1293_v57  ;;  %v1284_v57 = vld [vmem:[#allocation10 + $0x2d8] sm:$0xff] }
 0x19c   :  { %v569_v35 = vadd.f32 %v568_v30, %v4847_v0  ;;  %v410_v36 = vadd.f32 %v409_v31, %v4850_v1  ;;  %v570_v37 = vpop.f32.mrb[3].mxu1  ;;  %1392 = vmatprep.mubr.f32.mxu0 %v658_v21  ;;  %v4066_v31 = vpack.c.bf16 %v1312_v11, %v1311_v10  ;;  %v1267_v10 = vld [vmem:[#allocation10 + $0x250] sm:$0xff]  ;;  %v1268_v11 = vld [vmem:[#allocation10 + $0x258] sm:$0xff] }
 0x19d   :  { %v571_v41 = vadd.f32 %v570_v37, %v4853_v2  ;;  %1537 = vmatprep.mubr.f32.mxu1 %v660_v28  ;;  %1393 = vmatmul.mubr.f32.vlgmr.msra.gmra.mrb[64].mxu0 %v657_v27  ;;  %v661_v51 = vmax.f32 %v408_v29, 0.0  ;;  %v1296_v27 = vld [vmem:[#allocation10 + $0x338] sm:$0xff] }
 0x19e   :  { %v663_v44 = vmax.f32 %v569_v35, 0.0  ;;  %v662_v45 = vmax.f32 %v410_v36, 0.0  ;;  %1538 = vmatmul.mubr.f32.vlgmr.msra.gmra.mrb[64].mxu1 %v659_v20  ;;  %v413_v46 = vpop.f32.mrb[4].mxu0  ;;  %4025 = vmatpush3.bf16.msra.mxu0 %v4024_v23  ;;  %v1313_v35 = vld [vmem:[#allocation10 + $0x3c0] sm:$0xff]  ;;  %v1314_v36 = vld [vmem:[#allocation10 + $0x3c8] sm:$0xff] }
 0x19f   :  { %v664_v52 = vmax.f32 %v571_v41, 0.0  ;;  %v414_v53 = vadd.f32 %v413_v46, %v4844_v63  ;;  %v574_v54 = vpop.f32.mrb[4].mxu1  ;;  %v415_v55 = vpop.f32.mrb[5].mxu0  ;;  %4057 = vmatpush3.bf16.msra.mxu1 %v4056_v24  ;;  %4027 = vmatprep.subr.bf16.mxu0 %v4026_v32  ;;  %v1281_v32 = vld [vmem:[#allocation10 + $0x2c0] sm:$0xff]  ;;  %v4068_v41 = vpack.c.bf16 %v1296_v27, %v1295_v26  ;;  %v1286_v26 = vld [vmem:[#allocation10 + $0x2e8] sm:$0xff] }
 0x1a0   :  { %v575_v3 = vadd.f32 %v574_v54, %v4847_v0  ;;  %v416_v4 = vadd.f32 %v415_v55, %v4850_v1  ;;  %v576_v5 = vpop.f32.mrb[5].mxu1  ;;  %1397 = vmatprep.mubr.f32.mxu0 %v662_v45  ;;  %4059 = vmatprep.subr.bf16.mxu1 %v4058_v38  ;;  %v4038_v49 = vpack.c.bf16 %v1282_v33, %v1281_v32 }
 0x1a1   :  { %v577_v9 = vadd.f32 %v576_v5, %v4853_v2  ;;  %1542 = vmatprep.mubr.f32.mxu1 %v664_v52  ;;  %1398 = vmatmul.mubr.f32.gmra.mrb[66].mxu0 %v661_v51  ;;  %v665_v20 = vmax.f32 %v414_v53, 0.0  ;;  %v1298_v51 = vld [vmem:[#allocation10 + $0x348] sm:$0xff]  ;;  %v4070_v55 = vpack.c.bf16 %v1314_v36, %v1313_v35  ;;  %v4044_v33 = vpack.c.bf16 %v1268_v11, %v1267_v10  ;;  %v1269_v35 = vld [vmem:[#allocation10 + $0x260] sm:$0xff]  ;;  %v1272_v10 = vld [vmem:[#allocation10 + $0x278] sm:$0xff] }
 0x1a2   :  { %v667_v13 = vmax.f32 %v575_v3, 0.0  ;;  %v666_v14 = vmax.f32 %v416_v4, 0.0  ;;  %1543 = vmatmul.mubr.f32.gmra.mrb[66].mxu1 %v663_v44  ;;  %v419_v15 = vpop.f32.mrb[6].mxu0  ;;  %4029 = vmatpush3.bf16.msra.mxu0 %v4028_v47  ;;  %v1315_v3 = vld [vmem:[#allocation10 + $0x3d0] sm:$0xff]  ;;  %v1316_v4 = vld [vmem:[#allocation10 + $0x3d8] sm:$0xff]  ;;  %v1270_v36 = vld [vmem:[#allocation10 + $0x268] sm:$0xff] }
 0x1a3   :  { %v668_v21 = vmax.f32 %v577_v9, 0.0  ;;  %v420_v22 = vadd.f32 %v419_v15, %v4844_v63  ;;  %v580_v23 = vpop.f32.mrb[6].mxu1  ;;  %v421_v24 = vpop.f32.mrb[7].mxu0  ;;  %4061 = vmatpush3.bf16.msra.mxu1 %v4060_v48  ;;  %4031 = vmatprep.subr.bf16.mxu0 %v4030_v56  ;;  %v1283_v56 = vld [vmem:[#allocation10 + $0x2d0] sm:$0xff]  ;;  %v4072_v9 = vpack.c.bf16 %v1298_v51, %v1297_v50  ;;  %v1288_v50 = vld [vmem:[#allocation10 + $0x2f8] sm:$0xff] }
 0x1a4   :  { %v581_v28 = vadd.f32 %v580_v23, %v4847_v0  ;;  %v422_v29 = vadd.f32 %v421_v24, %v4850_v1  ;;  %v582_v30 = vpop.f32.mrb[7].mxu1  ;;  %1402 = vmatprep.mubr.f32.mxu0 %v666_v14  ;;  %4063 = vmatprep.subr.bf16.mxu1 %v4062_v6  ;;  %v4042_v18 = vpack.c.bf16 %v1284_v57, %v1283_v56 }
 0x1a5   :  { %v583_v34 = vadd.f32 %v582_v30, %v4853_v2  ;;  %1547 = vmatprep.mubr.f32.mxu1 %v668_v21  ;;  %1403 = vmatmul.mubr.f32.gmra.mrb[68].mxu0 %v665_v20  ;;  %v669_v44 = vmax.f32 %v420_v22, 0.0  ;;  %v1300_v20 = vld [vmem:[#allocation10 + $0x358] sm:$0xff]  ;;  %v4074_v24 = vpack.c.bf16 %v1316_v4, %v1315_v3  ;;  %v4048_v57 = vpack.c.bf16 %v1270_v36, %v1269_v35 }
 0x1a6   :  { %v671_v37 = vmax.f32 %v581_v28, 0.0  ;;  %v670_v38 = vmax.f32 %v422_v29, 0.0  ;;  %1548 = vmatmul.mubr.f32.gmra.mrb[68].mxu1 %v667_v13  ;;  %v425_v39 = vpop.f32.mrb[8].mxu0  ;;  %4033 = vmatpush3.bf16.msra.mxu0 %v4032_v16  ;;  %v1317_v28 = vld [vmem:[#allocation10 + $0x3e0] sm:$0xff]  ;;  %v1318_v29 = vld [vmem:[#allocation10 + $0x3e8] sm:$0xff] }
 0x1a7   :  { %v672_v45 = vmax.f32 %v583_v34, 0.0  ;;  %v426_v46 = vadd.f32 %v425_v39, %v4844_v63  ;;  %v586_v47 = vpop.f32.mrb[8].mxu1  ;;  %v427_v48 = vpop.f32.mrb[9].mxu0  ;;  %4065 = vmatpush3.bf16.msra.mxu1 %v4064_v17  ;;  %4035 = vmatprep.subr.bf16.mxu0 %v4034_v25  ;;  %v1285_v25 = vld [vmem:[#allocation10 + $0x2e0] sm:$0xff]  ;;  %v4076_v34 = vpack.c.bf16 %v1300_v20, %v1299_v19 }
 0x1a8   :  { %v587_v52 = vadd.f32 %v586_v47, %v4847_v0  ;;  %v428_v53 = vadd.f32 %v427_v48, %v4850_v1  ;;  %v588_v54 = vpop.f32.mrb[9].mxu1  ;;  %1407 = vmatprep.mubr.f32.mxu0 %v670_v38  ;;  %4067 = vmatprep.subr.bf16.mxu1 %v4066_v31  ;;  %v4046_v42 = vpack.c.bf16 %v1286_v26, %v1285_v25 }
 0x1a9   :  { %v589_v59 = vadd.f32 %v588_v54, %v4853_v2  ;;  %1552 = vmatprep.mubr.f32.mxu1 %v672_v45  ;;  %1408 = vmatmul.mubr.f32.gmra.mrb[70].mxu0 %v669_v44  ;;  %v673_v13 = vmax.f32 %v426_v46, 0.0  ;;  %v1302_v44 = vld [vmem:[#allocation10 + $0x368] sm:$0xff]  ;;  %v4078_v48 = vpack.c.bf16 %v1318_v29, %v1317_v28 }
 0x1aa   :  { %v675_v5 = vmax.f32 %v587_v52, 0.0  ;;  %v674_v6 = vmax.f32 %v428_v53, 0.0  ;;  %1553 = vmatmul.mubr.f32.gmra.mrb[70].mxu1 %v671_v37  ;;  %v431_v7 = vpop.f32.mrb[10].mxu0  ;;  %4037 = vmatpush3.bf16.msra.mxu0 %v4036_v40  ;;  %v1319_v52 = vld [vmem:[#allocation10 + $0x3f0] sm:$0xff]  ;;  %v1320_v53 = vld [vmem:[#allocation10 + $0x3f8] sm:$0xff] }
 0x1ab   :  { %v676_v14 = vmax.f32 %v589_v59, 0.0  ;;  %v432_v15 = vadd.f32 %v431_v7, %v4844_v63  ;;  %v592_v16 = vpop.f32.mrb[10].mxu1  ;;  %v433_v17 = vpop.f32.mrb[11].mxu0  ;;  %4069 = vmatpush3.bf16.msra.mxu1 %v4068_v41  ;;  %4039 = vmatprep.subr.bf16.mxu0 %v4038_v49  ;;  %v1287_v49 = vld [vmem:[#allocation10 + $0x2f0] sm:$0xff]  ;;  %v4080_v59 = vpack.c.bf16 %v1302_v44, %v1301_v43 }
 0x1ac   :  { %v593_v21 = vadd.f32 %v592_v16, %v4847_v0  ;;  %v434_v22 = vadd.f32 %v433_v17, %v4850_v1  ;;  %v594_v23 = vpop.f32.mrb[11].mxu1  ;;  %1412 = vmatprep.mubr.f32.mxu0 %v674_v6  ;;  %4071 = vmatprep.subr.bf16.mxu1 %v4070_v55  ;;  %v1303_v16 = vld [vmem:[#allocation10 + $0x370] sm:$0xff]  ;;  %v1304_v17 = vld [vmem:[#allocation10 + $0x378] sm:$0xff] }
 0x1ad   :  { %v595_v27 = vadd.f32 %v594_v23, %v4853_v2  ;;  %1557 = vmatprep.mubr.f32.mxu1 %v676_v14  ;;  %1413 = vmatmul.mubr.f32.gmra.mrb[72].mxu0 %v673_v13  ;;  %v677_v37 = vmax.f32 %v432_v15, 0.0  ;;  %v4082_v15 = vpack.c.bf16 %v1320_v53, %v1319_v52  ;;  %v4084_v28 = vpack.c.bf16 %v1304_v17, %v1303_v16 }
 0x1ae   :  { %v679_v30 = vmax.f32 %v593_v21, 0.0  ;;  %v678_v31 = vmax.f32 %v434_v22, 0.0  ;;  %1558 = vmatmul.mubr.f32.gmra.mrb[72].mxu1 %v675_v5  ;;  %v437_v32 = vpop.f32.mrb[12].mxu0  ;;  %4041 = vmatpush3.bf16.msra.mxu0 %v4040_v8  ;;  %v4050_v8 = vpack.c.bf16 %v1288_v50, %v1287_v49 }
 0x1af   :  { %v680_v38 = vmax.f32 %v595_v27, 0.0  ;;  %v438_v39 = vadd.f32 %v437_v32, %v4844_v63  ;;  %v598_v40 = vpop.f32.mrb[12].mxu1  ;;  %v439_v41 = vpop.f32.mrb[13].mxu0  ;;  %4073 = vmatpush3.bf16.msra.mxu1 %v4072_v9  ;;  %4043 = vmatprep.subr.bf16.mxu0 %v4042_v18  ;;  %v1271_v9 = vld [vmem:[#allocation10 + $0x270] sm:$0xff] }
 0x1b0   :  { %v599_v45 = vadd.f32 %v598_v40, %v4847_v0  ;;  %v440_v46 = vadd.f32 %v439_v41, %v4850_v1  ;;  %v600_v47 = vpop.f32.mrb[13].mxu1  ;;  %1417 = vmatprep.mubr.f32.mxu0 %v678_v31  ;;  %4075 = vmatprep.subr.bf16.mxu1 %v4074_v24  ;;  %v4052_v22 = vpack.c.bf16 %v1272_v10, %v1271_v9 }
 0x1b1   :  { %v601_v51 = vadd.f32 %v600_v47, %v4853_v2  ;;  %1562 = vmatprep.mubr.f32.mxu1 %v680_v38  ;;  %1418 = vmatmul.mubr.f32.gmra.mrb[74].mxu0 %v677_v37  ;;  %v681_v3 = vmax.f32 %v438_v39, 0.0 }
 0x1b2   :  { %v683_v54 = vmax.f32 %v599_v45, 0.0  ;;  %v682_v55 = vmax.f32 %v440_v46, 0.0  ;;  %1563 = vmatmul.mubr.f32.gmra.mrb[74].mxu1 %v679_v30  ;;  %v443_v56 = vpop.f32.mrb[14].mxu0  ;;  %4045 = vmatpush3.bf16.msra.mxu0 %v4044_v33 }
 0x1b3   :  { %v684_v4 = vmax.f32 %v601_v51, 0.0  ;;  %v444_v5 = vadd.f32 %v443_v56, %v4844_v63  ;;  %v604_v6 = vpop.f32.mrb[14].mxu1  ;;  %v445_v7 = vpop.f32.mrb[15].mxu0  ;;  %4077 = vmatpush3.bf16.msra.mxu1 %v4076_v34  ;;  %4047 = vmatprep.subr.bf16.mxu0 %v4046_v42 }
 0x1b4   :  { %v605_v11 = vadd.f32 %v604_v6, %v4847_v0  ;;  %v446_v13 = vadd.f32 %v445_v7, %v4850_v1  ;;  %v606_v14 = vpop.f32.mrb[15].mxu1  ;;  %1422 = vmatprep.mubr.f32.mxu0 %v682_v55  ;;  %4079 = vmatprep.subr.bf16.mxu1 %v4078_v48 }
 0x1b5   :  { %v607_v18 = vadd.f32 %v606_v14, %v4853_v2  ;;  %1567 = vmatprep.mubr.f32.mxu1 %v684_v4  ;;  %1423 = vmatmul.mubr.f32.gmra.mrb[76].mxu0 %v681_v3  ;;  %v685_v23 = vmax.f32 %v444_v5, 0.0 }
 0x1b6   :  { %v687_v19 = vmax.f32 %v605_v11, 0.0  ;;  %v686_v20 = vmax.f32 %v446_v13, 0.0  ;;  %1568 = vmatmul.mubr.f32.gmra.mrb[76].mxu1 %v683_v54  ;;  %v449_v21 = vpop.f32.mrb[16].mxu0  ;;  %4049 = vmatpush3.bf16.msra.mxu0 %v4048_v57 }
 0x1b7   :  { %v688_v24 = vmax.f32 %v607_v18, 0.0  ;;  %v450_v25 = vadd.f32 %v449_v21, %v4844_v63  ;;  %v610_v26 = vpop.f32.mrb[16].mxu1  ;;  %v451_v27 = vpop.f32.mrb[17].mxu0  ;;  %4081 = vmatpush3.bf16.msra.mxu1 %v4080_v59  ;;  %4051 = vmatprep.subr.bf16.mxu0 %v4050_v8 }
 0x1b8   :  { %v611_v29 = vadd.f32 %v610_v26, %v4847_v0  ;;  %v452_v30 = vadd.f32 %v451_v27, %v4850_v1  ;;  %v612_v31 = vpop.f32.mrb[17].mxu1  ;;  %1427 = vmatprep.mubr.f32.mxu0 %v686_v20  ;;  %4083 = vmatprep.subr.bf16.mxu1 %v4082_v15 }
 0x1b9   :  { %v613_v32 = vadd.f32 %v612_v31, %v4853_v2  ;;  %1572 = vmatprep.mubr.f32.mxu1 %v688_v24  ;;  %1428 = vmatmul.mubr.f32.gmra.mrb[78].mxu0 %v685_v23  ;;  %v689_v36 = vmax.f32 %v450_v25, 0.0 }
 0x1ba   :  { %v691_v33 = vmax.f32 %v611_v29, 0.0  ;;  %v690_v34 = vmax.f32 %v452_v30, 0.0  ;;  %1573 = vmatmul.mubr.f32.gmra.mrb[78].mxu1 %v687_v19  ;;  %v455_v35 = vpop.f32.mrb[18].mxu0  ;;  %4053 = vmatpush3.bf16.msra.mxu0 %v4052_v22 }
 0x1bb   :  { %v692_v37 = vmax.f32 %v613_v32, 0.0  ;;  %v456_v38 = vadd.f32 %v455_v35, %v4844_v63  ;;  %v616_v39 = vpop.f32.mrb[18].mxu1  ;;  %v457_v40 = vpop.f32.mrb[19].mxu0  ;;  %4085 = vmatpush3.bf16.msra.mxu1 %v4084_v28 }
 0x1bc   :  { %v617_v41 = vadd.f32 %v616_v39, %v4847_v0  ;;  %v458_v42 = vadd.f32 %v457_v40, %v4850_v1  ;;  %v618_v43 = vpop.f32.mrb[19].mxu1  ;;  %1432 = vmatprep.mubr.f32.mxu0 %v690_v34 }
 0x1bd   :  { %v619_v44 = vadd.f32 %v618_v43, %v4853_v2  ;;  %1577 = vmatprep.mubr.f32.mxu1 %v692_v37  ;;  %1433 = vmatmul.mubr.f32.gmra.mrb[80].mxu0 %v689_v36  ;;  %v693_v48 = vmax.f32 %v456_v38, 0.0 }
 0x1be   :  { %v695_v45 = vmax.f32 %v617_v41, 0.0  ;;  %v694_v46 = vmax.f32 %v458_v42, 0.0  ;;  %1578 = vmatmul.mubr.f32.gmra.mrb[80].mxu1 %v691_v33  ;;  %v461_v47 = vpop.f32.mrb[20].mxu0 }
 0x1bf   :  { %v696_v49 = vmax.f32 %v619_v44, 0.0  ;;  %v462_v50 = vadd.f32 %v461_v47, %v4844_v63  ;;  %v622_v51 = vpop.f32.mrb[20].mxu1  ;;  %v463_v52 = vpop.f32.mrb[21].mxu0 }
 0x1c0   :  { %v623_v53 = vadd.f32 %v622_v51, %v4847_v0  ;;  %v464_v54 = vadd.f32 %v463_v52, %v4850_v1  ;;  %v624_v55 = vpop.f32.mrb[21].mxu1  ;;  %1437 = vmatprep.mubr.f32.mxu0 %v694_v46 }
 0x1c1   :  { %v625_v56 = vadd.f32 %v624_v55, %v4853_v2  ;;  %1582 = vmatprep.mubr.f32.mxu1 %v696_v49  ;;  %1438 = vmatmul.mubr.f32.gmra.mrb[82].mxu0 %v693_v48  ;;  %v697_v4 = vmax.f32 %v462_v50, 0.0  ;;  %v785_v49 = vld [vmem:[%s5405_s5] sm:$0xf] }
 0x1c2   :  { %v699_v57 = vmax.f32 %v623_v53, 0.0  ;;  %v698_v59 = vmax.f32 %v464_v54, 0.0  ;;  %1583 = vmatmul.mubr.f32.gmra.mrb[82].mxu1 %v695_v45  ;;  %v467_v3 = vpop.f32.mrb[22].mxu0 }
 0x1c3   :  { %v700_v5 = vmax.f32 %v625_v56, 0.0  ;;  %v468_v6 = vadd.f32 %v467_v3, %v4844_v63  ;;  %v628_v7 = vpop.f32.mrb[22].mxu1  ;;  %v469_v8 = vpop.f32.mrb[23].mxu0  ;;  %v4920_v3 = vrot.slane %v785_v49, %v4832_v58 }
 0x1c4   :  { %v629_v9 = vadd.f32 %v628_v7, %v4847_v0  ;;  %v470_v10 = vadd.f32 %v469_v8, %v4850_v1  ;;  %v630_v11 = vpop.f32.mrb[23].mxu1  ;;  %1442 = vmatprep.mubr.f32.mxu0 %v698_v59  ;;  %v4925_v7 = vrot.slane %v785_v49, %v4837_v60  ;;  %v4928_v8 = vrot.slane %v785_v49, %v4839_v61 }
 0x1c5   :  { %v631_v13 = vadd.f32 %v630_v11, %v4853_v2  ;;  %1587 = vmatprep.mubr.f32.mxu1 %v700_v5  ;;  %1443 = vmatmul.mubr.f32.gmra.mrb[84].mxu0 %v697_v4  ;;  %v701_v17 = vmax.f32 %v468_v6, 0.0 }
 0x1c6   :  { %v703_v14 = vmax.f32 %v629_v9, 0.0  ;;  %v702_v15 = vmax.f32 %v470_v10, 0.0  ;;  %1588 = vmatmul.mubr.f32.gmra.mrb[84].mxu1 %v699_v57  ;;  %v473_v16 = vpop.f32.mrb[24].mxu0 }
 0x1c7   :  { %v704_v18 = vmax.f32 %v631_v13, 0.0  ;;  %v474_v19 = vadd.f32 %v473_v16, %v4844_v63  ;;  %v634_v20 = vpop.f32.mrb[24].mxu1  ;;  %v475_v21 = vpop.f32.mrb[25].mxu0 }
 0x1c8   :  { %v635_v22 = vadd.f32 %v634_v20, %v4847_v0  ;;  %v476_v23 = vadd.f32 %v475_v21, %v4850_v1  ;;  %v636_v24 = vpop.f32.mrb[25].mxu1  ;;  %1447 = vmatprep.mubr.f32.mxu0 %v702_v15 }
 0x1c9   :  { %v637_v25 = vadd.f32 %v636_v24, %v4853_v2  ;;  %1592 = vmatprep.mubr.f32.mxu1 %v704_v18  ;;  %1448 = vmatmul.mubr.f32.gmra.mrb[86].mxu0 %v701_v17  ;;  %v705_v29 = vmax.f32 %v474_v19, 0.0 }
 0x1ca   :  { %v707_v26 = vmax.f32 %v635_v22, 0.0  ;;  %v706_v27 = vmax.f32 %v476_v23, 0.0  ;;  %1593 = vmatmul.mubr.f32.gmra.mrb[86].mxu1 %v703_v14  ;;  %v479_v28 = vpop.f32.mrb[26].mxu0 }
 0x1cb   :  { %v708_v30 = vmax.f32 %v637_v25, 0.0  ;;  %v480_v31 = vadd.f32 %v479_v28, %v4844_v63  ;;  %v640_v32 = vpop.f32.mrb[26].mxu1  ;;  %v481_v33 = vpop.f32.mrb[27].mxu0 }
 0x1cc   :  { %v641_v34 = vadd.f32 %v640_v32, %v4847_v0  ;;  %v482_v35 = vadd.f32 %v481_v33, %v4850_v1  ;;  %v642_v36 = vpop.f32.mrb[27].mxu1  ;;  %1452 = vmatprep.mubr.f32.mxu0 %v706_v27 }
 0x1cd   :  { %v643_v37 = vadd.f32 %v642_v36, %v4853_v2  ;;  %1597 = vmatprep.mubr.f32.mxu1 %v708_v30  ;;  %1453 = vmatmul.mubr.f32.gmra.mrb[88].mxu0 %v705_v29  ;;  %v709_v41 = vmax.f32 %v480_v31, 0.0 }
 0x1ce   :  { %v711_v38 = vmax.f32 %v641_v34, 0.0  ;;  %v710_v39 = vmax.f32 %v482_v35, 0.0  ;;  %1598 = vmatmul.mubr.f32.gmra.mrb[88].mxu1 %v707_v26  ;;  %v485_v40 = vpop.f32.mrb[28].mxu0 }
 0x1cf   :  { %v712_v42 = vmax.f32 %v643_v37, 0.0  ;;  %v486_v43 = vadd.f32 %v485_v40, %v4844_v63  ;;  %v646_v44 = vpop.f32.mrb[28].mxu1  ;;  %v487_v45 = vpop.f32.mrb[29].mxu0 }
 0x1d0   :  { %v647_v46 = vadd.f32 %v646_v44, %v4847_v0  ;;  %v488_v47 = vadd.f32 %v487_v45, %v4850_v1  ;;  %v648_v48 = vpop.f32.mrb[29].mxu1  ;;  %1457 = vmatprep.mubr.f32.mxu0 %v710_v39 }
 0x1d1   :  { %v649_v50 = vadd.f32 %v648_v48, %v4853_v2  ;;  %1602 = vmatprep.mubr.f32.mxu1 %v712_v42  ;;  %1458 = vmatmul.mubr.f32.gmra.mrb[90].mxu0 %v709_v41  ;;  %v713_v54 = vmax.f32 %v486_v43, 0.0 }
 0x1d2   :  { %v715_v51 = vmax.f32 %v647_v46, 0.0  ;;  %v714_v52 = vmax.f32 %v488_v47, 0.0  ;;  %1603 = vmatmul.mubr.f32.gmra.mrb[90].mxu1 %v711_v38  ;;  %v491_v53 = vpop.f32.mrb[30].mxu0 }
 0x1d3   :  { %v716_v55 = vmax.f32 %v649_v50, 0.0  ;;  %v492_v56 = vadd.f32 %v491_v53, %v4844_v63  ;;  %v652_v57 = vpop.f32.mrb[30].mxu1  ;;  %v493_v59 = vpop.f32.mrb[31].mxu0  ;;  %v4932_v63 = vrot.slane %v785_v49, %v4841_v62 }
 0x1d4   :  { %v653_v4 = vadd.f32 %v652_v57, %v4847_v0  ;;  %v494_v5 = vadd.f32 %v493_v59, %v4850_v1  ;;  %v654_v6 = vpop.f32.mrb[31].mxu1  ;;  %1462 = vmatprep.mubr.f32.mxu0 %v714_v52 }
 0x1d5   :  { %v655_v9 = vadd.f32 %v654_v6, %v4853_v2  ;;  %1607 = vmatprep.mubr.f32.mxu1 %v716_v55  ;;  %1463 = vmatmul.mubr.f32.gmra.mrb[92].mxu0 %v713_v54  ;;  %v717_v1 = vmax.f32 %v492_v56, 0.0 }
 0x1d6   :  { %v719_v10 = vmax.f32 %v653_v4, 0.0  ;;  %v718_v11 = vmax.f32 %v494_v5, 0.0  ;;  %1608 = vmatmul.mubr.f32.gmra.mrb[92].mxu1 %v715_v51  ;;  %v873_v0 = vpop.f32.mrb[32].mxu0 }
 0x1d7   :  { %v720_v13 = vmax.f32 %v655_v9, 0.0  ;;  %v874_v14 = vadd.f32 %v873_v0, %v4920_v3  ;;  %v1034_v15 = vpop.f32.mrb[32].mxu1  ;;  %v875_v16 = vpop.f32.mrb[33].mxu0 }
 0x1d8   :  { %v1035_v17 = vadd.f32 %v1034_v15, %v4925_v7  ;;  %v876_v18 = vadd.f32 %v875_v16, %v4928_v8  ;;  %v1036_v2 = vpop.f32.mrb[33].mxu1  ;;  %1467 = vmatprep.mubr.f32.mxu0 %v718_v11 }
 0x1d9   :  { %v1037_v19 = vadd.f32 %v1036_v2, %v4932_v63  ;;  %1612 = vmatprep.mubr.f32.mxu1 %v720_v13  ;;  %1468 = vmatmul.mubr.f32.gmra.mrb[94].mxu0 %v717_v1  ;;  %v1129_v23 = vmax.f32 %v874_v14, 0.0 }
 0x1da   :  { %v1131_v20 = vmax.f32 %v1035_v17, 0.0  ;;  %v1130_v21 = vmax.f32 %v876_v18, 0.0  ;;  %1613 = vmatmul.mubr.f32.gmra.mrb[94].mxu1 %v719_v10  ;;  %v879_v22 = vpop.f32.mrb[34].mxu0 }
 0x1db   :  { %v1132_v24 = vmax.f32 %v1037_v19, 0.0  ;;  %v880_v25 = vadd.f32 %v879_v22, %v4920_v3  ;;  %v1040_v26 = vpop.f32.mrb[34].mxu1  ;;  %v881_v27 = vpop.f32.mrb[35].mxu0 }
 0x1dc   :  { %v1041_v28 = vadd.f32 %v1040_v26, %v4925_v7  ;;  %v882_v29 = vadd.f32 %v881_v27, %v4928_v8  ;;  %v1042_v30 = vpop.f32.mrb[35].mxu1  ;;  %1682 = vmatprep.mubr.f32.mxu0 %v1130_v21 }
 0x1dd   :  { %v1043_v31 = vadd.f32 %v1042_v30, %v4932_v63  ;;  %1827 = vmatprep.mubr.f32.mxu1 %v1132_v24  ;;  %1683 = vmatmul.mubr.f32.vlgmr.msra.gmra.mrb[96].mxu0 %v1129_v23  ;;  %v1133_v35 = vmax.f32 %v880_v25, 0.0 }
 0x1de   :  { %v1135_v32 = vmax.f32 %v1041_v28, 0.0  ;;  %v1134_v33 = vmax.f32 %v882_v29, 0.0  ;;  %1828 = vmatmul.mubr.f32.vlgmr.msra.gmra.mrb[96].mxu1 %v1131_v20  ;;  %v885_v34 = vpop.f32.mrb[36].mxu0 }
 0x1df   :  { %v1136_v36 = vmax.f32 %v1043_v31, 0.0  ;;  %v886_v37 = vadd.f32 %v885_v34, %v4920_v3  ;;  %v1046_v38 = vpop.f32.mrb[36].mxu1  ;;  %v887_v39 = vpop.f32.mrb[37].mxu0 }
 0x1e0   :  { %v1047_v40 = vadd.f32 %v1046_v38, %v4925_v7  ;;  %v888_v41 = vadd.f32 %v887_v39, %v4928_v8  ;;  %v1048_v42 = vpop.f32.mrb[37].mxu1  ;;  %1687 = vmatprep.mubr.f32.mxu0 %v1134_v33 }
 0x1e1   :  { %v1049_v43 = vadd.f32 %v1048_v42, %v4932_v63  ;;  %1832 = vmatprep.mubr.f32.mxu1 %v1136_v36  ;;  %1688 = vmatmul.mubr.f32.gmra.mrb[98].mxu0 %v1133_v35  ;;  %v1137_v47 = vmax.f32 %v886_v37, 0.0 }
 0x1e2   :  { %v1139_v44 = vmax.f32 %v1047_v40, 0.0  ;;  %v1138_v45 = vmax.f32 %v888_v41, 0.0  ;;  %1833 = vmatmul.mubr.f32.gmra.mrb[98].mxu1 %v1135_v32  ;;  %v891_v46 = vpop.f32.mrb[38].mxu0 }
 0x1e3   :  { %v1140_v48 = vmax.f32 %v1049_v43, 0.0  ;;  %v892_v49 = vadd.f32 %v891_v46, %v4920_v3  ;;  %v1052_v50 = vpop.f32.mrb[38].mxu1  ;;  %v893_v51 = vpop.f32.mrb[39].mxu0 }
 0x1e4   :  { %v1053_v52 = vadd.f32 %v1052_v50, %v4925_v7  ;;  %v894_v53 = vadd.f32 %v893_v51, %v4928_v8  ;;  %v1054_v54 = vpop.f32.mrb[39].mxu1  ;;  %1692 = vmatprep.mubr.f32.mxu0 %v1138_v45 }
 0x1e5   :  { %v1055_v55 = vadd.f32 %v1054_v54, %v4932_v63  ;;  %1837 = vmatprep.mubr.f32.mxu1 %v1140_v48  ;;  %1693 = vmatmul.mubr.f32.gmra.mrb[100].mxu0 %v1137_v47  ;;  %v1141_v4 = vmax.f32 %v892_v49, 0.0 }
 0x1e6   :  { %v1143_v56 = vmax.f32 %v1053_v52, 0.0  ;;  %v1142_v57 = vmax.f32 %v894_v53, 0.0  ;;  %1838 = vmatmul.mubr.f32.gmra.mrb[100].mxu1 %v1139_v44  ;;  %v897_v59 = vpop.f32.mrb[40].mxu0 }
 0x1e7   :  { %v1144_v5 = vmax.f32 %v1055_v55, 0.0  ;;  %v898_v6 = vadd.f32 %v897_v59, %v4920_v3  ;;  %v1058_v9 = vpop.f32.mrb[40].mxu1  ;;  %v899_v10 = vpop.f32.mrb[41].mxu0 }
 0x1e8   :  { %v1059_v11 = vadd.f32 %v1058_v9, %v4925_v7  ;;  %v900_v0 = vadd.f32 %v899_v10, %v4928_v8  ;;  %v1060_v1 = vpop.f32.mrb[41].mxu1  ;;  %1697 = vmatprep.mubr.f32.mxu0 %v1142_v57 }
 0x1e9   :  { %v1061_v13 = vadd.f32 %v1060_v1, %v4932_v63  ;;  %1842 = vmatprep.mubr.f32.mxu1 %v1144_v5  ;;  %1698 = vmatmul.mubr.f32.gmra.mrb[102].mxu0 %v1141_v4  ;;  %v1145_v17 = vmax.f32 %v898_v6, 0.0 }
 0x1ea   :  { %v1147_v14 = vmax.f32 %v1059_v11, 0.0  ;;  %v1146_v15 = vmax.f32 %v900_v0, 0.0  ;;  %1843 = vmatmul.mubr.f32.gmra.mrb[102].mxu1 %v1143_v56  ;;  %v903_v16 = vpop.f32.mrb[42].mxu0 }
 0x1eb   :  { %v1148_v18 = vmax.f32 %v1061_v13, 0.0  ;;  %v904_v2 = vadd.f32 %v903_v16, %v4920_v3  ;;  %v1064_v19 = vpop.f32.mrb[42].mxu1  ;;  %v905_v20 = vpop.f32.mrb[43].mxu0 }
 0x1ec   :  { %v1065_v21 = vadd.f32 %v1064_v19, %v4925_v7  ;;  %v906_v22 = vadd.f32 %v905_v20, %v4928_v8  ;;  %v1066_v23 = vpop.f32.mrb[43].mxu1  ;;  %1702 = vmatprep.mubr.f32.mxu0 %v1146_v15 }
 0x1ed   :  { %v1067_v24 = vadd.f32 %v1066_v23, %v4932_v63  ;;  %1847 = vmatprep.mubr.f32.mxu1 %v1148_v18  ;;  %1703 = vmatmul.mubr.f32.gmra.mrb[104].mxu0 %v1145_v17  ;;  %v1149_v28 = vmax.f32 %v904_v2, 0.0  ;;  %v1924_v23 = vld [vmem:[#allocation11] sm:$0xff] }
 0x1ee   :  { %v1151_v25 = vmax.f32 %v1065_v21, 0.0  ;;  %v1150_v26 = vmax.f32 %v906_v22, 0.0  ;;  %1848 = vmatmul.mubr.f32.gmra.mrb[104].mxu1 %v1147_v14  ;;  %v909_v27 = vpop.f32.mrb[44].mxu0  ;;  %v1925_v21 = vld [vmem:[#allocation11 + $0x8] sm:$0xff] }
 0x1ef   :  { %v1152_v29 = vmax.f32 %v1067_v24, 0.0  ;;  %v910_v30 = vadd.f32 %v909_v27, %v4920_v3  ;;  %v1070_v31 = vpop.f32.mrb[44].mxu1  ;;  %v911_v32 = vpop.f32.mrb[45].mxu0  ;;  %v1929_v22 = vld [vmem:[#allocation11 + $0x28] sm:$0xff] }
 0x1f0   :  { %v1071_v33 = vadd.f32 %v1070_v31, %v4925_v7  ;;  %v912_v34 = vadd.f32 %v911_v32, %v4928_v8  ;;  %v1072_v35 = vpop.f32.mrb[45].mxu1  ;;  %1707 = vmatprep.mubr.f32.mxu0 %v1150_v26 }
 0x1f1   :  { %v1073_v36 = vadd.f32 %v1072_v35, %v4932_v63  ;;  %1852 = vmatprep.mubr.f32.mxu1 %v1152_v29  ;;  %1708 = vmatmul.mubr.f32.gmra.mrb[106].mxu0 %v1149_v28  ;;  %v1153_v40 = vmax.f32 %v910_v30, 0.0  ;;  %v4086_v29 = vpack.c.bf16 %v1929_v22, %v1925_v21  ;;  %v1928_v30 = vld [vmem:[#allocation11 + $0x20] sm:$0xff] }
 0x1f2   :  { %v1155_v37 = vmax.f32 %v1071_v33, 0.0  ;;  %v1154_v38 = vmax.f32 %v912_v34, 0.0  ;;  %1853 = vmatmul.mubr.f32.gmra.mrb[106].mxu1 %v1151_v25  ;;  %v915_v39 = vpop.f32.mrb[46].mxu0  ;;  %v4088_v34 = vpack.c.bf16 %v1928_v30, %v1924_v23 }
 0x1f3   :  { %v1156_v41 = vmax.f32 %v1073_v36, 0.0  ;;  %v916_v42 = vadd.f32 %v915_v39, %v4920_v3  ;;  %v1076_v43 = vpop.f32.mrb[46].mxu1  ;;  %v917_v44 = vpop.f32.mrb[47].mxu0  ;;  %4087 = vmatprep.subr.bf16.mxu0 %v4086_v29 }
 0x1f4   :  { %v1077_v45 = vadd.f32 %v1076_v43, %v4925_v7  ;;  %v918_v46 = vadd.f32 %v917_v44, %v4928_v8  ;;  %v1078_v47 = vpop.f32.mrb[47].mxu1  ;;  %1712 = vmatprep.mubr.f32.mxu0 %v1154_v38  ;;  %4089 = vmatpush1.bf16.msra.mxu0 %v4088_v34 }
 0x1f5   :  { %v1079_v48 = vadd.f32 %v1078_v47, %v4932_v63  ;;  %1857 = vmatprep.mubr.f32.mxu1 %v1156_v41  ;;  %1713 = vmatmul.mubr.f32.gmra.mrb[108].mxu0 %v1153_v40  ;;  %v1157_v52 = vmax.f32 %v916_v42, 0.0 }
 0x1f6   :  { %v1159_v49 = vmax.f32 %v1077_v45, 0.0  ;;  %v1158_v50 = vmax.f32 %v918_v46, 0.0  ;;  %1858 = vmatmul.mubr.f32.gmra.mrb[108].mxu1 %v1155_v37  ;;  %v921_v51 = vpop.f32.mrb[48].mxu0 }
 0x1f7   :  { %v1160_v53 = vmax.f32 %v1079_v48, 0.0  ;;  %v922_v54 = vadd.f32 %v921_v51, %v4920_v3  ;;  %v1082_v55 = vpop.f32.mrb[48].mxu1  ;;  %v923_v56 = vpop.f32.mrb[49].mxu0  ;;  %v1933_v51 = vld [vmem:[#allocation11 + $0x48] sm:$0xff] }
 0x1f8   :  { %v1083_v57 = vadd.f32 %v1082_v55, %v4925_v7  ;;  %v924_v59 = vadd.f32 %v923_v56, %v4928_v8  ;;  %v1084_v4 = vpop.f32.mrb[49].mxu1  ;;  %1717 = vmatprep.mubr.f32.mxu0 %v1158_v50 }
 0x1f9   :  { %v1085_v5 = vadd.f32 %v1084_v4, %v4932_v63  ;;  %1862 = vmatprep.mubr.f32.mxu1 %v1160_v53  ;;  %1718 = vmatmul.mubr.f32.gmra.mrb[110].mxu0 %v1157_v52  ;;  %v1161_v11 = vmax.f32 %v922_v54, 0.0  ;;  %v1937_v52 = vld [vmem:[#allocation11 + $0x68] sm:$0xff]  ;;  %v1932_v53 = vld [vmem:[#allocation11 + $0x40] sm:$0xff] }
 0x1fa   :  { %v1163_v6 = vmax.f32 %v1083_v57, 0.0  ;;  %v1162_v9 = vmax.f32 %v924_v59, 0.0  ;;  %1863 = vmatmul.mubr.f32.gmra.mrb[110].mxu1 %v1159_v49  ;;  %v927_v10 = vpop.f32.mrb[50].mxu0  ;;  %v4090_v4 = vpack.c.bf16 %v1937_v52, %v1933_v51 }
 0x1fb   :  { %v1164_v0 = vmax.f32 %v1085_v5, 0.0  ;;  %v928_v1 = vadd.f32 %v927_v10, %v4920_v3  ;;  %v1088_v13 = vpop.f32.mrb[50].mxu1  ;;  %v929_v14 = vpop.f32.mrb[51].mxu0  ;;  %v1936_v5 = vld [vmem:[#allocation11 + $0x60] sm:$0xff] }
 0x1fc   :  { %v1089_v15 = vadd.f32 %v1088_v13, %v4925_v7  ;;  %v930_v16 = vadd.f32 %v929_v14, %v4928_v8  ;;  %v1090_v17 = vpop.f32.mrb[51].mxu1  ;;  %1722 = vmatprep.mubr.f32.mxu0 %v1162_v9  ;;  %4091 = vmatprep.subr.bf16.mxu0 %v4090_v4 }
 0x1fd   :  { %v1091_v18 = vadd.f32 %v1090_v17, %v4932_v63  ;;  %1867 = vmatprep.mubr.f32.mxu1 %v1164_v0  ;;  %1723 = vmatmul.mubr.f32.gmra.mrb[112].mxu0 %v1161_v11  ;;  %v1165_v24 = vmax.f32 %v928_v1, 0.0  ;;  %v4092_v11 = vpack.c.bf16 %v1936_v5, %v1932_v53  ;;  %v1952_v5 = vld [vmem:[#allocation11 + $0xe0] sm:$0xff] }
 0x1fe   :  { %v1167_v2 = vmax.f32 %v1089_v15, 0.0  ;;  %v1166_v19 = vmax.f32 %v930_v16, 0.0  ;;  %1868 = vmatmul.mubr.f32.gmra.mrb[112].mxu1 %v1163_v6  ;;  %v933_v20 = vpop.f32.mrb[52].mxu0 }
 0x1ff   :  { %v1168_v25 = vmax.f32 %v1091_v18, 0.0  ;;  %v934_v26 = vadd.f32 %v933_v20, %v4920_v3  ;;  %v1094_v27 = vpop.f32.mrb[52].mxu1  ;;  %v935_v28 = vpop.f32.mrb[53].mxu0  ;;  %4093 = vmatpush1.bf16.msra.mxu0 %v4092_v11 }
 0x200   :  { %v1095_v31 = vadd.f32 %v1094_v27, %v4925_v7  ;;  %v936_v32 = vadd.f32 %v935_v28, %v4928_v8  ;;  %v1096_v33 = vpop.f32.mrb[53].mxu1  ;;  %1727 = vmatprep.mubr.f32.mxu0 %v1166_v19  ;;  %v1945_v27 = vld [vmem:[#allocation11 + $0xa8] sm:$0xff]  ;;  %v1940_v28 = vld [vmem:[#allocation11 + $0x80] sm:$0xff] }
 0x201   :  { %v1097_v35 = vadd.f32 %v1096_v33, %v4932_v63  ;;  %1872 = vmatprep.mubr.f32.mxu1 %v1168_v25  ;;  %1728 = vmatmul.mubr.f32.gmra.mrb[114].mxu0 %v1165_v24  ;;  %v1169_v39 = vmax.f32 %v934_v26, 0.0  ;;  %v1941_v26 = vld [vmem:[#allocation11 + $0x88] sm:$0xff] }
 0x202   :  { %v1171_v36 = vmax.f32 %v1095_v31, 0.0  ;;  %v1170_v37 = vmax.f32 %v936_v32, 0.0  ;;  %1873 = vmatmul.mubr.f32.gmra.mrb[114].mxu1 %v1167_v2  ;;  %v939_v38 = vpop.f32.mrb[54].mxu0  ;;  %v4094_v34 = vpack.c.bf16 %v1945_v27, %v1941_v26  ;;  %v1946_v26 = vld [vmem:[#allocation11 + $0xb0] sm:$0xff] }
 0x203   :  { %v1172_v40 = vmax.f32 %v1097_v35, 0.0  ;;  %v940_v41 = vadd.f32 %v939_v38, %v4920_v3  ;;  %v1100_v42 = vpop.f32.mrb[54].mxu1  ;;  %v941_v43 = vpop.f32.mrb[55].mxu0  ;;  %v1944_v35 = vld [vmem:[#allocation11 + $0xa0] sm:$0xff] }
 0x204   :  { %v1101_v44 = vadd.f32 %v1100_v42, %v4925_v7  ;;  %v942_v45 = vadd.f32 %v941_v43, %v4928_v8  ;;  %v1102_v46 = vpop.f32.mrb[55].mxu1  ;;  %1732 = vmatprep.mubr.f32.mxu0 %v1170_v37  ;;  %4095 = vmatprep.subr.bf16.mxu0 %v4094_v34  ;;  %v1969_v34 = vld [vmem:[#allocation11 + $0x168] sm:$0xff] }
 0x205   :  { %v1103_v47 = vadd.f32 %v1102_v46, %v4932_v63  ;;  %1877 = vmatprep.mubr.f32.mxu1 %v1172_v40  ;;  %1733 = vmatmul.mubr.f32.gmra.mrb[116].mxu0 %v1169_v39  ;;  %v1173_v54 = vmax.f32 %v940_v41, 0.0  ;;  %v4096_v39 = vpack.c.bf16 %v1944_v35, %v1940_v28  ;;  %v1951_v28 = vld [vmem:[#allocation11 + $0xd8] sm:$0xff]  ;;  %v1964_v35 = vld [vmem:[#allocation11 + $0x140] sm:$0xff] }
 0x206   :  { %v1175_v48 = vmax.f32 %v1101_v44, 0.0  ;;  %v1174_v49 = vmax.f32 %v942_v45, 0.0  ;;  %1878 = vmatmul.mubr.f32.gmra.mrb[116].mxu1 %v1171_v36  ;;  %v945_v50 = vpop.f32.mrb[56].mxu0 }
 0x207   :  { %v1176_v55 = vmax.f32 %v1103_v47, 0.0  ;;  %v946_v56 = vadd.f32 %v945_v50, %v4920_v3  ;;  %v1106_v57 = vpop.f32.mrb[56].mxu1  ;;  %v947_v59 = vpop.f32.mrb[57].mxu0  ;;  %4097 = vmatpush1.bf16.msra.mxu0 %v4096_v39 }
 0x208   :  { %v1107_v6 = vadd.f32 %v1106_v57, %v4925_v7  ;;  %v948_v9 = vadd.f32 %v947_v59, %v4928_v8  ;;  %v1108_v10 = vpop.f32.mrb[57].mxu1  ;;  %1737 = vmatprep.mubr.f32.mxu0 %v1174_v49  ;;  %v1948_v57 = vld [vmem:[#allocation11 + $0xc0] sm:$0xff] }
 0x209   :  { %v1109_v0 = vadd.f32 %v1108_v10, %v4932_v63  ;;  %1882 = vmatprep.mubr.f32.mxu1 %v1176_v55  ;;  %1738 = vmatmul.mubr.f32.gmra.mrb[118].mxu0 %v1173_v54  ;;  %v1177_v15 = vmax.f32 %v946_v56, 0.0  ;;  %v1949_v55 = vld [vmem:[#allocation11 + $0xc8] sm:$0xff]  ;;  %v1930_v10 = vld [vmem:[#allocation11 + $0x30] sm:$0xff] }
 0x20a   :  { %v1179_v1 = vmax.f32 %v1107_v6, 0.0  ;;  %v1178_v13 = vmax.f32 %v948_v9, 0.0  ;;  %1883 = vmatmul.mubr.f32.gmra.mrb[118].mxu1 %v1175_v48  ;;  %v951_v14 = vpop.f32.mrb[58].mxu0  ;;  %v1953_v56 = vld [vmem:[#allocation11 + $0xe8] sm:$0xff]  ;;  %v1927_v6 = vld [vmem:[#allocation11 + $0x18] sm:$0xff] }
 0x20b   :  { %v1180_v16 = vmax.f32 %v1109_v0, 0.0  ;;  %v952_v17 = vadd.f32 %v951_v14, %v4920_v3  ;;  %v1112_v18 = vpop.f32.mrb[58].mxu1  ;;  %v953_v2 = vpop.f32.mrb[59].mxu0  ;;  %v4098_v4 = vpack.c.bf16 %v1953_v56, %v1949_v55  ;;  %v1935_v0 = vld [vmem:[#allocation11 + $0x58] sm:$0xff]  ;;  %v1934_v14 = vld [vmem:[#allocation11 + $0x50] sm:$0xff]  ;;  %v1976_v56 = vld [vmem:[#allocation11 + $0x1a0] sm:$0xff] }
 0x20c   :  { %v1113_v19 = vadd.f32 %v1112_v18, %v4925_v7  ;;  %v954_v20 = vadd.f32 %v953_v2, %v4928_v8  ;;  %v1114_v21 = vpop.f32.mrb[59].mxu1  ;;  %1742 = vmatprep.mubr.f32.mxu0 %v1178_v13  ;;  %v1956_v18 = vld [vmem:[#allocation11 + $0x100] sm:$0xff] }
 0x20d   :  { %v1115_v22 = vadd.f32 %v1114_v21, %v4932_v63  ;;  %1887 = vmatprep.mubr.f32.mxu1 %v1180_v16  ;;  %1743 = vmatmul.mubr.f32.gmra.mrb[120].mxu0 %v1177_v15  ;;  %v1181_v29 = vmax.f32 %v952_v17, 0.0  ;;  %v1938_v15 = vld [vmem:[#allocation11 + $0x70] sm:$0xff]  ;;  %v1957_v16 = vld [vmem:[#allocation11 + $0x108] sm:$0xff] }
 0x20e   :  { %v1183_v23 = vmax.f32 %v1113_v19, 0.0  ;;  %v1182_v24 = vmax.f32 %v954_v20, 0.0  ;;  %1888 = vmatmul.mubr.f32.gmra.mrb[120].mxu1 %v1179_v1  ;;  %v957_v25 = vpop.f32.mrb[60].mxu0  ;;  %4099 = vmatprep.subr.bf16.mxu0 %v4098_v4  ;;  %v1939_v1 = vld [vmem:[#allocation11 + $0x78] sm:$0xff]  ;;  %v1961_v17 = vld [vmem:[#allocation11 + $0x128] sm:$0xff]  ;;  %v4124_v2 = vpack.c.bf16 %v1938_v15, %v1934_v14  ;;  %v1960_v20 = vld [vmem:[#allocation11 + $0x120] sm:$0xff] }
 0x20f   :  { %v1184_v30 = vmax.f32 %v1115_v22, 0.0  ;;  %v958_v31 = vadd.f32 %v957_v25, %v4920_v3  ;;  %v1118_v32 = vpop.f32.mrb[60].mxu1  ;;  %v959_v33 = vpop.f32.mrb[61].mxu0  ;;  %v4122_v13 = vpack.c.bf16 %v1939_v1, %v1935_v0  ;;  %v4102_v19 = vpack.c.bf16 %v1961_v17, %v1957_v16  ;;  %v1943_v22 = vld [vmem:[#allocation11 + $0x98] sm:$0xff]  ;;  %v1942_v25 = vld [vmem:[#allocation11 + $0x90] sm:$0xff]  ;;  %v1984_v0 = vld [vmem:[#allocation11 + $0x1e0] sm:$0xff] }
 0x210   :  { %v1119_v36 = vadd.f32 %v1118_v32, %v4925_v7  ;;  %v960_v37 = vadd.f32 %v959_v33, %v4928_v8  ;;  %v1120_v38 = vpop.f32.mrb[61].mxu1  ;;  %1747 = vmatprep.mubr.f32.mxu0 %v1182_v24  ;;  %v4104_v21 = vpack.c.bf16 %v1960_v20, %v1956_v18  ;;  %v4128_v27 = vpack.c.bf16 %v1946_v26, %v1942_v25  ;;  %v1954_v32 = vld [vmem:[#allocation11 + $0xf0] sm:$0xff]  ;;  %v1965_v33 = vld [vmem:[#allocation11 + $0x148] sm:$0xff]  ;;  %v1987_v1 = vld [vmem:[#allocation11 + $0x1f8] sm:$0xff] }
 0x211   :  { %v1121_v40 = vadd.f32 %v1120_v38, %v4932_v63  ;;  %1892 = vmatprep.mubr.f32.mxu1 %v1184_v30  ;;  %1748 = vmatmul.mubr.f32.gmra.mrb[122].mxu0 %v1181_v29  ;;  %v1185_v44 = vmax.f32 %v958_v31, 0.0  ;;  %v1955_v29 = vld [vmem:[#allocation11 + $0xf8] sm:$0xff]  ;;  %v1950_v31 = vld [vmem:[#allocation11 + $0xd0] sm:$0xff]  ;;  %v1968_v38 = vld [vmem:[#allocation11 + $0x160] sm:$0xff] }
 0x212   :  { %v1187_v41 = vmax.f32 %v1119_v36, 0.0  ;;  %v1186_v42 = vmax.f32 %v960_v37, 0.0  ;;  %1893 = vmatmul.mubr.f32.gmra.mrb[122].mxu1 %v1183_v23  ;;  %v963_v43 = vpop.f32.mrb[62].mxu0  ;;  %v1947_v23 = vld [vmem:[#allocation11 + $0xb8] sm:$0xff]  ;;  %v4130_v30 = vpack.c.bf16 %v1955_v29, %v1951_v28  ;;  %v4132_v36 = vpack.c.bf16 %v1954_v32, %v1950_v31  ;;  %v1982_v15 = vld [vmem:[#allocation11 + $0x1d0] sm:$0xff]  ;;  %v2397_v31 = vld [vmem:[#allocation13 + $0x8] sm:$0xff] }
 0x213   :  { %v1188_v45 = vmax.f32 %v1121_v40, 0.0  ;;  %v964_v46 = vadd.f32 %v963_v43, %v4920_v3  ;;  %v1124_v47 = vpop.f32.mrb[62].mxu1  ;;  %v965_v48 = vpop.f32.mrb[63].mxu0  ;;  %v4126_v24 = vpack.c.bf16 %v1947_v23, %v1943_v22  ;;  %v4106_v37 = vpack.c.bf16 %v1969_v34, %v1965_v33  ;;  %v1959_v40 = vld [vmem:[#allocation11 + $0x118] sm:$0xff]  ;;  %v1958_v43 = vld [vmem:[#allocation11 + $0x110] sm:$0xff]  ;;  %v2400_v32 = vld [vmem:[#allocation13 + $0x20] sm:$0xff] }
 0x214   :  { %v1125_v49 = vadd.f32 %v1124_v47, %v4925_v7  ;;  %v966_v50 = vadd.f32 %v965_v48, %v4928_v8  ;;  %v1126_v51 = vpop.f32.mrb[63].mxu1  ;;  %1752 = vmatprep.mubr.f32.mxu0 %v1186_v42  ;;  %v4100_v7 = vpack.c.bf16 %v1952_v5, %v1948_v57  ;;  %v1931_v8 = vld [vmem:[#allocation11 + $0x38] sm:$0xff]  ;;  %v4108_v39 = vpack.c.bf16 %v1968_v38, %v1964_v35  ;;  %v1974_v5 = vld [vmem:[#allocation11 + $0x190] sm:$0xff] }
 0x215   :  { %v1127_v52 = vadd.f32 %v1126_v51, %v4932_v63  ;;  %1897 = vmatprep.mubr.f32.mxu1 %v1188_v45  ;;  %1753 = vmatmul.mubr.f32.gmra.mrb[124].mxu0 %v1185_v44  ;;  %v1189_v3 = vmax.f32 %v964_v46, 0.0  ;;  %v4118_v9 = vpack.c.bf16 %v1931_v8, %v1927_v6  ;;  %v1926_v63 = vld [vmem:[#allocation11 + $0x10] sm:$0xff]  ;;  %v1967_v46 = vld [vmem:[#allocation11 + $0x158] sm:$0xff]  ;;  %v1973_v51 = vld [vmem:[#allocation11 + $0x188] sm:$0xff]  ;;  %v4150_v35 = vpack.c.bf16 %v2400_v32, %v2397_v31 }
 0x216   :  { %v1191_v53 = vmax.f32 %v1125_v49, 0.0  ;;  %v1190_v54 = vmax.f32 %v966_v50, 0.0  ;;  %1898 = vmatmul.mubr.f32.gmra.mrb[124].mxu1 %v1187_v41  ;;  %v4120_v11 = vpack.c.bf16 %v1930_v10, %v1926_v63  ;;  %4101 = vmatpush1.bf16.msra.mxu0 %v4100_v7  ;;  %v1963_v41 = vld [vmem:[#allocation11 + $0x138] sm:$0xff]  ;;  %v1962_v44 = vld [vmem:[#allocation11 + $0x130] sm:$0xff]  ;;  %v1981_v8 = vld [vmem:[#allocation11 + $0x1c8] sm:$0xff] }
 0x217   :  { %v1192_v59 = vmax.f32 %v1127_v52, 0.0  ;;  %4119 = vmatprep.subr.bf16.mxu1 %v4118_v9  ;;  %4103 = vmatprep.subr.bf16.mxu0 %v4102_v19  ;;  %v4134_v42 = vpack.c.bf16 %v1963_v41, %v1959_v40  ;;  %v4136_v45 = vpack.c.bf16 %v1962_v44, %v1958_v43  ;;  %v1971_v47 = vld [vmem:[#allocation11 + $0x178] sm:$0xff]  ;;  %v1966_v49 = vld [vmem:[#allocation11 + $0x150] sm:$0xff]  ;;  %v1977_v52 = vld [vmem:[#allocation11 + $0x1a8] sm:$0xff] }
 0x218   :  { %1757 = vmatprep.mubr.f32.mxu0 %v1190_v54  ;;  %4121 = vmatpush1.bf16.msra.mxu1 %v4120_v11  ;;  %v4138_v48 = vpack.c.bf16 %v1971_v47, %v1967_v46  ;;  %v1970_v50 = vld [vmem:[#allocation11 + $0x170] sm:$0xff]  ;;  %v4110_v55 = vpack.c.bf16 %v1977_v52, %v1973_v51  ;;  %v1985_v9 = vld [vmem:[#allocation11 + $0x1e8] sm:$0xff]  ;;  %v1983_v63 = vld [vmem:[#allocation11 + $0x1d8] sm:$0xff] }
 0x219   :  { %1902 = vmatprep.mubr.f32.mxu1 %v1192_v59  ;;  %1758 = vmatmul.mubr.f32.gmra.mrb[126].mxu0 %v1189_v3  ;;  %v4140_v54 = vpack.c.bf16 %v1970_v50, %v1966_v49  ;;  %v1975_v3 = vld [vmem:[#allocation11 + $0x198] sm:$0xff]  ;;  %v1978_v7 = vld [vmem:[#allocation11 + $0x1b0] sm:$0xff]  ;;  %v4114_v10 = vpack.c.bf16 %v1985_v9, %v1981_v8  ;;  %v1980_v11 = vld [vmem:[#allocation11 + $0x1c0] sm:$0xff]  ;;  %v4146_v14 = vpack.c.bf16 %v1987_v1, %v1983_v63 }
 0x21a   :  { %1903 = vmatmul.mubr.f32.gmra.mrb[126].mxu1 %v1191_v53  ;;  %2074 = vmatprep.mubr.f32.mxu0 %v4624_v12  ;;  %v1972_v53 = vld [vmem:[#allocation11 + $0x180] sm:$0xff]  ;;  %v1979_v59 = vld [vmem:[#allocation11 + $0x1b8] sm:$0xff]  ;;  %v4144_v6 = vpack.c.bf16 %v1978_v7, %v1974_v5  ;;  %v1986_v16 = vld [vmem:[#allocation11 + $0x1f0] sm:$0xff] }
 0x21b   :  { %2235 = vmatprep.mubr.f32.mxu1 %v4624_v12  ;;  %4123 = vmatprep.subr.bf16.mxu1 %v4122_v13  ;;  %v4112_v57 = vpack.c.bf16 %v1976_v56, %v1972_v53  ;;  %v4142_v4 = vpack.c.bf16 %v1979_v59, %v1975_v3  ;;  %v4116_v13 = vpack.c.bf16 %v1984_v0, %v1980_v11  ;;  %v5003_v19 = vld [vmem:[%s5407_s7] ss:$0 sm:$0xff]  ;;  %v2446_v33 = vld [vmem:[#allocation13 + $0x190] sm:$0xff] }
 0x21c   :  { %4125 = vmatpush1.bf16.msra.mxu1 %v4124_v2  ;;  %4105 = vmatpush1.bf16.msra.mxu0 %v4104_v21  ;;  %v4148_v17 = vpack.c.bf16 %v1986_v16, %v1982_v15 }
 0x21d   :  { %4127 = vmatprep.subr.bf16.mxu1 %v4126_v24  ;;  %4107 = vmatprep.subr.bf16.mxu0 %v4106_v37 }
 0x220   :  { %4129 = vmatpush1.bf16.msra.mxu1 %v4128_v27  ;;  %4109 = vmatpush1.bf16.msra.mxu0 %v4108_v39 }
 0x221   :  { %4131 = vmatprep.subr.bf16.mxu1 %v4130_v30  ;;  %4111 = vmatprep.subr.bf16.mxu0 %v4110_v55 }
 0x224   :  { %4133 = vmatpush1.bf16.msra.mxu1 %v4132_v36  ;;  %4113 = vmatpush1.bf16.msra.mxu0 %v4112_v57  ;;  %v2449_v36 = vld [vmem:[#allocation13 + $0x1a8] sm:$0xff] }
 0x225   :  { %4135 = vmatprep.subr.bf16.mxu1 %v4134_v42  ;;  %4115 = vmatprep.subr.bf16.mxu0 %v4114_v10  ;;  %v4278_v39 = vpack.c.bf16 %v2449_v36, %v2446_v33 }
 0x228   :  { %4137 = vmatpush1.bf16.msra.mxu1 %v4136_v45  ;;  %4117 = vmatpush1.bf16.msra.mxu0 %v4116_v13 }
 0x229   :  { %4139 = vmatprep.subr.bf16.mxu1 %v4138_v48  ;;  %4151 = vmatprep.subr.bf16.mxu0 %v4150_v35 }
 0x22c   :  { %4141 = vmatpush1.bf16.msra.mxu1 %v4140_v54 }
 0x22d   :  { %4143 = vmatprep.subr.bf16.mxu1 %v4142_v4 }
 0x230   :  { %4145 = vmatpush1.bf16.msra.mxu1 %v4144_v6 }
 0x231   :  { %4147 = vmatprep.subr.bf16.mxu1 %v4146_v14 }
 0x234   :  { %4149 = vmatpush1.bf16.msra.mxu1 %v4148_v17 }
 0x235   :  { %4279 = vmatprep.subr.bf16.mxu1 %v4278_v39 }
 0x270   :  { %v3318_v18 = vpop.f32.mrb[64].mxu0 }
 0x271   :  { %v3398_v2 = vpop.f32.mrb[64].mxu1  ;;  %v3319_v20 = vpop.f32.mrb[65].mxu0 }
 0x272   :  { %v3320_v21 = vadd.f32 %v3319_v20, %v3318_v18  ;;  %v3399_v22 = vpop.f32.mrb[65].mxu1 }
 0x273   :  { %v3400_v23 = vadd.f32 %v3399_v22, %v3398_v2 }
 0x274   :  { %v1395_v24 = vadd.f32 %v3320_v21, %v5003_v19  ;;  %v3321_v25 = vpop.f32.mrb[66].mxu0 }
 0x275   :  { %v3401_v26 = vpop.f32.mrb[66].mxu1  ;;  %v3322_v27 = vpop.f32.mrb[67].mxu0 }
 0x276   :  { %v5006_v28 = vadd.f32 %v3400_v23, %v1395_v24  ;;  %v3323_v29 = vadd.f32 %v3322_v27, %v3321_v25  ;;  %v3402_v30 = vpop.f32.mrb[67].mxu1 }
 0x277   :  { %v3403_v34 = vadd.f32 %v3402_v30, %v3401_v26 }
 0x278   :  { %v1400_v37 = vadd.f32 %v3323_v29, %v5003_v19  ;;  %v3324_v38 = vpop.f32.mrb[68].mxu0 }
 0x279   :  { %v3404_v40 = vpop.f32.mrb[68].mxu1  ;;  %v3325_v41 = vpop.f32.mrb[69].mxu0 }
 0x27a   :  { %v5009_v42 = vadd.f32 %v3403_v34, %v1400_v37  ;;  %v3326_v43 = vadd.f32 %v3325_v41, %v3324_v38  ;;  %v3405_v44 = vpop.f32.mrb[69].mxu1 }
 0x27b   :  { %v3406_v45 = vadd.f32 %v3405_v44, %v3404_v40 }
 0x27c   :  { %v1405_v46 = vadd.f32 %v3326_v43, %v5003_v19  ;;  %v3327_v47 = vpop.f32.mrb[70].mxu0 }
 0x27d   :  { %v3407_v48 = vpop.f32.mrb[70].mxu1  ;;  %v3328_v49 = vpop.f32.mrb[71].mxu0 }
 0x27e   :  { %v5012_v50 = vadd.f32 %v3406_v45, %v1405_v46  ;;  %v3329_v51 = vadd.f32 %v3328_v49, %v3327_v47  ;;  %v3408_v52 = vpop.f32.mrb[71].mxu1 }
 0x27f   :  { %v3409_v53 = vadd.f32 %v3408_v52, %v3407_v48 }
 0x280   :  { %v1410_v54 = vadd.f32 %v3329_v51, %v5003_v19  ;;  %v3330_v55 = vpop.f32.mrb[72].mxu0 }
 0x281   :  { %v3410_v56 = vpop.f32.mrb[72].mxu1  ;;  %v3331_v57 = vpop.f32.mrb[73].mxu0 }
 0x282   :  { %v5015_v3 = vadd.f32 %v3409_v53, %v1410_v54  ;;  %v3332_v59 = vadd.f32 %v3331_v57, %v3330_v55  ;;  %v3411_v4 = vpop.f32.mrb[73].mxu1 }
 0x283   :  { %v3412_v5 = vadd.f32 %v3411_v4, %v3410_v56 }
 0x284   :  { %v1415_v7 = vadd.f32 %v3332_v59, %v5003_v19  ;;  %v3333_v6 = vpop.f32.mrb[74].mxu0 }
 0x285   :  { %v3413_v8 = vpop.f32.mrb[74].mxu1  ;;  %v3334_v9 = vpop.f32.mrb[75].mxu0 }
 0x286   :  { %v5018_v63 = vadd.f32 %v3412_v5, %v1415_v7  ;;  %v3335_v10 = vadd.f32 %v3334_v9, %v3333_v6  ;;  %v3414_v11 = vpop.f32.mrb[75].mxu1 }
 0x287   :  { %v3415_v0 = vadd.f32 %v3414_v11, %v3413_v8 }
 0x288   :  { %v1420_v1 = vadd.f32 %v3335_v10, %v5003_v19  ;;  %v3336_v13 = vpop.f32.mrb[76].mxu0 }
 0x289   :  { %v3416_v14 = vpop.f32.mrb[76].mxu1  ;;  %v3337_v15 = vpop.f32.mrb[77].mxu0 }
 0x28a   :  { %v5021_v16 = vadd.f32 %v3415_v0, %v1420_v1  ;;  %v3338_v17 = vadd.f32 %v3337_v15, %v3336_v13  ;;  %v3417_v18 = vpop.f32.mrb[77].mxu1 }
 0x28b   :  { %v3418_v2 = vadd.f32 %v3417_v18, %v3416_v14 }
 0x28c   :  { %v1425_v20 = vadd.f32 %v3338_v17, %v5003_v19  ;;  %v3339_v21 = vpop.f32.mrb[78].mxu0 }
 0x28d   :  { %v3419_v22 = vpop.f32.mrb[78].mxu1  ;;  %v3340_v23 = vpop.f32.mrb[79].mxu0 }
 0x28e   :  { %v5024_v24 = vadd.f32 %v3418_v2, %v1425_v20  ;;  %v3341_v25 = vadd.f32 %v3340_v23, %v3339_v21  ;;  %v3420_v26 = vpop.f32.mrb[79].mxu1 }
 0x28f   :  { %v3421_v27 = vadd.f32 %v3420_v26, %v3419_v22 }
 0x290   :  { %v1430_v29 = vadd.f32 %v3341_v25, %v5003_v19  ;;  %v3342_v30 = vpop.f32.mrb[80].mxu0 }
 0x291   :  { %v3422_v31 = vpop.f32.mrb[80].mxu1  ;;  %v3343_v32 = vpop.f32.mrb[81].mxu0 }
 0x292   :  { %v5027_v33 = vadd.f32 %v3421_v27, %v1430_v29  ;;  %v3344_v34 = vadd.f32 %v3343_v32, %v3342_v30  ;;  %v3423_v35 = vpop.f32.mrb[81].mxu1 }
 0x293   :  { %v3424_v36 = vadd.f32 %v3423_v35, %v3422_v31 }
 0x294   :  { %v1435_v37 = vadd.f32 %v3344_v34, %v5003_v19  ;;  %v3345_v38 = vpop.f32.mrb[82].mxu0 }
 0x295   :  { %v3425_v39 = vpop.f32.mrb[82].mxu1  ;;  %v3346_v40 = vpop.f32.mrb[83].mxu0 }
 0x296   :  { %v5030_v41 = vadd.f32 %v3424_v36, %v1435_v37  ;;  %v3347_v43 = vadd.f32 %v3346_v40, %v3345_v38  ;;  %v3426_v44 = vpop.f32.mrb[83].mxu1 }
 0x297   :  { %v3427_v45 = vadd.f32 %v3426_v44, %v3425_v39 }
 0x298   :  { %v1440_v46 = vadd.f32 %v3347_v43, %v5003_v19  ;;  %v3348_v47 = vpop.f32.mrb[84].mxu0 }
 0x299   :  { %v3428_v48 = vpop.f32.mrb[84].mxu1  ;;  %v3349_v49 = vpop.f32.mrb[85].mxu0 }
 0x29a   :  { %v5033_v51 = vadd.f32 %v3427_v45, %v1440_v46  ;;  %v3350_v52 = vadd.f32 %v3349_v49, %v3348_v47  ;;  %v3429_v53 = vpop.f32.mrb[85].mxu1 }
 0x29b   :  { %v3430_v54 = vadd.f32 %v3429_v53, %v3428_v48 }
 0x29c   :  { %v1445_v55 = vadd.f32 %v3350_v52, %v5003_v19  ;;  %v3351_v56 = vpop.f32.mrb[86].mxu0 }
 0x29d   :  { %v3431_v57 = vpop.f32.mrb[86].mxu1  ;;  %v3352_v59 = vpop.f32.mrb[87].mxu0 }
 0x29e   :  { %v5036_v4 = vadd.f32 %v3430_v54, %v1445_v55  ;;  %v3353_v5 = vadd.f32 %v3352_v59, %v3351_v56  ;;  %v3432_v7 = vpop.f32.mrb[87].mxu1  ;;  %v2399_v59 = vld [vmem:[#allocation13 + $0x18] sm:$0xff] }
 0x29f   :  { %v3433_v6 = vadd.f32 %v3432_v7, %v3431_v57  ;;  %v2396_v57 = vld [vmem:[#allocation13] sm:$0xff] }
 0x2a0   :  { %v1450_v8 = vadd.f32 %v3353_v5, %v5003_v19  ;;  %v3354_v9 = vpop.f32.mrb[88].mxu0 }
 0x2a1   :  { %v3434_v10 = vpop.f32.mrb[88].mxu1  ;;  %v3355_v11 = vpop.f32.mrb[89].mxu0 }
 0x2a2   :  { %v5039_v0 = vadd.f32 %v3433_v6, %v1450_v8  ;;  %v3356_v1 = vadd.f32 %v3355_v11, %v3354_v9  ;;  %v3435_v13 = vpop.f32.mrb[89].mxu1  ;;  %v2398_v6 = vld [vmem:[#allocation13 + $0x10] sm:$0xff]  ;;  %v2401_v8 = vld [vmem:[#allocation13 + $0x28] sm:$0xff]  ;;  %v2403_v9 = vld [vmem:[#allocation13 + $0x38] sm:$0xff] }
 0x2a3   :  { %v3436_v14 = vadd.f32 %v3435_v13, %v3434_v10  ;;  %v2452_v13 = vld [vmem:[#allocation13 + $0x1c0] sm:$0xff] }
 0x2a4   :  { %v1455_v15 = vadd.f32 %v3356_v1, %v5003_v19  ;;  %v3357_v17 = vpop.f32.mrb[90].mxu0  ;;  %v2406_v1 = vld [vmem:[#allocation13 + $0x50] sm:$0xff] }
 0x2a5   :  { %v3437_v18 = vpop.f32.mrb[90].mxu1  ;;  %v3358_v2 = vpop.f32.mrb[91].mxu0 }
 0x2a6   :  { %v5042_v20 = vadd.f32 %v3436_v14, %v1455_v15  ;;  %v3359_v21 = vadd.f32 %v3358_v2, %v3357_v17  ;;  %v3438_v22 = vpop.f32.mrb[91].mxu1  ;;  %v2455_v14 = vld [vmem:[#allocation13 + $0x1d8] sm:$0xff] }
 0x2a7   :  { %v3439_v23 = vadd.f32 %v3438_v22, %v3437_v18  ;;  %v2402_v22 = vld [vmem:[#allocation13 + $0x30] sm:$0xff] }
 0x2a8   :  { %v1460_v25 = vadd.f32 %v3359_v21, %v5003_v19  ;;  %v3360_v26 = vpop.f32.mrb[92].mxu0  ;;  %v4280_v21 = vpack.c.bf16 %v2401_v8, %v2398_v6 }
 0x2a9   :  { %v3440_v27 = vpop.f32.mrb[92].mxu1  ;;  %v3361_v29 = vpop.f32.mrb[93].mxu0 }
 0x2aa   :  { %v5045_v30 = vadd.f32 %v3439_v23, %v1460_v25  ;;  %v3362_v31 = vadd.f32 %v3361_v29, %v3360_v26  ;;  %v3441_v32 = vpop.f32.mrb[93].mxu1  ;;  %v2405_v23 = vld [vmem:[#allocation13 + $0x48] sm:$0xff] }
 0x2ab   :  { %v3442_v34 = vadd.f32 %v3441_v32, %v3440_v27  ;;  %v4154_v27 = vpack.c.bf16 %v2406_v1, %v2403_v9  ;;  %v2409_v29 = vld [vmem:[#allocation13 + $0x68] sm:$0xff]  ;;  %v2404_v32 = vld [vmem:[#allocation13 + $0x40] sm:$0xff] }
 0x2ac   :  { %v1465_v35 = vadd.f32 %v3362_v31, %v5003_v19  ;;  %v3363_v36 = vpop.f32.mrb[94].mxu0  ;;  %v4282_v31 = vpack.c.bf16 %v2455_v14, %v2452_v13 }
 0x2ad   :  { %v3443_v37 = vpop.f32.mrb[94].mxu1  ;;  %v3364_v38 = vpop.f32.mrb[95].mxu0 }
 0x2ae   :  { %v5048_v39 = vadd.f32 %v3442_v34, %v1465_v35  ;;  %v3365_v40 = vadd.f32 %v3364_v38, %v3363_v36  ;;  %v3444_v43 = vpop.f32.mrb[95].mxu1  ;;  %v2407_v34 = vld [vmem:[#allocation13 + $0x58] sm:$0xff]  ;;  %v2412_v38 = vld [vmem:[#allocation13 + $0x80] sm:$0xff] }
 0x2af   :  { %v3445_v44 = vadd.f32 %v3444_v43, %v3443_v37 }
 0x2b0   :  { %v1470_v45 = vadd.f32 %v3365_v40, %v5003_v19  ;;  %v3478_v46 = vpop.f32.mrb[96].mxu0  ;;  %v2458_v40 = vld [vmem:[#allocation13 + $0x1f0] sm:$0xff] }
 0x2b1   :  { %v3558_v47 = vpop.f32.mrb[96].mxu1  ;;  %v3479_v48 = vpop.f32.mrb[97].mxu0 }
 0x2b2   :  { %v5051_v49 = vadd.f32 %v3445_v44, %v1470_v45  ;;  %v3480_v52 = vadd.f32 %v3479_v48, %v3478_v46  ;;  %v3559_v53 = vpop.f32.mrb[97].mxu1  ;;  %v2408_v48 = vld [vmem:[#allocation13 + $0x60] sm:$0xff] }
 0x2b3   :  { %v3560_v54 = vadd.f32 %v3559_v53, %v3558_v47  ;;  %v4156_v47 = vpack.c.bf16 %v2405_v23, %v2402_v22  ;;  %v4284_v53 = vpack.c.bf16 %v2407_v34, %v2404_v32  ;;  %v2421_v23 = vld [vmem:[#allocation13 + $0xc8] sm:$0xff]  ;;  %v2470_v34 = vld [vmem:[#allocation13 + $0x250] sm:$0xff] }
 0x2b4   :  { %v1685_v55 = vadd.f32 %v3480_v52, %v5006_v28  ;;  %v3481_v56 = vpop.f32.mrb[98].mxu0  ;;  %v4152_v28 = vpack.c.bf16 %v2399_v59, %v2396_v57  ;;  %v2411_v52 = vld [vmem:[#allocation13 + $0x78] sm:$0xff] }
 0x2b5   :  { %v3561_v5 = vpop.f32.mrb[98].mxu1  ;;  %v3482_v7 = vpop.f32.mrb[99].mxu0  ;;  %v2415_v57 = vld [vmem:[#allocation13 + $0x98] sm:$0xff] }
 0x2b6   :  { %v1830_v10 = vadd.f32 %v3560_v54, %v1685_v55  ;;  %v3483_v19 = vadd.f32 %v3482_v7, %v3481_v56  ;;  %v3562_v11 = vpop.f32.mrb[99].mxu1  ;;  %v4158_v56 = vpack.c.bf16 %v2412_v38, %v2409_v29  ;;  %v2413_v7 = vld [vmem:[#allocation13 + $0x88] sm:$0xff] }
 0x2b7   :  { %v3563_v15 = vadd.f32 %v3562_v11, %v3561_v5  ;;  %v2410_v5 = vld [vmem:[#allocation13 + $0x70] sm:$0xff] }
 0x2b8   :  { %v1908_v17 = vmul.f32 0.5, %v1830_v10  ;;  %v1690_v18 = vadd.f32 %v3483_v19, %v5009_v42  ;;  %v3484_v2 = vpop.f32.mrb[100].mxu0  ;;  %v2461_v42 = vld [vmem:[#allocation13 + $0x208] sm:$0xff]  ;;  %v2464_v10 = vld [vmem:[#allocation13 + $0x220] sm:$0xff]  ;;  %v2467_v19 = vld [vmem:[#allocation13 + $0x238] sm:$0xff] }
 0x2b9   :  { %v3564_v25 = vpop.f32.mrb[100].mxu1  ;;  %v3485_v26 = vpop.f32.mrb[101].mxu0  ;;  %v4286_v59 = vpack.c.bf16 %v2461_v42, %v2458_v40 }
 0x2ba   :  { %v1835_v35 = vadd.f32 %v3563_v15, %v1690_v18  ;;  %v3486_v36 = vadd.f32 %v3485_v26, %v3484_v2  ;;  %v3565_v37 = vpop.f32.mrb[101].mxu1  ;;  %2075 = vmatmul.mubr.f32.vlgmr.msra.gmra.mrb[128].mxu0 %v1908_v17  ;;  %2236 = vmatmul.mubr.f32.vlgmr.msra.gmra.mrb[128].mxu1 %v1908_v17  ;;  %v4160_v15 = vpack.c.bf16 %v2411_v52, %v2408_v48  ;;  %v2414_v17 = vld [vmem:[#allocation13 + $0x90] sm:$0xff]  ;;  %v2417_v18 = vld [vmem:[#allocation13 + $0xa8] sm:$0xff]  ;;  %v2416_v26 = vld [vmem:[#allocation13 + $0xa0] sm:$0xff] }
 0x2bb   :  { %v3566_v43 = vadd.f32 %v3565_v37, %v3564_v25  ;;  %2080 = vmatprep.mubr.f32.mxu0 %v4624_v12  ;;  %2241 = vmatprep.mubr.f32.mxu1 %v4624_v12  ;;  %v4288_v2 = vpack.c.bf16 %v2413_v7, %v2410_v5  ;;  %v4290_v25 = vpack.c.bf16 %v2467_v19, %v2464_v10  ;;  %v2427_v52 = vld [vmem:[#allocation13 + $0xf8] sm:$0xff]  ;;  %v2476_v5 = vld [vmem:[#allocation13 + $0x280] sm:$0xff]  ;;  %v2426_v19 = vld [vmem:[#allocation13 + $0xf0] sm:$0xff] }
 0x2bc   :  { %v1909_v44 = vmul.f32 0.5, %v1835_v35  ;;  %v1695_v45 = vadd.f32 %v3486_v36, %v5012_v50  ;;  %v3487_v46 = vpop.f32.mrb[102].mxu0  ;;  %4153 = vmatpush1.bf16.msra.mxu0 %v4152_v28  ;;  %4281 = vmatpush3.bf16.msra.mxu1 %v4280_v21  ;;  %v2418_v50 = vld [vmem:[#allocation13 + $0xb0] sm:$0xff]  ;;  %v2473_v35 = vld [vmem:[#allocation13 + $0x268] sm:$0xff]  ;;  %v4164_v42 = vpack.c.bf16 %v2417_v18, %v2414_v17  ;;  %v2479_v7 = vld [vmem:[#allocation13 + $0x298] sm:$0xff] }
 0x2bd   :  { %v3567_v54 = vpop.f32.mrb[102].mxu1  ;;  %v3488_v55 = vpop.f32.mrb[103].mxu0  ;;  %4155 = vmatprep.subr.bf16.mxu0 %v4154_v27  ;;  %4283 = vmatprep.subr.bf16.mxu1 %v4282_v31  ;;  %v4162_v22 = vpack.c.bf16 %v2418_v50, %v2415_v57  ;;  %v2419_v27 = vld [vmem:[#allocation13 + $0xb8] sm:$0xff]  ;;  %v2433_v17 = vld [vmem:[#allocation13 + $0x128] sm:$0xff]  ;;  %v4298_v18 = vpack.c.bf16 %v2479_v7, %v2476_v5 }
 0x2be   :  { %v1840_v6 = vadd.f32 %v3566_v43, %v1695_v45  ;;  %v3489_v8 = vadd.f32 %v3488_v55, %v3487_v46  ;;  %v3568_v9 = vpop.f32.mrb[103].mxu1  ;;  %2081 = vmatmul.mubr.f32.gmra.mrb[130].mxu0 %v1909_v44  ;;  %2242 = vmatmul.mubr.f32.gmra.mrb[130].mxu1 %v1909_v44  ;;  %v2420_v43 = vld [vmem:[#allocation13 + $0xc0] sm:$0xff]  ;;  %v2423_v44 = vld [vmem:[#allocation13 + $0xd8] sm:$0xff]  ;;  %v4292_v45 = vpack.c.bf16 %v2419_v27, %v2416_v26  ;;  %v2425_v55 = vld [vmem:[#allocation13 + $0xe8] sm:$0xff] }
 0x2bf   :  { %v3569_v11 = vadd.f32 %v3568_v9, %v3567_v54  ;;  %2086 = vmatprep.mubr.f32.mxu0 %v4624_v12  ;;  %2247 = vmatprep.mubr.f32.mxu1 %v4624_v12  ;;  %v2422_v54 = vld [vmem:[#allocation13 + $0xd0] sm:$0xff]  ;;  %v4168_v10 = vpack.c.bf16 %v2423_v44, %v2420_v43  ;;  %v2485_v26 = vld [vmem:[#allocation13 + $0x2c8] sm:$0xff] }
 0x2c0   :  { %v1910_v1 = vmul.f32 0.5, %v1840_v6  ;;  %v1700_v13 = vadd.f32 %v3489_v8, %v5015_v3  ;;  %v3490_v14 = vpop.f32.mrb[104].mxu0  ;;  %4157 = vmatpush1.bf16.msra.mxu0 %v4156_v47  ;;  %4285 = vmatpush3.bf16.msra.mxu1 %v4284_v53  ;;  %v2424_v3 = vld [vmem:[#allocation13 + $0xe0] sm:$0xff]  ;;  %v4294_v53 = vpack.c.bf16 %v2473_v35, %v2470_v34  ;;  %v2435_v35 = vld [vmem:[#allocation13 + $0x138] sm:$0xff]  ;;  %v2434_v44 = vld [vmem:[#allocation13 + $0x130] sm:$0xff] }
 0x2c1   :  { %v3570_v28 = vpop.f32.mrb[104].mxu1  ;;  %v3491_v21 = vpop.f32.mrb[105].mxu0  ;;  %4159 = vmatprep.subr.bf16.mxu0 %v4158_v56  ;;  %4287 = vmatprep.subr.bf16.mxu1 %v4286_v59  ;;  %v4166_v48 = vpack.c.bf16 %v2424_v3, %v2421_v23  ;;  %v2432_v34 = vld [vmem:[#allocation13 + $0x120] sm:$0xff] }
 0x2c2   :  { %v1845_v29 = vadd.f32 %v3569_v11, %v1700_v13  ;;  %v3492_v31 = vadd.f32 %v3491_v21, %v3490_v14  ;;  %v3571_v32 = vpop.f32.mrb[105].mxu1  ;;  %2087 = vmatmul.mubr.f32.gmra.mrb[132].mxu0 %v1910_v1  ;;  %2248 = vmatmul.mubr.f32.gmra.mrb[132].mxu1 %v1910_v1  ;;  %v2429_v11 = vld [vmem:[#allocation13 + $0x108] sm:$0xff]  ;;  %v4296_v1 = vpack.c.bf16 %v2425_v55, %v2422_v54 }
 0x2c3   :  { %v3572_v36 = vadd.f32 %v3571_v32, %v3570_v28  ;;  %2092 = vmatprep.mubr.f32.mxu0 %v4624_v12  ;;  %2253 = vmatprep.mubr.f32.mxu1 %v4624_v12  ;;  %v2431_v28 = vld [vmem:[#allocation13 + $0x118] sm:$0xff]  ;;  %v4172_v3 = vpack.c.bf16 %v2429_v11, %v2426_v19 }
 0x2c4   :  { %v1911_v37 = vmul.f32 0.5, %v1845_v29  ;;  %v1705_v38 = vadd.f32 %v3492_v31, %v5018_v63  ;;  %v3493_v40 = vpop.f32.mrb[106].mxu0  ;;  %4161 = vmatpush1.bf16.msra.mxu0 %v4160_v15  ;;  %4289 = vmatpush3.bf16.msra.mxu1 %v4288_v2  ;;  %v2430_v63 = vld [vmem:[#allocation13 + $0x110] sm:$0xff]  ;;  %v2428_v2 = vld [vmem:[#allocation13 + $0x100] sm:$0xff] }
 0x2c5   :  { %v3573_v46 = vpop.f32.mrb[106].mxu1  ;;  %v3494_v47 = vpop.f32.mrb[107].mxu0  ;;  %4163 = vmatprep.subr.bf16.mxu0 %v4162_v22  ;;  %4291 = vmatprep.subr.bf16.mxu1 %v4290_v25  ;;  %v4170_v15 = vpack.c.bf16 %v2430_v63, %v2427_v52  ;;  %v2482_v25 = vld [vmem:[#allocation13 + $0x2b0] sm:$0xff]  ;;  %v2488_v52 = vld [vmem:[#allocation13 + $0x2e0] sm:$0xff] }
 0x2c6   :  { %v1850_v56 = vadd.f32 %v3572_v36, %v1705_v38  ;;  %v3495_v57 = vadd.f32 %v3494_v47, %v3493_v40  ;;  %v3574_v59 = vpop.f32.mrb[107].mxu1  ;;  %2093 = vmatmul.mubr.f32.gmra.mrb[134].mxu0 %v1911_v37  ;;  %2254 = vmatmul.mubr.f32.gmra.mrb[134].mxu1 %v1911_v37  ;;  %v4300_v36 = vpack.c.bf16 %v2431_v28, %v2428_v2 }
 0x2c7   :  { %v3575_v6 = vadd.f32 %v3574_v59, %v3573_v46  ;;  %2098 = vmatprep.mubr.f32.mxu0 %v4624_v12  ;;  %2259 = vmatprep.mubr.f32.mxu1 %v4624_v12  ;;  %v4302_v43 = vpack.c.bf16 %v2485_v26, %v2482_v25  ;;  %v4176_v59 = vpack.c.bf16 %v2435_v35, %v2432_v34 }
 0x2c8   :  { %v1912_v8 = vmul.f32 0.5, %v1850_v56  ;;  %v1710_v9 = vadd.f32 %v3495_v57, %v5021_v16  ;;  %v3496_v50 = vpop.f32.mrb[108].mxu0  ;;  %4165 = vmatpush1.bf16.msra.mxu0 %v4164_v42  ;;  %4293 = vmatpush3.bf16.msra.mxu1 %v4292_v45  ;;  %v2436_v16 = vld [vmem:[#allocation13 + $0x140] sm:$0xff]  ;;  %v2439_v42 = vld [vmem:[#allocation13 + $0x158] sm:$0xff]  ;;  %v2437_v45 = vld [vmem:[#allocation13 + $0x148] sm:$0xff] }
 0x2c9   :  { %v3576_v13 = vpop.f32.mrb[108].mxu1  ;;  %v3497_v14 = vpop.f32.mrb[109].mxu0  ;;  %4167 = vmatprep.subr.bf16.mxu0 %v4166_v48  ;;  %4295 = vmatprep.subr.bf16.mxu1 %v4294_v53  ;;  %v4174_v40 = vpack.c.bf16 %v2436_v16, %v2433_v17  ;;  %v2491_v53 = vld [vmem:[#allocation13 + $0x2f8] sm:$0xff]  ;;  %v4304_v63 = vpack.c.bf16 %v2437_v45, %v2434_v44  ;;  %v2457_v45 = vld [vmem:[#allocation13 + $0x1e8] sm:$0xff] }
 0x2ca   :  { %v1855_v21 = vadd.f32 %v3575_v6, %v1710_v9  ;;  %v3498_v22 = vadd.f32 %v3497_v14, %v3496_v50  ;;  %v3577_v23 = vpop.f32.mrb[109].mxu1  ;;  %2099 = vmatmul.mubr.f32.gmra.mrb[136].mxu0 %v1912_v8  ;;  %2260 = vmatmul.mubr.f32.gmra.mrb[136].mxu1 %v1912_v8  ;;  %v2438_v8 = vld [vmem:[#allocation13 + $0x150] sm:$0xff]  ;;  %v2441_v9 = vld [vmem:[#allocation13 + $0x168] sm:$0xff]  ;;  %v4306_v50 = vpack.c.bf16 %v2491_v53, %v2488_v52 }
 0x2cb   :  { %v3578_v27 = vadd.f32 %v3577_v23, %v3576_v13  ;;  %2104 = vmatprep.mubr.f32.mxu0 %v4624_v12  ;;  %2265 = vmatprep.mubr.f32.mxu1 %v4624_v12  ;;  %v2447_v23 = vld [vmem:[#allocation13 + $0x198] sm:$0xff] }
 0x2cc   :  { %v1913_v29 = vmul.f32 0.5, %v1855_v21  ;;  %v1715_v31 = vadd.f32 %v3498_v22, %v5024_v24  ;;  %v3499_v32 = vpop.f32.mrb[110].mxu0  ;;  %4169 = vmatpush1.bf16.msra.mxu0 %v4168_v10  ;;  %4297 = vmatpush3.bf16.msra.mxu1 %v4296_v1  ;;  %v2442_v24 = vld [vmem:[#allocation13 + $0x170] sm:$0xff]  ;;  %v2445_v1 = vld [vmem:[#allocation13 + $0x188] sm:$0xff]  ;;  %v2444_v22 = vld [vmem:[#allocation13 + $0x180] sm:$0xff] }
 0x2cd   :  { %v3579_v37 = vpop.f32.mrb[110].mxu1  ;;  %v3500_v38 = vpop.f32.mrb[111].mxu0  ;;  %4171 = vmatprep.subr.bf16.mxu0 %v4170_v15  ;;  %4299 = vmatprep.subr.bf16.mxu1 %v4298_v18  ;;  %v4178_v6 = vpack.c.bf16 %v2442_v24, %v2439_v42  ;;  %v4180_v18 = vpack.c.bf16 %v2441_v9, %v2438_v8  ;;  %v4184_v34 = vpack.c.bf16 %v2447_v23, %v2444_v22 }
 0x2ce   :  { %v1860_v46 = vadd.f32 %v3578_v27, %v1715_v31  ;;  %v3501_v47 = vadd.f32 %v3500_v38, %v3499_v32  ;;  %v3580_v48 = vpop.f32.mrb[111].mxu1  ;;  %2105 = vmatmul.mubr.f32.gmra.mrb[138].mxu0 %v1913_v29  ;;  %2266 = vmatmul.mubr.f32.gmra.mrb[138].mxu1 %v1913_v29  ;;  %v2451_v27 = vld [vmem:[#allocation13 + $0x1b8] sm:$0xff]  ;;  %v2454_v29 = vld [vmem:[#allocation13 + $0x1d0] sm:$0xff] }
 0x2cf   :  { %v3581_v54 = vadd.f32 %v3580_v48, %v3579_v37  ;;  %2110 = vmatprep.mubr.f32.mxu0 %v4624_v12  ;;  %2271 = vmatprep.mubr.f32.mxu1 %v4624_v12  ;;  %v4186_v37 = vpack.c.bf16 %v2454_v29, %v2451_v27  ;;  %v2450_v38 = vld [vmem:[#allocation13 + $0x1b0] sm:$0xff]  ;;  %v2468_v27 = vld [vmem:[#allocation13 + $0x240] sm:$0xff]  ;;  %v2471_v29 = vld [vmem:[#allocation13 + $0x258] sm:$0xff] }
 0x2d0   :  { %v1914_v55 = vmul.f32 0.5, %v1860_v46  ;;  %v1720_v56 = vadd.f32 %v3501_v47, %v5027_v33  ;;  %v3502_v57 = vpop.f32.mrb[112].mxu0  ;;  %4173 = vmatpush1.bf16.msra.mxu0 %v4172_v3  ;;  %4301 = vmatpush3.bf16.msra.mxu1 %v4300_v36  ;;  %v2448_v33 = vld [vmem:[#allocation13 + $0x1a0] sm:$0xff] }
 0x2d1   :  { %v3582_v5 = vpop.f32.mrb[112].mxu1  ;;  %v3503_v7 = vpop.f32.mrb[113].mxu0  ;;  %4175 = vmatprep.subr.bf16.mxu0 %v4174_v40  ;;  %4303 = vmatprep.subr.bf16.mxu1 %v4302_v43  ;;  %v4182_v21 = vpack.c.bf16 %v2448_v33, %v2445_v1  ;;  %v2453_v40 = vld [vmem:[#allocation13 + $0x1c8] sm:$0xff]  ;;  %v2460_v46 = vld [vmem:[#allocation13 + $0x200] sm:$0xff]  ;;  %v2462_v33 = vld [vmem:[#allocation13 + $0x210] sm:$0xff] }
 0x2d2   :  { %v1865_v10 = vadd.f32 %v3581_v54, %v1720_v56  ;;  %v3504_v19 = vadd.f32 %v3503_v7, %v3502_v57  ;;  %v3583_v11 = vpop.f32.mrb[113].mxu1  ;;  %2111 = vmatmul.mubr.f32.gmra.mrb[140].mxu0 %v1914_v55  ;;  %2272 = vmatmul.mubr.f32.gmra.mrb[140].mxu1 %v1914_v55  ;;  %v4188_v52 = vpack.c.bf16 %v2453_v40, %v2450_v38  ;;  %v2456_v56 = vld [vmem:[#allocation13 + $0x1e0] sm:$0xff]  ;;  %v2459_v57 = vld [vmem:[#allocation13 + $0x1f8] sm:$0xff] }
 0x2d3   :  { %v3584_v13 = vadd.f32 %v3583_v11, %v3582_v5  ;;  %2116 = vmatprep.mubr.f32.mxu0 %v4624_v12  ;;  %2277 = vmatprep.mubr.f32.mxu1 %v4624_v12  ;;  %v4190_v55 = vpack.c.bf16 %v2460_v46, %v2457_v45  ;;  %v2463_v7 = vld [vmem:[#allocation13 + $0x218] sm:$0xff]  ;;  %v4200_v38 = vpack.c.bf16 %v2471_v29, %v2468_v27  ;;  %v2477_v45 = vld [vmem:[#allocation13 + $0x288] sm:$0xff]  ;;  %v2492_v29 = vld [vmem:[#allocation13 + $0x300] sm:$0xff] }
 0x2d4   :  { %v1915_v14 = vmul.f32 0.5, %v1865_v10  ;;  %v1725_v15 = vadd.f32 %v3504_v19, %v5030_v41  ;;  %v3505_v17 = vpop.f32.mrb[114].mxu0  ;;  %4177 = vmatpush1.bf16.msra.mxu0 %v4176_v59  ;;  %4305 = vmatpush3.bf16.msra.mxu1 %v4304_v63  ;;  %v4192_v10 = vpack.c.bf16 %v2459_v57, %v2456_v56 }
 0x2d5   :  { %v3585_v2 = vpop.f32.mrb[114].mxu1  ;;  %v3506_v28 = vpop.f32.mrb[115].mxu0  ;;  %4179 = vmatprep.subr.bf16.mxu0 %v4178_v6  ;;  %4307 = vmatprep.subr.bf16.mxu1 %v4306_v50  ;;  %v2466_v6 = vld [vmem:[#allocation13 + $0x230] sm:$0xff] }
 0x2d6   :  { %v1870_v16 = vadd.f32 %v3584_v13, %v1725_v15  ;;  %v3507_v25 = vadd.f32 %v3506_v28, %v3505_v17  ;;  %v3586_v26 = vpop.f32.mrb[115].mxu1  ;;  %2117 = vmatmul.mubr.f32.gmra.mrb[142].mxu0 %v1915_v14  ;;  %2278 = vmatmul.mubr.f32.gmra.mrb[142].mxu1 %v1915_v14  ;;  %v4194_v1 = vpack.c.bf16 %v2466_v6, %v2463_v7  ;;  %v2465_v13 = vld [vmem:[#allocation13 + $0x228] sm:$0xff] }
 0x2d7   :  { %v3587_v31 = vadd.f32 %v3586_v26, %v3585_v2  ;;  %2122 = vmatprep.mubr.f32.mxu0 %v4624_v12  ;;  %2283 = vmatprep.mubr.f32.mxu1 %v4624_v12  ;;  %v2472_v2 = vld [vmem:[#allocation13 + $0x260] sm:$0xff]  ;;  %v4196_v23 = vpack.c.bf16 %v2465_v13, %v2462_v33 }
 0x2d8   :  { %v1916_v41 = vmul.f32 0.5, %v1870_v16  ;;  %v1730_v32 = vadd.f32 %v3507_v25, %v5033_v51  ;;  %v3508_v3 = vpop.f32.mrb[116].mxu0  ;;  %4181 = vmatpush1.bf16.msra.mxu0 %v4180_v18  ;;  %v2469_v18 = vld [vmem:[#allocation13 + $0x248] sm:$0xff]  ;;  %v2440_v33 = vld [vmem:[#allocation13 + $0x160] sm:$0xff] }
 0x2d9   :  { %v3588_v35 = vpop.f32.mrb[116].mxu1  ;;  %v3509_v36 = vpop.f32.mrb[117].mxu0  ;;  %4183 = vmatprep.subr.bf16.mxu0 %v4182_v21  ;;  %v4198_v26 = vpack.c.bf16 %v2472_v2, %v2469_v18  ;;  %v2493_v2 = vld [vmem:[#allocation13 + $0x308] sm:$0xff] }
 0x2da   :  { %v1875_v42 = vadd.f32 %v3587_v31, %v1730_v32  ;;  %v3510_v43 = vadd.f32 %v3509_v36, %v3508_v3  ;;  %v3589_v44 = vpop.f32.mrb[117].mxu1  ;;  %2123 = vmatmul.mubr.f32.gmra.mrb[144].mxu0 %v1916_v41  ;;  %2284 = vmatmul.mubr.f32.gmra.mrb[144].mxu1 %v1916_v41  ;;  %v2475_v3 = vld [vmem:[#allocation13 + $0x278] sm:$0xff] }
 0x2db   :  { %v3590_v47 = vadd.f32 %v3589_v44, %v3588_v35  ;;  %2128 = vmatprep.mubr.f32.mxu0 %v4624_v12  ;;  %2289 = vmatprep.mubr.f32.mxu1 %v4624_v12  ;;  %v2474_v44 = vld [vmem:[#allocation13 + $0x270] sm:$0xff] }
 0x2dc   :  { %v1917_v51 = vmul.f32 0.5, %v1875_v42  ;;  %v1735_v48 = vadd.f32 %v3510_v43, %v5036_v4  ;;  %v3511_v24 = vpop.f32.mrb[118].mxu0  ;;  %4185 = vmatpush1.bf16.msra.mxu0 %v4184_v34  ;;  %v2478_v34 = vld [vmem:[#allocation13 + $0x290] sm:$0xff] }
 0x2dd   :  { %v3591_v53 = vpop.f32.mrb[118].mxu1  ;;  %v3512_v54 = vpop.f32.mrb[119].mxu0  ;;  %4187 = vmatprep.subr.bf16.mxu0 %v4186_v37  ;;  %v4202_v43 = vpack.c.bf16 %v2478_v34, %v2475_v3  ;;  %v2494_v34 = vld [vmem:[#allocation13 + $0x310] sm:$0xff] }
 0x2de   :  { %v1880_v59 = vadd.f32 %v3590_v47, %v1735_v48  ;;  %v3513_v63 = vadd.f32 %v3512_v54, %v3511_v24  ;;  %v3592_v5 = vpop.f32.mrb[119].mxu1  ;;  %2129 = vmatmul.mubr.f32.gmra.mrb[146].mxu0 %v1917_v51  ;;  %2290 = vmatmul.mubr.f32.gmra.mrb[146].mxu1 %v1917_v51  ;;  %v2481_v48 = vld [vmem:[#allocation13 + $0x2a8] sm:$0xff]  ;;  %v2484_v24 = vld [vmem:[#allocation13 + $0x2c0] sm:$0xff] }
 0x2df   :  { %v3593_v8 = vadd.f32 %v3592_v5, %v3591_v53  ;;  %2134 = vmatprep.mubr.f32.mxu0 %v4624_v12  ;;  %2295 = vmatprep.mubr.f32.mxu1 %v4624_v12 }
 0x2e0   :  { %v1918_v4 = vmul.f32 0.5, %v1880_v59  ;;  %v1740_v9 = vadd.f32 %v3513_v63, %v5039_v0  ;;  %v3514_v50 = vpop.f32.mrb[120].mxu0  ;;  %4189 = vmatpush1.bf16.msra.mxu0 %v4188_v52  ;;  %v4206_v59 = vpack.c.bf16 %v2484_v24, %v2481_v48 }
 0x2e1   :  { %v3594_v19 = vpop.f32.mrb[120].mxu1  ;;  %v3515_v11 = vpop.f32.mrb[121].mxu0  ;;  %4191 = vmatprep.subr.bf16.mxu0 %v4190_v55  ;;  %v4204_v55 = vpack.c.bf16 %v2477_v45, %v2474_v44 }
 0x2e2   :  { %v1885_v14 = vadd.f32 %v3593_v8, %v1740_v9  ;;  %v3516_v15 = vadd.f32 %v3515_v11, %v3514_v50  ;;  %v3595_v17 = vpop.f32.mrb[121].mxu1  ;;  %2135 = vmatmul.mubr.f32.gmra.mrb[148].mxu0 %v1918_v4  ;;  %2296 = vmatmul.mubr.f32.gmra.mrb[148].mxu1 %v1918_v4  ;;  %v2480_v50 = vld [vmem:[#allocation13 + $0x2a0] sm:$0xff]  ;;  %v2487_v11 = vld [vmem:[#allocation13 + $0x2d8] sm:$0xff] }
 0x2e3   :  { %v3596_v28 = vadd.f32 %v3595_v17, %v3594_v19  ;;  %2140 = vmatprep.mubr.f32.mxu0 %v4624_v12  ;;  %2301 = vmatprep.mubr.f32.mxu1 %v4624_v12  ;;  %v2489_v17 = vld [vmem:[#allocation13 + $0x2e8] sm:$0xff] }
 0x2e4   :  { %v1919_v0 = vmul.f32 0.5, %v1885_v14  ;;  %v1745_v21 = vadd.f32 %v3516_v15, %v5042_v20  ;;  %v3517_v22 = vpop.f32.mrb[122].mxu0  ;;  %4193 = vmatpush1.bf16.msra.mxu0 %v4192_v10  ;;  %v2483_v10 = vld [vmem:[#allocation13 + $0x2b8] sm:$0xff]  ;;  %v2486_v14 = vld [vmem:[#allocation13 + $0x2d0] sm:$0xff] }
 0x2e5   :  { %v3597_v16 = vpop.f32.mrb[122].mxu1  ;;  %v3518_v25 = vpop.f32.mrb[123].mxu0  ;;  %4195 = vmatprep.subr.bf16.mxu0 %v4194_v1  ;;  %v4208_v19 = vpack.c.bf16 %v2483_v10, %v2480_v50  ;;  %v2490_v1 = vld [vmem:[#allocation13 + $0x2f0] sm:$0xff]  ;;  %v4212_v18 = vpack.c.bf16 %v2489_v17, %v2486_v14  ;;  %v2507_v50 = vld [vmem:[#allocation13 + $0x378] sm:$0xff]  ;;  %v2509_v17 = vld [vmem:[#allocation13 + $0x388] sm:$0xff] }
 0x2e6   :  { %v1890_v31 = vadd.f32 %v3596_v28, %v1745_v21  ;;  %v3519_v41 = vadd.f32 %v3518_v25, %v3517_v22  ;;  %v3598_v32 = vpop.f32.mrb[123].mxu1  ;;  %2141 = vmatmul.mubr.f32.gmra.mrb[150].mxu0 %v1919_v0  ;;  %2302 = vmatmul.mubr.f32.gmra.mrb[150].mxu1 %v1919_v0  ;;  %v4210_v13 = vpack.c.bf16 %v2490_v1, %v2487_v11  ;;  %v2542_v0 = vld [vmem:[#allocation13 + $0x490] sm:$0xff]  ;;  %v2545_v21 = vld [vmem:[#allocation13 + $0x4a8] sm:$0xff] }
 0x2e7   :  { %v3599_v35 = vadd.f32 %v3598_v32, %v3597_v16  ;;  %2146 = vmatprep.mubr.f32.mxu0 %v4624_v12  ;;  %2307 = vmatprep.mubr.f32.mxu1 %v4624_v12  ;;  %v4310_v22 = vpack.c.bf16 %v2545_v21, %v2542_v0 }
 0x2e8   :  { %v1920_v20 = vmul.f32 0.5, %v1890_v31  ;;  %v1750_v36 = vadd.f32 %v3519_v41, %v5045_v30  ;;  %v3520_v37 = vpop.f32.mrb[124].mxu0  ;;  %4197 = vmatpush1.bf16.msra.mxu0 %v4196_v23  ;;  %v5102_v23 = vld [vmem:[%s5409_s9] sm:$0xf]  ;;  %v2495_v31 = vld [vmem:[#allocation13 + $0x318] sm:$0xff] }
 0x2e9   :  { %v3600_v40 = vpop.f32.mrb[124].mxu1  ;;  %v3521_v42 = vpop.f32.mrb[125].mxu0  ;;  %4199 = vmatprep.subr.bf16.mxu0 %v4198_v26  ;;  %v5106_v16 = vrot.slane %v5102_v23, %v4832_v58  ;;  %v5110_v25 = vrot.slane %v5102_v23, %v4839_v61  ;;  %v4216_v45 = vpack.c.bf16 %v2495_v31, %v2492_v29  ;;  %v2510_v29 = vld [vmem:[#allocation13 + $0x390] sm:$0xff]  ;;  %v2513_v31 = vld [vmem:[#allocation13 + $0x3a8] sm:$0xff] }
 0x2ea   :  { %v1895_v46 = vadd.f32 %v3599_v35, %v1750_v36  ;;  %v3522_v47 = vadd.f32 %v3521_v42, %v3520_v37  ;;  %v3601_v51 = vpop.f32.mrb[125].mxu1  ;;  %2147 = vmatmul.mubr.f32.gmra.mrb[152].mxu0 %v1920_v20  ;;  %2308 = vmatmul.mubr.f32.gmra.mrb[152].mxu1 %v1920_v20  ;;  %v2497_v35 = vld [vmem:[#allocation13 + $0x328] sm:$0xff]  ;;  %v2499_v20 = vld [vmem:[#allocation13 + $0x338] sm:$0xff]  ;;  %v2502_v37 = vld [vmem:[#allocation13 + $0x350] sm:$0xff] }
 0x2eb   :  { %v3602_v52 = vadd.f32 %v3601_v51, %v3600_v40  ;;  %2152 = vmatprep.mubr.f32.mxu0 %v4624_v12  ;;  %2313 = vmatprep.mubr.f32.mxu1 %v4624_v12  ;;  %v2551_v40 = vld [vmem:[#allocation13 + $0x4d8] sm:$0xff]  ;;  %v2501_v51 = vld [vmem:[#allocation13 + $0x348] sm:$0xff] }
 0x2ec   :  { %v1921_v30 = vmul.f32 0.5, %v1895_v46  ;;  %v1755_v53 = vadd.f32 %v3522_v47, %v5048_v39  ;;  %v3523_v54 = vpop.f32.mrb[126].mxu0  ;;  %4201 = vmatpush1.bf16.msra.mxu0 %v4200_v38  ;;  %v2548_v38 = vld [vmem:[#allocation13 + $0x4c0] sm:$0xff]  ;;  %v4312_v46 = vpack.c.bf16 %v2497_v35, %v2494_v34  ;;  %v2498_v47 = vld [vmem:[#allocation13 + $0x330] sm:$0xff] }
 0x2ed   :  { %v3603_v56 = vpop.f32.mrb[126].mxu1  ;;  %v3524_v57 = vpop.f32.mrb[127].mxu0  ;;  %4203 = vmatprep.subr.bf16.mxu0 %v4202_v43 }
 0x2ee   :  { %v1900_v63 = vadd.f32 %v3602_v52, %v1755_v53  ;;  %v3525_v5 = vadd.f32 %v3524_v57, %v3523_v54  ;;  %v3604_v7 = vpop.f32.mrb[127].mxu1  ;;  %2153 = vmatmul.mubr.f32.gmra.mrb[154].mxu0 %v1921_v30  ;;  %2314 = vmatmul.mubr.f32.gmra.mrb[154].mxu1 %v1921_v30  ;;  %v4218_v53 = vpack.c.bf16 %v2502_v37, %v2499_v20  ;;  %v2505_v54 = vld [vmem:[#allocation13 + $0x368] sm:$0xff]  ;;  %v2503_v57 = vld [vmem:[#allocation13 + $0x358] sm:$0xff] }
 0x2ef   :  { %v3605_v6 = vadd.f32 %v3604_v7, %v3603_v56  ;;  %2158 = vmatprep.mubr.f32.mxu0 %v4624_v12  ;;  %2319 = vmatprep.mubr.f32.mxu1 %v4624_v12  ;;  %v2500_v56 = vld [vmem:[#allocation13 + $0x340] sm:$0xff]  ;;  %v2557_v7 = vld [vmem:[#allocation13 + $0x508] sm:$0xff] }
 0x2f0   :  { %v1922_v8 = vmul.f32 0.5, %v1900_v63  ;;  %v1760_v39 = vadd.f32 %v3525_v5, %v5051_v49  ;;  %4205 = vmatpush1.bf16.msra.mxu0 %v4204_v55  ;;  %v2443_v49 = vld [vmem:[#allocation13 + $0x178] sm:$0xff]  ;;  %v4314_v55 = vpack.c.bf16 %v2551_v40, %v2548_v38  ;;  %v2508_v63 = vld [vmem:[#allocation13 + $0x380] sm:$0xff]  ;;  %v2554_v5 = vld [vmem:[#allocation13 + $0x4f0] sm:$0xff]  ;;  %v4316_v10 = vpack.c.bf16 %v2503_v57, %v2500_v56 }
 0x2f1   :  { %4207 = vmatprep.subr.bf16.mxu0 %v4206_v59  ;;  %v4308_v15 = vpack.c.bf16 %v2443_v49, %v2440_v33  ;;  %v4222_v49 = vpack.c.bf16 %v2508_v63, %v2505_v54  ;;  %v4318_v14 = vpack.c.bf16 %v2557_v7, %v2554_v5  ;;  %v2517_v37 = vld [vmem:[#allocation13 + $0x3c8] sm:$0xff]  ;;  %v2512_v40 = vld [vmem:[#allocation13 + $0x3a0] sm:$0xff]  ;;  %v2519_v54 = vld [vmem:[#allocation13 + $0x3d8] sm:$0xff] }
 0x2f2   :  { %v1905_v4 = vadd.f32 %v3605_v6, %v1760_v39  ;;  %2159 = vmatmul.mubr.f32.gmra.mrb[156].mxu0 %v1922_v8  ;;  %2320 = vmatmul.mubr.f32.gmra.mrb[156].mxu1 %v1922_v8  ;;  %v2523_v7 = vld [vmem:[#allocation13 + $0x3f8] sm:$0xff] }
 0x2f3   :  { %2164 = vmatprep.mubr.f32.mxu0 %v4624_v12  ;;  %2325 = vmatprep.mubr.f32.mxu1 %v4624_v12  ;;  %v2496_v12 = vld [vmem:[#allocation13 + $0x320] sm:$0xff] }
 0x2f4   :  { %v1923_v9 = vmul.f32 0.5, %v1905_v4  ;;  %4209 = vmatpush1.bf16.msra.mxu0 %v4208_v19  ;;  %4309 = vmatpush3.bf16.msra.mxu1 %v4308_v15  ;;  %v4214_v28 = vpack.c.bf16 %v2496_v12, %v2493_v2  ;;  %v4220_v4 = vpack.c.bf16 %v2501_v51, %v2498_v47  ;;  %v2506_v15 = vld [vmem:[#allocation13 + $0x370] sm:$0xff]  ;;  %v2560_v12 = vld [vmem:[#allocation13 + $0x520] sm:$0xff]  ;;  %v2569_v47 = vld [vmem:[#allocation13 + $0x568] sm:$0xff] }
 0x2f5   :  { %4211 = vmatprep.subr.bf16.mxu0 %v4210_v13  ;;  %4311 = vmatprep.subr.bf16.mxu1 %v4310_v22  ;;  %v2511_v13 = vld [vmem:[#allocation13 + $0x398] sm:$0xff]  ;;  %v2514_v2 = vld [vmem:[#allocation13 + $0x3b0] sm:$0xff] }
 0x2f6   :  { %2165 = vmatmul.mubr.f32.gmra.mrb[158].mxu0 %v1923_v9  ;;  %2326 = vmatmul.mubr.f32.gmra.mrb[158].mxu1 %v1923_v9  ;;  %v2504_v9 = vld [vmem:[#allocation13 + $0x360] sm:$0xff] }
 0x2f8   :  { %4213 = vmatpush1.bf16.msra.mxu0 %v4212_v18 }
 0x2f9   :  { %4215 = vmatprep.subr.bf16.mxu0 %v4214_v28  ;;  %v2563_v28 = vld [vmem:[#allocation13 + $0x538] sm:$0xff] }
 0x2fa   :  { %v4322_v38 = vpack.c.bf16 %v2563_v28, %v2560_v12 }
 0x38d   :  { %v2076_v26 = vpop.f32.mrb[128].mxu0  ;;  %v5112_v27 = vpop.f32.mrb[128].mxu1 }
 0x38e   :  { %v2077_v41 = vadd.f32 %v2076_v26, %v5106_v16  ;;  %v2078_v32 = vpop.f32.mrb[129].mxu0  ;;  %v5115_v3 = vpop.f32.mrb[129].mxu1  ;;  %v4224_v26 = vpack.c.bf16 %v2507_v50, %v2504_v9  ;;  %v2526_v50 = vld [vmem:[#allocation13 + $0x410] sm:$0xff] }
 0x38f   :  { %v2079_v36 = vadd.f32 %v2078_v32, %v5110_v25 }
 0x390   :  { %v2332_v48 = vmax.f32 %v2077_v41, 0.0  ;;  %v4320_v41 = vpack.c.bf16 %v2509_v17, %v2506_v15  ;;  %v2525_v15 = vld [vmem:[#allocation13 + $0x408] sm:$0xff] }
 0x391   :  { %v2333_v42 = vmax.f32 %v2079_v36, 0.0  ;;  %v2082_v43 = vpop.f32.mrb[130].mxu0  ;;  %v5118_v44 = vpop.f32.mrb[130].mxu1  ;;  %v4226_v36 = vpack.c.bf16 %v2514_v2, %v2511_v13 }
 0x392   :  { %v2083_v24 = vadd.f32 %v2082_v43, %v5106_v16  ;;  %v2084_v52 = vpop.f32.mrb[131].mxu0  ;;  %v5121_v30 = vpop.f32.mrb[131].mxu1 }
 0x393   :  { %v2085_v59 = vadd.f32 %v2084_v52, %v5110_v25  ;;  %2669 = vmatprep.mubr.f32.mxu0 %v2333_v42  ;;  %2991 = vmatprep.mubr.f32.mxu1 %v2333_v42  ;;  %v2515_v42 = vld [vmem:[#allocation13 + $0x3b8] sm:$0xff]  ;;  %v4228_v52 = vpack.c.bf16 %v2513_v31, %v2510_v29  ;;  %v2524_v29 = vld [vmem:[#allocation13 + $0x400] sm:$0xff] }
 0x394   :  { %2670 = vmatmul.mubr.f32.vlgmr.msra.gmra.mrb[160].mxu0 %v2332_v48  ;;  %2992 = vmatmul.mubr.f32.vlgmr.msra.gmra.mrb[160].mxu1 %v2332_v48  ;;  %v2336_v19 = vmax.f32 %v2083_v24, 0.0  ;;  %v2527_v31 = vld [vmem:[#allocation13 + $0x418] sm:$0xff] }
 0x395   :  { %v2337_v6 = vmax.f32 %v2085_v59, 0.0  ;;  %v2088_v8 = vpop.f32.mrb[132].mxu0  ;;  %v5124_v39 = vpop.f32.mrb[132].mxu1  ;;  %4217 = vmatpush1.bf16.msra.mxu0 %v4216_v45  ;;  %4313 = vmatpush3.bf16.msra.mxu1 %v4312_v46  ;;  %v2520_v45 = vld [vmem:[#allocation13 + $0x3e0] sm:$0xff]  ;;  %v2566_v46 = vld [vmem:[#allocation13 + $0x550] sm:$0xff] }
 0x396   :  { %v2089_v11 = vadd.f32 %v2088_v8, %v5106_v16  ;;  %v2090_v1 = vpop.f32.mrb[133].mxu0  ;;  %v5127_v33 = vpop.f32.mrb[133].mxu1  ;;  %4219 = vmatprep.subr.bf16.mxu0 %v4218_v53  ;;  %4315 = vmatprep.subr.bf16.mxu1 %v4314_v55  ;;  %v2516_v53 = vld [vmem:[#allocation13 + $0x3c0] sm:$0xff]  ;;  %v4324_v55 = vpack.c.bf16 %v2515_v42, %v2512_v40  ;;  %v4230_v5 = vpack.c.bf16 %v2520_v45, %v2517_v37  ;;  %v2518_v8 = vld [vmem:[#allocation13 + $0x3d0] sm:$0xff] }
 0x397   :  { %v2091_v18 = vadd.f32 %v2090_v1, %v5110_v25  ;;  %2675 = vmatprep.mubr.f32.mxu0 %v2337_v6  ;;  %2996 = vmatprep.mubr.f32.mxu1 %v2337_v6  ;;  %v4326_v6 = vpack.c.bf16 %v2569_v47, %v2566_v46  ;;  %v4232_v13 = vpack.c.bf16 %v2519_v54, %v2516_v53  ;;  %v2528_v42 = vld [vmem:[#allocation13 + $0x420] sm:$0xff]  ;;  %v2535_v53 = vld [vmem:[#allocation13 + $0x458] sm:$0xff] }
 0x398   :  { %2676 = vmatmul.mubr.f32.gmra.mrb[162].mxu0 %v2336_v19  ;;  %2997 = vmatmul.mubr.f32.gmra.mrb[162].mxu1 %v2336_v19  ;;  %v2340_v32 = vmax.f32 %v2089_v11, 0.0  ;;  %v2575_v19 = vld [vmem:[#allocation13 + $0x598] sm:$0xff]  ;;  %v4332_v45 = vpack.c.bf16 %v2527_v31, %v2524_v29 }
 0x399   :  { %v2341_v0 = vmax.f32 %v2091_v18, 0.0  ;;  %v2094_v21 = vpop.f32.mrb[134].mxu0  ;;  %v5130_v22 = vpop.f32.mrb[134].mxu1  ;;  %4221 = vmatpush1.bf16.msra.mxu0 %v4220_v4  ;;  %4317 = vmatpush3.bf16.msra.mxu1 %v4316_v10  ;;  %v2521_v4 = vld [vmem:[#allocation13 + $0x3e8] sm:$0xff]  ;;  %v2572_v10 = vld [vmem:[#allocation13 + $0x580] sm:$0xff] }
 0x39a   :  { %v2095_v34 = vadd.f32 %v2094_v21, %v5106_v16  ;;  %v2096_v35 = vpop.f32.mrb[135].mxu0  ;;  %v5133_v20 = vpop.f32.mrb[135].mxu1  ;;  %4223 = vmatprep.subr.bf16.mxu0 %v4222_v49  ;;  %4319 = vmatprep.subr.bf16.mxu1 %v4318_v14  ;;  %v2522_v14 = vld [vmem:[#allocation13 + $0x3f0] sm:$0xff]  ;;  %v4328_v17 = vpack.c.bf16 %v2521_v4, %v2518_v8  ;;  %v2529_v21 = vld [vmem:[#allocation13 + $0x428] sm:$0xff] }
 0x39b   :  { %v2097_v43 = vadd.f32 %v2096_v35, %v5110_v25  ;;  %2681 = vmatprep.mubr.f32.mxu0 %v2341_v0  ;;  %3001 = vmatprep.mubr.f32.mxu1 %v2341_v0  ;;  %v4234_v0 = vpack.c.bf16 %v2526_v50, %v2523_v7  ;;  %v2581_v35 = vld [vmem:[#allocation13 + $0x5c8] sm:$0xff]  ;;  %v4236_v40 = vpack.c.bf16 %v2525_v15, %v2522_v14  ;;  %v2587_v7 = vld [vmem:[#allocation13 + $0x5f8] sm:$0xff]  ;;  %v2534_v50 = vld [vmem:[#allocation13 + $0x450] sm:$0xff] }
 0x39c   :  { %2682 = vmatmul.mubr.f32.gmra.mrb[164].mxu0 %v2340_v32  ;;  %3002 = vmatmul.mubr.f32.gmra.mrb[164].mxu1 %v2340_v32  ;;  %v2344_v56 = vmax.f32 %v2095_v34, 0.0  ;;  %v2532_v32 = vld [vmem:[#allocation13 + $0x440] sm:$0xff]  ;;  %v2578_v34 = vld [vmem:[#allocation13 + $0x5b0] sm:$0xff]  ;;  %v2537_v15 = vld [vmem:[#allocation13 + $0x468] sm:$0xff] }
 0x39d   :  { %v2345_v51 = vmax.f32 %v2097_v43, 0.0  ;;  %v2100_v48 = vpop.f32.mrb[136].mxu0  ;;  %v5136_v24 = vpop.f32.mrb[136].mxu1  ;;  %4225 = vmatpush1.bf16.msra.mxu0 %v4224_v26  ;;  %4321 = vmatpush3.bf16.msra.mxu1 %v4320_v41  ;;  %v4330_v26 = vpack.c.bf16 %v2575_v19, %v2572_v10  ;;  %v2531_v43 = vld [vmem:[#allocation13 + $0x438] sm:$0xff]  ;;  %v4334_v54 = vpack.c.bf16 %v2581_v35, %v2578_v34 }
 0x39e   :  { %v2101_v57 = vadd.f32 %v2100_v48, %v5106_v16  ;;  %v2102_v59 = vpop.f32.mrb[137].mxu0  ;;  %v5139_v63 = vpop.f32.mrb[137].mxu1  ;;  %4227 = vmatprep.subr.bf16.mxu0 %v4226_v36  ;;  %4323 = vmatprep.subr.bf16.mxu1 %v4322_v38 }
 0x39f   :  { %v2103_v9 = vadd.f32 %v2102_v59, %v5110_v25  ;;  %2687 = vmatprep.mubr.f32.mxu0 %v2345_v51  ;;  %3006 = vmatprep.mubr.f32.mxu1 %v2345_v51  ;;  %v2538_v59 = vld [vmem:[#allocation13 + $0x470] sm:$0xff] }
 0x3a0   :  { %2688 = vmatmul.mubr.f32.gmra.mrb[166].mxu0 %v2344_v56  ;;  %3007 = vmatmul.mubr.f32.gmra.mrb[166].mxu1 %v2344_v56  ;;  %v2348_v18 = vmax.f32 %v2101_v57, 0.0  ;;  %v2533_v56 = vld [vmem:[#allocation13 + $0x448] sm:$0xff]  ;;  %v4242_v14 = vpack.c.bf16 %v2538_v59, %v2535_v53 }
 0x3a1   :  { %v2349_v11 = vmax.f32 %v2103_v9, 0.0  ;;  %v2106_v1 = vpop.f32.mrb[138].mxu0  ;;  %v5142_v49 = vpop.f32.mrb[138].mxu1  ;;  %4229 = vmatpush1.bf16.msra.mxu0 %v4228_v52  ;;  %4325 = vmatpush3.bf16.msra.mxu1 %v4324_v55  ;;  %v4238_v52 = vpack.c.bf16 %v2532_v32, %v2529_v21  ;;  %v2530_v55 = vld [vmem:[#allocation13 + $0x430] sm:$0xff]  ;;  %v4240_v9 = vpack.c.bf16 %v2531_v43, %v2528_v42  ;;  %v2544_v21 = vld [vmem:[#allocation13 + $0x4a0] sm:$0xff]  ;;  %v2543_v43 = vld [vmem:[#allocation13 + $0x498] sm:$0xff] }
 0x3a2   :  { %v2107_v2 = vadd.f32 %v2106_v1, %v5106_v16  ;;  %v2108_v12 = vpop.f32.mrb[139].mxu0  ;;  %v5145_v28 = vpop.f32.mrb[139].mxu1  ;;  %4231 = vmatprep.subr.bf16.mxu0 %v4230_v5  ;;  %4327 = vmatprep.subr.bf16.mxu1 %v4326_v6  ;;  %v2584_v5 = vld [vmem:[#allocation13 + $0x5e0] sm:$0xff]  ;;  %v4336_v10 = vpack.c.bf16 %v2533_v56, %v2530_v55 }
 0x3a3   :  { %v2109_v41 = vadd.f32 %v2108_v12, %v5110_v25  ;;  %2693 = vmatprep.mubr.f32.mxu0 %v2349_v11  ;;  %3011 = vmatprep.mubr.f32.mxu1 %v2349_v11  ;;  %v2540_v42 = vld [vmem:[#allocation13 + $0x480] sm:$0xff] }
 0x3a4   :  { %2694 = vmatmul.mubr.f32.gmra.mrb[168].mxu0 %v2348_v18  ;;  %3012 = vmatmul.mubr.f32.gmra.mrb[168].mxu1 %v2348_v18  ;;  %v2352_v46 = vmax.f32 %v2107_v2, 0.0  ;;  %v2536_v18 = vld [vmem:[#allocation13 + $0x460] sm:$0xff]  ;;  %v2539_v2 = vld [vmem:[#allocation13 + $0x478] sm:$0xff] }
 0x3a5   :  { %v2353_v36 = vmax.f32 %v2109_v41, 0.0  ;;  %v2112_v37 = vpop.f32.mrb[140].mxu0  ;;  %v5148_v38 = vpop.f32.mrb[140].mxu1  ;;  %4233 = vmatpush1.bf16.msra.mxu0 %v4232_v13  ;;  %4329 = vmatpush3.bf16.msra.mxu1 %v4328_v17  ;;  %v4338_v17 = vpack.c.bf16 %v2587_v7, %v2584_v5  ;;  %v4244_v41 = vpack.c.bf16 %v2537_v15, %v2534_v50  ;;  %v4340_v32 = vpack.c.bf16 %v2539_v2, %v2536_v18  ;;  %v2546_v7 = vld [vmem:[#allocation13 + $0x4b0] sm:$0xff]  ;;  %v2556_v50 = vld [vmem:[#allocation13 + $0x500] sm:$0xff] }
 0x3a6   :  { %v2113_v47 = vadd.f32 %v2112_v37, %v5106_v16  ;;  %v2114_v51 = vpop.f32.mrb[141].mxu0  ;;  %v5151_v48 = vpop.f32.mrb[141].mxu1  ;;  %4235 = vmatprep.subr.bf16.mxu0 %v4234_v0  ;;  %4331 = vmatprep.subr.bf16.mxu1 %v4330_v26  ;;  %v2541_v0 = vld [vmem:[#allocation13 + $0x488] sm:$0xff] }
 0x3a7   :  { %v2115_v57 = vadd.f32 %v2114_v51, %v5110_v25  ;;  %2699 = vmatprep.mubr.f32.mxu0 %v2353_v36  ;;  %3016 = vmatprep.mubr.f32.mxu1 %v2353_v36 }
 0x3a8   :  { %2700 = vmatmul.mubr.f32.gmra.mrb[170].mxu0 %v2352_v46  ;;  %3017 = vmatmul.mubr.f32.gmra.mrb[170].mxu1 %v2352_v46  ;;  %v2356_v19 = vmax.f32 %v2113_v47, 0.0  ;;  %v2547_v46 = vld [vmem:[#allocation13 + $0x4b8] sm:$0xff]  ;;  %v2550_v47 = vld [vmem:[#allocation13 + $0x4d0] sm:$0xff] }
 0x3a9   :  { %v2357_v6 = vmax.f32 %v2115_v57, 0.0  ;;  %v2118_v8 = vpop.f32.mrb[142].mxu0  ;;  %v5154_v4 = vpop.f32.mrb[142].mxu1  ;;  %4237 = vmatpush1.bf16.msra.mxu0 %v4236_v40  ;;  %4333 = vmatpush3.bf16.msra.mxu1 %v4332_v45  ;;  %v4246_v40 = vpack.c.bf16 %v2544_v21, %v2541_v0  ;;  %v4250_v5 = vpack.c.bf16 %v2550_v47, %v2547_v46  ;;  %v2555_v0 = vld [vmem:[#allocation13 + $0x4f8] sm:$0xff]  ;;  %v2558_v46 = vld [vmem:[#allocation13 + $0x510] sm:$0xff]  ;;  %v2561_v47 = vld [vmem:[#allocation13 + $0x528] sm:$0xff] }
 0x3aa   :  { %v2119_v11 = vadd.f32 %v2118_v8, %v5106_v16  ;;  %v2120_v1 = vpop.f32.mrb[143].mxu0  ;;  %v5157_v13 = vpop.f32.mrb[143].mxu1  ;;  %4239 = vmatprep.subr.bf16.mxu0 %v4238_v52  ;;  %4335 = vmatprep.subr.bf16.mxu1 %v4334_v54  ;;  %v4248_v54 = vpack.c.bf16 %v2543_v43, %v2540_v42 }
 0x3ab   :  { %v2121_v12 = vadd.f32 %v2120_v1, %v5110_v25  ;;  %2705 = vmatprep.mubr.f32.mxu0 %v2357_v6  ;;  %3021 = vmatprep.mubr.f32.mxu1 %v2357_v6  ;;  %v2549_v6 = vld [vmem:[#allocation13 + $0x4c8] sm:$0xff] }
 0x3ac   :  { %2706 = vmatmul.mubr.f32.gmra.mrb[172].mxu0 %v2356_v19  ;;  %3022 = vmatmul.mubr.f32.gmra.mrb[172].mxu1 %v2356_v19  ;;  %v2360_v34 = vmax.f32 %v2119_v11, 0.0  ;;  %v4252_v1 = vpack.c.bf16 %v2549_v6, %v2546_v7 }
 0x3ad   :  { %v2361_v26 = vmax.f32 %v2121_v12, 0.0  ;;  %v2124_v29 = vpop.f32.mrb[144].mxu0  ;;  %v5160_v31 = vpop.f32.mrb[144].mxu1  ;;  %4241 = vmatpush1.bf16.msra.mxu0 %v4240_v9  ;;  %4337 = vmatpush3.bf16.msra.mxu1 %v4336_v10  ;;  %v2553_v9 = vld [vmem:[#allocation13 + $0x4e8] sm:$0xff]  ;;  %v2552_v12 = vld [vmem:[#allocation13 + $0x4e0] sm:$0xff] }
 0x3ae   :  { %v2125_v35 = vadd.f32 %v2124_v29, %v5106_v16  ;;  %v2126_v36 = vpop.f32.mrb[145].mxu0  ;;  %v5163_v37 = vpop.f32.mrb[145].mxu1  ;;  %4243 = vmatprep.subr.bf16.mxu0 %v4242_v14  ;;  %4339 = vmatprep.subr.bf16.mxu1 %v4338_v17  ;;  %v4254_v2 = vpack.c.bf16 %v2556_v50, %v2553_v9  ;;  %v2562_v29 = vld [vmem:[#allocation13 + $0x530] sm:$0xff] }
 0x3af   :  { %v2127_v45 = vadd.f32 %v2126_v36, %v5110_v25  ;;  %2711 = vmatprep.mubr.f32.mxu0 %v2361_v26  ;;  %3026 = vmatprep.mubr.f32.mxu1 %v2361_v26  ;;  %v2559_v26 = vld [vmem:[#allocation13 + $0x518] sm:$0xff] }
 0x3b0   :  { %2712 = vmatmul.mubr.f32.gmra.mrb[174].mxu0 %v2360_v34  ;;  %3027 = vmatmul.mubr.f32.gmra.mrb[174].mxu1 %v2360_v34  ;;  %v2364_v55 = vmax.f32 %v2125_v35, 0.0  ;;  %v4256_v35 = vpack.c.bf16 %v2555_v0, %v2552_v12 }
 0x3b1   :  { %v2365_v51 = vmax.f32 %v2127_v45, 0.0  ;;  %v2130_v52 = vpop.f32.mrb[146].mxu0  ;;  %v5166_v53 = vpop.f32.mrb[146].mxu1  ;;  %4245 = vmatpush1.bf16.msra.mxu0 %v4244_v41  ;;  %4341 = vmatpush3.bf16.msra.mxu1 %v4340_v32  ;;  %v4258_v45 = vpack.c.bf16 %v2562_v29, %v2559_v26 }
 0x3b2   :  { %v2131_v56 = vadd.f32 %v2130_v52, %v5106_v16  ;;  %v2132_v57 = vpop.f32.mrb[147].mxu0  ;;  %v5169_v59 = vpop.f32.mrb[147].mxu1  ;;  %4247 = vmatprep.subr.bf16.mxu0 %v4246_v40  ;;  %v2565_v52 = vld [vmem:[#allocation13 + $0x548] sm:$0xff] }
 0x3b3   :  { %v2133_v8 = vadd.f32 %v2132_v57, %v5110_v25  ;;  %2717 = vmatprep.mubr.f32.mxu0 %v2365_v51  ;;  %3031 = vmatprep.mubr.f32.mxu1 %v2365_v51 }
 0x3b4   :  { %2718 = vmatmul.mubr.f32.gmra.mrb[176].mxu0 %v2364_v55  ;;  %3032 = vmatmul.mubr.f32.gmra.mrb[176].mxu1 %v2364_v55  ;;  %v2368_v14 = vmax.f32 %v2131_v56, 0.0 }
 0x3b5   :  { %v2369_v10 = vmax.f32 %v2133_v8, 0.0  ;;  %v2136_v19 = vpop.f32.mrb[148].mxu0  ;;  %v5172_v11 = vpop.f32.mrb[148].mxu1  ;;  %4249 = vmatpush1.bf16.msra.mxu0 %v4248_v54  ;;  %v2568_v54 = vld [vmem:[#allocation13 + $0x560] sm:$0xff] }
 0x3b6   :  { %v2137_v15 = vadd.f32 %v2136_v19, %v5106_v16  ;;  %v2138_v17 = vpop.f32.mrb[149].mxu0  ;;  %v5175_v18 = vpop.f32.mrb[149].mxu1  ;;  %4251 = vmatprep.subr.bf16.mxu0 %v4250_v5  ;;  %v4260_v5 = vpack.c.bf16 %v2561_v47, %v2558_v46  ;;  %v4262_v50 = vpack.c.bf16 %v2568_v54, %v2565_v52  ;;  %v2567_v19 = vld [vmem:[#allocation13 + $0x558] sm:$0xff] }
 0x3b7   :  { %v2139_v21 = vadd.f32 %v2138_v17, %v5110_v25  ;;  %2723 = vmatprep.mubr.f32.mxu0 %v2369_v10  ;;  %3036 = vmatprep.mubr.f32.mxu1 %v2369_v10  ;;  %v2564_v10 = vld [vmem:[#allocation13 + $0x540] sm:$0xff] }
 0x3b8   :  { %2724 = vmatmul.mubr.f32.gmra.mrb[178].mxu0 %v2368_v14  ;;  %3037 = vmatmul.mubr.f32.gmra.mrb[178].mxu1 %v2368_v14  ;;  %v2372_v36 = vmax.f32 %v2137_v15, 0.0  ;;  %v2571_v14 = vld [vmem:[#allocation13 + $0x578] sm:$0xff]  ;;  %v2574_v15 = vld [vmem:[#allocation13 + $0x590] sm:$0xff]  ;;  %v4264_v0 = vpack.c.bf16 %v2567_v19, %v2564_v10 }
 0x3b9   :  { %v2373_v41 = vmax.f32 %v2139_v21, 0.0  ;;  %v2142_v32 = vpop.f32.mrb[150].mxu0  ;;  %v5178_v34 = vpop.f32.mrb[150].mxu1  ;;  %4253 = vmatpush1.bf16.msra.mxu0 %v4252_v1  ;;  %v2583_v19 = vld [vmem:[#allocation13 + $0x5d8] sm:$0xff] }
 0x3ba   :  { %v2143_v40 = vadd.f32 %v2142_v32, %v5106_v16  ;;  %v2144_v42 = vpop.f32.mrb[151].mxu0  ;;  %v5181_v43 = vpop.f32.mrb[151].mxu1  ;;  %4255 = vmatprep.subr.bf16.mxu0 %v4254_v2  ;;  %v4266_v32 = vpack.c.bf16 %v2574_v15, %v2571_v14 }
 0x3bb   :  { %v2145_v51 = vadd.f32 %v2144_v42, %v5110_v25  ;;  %2729 = vmatprep.mubr.f32.mxu0 %v2373_v41  ;;  %3041 = vmatprep.mubr.f32.mxu1 %v2373_v41  ;;  %v2577_v42 = vld [vmem:[#allocation13 + $0x5a8] sm:$0xff] }
 0x3bc   :  { %2730 = vmatmul.mubr.f32.gmra.mrb[180].mxu0 %v2372_v36  ;;  %3042 = vmatmul.mubr.f32.gmra.mrb[180].mxu1 %v2372_v36  ;;  %v2376_v7 = vmax.f32 %v2143_v40, 0.0  ;;  %v2573_v36 = vld [vmem:[#allocation13 + $0x588] sm:$0xff] }
 0x3bd   :  { %v2377_v55 = vmax.f32 %v2145_v51, 0.0  ;;  %v2148_v56 = vpop.f32.mrb[152].mxu0  ;;  %v5184_v57 = vpop.f32.mrb[152].mxu1  ;;  %4257 = vmatpush1.bf16.msra.mxu0 %v4256_v35  ;;  %v2570_v35 = vld [vmem:[#allocation13 + $0x570] sm:$0xff] }
 0x3be   :  { %v2149_v6 = vadd.f32 %v2148_v56, %v5106_v16  ;;  %v2150_v8 = vpop.f32.mrb[153].mxu0  ;;  %v5187_v9 = vpop.f32.mrb[153].mxu1  ;;  %4259 = vmatprep.subr.bf16.mxu0 %v4258_v45  ;;  %v2580_v45 = vld [vmem:[#allocation13 + $0x5c0] sm:$0xff]  ;;  %v4268_v52 = vpack.c.bf16 %v2573_v36, %v2570_v35  ;;  %v2582_v35 = vld [vmem:[#allocation13 + $0x5d0] sm:$0xff]  ;;  %v2585_v36 = vld [vmem:[#allocation13 + $0x5e8] sm:$0xff] }
 0x3bf   :  { %v2151_v1 = vadd.f32 %v2150_v8, %v5110_v25  ;;  %2735 = vmatprep.mubr.f32.mxu0 %v2377_v55  ;;  %3046 = vmatprep.mubr.f32.mxu1 %v2377_v55  ;;  %v2579_v8 = vld [vmem:[#allocation13 + $0x5b8] sm:$0xff] }
 0x3c0   :  { %2736 = vmatmul.mubr.f32.gmra.mrb[182].mxu0 %v2376_v7  ;;  %3047 = vmatmul.mubr.f32.gmra.mrb[182].mxu1 %v2376_v7  ;;  %v2380_v21 = vmax.f32 %v2149_v6, 0.0  ;;  %v4270_v7 = vpack.c.bf16 %v2580_v45, %v2577_v42  ;;  %v2576_v6 = vld [vmem:[#allocation13 + $0x5a0] sm:$0xff]  ;;  %v4276_v45 = vpack.c.bf16 %v2585_v36, %v2582_v35 }
 0x3c1   :  { %v2381_v17 = vmax.f32 %v2151_v1, 0.0  ;;  %v2154_v2 = vpop.f32.mrb[154].mxu0  ;;  %v5190_v12 = vpop.f32.mrb[154].mxu1  ;;  %4261 = vmatpush1.bf16.msra.mxu0 %v4260_v5  ;;  %v2586_v1 = vld [vmem:[#allocation13 + $0x5f0] sm:$0xff] }
 0x3c2   :  { %v2155_v26 = vadd.f32 %v2154_v2, %v5106_v16  ;;  %v2156_v29 = vpop.f32.mrb[155].mxu0  ;;  %v5193_v41 = vpop.f32.mrb[155].mxu1  ;;  %4263 = vmatprep.subr.bf16.mxu0 %v4262_v50  ;;  %v5203_v50 = vrot.slane %v5102_v23, %v4841_v62  ;;  %v4272_v2 = vpack.c.bf16 %v2579_v8, %v2576_v6 }
 0x3c3   :  { %v2157_v40 = vadd.f32 %v2156_v29, %v5110_v25  ;;  %2741 = vmatprep.mubr.f32.mxu0 %v2381_v17  ;;  %3051 = vmatprep.mubr.f32.mxu1 %v2381_v17 }
 0x3c4   :  { %2742 = vmatmul.mubr.f32.gmra.mrb[184].mxu0 %v2380_v21  ;;  %3052 = vmatmul.mubr.f32.gmra.mrb[184].mxu1 %v2380_v21  ;;  %v2384_v54 = vmax.f32 %v2155_v26, 0.0  ;;  %v2264_v8 = vadd.f32 %v5139_v63, %v5203_v50  ;;  %v2300_v36 = vadd.f32 %v5175_v18, %v5203_v50 }
 0x3c5   :  { %v2385_v46 = vmax.f32 %v2157_v40, 0.0  ;;  %v2160_v47 = vpop.f32.mrb[156].mxu0  ;;  %v5196_v51 = vpop.f32.mrb[156].mxu1  ;;  %4265 = vmatpush1.bf16.msra.mxu0 %v4264_v0  ;;  %v5210_v0 = vrot.slane %v5102_v23, %v4837_v60  ;;  %v2240_v40 = vadd.f32 %v5115_v3, %v5203_v50 }
 0x3c6   :  { %v2161_v55 = vadd.f32 %v2160_v47, %v5106_v16  ;;  %v2162_v56 = vpop.f32.mrb[157].mxu0  ;;  %v5199_v5 = vpop.f32.mrb[157].mxu1  ;;  %4267 = vmatprep.subr.bf16.mxu0 %v4266_v32  ;;  %v4274_v32 = vpack.c.bf16 %v2586_v1, %v2583_v19  ;;  %v2270_v19 = vadd.f32 %v5145_v28, %v5203_v50 }
 0x3c7   :  { %v2163_v10 = vadd.f32 %v2162_v56, %v5110_v25  ;;  %2747 = vmatprep.mubr.f32.mxu0 %v2385_v46  ;;  %3056 = vmatprep.mubr.f32.mxu1 %v2385_v46  ;;  %v2335_v47 = vmax.f32 %v2240_v40, 0.0  ;;  %v2244_v3 = vadd.f32 %v5118_v44, %v5210_v0  ;;  %v2268_v63 = vadd.f32 %v5142_v49, %v5210_v0 }
 0x3c8   :  { %2748 = vmatmul.mubr.f32.gmra.mrb[186].mxu0 %v2384_v54  ;;  %3057 = vmatmul.mubr.f32.gmra.mrb[186].mxu1 %v2384_v54  ;;  %v2388_v62 = vmax.f32 %v2161_v55, 0.0  ;;  %v2250_v55 = vadd.f32 %v5124_v39, %v5210_v0  ;;  %v2355_v1 = vmax.f32 %v2270_v19, 0.0  ;;  %v2274_v28 = vadd.f32 %v5148_v38, %v5210_v0 }
 0x3c9   :  { %v2389_v14 = vmax.f32 %v2163_v10, 0.0  ;;  %v2166_v15 = vpop.f32.mrb[158].mxu0  ;;  %v5206_v17 = vpop.f32.mrb[158].mxu1  ;;  %4269 = vmatpush1.bf16.msra.mxu0 %v4268_v52  ;;  %v2246_v52 = vadd.f32 %v5121_v30, %v5203_v50  ;;  %v2338_v30 = vmax.f32 %v2244_v3, 0.0  ;;  %v2351_v10 = vmax.f32 %v2264_v8, 0.0 }
 0x3ca   :  { %v2167_v21 = vadd.f32 %v2166_v15, %v5106_v16  ;;  %v2168_v26 = vpop.f32.mrb[159].mxu0  ;;  %v5213_v29 = vpop.f32.mrb[159].mxu1  ;;  %4271 = vmatprep.subr.bf16.mxu0 %v4270_v7  ;;  %v2238_v16 = vadd.f32 %v5112_v27, %v5210_v0  ;;  %v2252_v27 = vadd.f32 %v5127_v33, %v5203_v50  ;;  %v2258_v7 = vadd.f32 %v5133_v20, %v5203_v50 }
 0x3cb   :  { %v2169_v42 = vadd.f32 %v2168_v26, %v5110_v25  ;;  %2753 = vmatprep.mubr.f32.mxu0 %v2389_v14  ;;  %3061 = vmatprep.mubr.f32.mxu1 %v2389_v14  ;;  %v2339_v54 = vmax.f32 %v2246_v52, 0.0  ;;  %v2342_v44 = vmax.f32 %v2250_v55, 0.0  ;;  %v2256_v33 = vadd.f32 %v5130_v22, %v5210_v0 }
 0x3cc   :  { %2754 = vmatmul.mubr.f32.gmra.mrb[188].mxu0 %v2388_v62  ;;  %3062 = vmatmul.mubr.f32.gmra.mrb[188].mxu1 %v2388_v62  ;;  %v2392_v46 = vmax.f32 %v2167_v21, 0.0  ;;  %v2334_v25 = vmax.f32 %v2238_v16, 0.0  ;;  %v2343_v56 = vmax.f32 %v2252_v27, 0.0  ;;  %v2347_v6 = vmax.f32 %v2258_v7, 0.0 }
 0x3cd   :  { %v2393_v23 = vmax.f32 %v2169_v42, 0.0  ;;  %4273 = vmatpush1.bf16.msra.mxu0 %v4272_v2  ;;  %v2346_v39 = vmax.f32 %v2256_v33, 0.0  ;;  %v2262_v20 = vadd.f32 %v5136_v24, %v5210_v0  ;;  %v2276_v14 = vadd.f32 %v5151_v48, %v5203_v50 }
 0x3ce   :  { %4275 = vmatprep.subr.bf16.mxu0 %v4274_v32  ;;  %v2354_v24 = vmax.f32 %v2268_v63, 0.0  ;;  %v2282_v2 = vadd.f32 %v5157_v13, %v5203_v50  ;;  %v2358_v49 = vmax.f32 %v2274_v28, 0.0  ;;  %v2280_v48 = vadd.f32 %v5154_v4, %v5210_v0 }
 0x3cf   :  { %2759 = vmatprep.mubr.f32.mxu0 %v2393_v23  ;;  %3066 = vmatprep.mubr.f32.mxu1 %v2393_v23  ;;  %v2350_v22 = vmax.f32 %v2262_v20, 0.0  ;;  %v2359_v15 = vmax.f32 %v2276_v14, 0.0  ;;  %v2288_v21 = vadd.f32 %v5163_v37, %v5203_v50  ;;  %v2286_v13 = vadd.f32 %v5160_v31, %v5210_v0 }
 0x3d0   :  { %2760 = vmatmul.mubr.f32.gmra.mrb[190].mxu0 %v2392_v46  ;;  %3067 = vmatmul.mubr.f32.gmra.mrb[190].mxu1 %v2392_v46  ;;  %v2363_v62 = vmax.f32 %v2282_v2, 0.0  ;;  %v2362_v38 = vmax.f32 %v2280_v48, 0.0  ;;  %v2294_v32 = vadd.f32 %v5169_v59, %v5203_v50  ;;  %v2292_v37 = vadd.f32 %v5166_v53, %v5210_v0 }
 0x3d1   :  { %4277 = vmatpush1.bf16.msra.mxu0 %v4276_v45  ;;  %2830 = vmatprep.mubr.f32.mxu0 %v2335_v47  ;;  %v2367_v26 = vmax.f32 %v2288_v21, 0.0  ;;  %v2366_v4 = vmax.f32 %v2286_v13, 0.0  ;;  %v2298_v59 = vadd.f32 %v5172_v11, %v5210_v0  ;;  %v2375_v40 = vmax.f32 %v2300_v36, 0.0 }
 0x3d2   :  { %3136 = vmatprep.mubr.f32.mxu1 %v2335_v47  ;;  %v2371_v35 = vmax.f32 %v2294_v32, 0.0  ;;  %v2370_v31 = vmax.f32 %v2292_v37, 0.0  ;;  %v2306_v42 = vadd.f32 %v5181_v43, %v5203_v50  ;;  %v2304_v18 = vadd.f32 %v5178_v34, %v5210_v0 }
 0x3d3   :  { %v2374_v53 = vmax.f32 %v2298_v59, 0.0  ;;  %v2312_v45 = vadd.f32 %v5187_v9, %v5203_v50  ;;  %v2310_v43 = vadd.f32 %v5184_v57, %v5210_v0  ;;  %v2318_v46 = vadd.f32 %v5193_v41, %v5203_v50 }
 0x3d4   :  { %2831 = vmatmul.mubr.f32.vlgmr.msra.gmra.mrb[160].mxu0 %v2334_v25  ;;  %3137 = vmatmul.mubr.f32.vlgmr.msra.gmra.mrb[192].mxu1 %v2334_v25  ;;  %v2379_v23 = vmax.f32 %v2306_v42, 0.0  ;;  %v2378_v11 = vmax.f32 %v2304_v18, 0.0  ;;  %v2316_v9 = vadd.f32 %v5190_v12, %v5210_v0  ;;  %v2324_v52 = vadd.f32 %v5199_v5, %v5203_v50 }
 0x3d5   :  { %2836 = vmatprep.mubr.f32.mxu0 %v2339_v54  ;;  %3141 = vmatprep.mubr.f32.mxu1 %v2339_v54  ;;  %v2383_v16 = vmax.f32 %v2312_v45, 0.0  ;;  %v2382_v34 = vmax.f32 %v2310_v43, 0.0  ;;  %v2387_v47 = vmax.f32 %v2318_v46, 0.0  ;;  %v2322_v41 = vadd.f32 %v5196_v51, %v5210_v0 }
 0x3d6   :  { %v2386_v57 = vmax.f32 %v2316_v9, 0.0  ;;  %v2391_v25 = vmax.f32 %v2324_v52, 0.0  ;;  %v2330_v3 = vadd.f32 %v5213_v29, %v5203_v50  ;;  %v2328_v5 = vadd.f32 %v5206_v17, %v5210_v0 }
 0x3d7   :  { %v2390_v12 = vmax.f32 %v2322_v41, 0.0 }
 0x3d8   :  { %2837 = vmatmul.mubr.f32.gmra.mrb[162].mxu0 %v2338_v30  ;;  %3142 = vmatmul.mubr.f32.gmra.mrb[194].mxu1 %v2338_v30  ;;  %v2395_v54 = vmax.f32 %v2330_v3, 0.0  ;;  %v2394_v27 = vmax.f32 %v2328_v5, 0.0 }
 0x3d9   :  { %2842 = vmatprep.mubr.f32.mxu0 %v2343_v56  ;;  %3146 = vmatprep.mubr.f32.mxu1 %v2343_v56 }
 0x3dc   :  { %2843 = vmatmul.mubr.f32.gmra.mrb[164].mxu0 %v2342_v44  ;;  %3147 = vmatmul.mubr.f32.gmra.mrb[196].mxu1 %v2342_v44 }
 0x3dd   :  { %2848 = vmatprep.mubr.f32.mxu0 %v2347_v6  ;;  %3151 = vmatprep.mubr.f32.mxu1 %v2347_v6 }
 0x3e0   :  { %2849 = vmatmul.mubr.f32.gmra.mrb[166].mxu0 %v2346_v39  ;;  %3152 = vmatmul.mubr.f32.gmra.mrb[198].mxu1 %v2346_v39 }
 0x3e1   :  { %2854 = vmatprep.mubr.f32.mxu0 %v2351_v10  ;;  %3156 = vmatprep.mubr.f32.mxu1 %v2351_v10 }
 0x3e4   :  { %2855 = vmatmul.mubr.f32.gmra.mrb[168].mxu0 %v2350_v22  ;;  %3157 = vmatmul.mubr.f32.gmra.mrb[200].mxu1 %v2350_v22 }
 0x3e5   :  { %2860 = vmatprep.mubr.f32.mxu0 %v2355_v1  ;;  %3161 = vmatprep.mubr.f32.mxu1 %v2355_v1 }
 0x3e8   :  { %2861 = vmatmul.mubr.f32.gmra.mrb[170].mxu0 %v2354_v24  ;;  %3162 = vmatmul.mubr.f32.gmra.mrb[202].mxu1 %v2354_v24 }
 0x3e9   :  { %2866 = vmatprep.mubr.f32.mxu0 %v2359_v15  ;;  %3166 = vmatprep.mubr.f32.mxu1 %v2359_v15 }
 0x3ec   :  { %2867 = vmatmul.mubr.f32.gmra.mrb[172].mxu0 %v2358_v49  ;;  %3167 = vmatmul.mubr.f32.gmra.mrb[204].mxu1 %v2358_v49 }
 0x3ed   :  { %2872 = vmatprep.mubr.f32.mxu0 %v2363_v62  ;;  %3171 = vmatprep.mubr.f32.mxu1 %v2363_v62 }
 0x3f0   :  { %2873 = vmatmul.mubr.f32.gmra.mrb[174].mxu0 %v2362_v38  ;;  %3172 = vmatmul.mubr.f32.gmra.mrb[206].mxu1 %v2362_v38 }
 0x3f1   :  { %2878 = vmatprep.mubr.f32.mxu0 %v2367_v26  ;;  %3176 = vmatprep.mubr.f32.mxu1 %v2367_v26 }
 0x3f4   :  { %2879 = vmatmul.mubr.f32.gmra.mrb[176].mxu0 %v2366_v4  ;;  %3177 = vmatmul.mubr.f32.gmra.mrb[208].mxu1 %v2366_v4 }
 0x3f5   :  { %2884 = vmatprep.mubr.f32.mxu0 %v2371_v35  ;;  %3181 = vmatprep.mubr.f32.mxu1 %v2371_v35 }
 0x3f8   :  { %2885 = vmatmul.mubr.f32.gmra.mrb[178].mxu0 %v2370_v31  ;;  %3182 = vmatmul.mubr.f32.gmra.mrb[210].mxu1 %v2370_v31 }
 0x3f9   :  { %2890 = vmatprep.mubr.f32.mxu0 %v2375_v40  ;;  %3186 = vmatprep.mubr.f32.mxu1 %v2375_v40 }
 0x3fc   :  { %2891 = vmatmul.mubr.f32.gmra.mrb[180].mxu0 %v2374_v53  ;;  %3187 = vmatmul.mubr.f32.gmra.mrb[212].mxu1 %v2374_v53 }
 0x3fd   :  { %2896 = vmatprep.mubr.f32.mxu0 %v2379_v23  ;;  %3191 = vmatprep.mubr.f32.mxu1 %v2379_v23 }
 0x400   :  { %2897 = vmatmul.mubr.f32.gmra.mrb[182].mxu0 %v2378_v11  ;;  %3192 = vmatmul.mubr.f32.gmra.mrb[214].mxu1 %v2378_v11  ;;  %v2588_v11 = vld [vmem:[%s5411_s11] sm:$0x7]  ;;  %s4625_s11 = smov [#allocation14]  }
 0x401   :  { %2902 = vmatprep.mubr.f32.mxu0 %v2383_v16  ;;  %3196 = vmatprep.mubr.f32.mxu1 %v2383_v16  ;;  %v5312_v46 = vrot.slane %v2588_v11, %v4832_v58  ;;  %s3270_s18 = sshll.u32 %s4625_s11, 4  ;;  %s3271_s18 = int_to_ptr.vmem [resolvable:$true] %s3270_s18 }
 0x402   :  { %s4577_s1 = scalar_lea.vmem %s3271_s18, 6144  ;;  %p4582_p1 = scmp.lt.s32.totalorder %s3271_s18, %s3271_s18 }
 0x403   :  { %p4578_p0 = scmp.ne.s32.totalorder %s3271_s18, %s4577_s1  ;;  %p4583_p2 = scmp.lt.s32.totalorder %s4577_s1, %s4577_s1 }
 0x404   :  { %2903 = vmatmul.mubr.f32.gmra.mrb[184].mxu0 %v2382_v34  ;;  %3197 = vmatmul.mubr.f32.gmra.mrb[216].mxu1 %v2382_v34  ;;  %v5315_v34 = vrot.slane %v2588_v11, %v4837_v60 }
 0x405   :  { %2908 = vmatprep.mubr.f32.mxu0 %v2387_v47  ;;  %3201 = vmatprep.mubr.f32.mxu1 %v2387_v47  ;;  %v5320_v47 = vrot.slane %v2588_v11, %v4839_v61  ;;  %p4584_p3 = por %p4583_p2, %p4582_p1 }
 0x407   :  { %p4585_p4 = pnand %p4584_p3, %p4578_p0 }
 0x408   :  { %2909 = vmatmul.mubr.f32.gmra.mrb[186].mxu0 %v2386_v57  ;;  %3202 = vmatmul.mubr.f32.gmra.mrb[218].mxu1 %v2386_v57 }
 0x409   :  { %2914 = vmatprep.mubr.f32.mxu0 %v2391_v25  ;;  %3206 = vmatprep.mubr.f32.mxu1 %v2391_v25 }
 0x40c   :  { %2915 = vmatmul.mubr.f32.gmra.mrb[188].mxu0 %v2390_v12  ;;  %3207 = vmatmul.mubr.f32.gmra.mrb[220].mxu1 %v2390_v12 }
 0x40d   :  { %2920 = vmatprep.mubr.f32.mxu0 %v2395_v54  ;;  %3211 = vmatprep.mubr.f32.mxu1 %v2395_v54 }
 0x410   :  { %2921 = vmatmul.mubr.f32.gmra.mrb[190].mxu0 %v2394_v27  ;;  %3212 = vmatmul.mubr.f32.gmra.mrb[222].mxu1 %v2394_v27 }
 0x467   :  { %v3638_v51 = vpop.f32.mrb[160].mxu1 }
 0x468   :  { %v3639_v30 = vpop.f32.mrb[161].mxu1 }
 0x469   :  { %v3640_v55 = vadd.f32 %v3639_v30, %v3638_v51 }
 0x46b   :  { %v3641_v50 = vpop.f32.mrb[162].mxu1  ;;  %v2994_v12 = vadd.f32 %v3640_v55, %v5315_v34 }
 0x46c   :  { %v3642_v29 = vpop.f32.mrb[163].mxu1 }
 0x46d   :  { %v5280_v56 = vadd.f32 %v3642_v29, %v3641_v50 }
 0x46f   :  { %v3644_v7 = vpop.f32.mrb[164].mxu1  ;;  %v2999_v50 = vadd.f32 %v5280_v56, %v5315_v34 }
 0x470   :  { %v3645_v44 = vpop.f32.mrb[165].mxu1 }
 0x471   :  { %v5282_v33 = vadd.f32 %v3645_v44, %v3644_v7 }
 0x473   :  { %v3647_v17 = vpop.f32.mrb[166].mxu1 }
 0x474   :  { %v3648_v0 = vpop.f32.mrb[167].mxu1 }
 0x475   :  { %v5284_v6 = vadd.f32 %v3648_v0, %v3647_v17 }
 0x477   :  { %v3650_v8 = vpop.f32.mrb[168].mxu1 }
 0x478   :  { %v3651_v39 = vpop.f32.mrb[169].mxu1 }
 0x479   :  { %v5286_v20 = vadd.f32 %v3651_v39, %v3650_v8 }
 0x47b   :  { %v3653_v10 = vpop.f32.mrb[170].mxu1 }
 0x47c   :  { %v3654_v19 = vpop.f32.mrb[171].mxu1 }
 0x47d   :  { %v5288_v22 = vadd.f32 %v3654_v19, %v3653_v10  ;;  %v3004_v10 = vadd.f32 %v5282_v33, %v5315_v34 }
 0x47f   :  { %v3656_v63 = vpop.f32.mrb[172].mxu1 }
 0x480   :  { %v3657_v1 = vpop.f32.mrb[173].mxu1 }
 0x481   :  { %v5290_v14 = vadd.f32 %v3657_v1, %v3656_v63 }
 0x483   :  { %v3659_v24 = vpop.f32.mrb[174].mxu1 }
 0x484   :  { %v3660_v28 = vpop.f32.mrb[175].mxu1 }
 0x485   :  { %v5292_v15 = vadd.f32 %v3660_v28, %v3659_v24 }
 0x487   :  { %v3662_v2 = vpop.f32.mrb[176].mxu1 }
 0x488   :  { %v3663_v49 = vpop.f32.mrb[177].mxu1 }
 0x489   :  { %v5294_v48 = vadd.f32 %v3663_v49, %v3662_v2 }
 0x48b   :  { %v3665_v62 = vpop.f32.mrb[178].mxu1 }
 0x48c   :  { %v3666_v21 = vpop.f32.mrb[179].mxu1 }
 0x48d   :  { %v5296_v38 = vadd.f32 %v3666_v21, %v3665_v62  ;;  %v3009_v62 = vadd.f32 %v5284_v6, %v5315_v34 }
 0x48f   :  { %v3668_v13 = vpop.f32.mrb[180].mxu1 }
 0x490   :  { %v3669_v26 = vpop.f32.mrb[181].mxu1 }
 0x491   :  { %v5298_v32 = vadd.f32 %v3669_v26, %v3668_v13 }
 0x493   :  { %v3671_v4 = vpop.f32.mrb[182].mxu1 }
 0x494   :  { %v3672_v37 = vpop.f32.mrb[183].mxu1 }
 0x495   :  { %v5300_v35 = vadd.f32 %v3672_v37, %v3671_v4 }
 0x497   :  { %v3674_v36 = vpop.f32.mrb[184].mxu1 }
 0x498   :  { %v3675_v31 = vpop.f32.mrb[185].mxu1 }
 0x499   :  { %v5302_v59 = vadd.f32 %v3675_v31, %v3674_v36 }
 0x49b   :  { %v3677_v40 = vpop.f32.mrb[186].mxu1 }
 0x49c   :  { %v3678_v42 = vpop.f32.mrb[187].mxu1 }
 0x49d   :  { %v5304_v53 = vadd.f32 %v3678_v42, %v3677_v40  ;;  %v3014_v40 = vadd.f32 %v5286_v20, %v5315_v34 }
 0x49f   :  { %v3680_v18 = vpop.f32.mrb[188].mxu1 }
 0x4a0   :  { %v3681_v23 = vpop.f32.mrb[189].mxu1 }
 0x4a1   :  { %v5306_v45 = vadd.f32 %v3681_v23, %v3680_v18 }
 0x4a3   :  { %v3683_v43 = vpop.f32.mrb[190].mxu1 }
 0x4a4   :  { %v3684_v16 = vpop.f32.mrb[191].mxu1 }
 0x4a5   :  { %v5317_v9 = vadd.f32 %v3684_v16, %v3683_v43 }
 0x4a7   :  { %v2832_v52 = vpop.f32.mrb[160].mxu0  ;;  %v3718_v57 = vpop.f32.mrb[192].mxu1 }
 0x4a8   :  { %v4342_v41 = vadd.f32 %v2832_v52, %v5312_v46  ;;  %v2834_v25 = vpop.f32.mrb[161].mxu0  ;;  %v3719_v3 = vpop.f32.mrb[193].mxu1 }
 0x4a9   :  { %v4343_v5 = vadd.f32 %v2834_v25, %v5320_v47  ;;  %v3720_v58 = vadd.f32 %v3719_v3, %v3718_v57  ;;  %v3019_v57 = vadd.f32 %v5288_v22, %v5315_v34 }
 0x4aa   :  { %3217 = vst [vmem:[#allocation14] sm:$0xff] %v4342_v41 }
 0x4ab   :  { %3218 = vst [vmem:[#allocation14 + $0x8] sm:$0xff] %v4343_v5  ;;  %v3139_v60 = vadd.f32 %v3720_v58, %v2994_v12  ;;  %v2838_v54 = vpop.f32.mrb[162].mxu0  ;;  %v3721_v27 = vpop.f32.mrb[194].mxu1 }
 0x4ac   :  { %v4344_v51 = vadd.f32 %v2838_v54, %v5312_v46  ;;  %v2840_v61 = vpop.f32.mrb[163].mxu0  ;;  %v3722_v30 = vpop.f32.mrb[195].mxu1  ;;  %v3024_v54 = vadd.f32 %v5290_v14, %v5315_v34 }
 0x4ad   :  { %3219 = vst [vmem:[#allocation14 + $0x10] sm:$0xff] %v3139_v60  ;;  %v4345_v29 = vadd.f32 %v2840_v61, %v5320_v47  ;;  %v3723_v7 = vadd.f32 %v3722_v30, %v3721_v27 }
 0x4ae   :  { %3220 = vst [vmem:[#allocation14 + $0x18] sm:$0xff] %v4344_v51 }
 0x4af   :  { %3221 = vst [vmem:[#allocation14 + $0x20] sm:$0xff] %v4345_v29  ;;  %v3144_v55 = vadd.f32 %v3723_v7, %v2999_v50  ;;  %v2844_v44 = vpop.f32.mrb[164].mxu0  ;;  %v3724_v17 = vpop.f32.mrb[196].mxu1 }
 0x4b0   :  { %v4346_v0 = vadd.f32 %v2844_v44, %v5312_v46  ;;  %v2846_v8 = vpop.f32.mrb[165].mxu0  ;;  %v3725_v39 = vpop.f32.mrb[197].mxu1 }
 0x4b1   :  { %3222 = vst [vmem:[#allocation14 + $0x28] sm:$0xff] %v3144_v55  ;;  %v4347_v19 = vadd.f32 %v2846_v8, %v5320_v47  ;;  %v3726_v56 = vadd.f32 %v3725_v39, %v3724_v17  ;;  %v3029_v55 = vadd.f32 %v5292_v15, %v5315_v34 }
 0x4b2   :  { %3223 = vst [vmem:[#allocation14 + $0x30] sm:$0xff] %v4346_v0 }
 0x4b3   :  { %3224 = vst [vmem:[#allocation14 + $0x38] sm:$0xff] %v4347_v19  ;;  %v3149_v63 = vadd.f32 %v3726_v56, %v3004_v10  ;;  %v2850_v1 = vpop.f32.mrb[166].mxu0  ;;  %v3727_v24 = vpop.f32.mrb[198].mxu1  ;;  %v3034_v56 = vadd.f32 %v5294_v48, %v5315_v34 }
 0x4b4   :  { %v4348_v28 = vadd.f32 %v2850_v1, %v5312_v46  ;;  %v2852_v2 = vpop.f32.mrb[167].mxu0  ;;  %v3728_v49 = vpop.f32.mrb[199].mxu1 }
 0x4b5   :  { %3225 = vst [vmem:[#allocation14 + $0x40] sm:$0xff] %v3149_v63  ;;  %v4349_v21 = vadd.f32 %v2852_v2, %v5320_v47  ;;  %v3729_v33 = vadd.f32 %v3728_v49, %v3727_v24 }
 0x4b6   :  { %3226 = vst [vmem:[#allocation14 + $0x48] sm:$0xff] %v4348_v28 }
 0x4b7   :  { %3227 = vst [vmem:[#allocation14 + $0x50] sm:$0xff] %v4349_v21  ;;  %v3154_v13 = vadd.f32 %v3729_v33, %v3009_v62  ;;  %v2856_v26 = vpop.f32.mrb[168].mxu0  ;;  %v3730_v4 = vpop.f32.mrb[200].mxu1  ;;  %v3039_v21 = vadd.f32 %v5296_v38, %v5315_v34 }
 0x4b8   :  { %v4350_v37 = vadd.f32 %v2856_v26, %v5312_v46  ;;  %v2858_v36 = vpop.f32.mrb[169].mxu0  ;;  %v3731_v31 = vpop.f32.mrb[201].mxu1 }
 0x4b9   :  { %3228 = vst [vmem:[#allocation14 + $0x58] sm:$0xff] %v3154_v13  ;;  %v4351_v42 = vadd.f32 %v2858_v36, %v5320_v47  ;;  %v3732_v6 = vadd.f32 %v3731_v31, %v3730_v4 }
 0x4ba   :  { %3229 = vst [vmem:[#allocation14 + $0x60] sm:$0xff] %v4350_v37 }
 0x4bb   :  { %3230 = vst [vmem:[#allocation14 + $0x68] sm:$0xff] %v4351_v42  ;;  %v3159_v18 = vadd.f32 %v3732_v6, %v3014_v40  ;;  %v2862_v23 = vpop.f32.mrb[170].mxu0  ;;  %v3733_v11 = vpop.f32.mrb[202].mxu1  ;;  %v3044_v40 = vadd.f32 %v5298_v32, %v5315_v34 }
 0x4bc   :  { %v4352_v43 = vadd.f32 %v2862_v23, %v5312_v46  ;;  %v2864_v16 = vpop.f32.mrb[171].mxu0  ;;  %v3734_v52 = vpop.f32.mrb[203].mxu1 }
 0x4bd   :  { %3231 = vst [vmem:[#allocation14 + $0x70] sm:$0xff] %v3159_v18  ;;  %v4353_v41 = vadd.f32 %v2864_v16, %v5320_v47  ;;  %v3735_v20 = vadd.f32 %v3734_v52, %v3733_v11  ;;  %v3049_v52 = vadd.f32 %v5300_v35, %v5315_v34 }
 0x4be   :  { %3232 = vst [vmem:[#allocation14 + $0x78] sm:$0xff] %v4352_v43 }
 0x4bf   :  { %3233 = vst [vmem:[#allocation14 + $0x80] sm:$0xff] %v4353_v41  ;;  %v3164_v25 = vadd.f32 %v3735_v20, %v3019_v57  ;;  %v2868_v3 = vpop.f32.mrb[172].mxu0  ;;  %v3736_v12 = vpop.f32.mrb[204].mxu1 }
 0x4c0   :  { %v4354_v5 = vadd.f32 %v2868_v3, %v5312_v46  ;;  %v2870_v58 = vpop.f32.mrb[173].mxu0  ;;  %v3737_v60 = vpop.f32.mrb[205].mxu1 }
 0x4c1   :  { %3234 = vst [vmem:[#allocation14 + $0x88] sm:$0xff] %v3164_v25  ;;  %v4355_v27 = vadd.f32 %v2870_v58, %v5320_v47  ;;  %v3738_v22 = vadd.f32 %v3737_v60, %v3736_v12  ;;  %v3054_v58 = vadd.f32 %v5302_v59, %v5315_v34 }
 0x4c2   :  { %3235 = vst [vmem:[#allocation14 + $0x90] sm:$0xff] %v4354_v5 }
 0x4c3   :  { %3236 = vst [vmem:[#allocation14 + $0x98] sm:$0xff] %v4355_v27  ;;  %v3169_v51 = vadd.f32 %v3738_v22, %v3024_v54  ;;  %v2874_v61 = vpop.f32.mrb[174].mxu0  ;;  %v3739_v30 = vpop.f32.mrb[206].mxu1 }
 0x4c4   :  { %v4356_v50 = vadd.f32 %v2874_v61, %v5312_v46  ;;  %v2876_v29 = vpop.f32.mrb[175].mxu0  ;;  %v3740_v7 = vpop.f32.mrb[207].mxu1 }
 0x4c5   :  { %3237 = vst [vmem:[#allocation14 + $0xa0] sm:$0xff] %v3169_v51  ;;  %v4357_v44 = vadd.f32 %v2876_v29, %v5320_v47  ;;  %v3741_v14 = vadd.f32 %v3740_v7, %v3739_v30 }
 0x4c6   :  { %3238 = vst [vmem:[#allocation14 + $0xa8] sm:$0xff] %v4356_v50  ;;  %v3059_v50 = vadd.f32 %v5304_v53, %v5315_v34 }
 0x4c7   :  { %3239 = vst [vmem:[#allocation14 + $0xb0] sm:$0xff] %v4357_v44  ;;  %v3174_v17 = vadd.f32 %v3741_v14, %v3029_v55  ;;  %v2880_v0 = vpop.f32.mrb[176].mxu0  ;;  %v3742_v8 = vpop.f32.mrb[208].mxu1 }
 0x4c8   :  { %v4358_v39 = vadd.f32 %v2880_v0, %v5312_v46  ;;  %v2882_v10 = vpop.f32.mrb[177].mxu0  ;;  %v3743_v19 = vpop.f32.mrb[209].mxu1 }
 0x4c9   :  { %3240 = vst [vmem:[#allocation14 + $0xb8] sm:$0xff] %v3174_v17  ;;  %v4359_v63 = vadd.f32 %v2882_v10, %v5320_v47  ;;  %v3744_v15 = vadd.f32 %v3743_v19, %v3742_v8  ;;  %v3064_v8 = vadd.f32 %v5306_v45, %v5315_v34 }
 0x4ca   :  { %3241 = vst [vmem:[#allocation14 + $0xc0] sm:$0xff] %v4358_v39 }
 0x4cb   :  { %3242 = vst [vmem:[#allocation14 + $0xc8] sm:$0xff] %v4359_v63  ;;  %v3179_v1 = vadd.f32 %v3744_v15, %v3034_v56  ;;  %v2886_v24 = vpop.f32.mrb[178].mxu0  ;;  %v3745_v28 = vpop.f32.mrb[210].mxu1 }
 0x4cc   :  { %v4360_v2 = vadd.f32 %v2886_v24, %v5312_v46  ;;  %v2888_v49 = vpop.f32.mrb[179].mxu0  ;;  %v3746_v62 = vpop.f32.mrb[211].mxu1  ;;  %v3069_v24 = vadd.f32 %v5317_v9, %v5315_v34 }
 0x4cd   :  { %3243 = vst [vmem:[#allocation14 + $0xd0] sm:$0xff] %v3179_v1  ;;  %v4361_v33 = vadd.f32 %v2888_v49, %v5320_v47  ;;  %v3747_v48 = vadd.f32 %v3746_v62, %v3745_v28 }
 0x4ce   :  { %3244 = vst [vmem:[#allocation14 + $0xd8] sm:$0xff] %v4360_v2 }
 0x4cf   :  { %3245 = vst [vmem:[#allocation14 + $0xe0] sm:$0xff] %v4361_v33  ;;  %v3184_v13 = vadd.f32 %v3747_v48, %v3039_v21  ;;  %v2892_v26 = vpop.f32.mrb[180].mxu0  ;;  %v3748_v4 = vpop.f32.mrb[212].mxu1 }
 0x4d0   :  { %v4362_v37 = vadd.f32 %v2892_v26, %v5312_v46  ;;  %v2894_v36 = vpop.f32.mrb[181].mxu0  ;;  %v3749_v31 = vpop.f32.mrb[213].mxu1 }
 0x4d1   :  { %3246 = vst [vmem:[#allocation14 + $0xe8] sm:$0xff] %v3184_v13  ;;  %v4363_v42 = vadd.f32 %v2894_v36, %v5320_v47  ;;  %v3750_v38 = vadd.f32 %v3749_v31, %v3748_v4 }
 0x4d2   :  { %3247 = vst [vmem:[#allocation14 + $0xf0] sm:$0xff] %v4362_v37 }
 0x4d3   :  { %3248 = vst [vmem:[#allocation14 + $0xf8] sm:$0xff] %v4363_v42  ;;  %v3189_v6 = vadd.f32 %v3750_v38, %v3044_v40  ;;  %v2898_v18 = vpop.f32.mrb[182].mxu0  ;;  %v3751_v23 = vpop.f32.mrb[214].mxu1 }
 0x4d4   :  { %v4364_v11 = vadd.f32 %v2898_v18, %v5312_v46  ;;  %v2900_v43 = vpop.f32.mrb[183].mxu0  ;;  %v3752_v16 = vpop.f32.mrb[215].mxu1 }
 0x4d5   :  { %3249 = vst [vmem:[#allocation14 + $0x100] sm:$0xff] %v3189_v6  ;;  %v4365_v57 = vadd.f32 %v2900_v43, %v5320_v47  ;;  %v3753_v32 = vadd.f32 %v3752_v16, %v3751_v23 }
 0x4d6   :  { %3250 = vst [vmem:[#allocation14 + $0x108] sm:$0xff] %v4364_v11 }
 0x4d7   :  { %3251 = vst [vmem:[#allocation14 + $0x110] sm:$0xff] %v4365_v57  ;;  %v3194_v41 = vadd.f32 %v3753_v32, %v3049_v52  ;;  %v2904_v20 = vpop.f32.mrb[184].mxu0  ;;  %v3754_v25 = vpop.f32.mrb[216].mxu1 }
 0x4d8   :  { %v4366_v3 = vadd.f32 %v2904_v20, %v5312_v46  ;;  %v2906_v12 = vpop.f32.mrb[185].mxu0  ;;  %v3755_v5 = vpop.f32.mrb[217].mxu1 }
 0x4d9   :  { %3252 = vst [vmem:[#allocation14 + $0x118] sm:$0xff] %v3194_v41  ;;  %v4367_v60 = vadd.f32 %v2906_v12, %v5320_v47  ;;  %v3756_v35 = vadd.f32 %v3755_v5, %v3754_v25 }
 0x4da   :  { %3253 = vst [vmem:[#allocation14 + $0x120] sm:$0xff] %v4366_v3 }
 0x4db   :  { %3254 = vst [vmem:[#allocation14 + $0x128] sm:$0xff] %v4367_v60  ;;  %v3199_v54 = vadd.f32 %v3756_v35, %v3054_v58  ;;  %v2910_v27 = vpop.f32.mrb[186].mxu0  ;;  %v3757_v22 = vpop.f32.mrb[218].mxu1 }
 0x4dc   :  { %v4368_v51 = vadd.f32 %v2910_v27, %v5312_v46  ;;  %v2912_v61 = vpop.f32.mrb[187].mxu0  ;;  %v3758_v30 = vpop.f32.mrb[219].mxu1 }
 0x4dd   :  { %3255 = vst [vmem:[#allocation14 + $0x130] sm:$0xff] %v3199_v54  ;;  %v4369_v29 = vadd.f32 %v2912_v61, %v5320_v47  ;;  %v3759_v59 = vadd.f32 %v3758_v30, %v3757_v22 }
 0x4de   :  { %3256 = vst [vmem:[#allocation14 + $0x138] sm:$0xff] %v4368_v51 }
 0x4df   :  { %3257 = vst [vmem:[#allocation14 + $0x140] sm:$0xff] %v4369_v29  ;;  %v3204_v7 = vadd.f32 %v3759_v59, %v3059_v50  ;;  %v2916_v55 = vpop.f32.mrb[188].mxu0  ;;  %v3760_v44 = vpop.f32.mrb[220].mxu1 }
 0x4e0   :  { %v4370_v14 = vadd.f32 %v2916_v55, %v5312_v46  ;;  %v2918_v17 = vpop.f32.mrb[189].mxu0  ;;  %v3761_v0 = vpop.f32.mrb[221].mxu1 }
 0x4e1   :  { %3258 = vst [vmem:[#allocation14 + $0x148] sm:$0xff] %v3204_v7  ;;  %v4371_v39 = vadd.f32 %v2918_v17, %v5320_v47  ;;  %v3762_v53 = vadd.f32 %v3761_v0, %v3760_v44 }
 0x4e2   :  { %3259 = vst [vmem:[#allocation14 + $0x150] sm:$0xff] %v4370_v14 }
 0x4e3   :  { %3260 = vst [vmem:[#allocation14 + $0x158] sm:$0xff] %v4371_v39  ;;  %v3209_v10 = vadd.f32 %v3762_v53, %v3064_v8  ;;  %v2922_v19 = vpop.f32.mrb[190].mxu0  ;;  %v3763_v56 = vpop.f32.mrb[222].mxu1 }
 0x4e4   :  { %v4372_v63 = vadd.f32 %v2922_v19, %v5312_v46  ;;  %v2924_v15 = vpop.f32.mrb[191].mxu0  ;;  %v3764_v1 = vpop.f32.mrb[223].mxu1 }
 0x4e5   :  { %3261 = vst [vmem:[#allocation14 + $0x160] sm:$0xff] %v3209_v10  ;;  %v4373_v45 = vadd.f32 %v2924_v15, %v5320_v47  ;;  %v3765_v28 = vadd.f32 %v3764_v1, %v3763_v56 }
 0x4e6   :  { %3262 = vst [vmem:[#allocation14 + $0x168] sm:$0xff] %v4372_v63 }
 0x4e7   :  { %3263 = vst [vmem:[#allocation14 + $0x170] sm:$0xff] %v4373_v45  ;;  %v3214_v2 = vadd.f32 %v3765_v28, %v3069_v24 }
 0x4e9   :  { %3264 = vst [vmem:[#allocation14 + $0x178] sm:$0xff] %v3214_v2 }
 0x4ea   :  { %4588 = shalt.err (!%p4585_p4)
}
 0x4eb   :  { %s4589_s22 = scalar_lea.hbm %s5412_s12, 6144 }
 0x4ec   :  { %p4590_p5 = scmp.ne.s32.totalorder %s5412_s12, %s4589_s22  ;;  %p4593_p6 = scmp.lt.u32.totalorder %s4589_s22, %s5412_s12 }
 0x4ee   :  { %p4595_p7 = pnand %p4593_p6, %p4590_p5 }
 0x4f0   :  { %4598 = shalt.err (!%p4595_p7)
}
 0x4f1   :  { %3276 = dma.vmem_to_hbm [thread:$0]  %s3271_s18, 6144, %s5412_s12, [#allocation4], %s4622_s6, %s4622_s6, %s4623_s13  }
 0x4f2   :  { %4607 = dma.done.wait [#allocation4], 6144  }
 0x4f3   :  { %4608 = vsyncadd [#allocation4], 4294961152 }
 0x4f4   :  { %3280 = vsyncpa [#allocation3], 1 }
 0x4f5   :  { %3281 = vsyncpa [#allocation6], 1 }
 0x4f6   :  { %3282 = vsyncpa [#allocation9], 1 }
 0x4f7   :  { %3283 = vsyncpa [#allocation12], 1 }
 0x4f8   :  { %3284 = vsyncpa [#allocation4], 1 }

</bundles_post_ra>
